<compile_context>
chip_gen: v5e
topology: v5e:2x2
jax: 0.10.0
libtpu: 0.0.40
codegen_flags: <defaults>
</compile_context>

<pallas_src>
import functools

import jax
import jax.numpy as jnp
from jax.experimental import pallas as pl
from jax.experimental.pallas import tpu as pltpu

BN_EPS = 1e-5
LAYERS_ACTIVATION = "relu"    # 'relu' | 'elu' | 'leaky_relu'
LATENT_ACTIVATION = "tanh"    # '' | 'tanh' | 'leaky_relu' | 'sigmoid'


def _layer_activate(y, kind):
    if kind == "relu":
        return jnp.maximum(y, 0.0)
    if kind == "leaky_relu":
        return jnp.where(y > 0, y, 0.01 * y)
    if kind == "elu":
        return jnp.where(y > 0, y, jnp.expm1(y))
    return y


def _latent_activate(y, kind):
    if kind == "tanh":
        return jnp.tanh(y)
    if kind == "sigmoid":
        return jax.nn.sigmoid(y)
    if kind == "leaky_relu":
        return jnp.where(y > 0, y, 0.01 * y)
    return y


def _channel_total_tiled(v, w, c):
    """v: (1, w*c) per-(w, channel) partial sums, lanes ordered (w, c).

    Returns (1, w*c) where EVERY lane holds its channel's total over the w
    groups.  For power-of-two w this is log2(w) circular lane rotations
    (pltpu.roll, XLU slot; direction-agnostic).  Tiny-reshape fallback otherwise.
    """
    if w & (w - 1) == 0:
        k = c
        while k < w * c:
            v = v + pltpu.roll(v, shift=k, axis=1)
            k *= 2
        return v
    tot = jnp.sum(v.reshape(w, c), axis=0, keepdims=True)            # (1, c)
    return jnp.broadcast_to(tot, (w, c)).reshape(1, w * c)


# ----------------------------------------------------------------------------
# Single fused kernel: all conv blocks + flatten + fc1 + latent activation.
# ----------------------------------------------------------------------------
def encoder_fused_kernel(*refs, layer_meta, act, latent_act, eps):
    """Fused encoder forward.

    refs = (x_ref,                                   # (N, H0, W0*C0)       bf16
            [toep_ref, gamma_ref, beta_ref] * L,     # per conv block
            fcw_ref, fcb_ref,                        # (feat, latent) bf16, (1, latent) f32
            o_ref,                                   # (N, latent)          f32
            pad_ref_0 .. pad_ref_{L-1})              # scratch (N, H+4, (W+4)*Cin) bf16

    toep_ref[l]: (5, (W+4)*Cin, W*Cout) bf16 — per-kh Toeplitz-over-kw conv
                 weight; each conv is 5 accumulating MXU matmuls on dense,
                 lane-packed activation rows (kh = contiguous sublane slices).
    gamma/beta:  (1, W*Cout) f32 — per-channel BN affine, pre-tiled over the
                 (w, c) lane layout at construction time.
    """
    nl = len(layer_meta)
    x_ref = refs[0]
    fcw_ref = refs[1 + 3 * nl]
    fcb_ref = refs[2 + 3 * nl]
    o_ref = refs[3 + 3 * nl]
    pad_refs = refs[4 + 3 * nl:]

    cur = x_ref[...]                                   # (N, H0, W0*C0) bf16
    N = cur.shape[0]

    for li, (H, W, Cin, Cout) in enumerate(layer_meta):
        toep_ref = refs[1 + 3 * li]
        gamma_ref = refs[2 + 3 * li]
        beta_ref = refs[3 + 3 * li]
        pad_ref = pad_refs[li]
        L = (W + 4) * Cin

        # ---- spatial zero-pad (Conv2d padding=2) via zeroed VMEM scratch ----
        # Every row keeps the dense lane-packed (w, cin) layout.
        pad_ref[...] = jnp.zeros(pad_ref.shape, dtype=pad_ref.dtype)
        pad_ref[:, 2:2 + H, 2 * Cin:(W + 2) * Cin] = cur

        # ---- conv 5x5: 5 accumulating MXU matmuls (one per kh) --------------
        # LHS: contiguous sublane slice of the padded buffer (no lane work),
        # RHS: per-kh Toeplitz-over-kw weight -> output lanes ordered (w, cout).
        acc = jnp.zeros((N * H, W * Cout), jnp.float32)
        for kh in range(5):
            a = pad_ref[:, kh:kh + H, :].reshape(N * H, L)                 # bf16
            acc = acc + jnp.dot(a, toep_ref[kh],
                                preferred_element_type=jnp.float32)       # f32

        # ---- BatchNorm2d (training mode): two-pass stats, f32 epilogue ------
        # Conv bias omitted: training-mode BN subtracts the per-channel batch
        # mean right after the conv, cancelling the bias exactly.
        inv_m = 1.0 / float(N * H * W)
        s1 = jnp.sum(acc, axis=0, keepdims=True)                 # (1, W*Cout)
        mean_t = _channel_total_tiled(s1, W, Cout) * inv_m       # tiled channel mean
        d = acc - mean_t
        s2 = jnp.sum(d * d, axis=0, keepdims=True)
        var_t = _channel_total_tiled(s2, W, Cout) * inv_m        # biased variance
        scale_t = gamma_ref[...] * jax.lax.rsqrt(var_t + eps)
        y = _layer_activate(d * scale_t + beta_ref[...], act)    # (N*H, W*Cout) f32

        # ---- MaxPool2d(2, 2): pool h first (adjacent sublane rows), then w --
        H2, W2 = H // 2, W // 2
        yh = y.reshape(N * H2, 2, W * Cout)
        yh = jnp.maximum(yh[:, 0, :], yh[:, 1, :])               # (N*H2, W*Cout)
        yw = yh.reshape(N * H2, W2, 2 * Cout)
        yw = jnp.maximum(yw[:, :, :Cout], yw[:, :, Cout:])       # (N*H2, W2, Cout)
        cur = yw.reshape(N, H2, W2 * Cout).astype(jnp.bfloat16)  # next layer input

    # ---- flatten: plain reshape; (h, w, c) order matches the permuted fc rows
    xf = cur.reshape(N, -1)                                      # (N, feat) bf16

    # ---- fc1 + latent activation (bn_latent=False -> identity) --------------
    z = jnp.dot(xf, fcw_ref[...], preferred_element_type=jnp.float32) + fcb_ref[...]
    o_ref[...] = _latent_activate(z, latent_act)


# ----------------------------------------------------------------------------
# Parameter construction (deterministic, synthetic; mirrors module __init__).
# ----------------------------------------------------------------------------
def _xavier_uniform(key, shape, fan_in, fan_out, gain=1.0):
    limit = gain * (6.0 / (fan_in + fan_out)) ** 0.5
    return jax.random.uniform(key, shape, jnp.float32, -limit, limit)


def _toeplitz_conv_weight(w_oihw, W):
    """(Cout, Cin, 5, 5) OIHW weight -> (5, (W+4)*Cin, W*Cout) f32 such that
    B[kh][(w+kw)*Cin + ci, w*Cout + co] = w_oihw[co, ci, kh, kw]  (pad=2 conv)."""
    out_c, in_c, KH, KW = w_oihw.shape
    wt = jnp.transpose(w_oihw, (2, 3, 1, 0)).reshape(KH, KW * in_c, out_c)  # (kh,(kw,ci),co)
    toep = jnp.zeros((KH, (W + 4) * in_c, W * out_c), jnp.float32)
    for kh in range(KH):
        for w in range(W):
            toep = toep.at[kh, w * in_c:(w + KW) * in_c,
                           w * out_c:(w + 1) * out_c].set(wt[kh])
    return toep


class EncoderPallas:
    def __init__(self, num_channels, latent_size, input_size, num_layers, key):
        assert num_layers > 0
        latent_image_size = input_size // 2 ** num_layers
        assert latent_image_size > 0
        assert input_size % (2 ** num_layers) == 0, "spatial size must halve cleanly"
        self.num_layers = num_layers
        self.latent_size = latent_size

        gain = 2.0 ** 0.5 if LAYERS_ACTIVATION == "relu" else 1.0
        self.conv_params = []   # (toep bf16 (5,(W+4)Cin,W*Cout), gamma_t, beta_t (1, W*Cout) f32)
        self.layer_meta = []    # (H, W, Cin, Cout)
        in_c = num_channels
        size = input_size
        for i in range(num_layers):
            out_c = 32 * 2 ** i
            key, kconv = jax.random.split(key)
            fan_in, fan_out = in_c * 25, out_c * 25
            w_oihw = _xavier_uniform(kconv, (out_c, in_c, 5, 5), fan_in, fan_out, gain)
            # Conv bias intentionally omitted: cancelled exactly by BN mean subtraction.
            toep = _toeplitz_conv_weight(w_oihw, size).astype(jnp.bfloat16)
            gamma_c = jnp.ones((1, out_c), jnp.float32)       # BN affine init
            beta_c = jnp.zeros((1, out_c), jnp.float32)
            gamma_t = jnp.tile(gamma_c, (1, size))            # pre-tiled over (w, c) lanes
            beta_t = jnp.tile(beta_c, (1, size))
            self.conv_params.append((toep, gamma_t, beta_t))
            self.layer_meta.append((size, size, in_c, out_c))
            in_c = out_c
            size //= 2

        feat = in_c * latent_image_size ** 2
        key, kfw, kfb = jax.random.split(key, 3)
        bound = 1.0 / (feat ** 0.5)                           # nn.Linear default init
        fc_w = jax.random.uniform(kfw, (latent_size, feat), jnp.float32, -bound, bound)
        fc_b = jax.random.uniform(kfb, (latent_size,), jnp.float32, -bound, bound)
        # Fold the PyTorch NCHW flatten order (c, h, w) into the weight rows so the
        # kernel consumes the NHWC-flattened conv output (h, w, c) directly; bf16.
        w4 = fc_w.reshape(latent_size, in_c, latent_image_size, latent_image_size)
        self.fc_w_t = jnp.transpose(w4, (2, 3, 1, 0)).reshape(
            feat, latent_size).astype(jnp.bfloat16)
        self.fc_b = fc_b.reshape(1, latent_size)

    def __call__(self, x_nchw):
        N = x_nchw.shape[0]
        H0, W0, C0, _ = self.layer_meta[0]
        # NCHW -> NHWC -> lane-packed (N, H, W*C), bf16 (tiny one-off op outside kernel).
        x = jnp.transpose(x_nchw, (0, 2, 3, 1)).reshape(N, H0, W0 * C0).astype(jnp.bfloat16)

        kernel = functools.partial(
            encoder_fused_kernel,
            layer_meta=tuple(self.layer_meta),
            act=LAYERS_ACTIVATION, latent_act=LATENT_ACTIVATION, eps=BN_EPS)

        flat_params = []
        for (w, g, b) in self.conv_params:
            flat_params += [w, g, b]
        flat_params += [self.fc_w_t, self.fc_b]

        scratch_shapes = [
            pltpu.VMEM((N, H + 4, (W + 4) * Cin), jnp.bfloat16)
            for (H, W, Cin, _) in self.layer_meta
        ]

        return pl.pallas_call(
            kernel,
            out_shape=jax.ShapeDtypeStruct((N, self.latent_size), jnp.float32),
            in_specs=[pl.BlockSpec(memory_space=pltpu.MemorySpace.VMEM)]
                     * (1 + len(flat_params)),
            out_specs=pl.BlockSpec(memory_space=pltpu.MemorySpace.VMEM),
            scratch_shapes=scratch_shapes,
        )(x, *flat_params)


if __name__ == "__main__":
    key = jax.random.PRNGKey(0)
    k_param, k_x = jax.random.split(key)

    num_channels, latent_size, input_size, num_layers = 4, 32, 16, 2
    enc = EncoderPallas(num_channels, latent_size, input_size, num_layers, k_param)

    x = jax.random.normal(k_x, (2, num_channels, input_size, input_size), jnp.float32)

    out = jax.jit(enc.__call__)(x)
    out = jax.block_until_ready(out)
    assert out.shape == (2, latent_size)
    assert bool(jnp.all(jnp.isfinite(out)))
    print("KERNEL_OK")
</pallas_src>

<mosaic_0001>
module attributes {stable_mosaic.version = 11 : i64} {
  func.func @encoder_fused_kernel(%arg0: memref<2x16x64xbf16, #tpu.memory_space<vmem>>, %arg1: memref<5x80x512xbf16, #tpu.memory_space<vmem>>, %arg2: memref<1x512xf32, #tpu.memory_space<vmem>>, %arg3: memref<1x512xf32, #tpu.memory_space<vmem>>, %arg4: memref<5x384x512xbf16, #tpu.memory_space<vmem>>, %arg5: memref<1x512xf32, #tpu.memory_space<vmem>>, %arg6: memref<1x512xf32, #tpu.memory_space<vmem>>, %arg7: memref<1024x32xbf16, #tpu.memory_space<vmem>>, %arg8: memref<1x32xf32, #tpu.memory_space<vmem>>, %arg9: memref<2x32xf32, #tpu.memory_space<vmem>>, %arg10: memref<2x20x80xbf16, #tpu.memory_space<vmem>>, %arg11: memref<2x12x384xbf16, #tpu.memory_space<vmem>>) attributes {dimension_semantics = [], scalar_prefetch = 0 : i64, scratch_operands = 2 : i64, tpu.core_type = #tpu.core_type<tc>} {
    %c0 = arith.constant 0 : index
    %c0_0 = arith.constant 0 : index
    %c0_1 = arith.constant 0 : index
    %0 = vector.load %arg0[%c0, %c0_0, %c0_1] : memref<2x16x64xbf16, #tpu.memory_space<vmem>>, vector<2x16x64xbf16>
    %cst = arith.constant 0.000000e+00 : bf16
    %1 = vector.broadcast %cst : bf16 to vector<2x20x80xbf16>
    %c0_2 = arith.constant 0 : index
    %c0_3 = arith.constant 0 : index
    %c0_4 = arith.constant 0 : index
    %2 = vector.load %arg10[%c0_2, %c0_3, %c0_4] : memref<2x20x80xbf16, #tpu.memory_space<vmem>>, vector<2x20x80xbf16>
    tpu.vector_store %arg10[%c0_2, %c0_3, %c0_4], %1 {strides = array<i32>} : memref<2x20x80xbf16, #tpu.memory_space<vmem>>, vector<2x20x80xbf16>,
    %c0_5 = arith.constant 0 : index
    %c2 = arith.constant 2 : index
    %c8 = arith.constant 8 : index
    %3 = vector.load %arg10[%c0_5, %c2, %c8] : memref<2x20x80xbf16, #tpu.memory_space<vmem>>, vector<2x16x64xbf16>
    tpu.vector_store %arg10[%c0_5, %c2, %c8], %0 {strides = array<i32>} : memref<2x20x80xbf16, #tpu.memory_space<vmem>>, vector<2x16x64xbf16>,
    %cst_6 = arith.constant 0.000000e+00 : f32
    %4 = vector.broadcast %cst_6 : f32 to vector<32x512xf32>
    %c0_7 = arith.constant 0 : index
    %c0_8 = arith.constant 0 : index
    %c0_9 = arith.constant 0 : index
    %5 = vector.load %arg10[%c0_7, %c0_8, %c0_9] : memref<2x20x80xbf16, #tpu.memory_space<vmem>>, vector<2x16x80xbf16>
    %6 = vector.shape_cast %5 : vector<2x16x80xbf16> to vector<32x80xbf16>
    %c0_10 = arith.constant 0 : index
    %c0_11 = arith.constant 0 : index
    %c0_12 = arith.constant 0 : index
    %7 = vector.load %arg1[%c0_10, %c0_11, %c0_12] : memref<5x80x512xbf16, #tpu.memory_space<vmem>>, vector<1x80x512xbf16>
    %8 = vector.shape_cast %7 : vector<1x80x512xbf16> to vector<80x512xbf16>
    %cst_13 = arith.constant dense<0.000000e+00> : vector<32x512xf32>
    %9 = tpu.matmul %6, %8, %cst_13 {dimension_numbers = #tpu.dot_dimension_numbers<[1], [0], [0], [1], [0, 0, 1, 1], [], []>} : vector<32x80xbf16>, vector<80x512xbf16>, vector<32x512xf32> -> vector<32x512xf32>
    %10 = arith.addf %4, %9 : vector<32x512xf32>
    %c0_14 = arith.constant 0 : index
    %c1 = arith.constant 1 : index
    %c0_15 = arith.constant 0 : index
    %11 = vector.load %arg10[%c0_14, %c1, %c0_15] : memref<2x20x80xbf16, #tpu.memory_space<vmem>>, vector<2x16x80xbf16>
    %12 = vector.shape_cast %11 : vector<2x16x80xbf16> to vector<32x80xbf16>
    %c1_16 = arith.constant 1 : index
    %c0_17 = arith.constant 0 : index
    %c0_18 = arith.constant 0 : index
    %13 = vector.load %arg1[%c1_16, %c0_17, %c0_18] : memref<5x80x512xbf16, #tpu.memory_space<vmem>>, vector<1x80x512xbf16>
    %14 = vector.shape_cast %13 : vector<1x80x512xbf16> to vector<80x512xbf16>
    %cst_19 = arith.constant dense<0.000000e+00> : vector<32x512xf32>
    %15 = tpu.matmul %12, %14, %cst_19 {dimension_numbers = #tpu.dot_dimension_numbers<[1], [0], [0], [1], [0, 0, 1, 1], [], []>} : vector<32x80xbf16>, vector<80x512xbf16>, vector<32x512xf32> -> vector<32x512xf32>
    %16 = arith.addf %10, %15 : vector<32x512xf32>
    %c0_20 = arith.constant 0 : index
    %c2_21 = arith.constant 2 : index
    %c0_22 = arith.constant 0 : index
    %17 = vector.load %arg10[%c0_20, %c2_21, %c0_22] : memref<2x20x80xbf16, #tpu.memory_space<vmem>>, vector<2x16x80xbf16>
    %18 = vector.shape_cast %17 : vector<2x16x80xbf16> to vector<32x80xbf16>
    %c2_23 = arith.constant 2 : index
    %c0_24 = arith.constant 0 : index
    %c0_25 = arith.constant 0 : index
    %19 = vector.load %arg1[%c2_23, %c0_24, %c0_25] : memref<5x80x512xbf16, #tpu.memory_space<vmem>>, vector<1x80x512xbf16>
    %20 = vector.shape_cast %19 : vector<1x80x512xbf16> to vector<80x512xbf16>
    %cst_26 = arith.constant dense<0.000000e+00> : vector<32x512xf32>
    %21 = tpu.matmul %18, %20, %cst_26 {dimension_numbers = #tpu.dot_dimension_numbers<[1], [0], [0], [1], [0, 0, 1, 1], [], []>} : vector<32x80xbf16>, vector<80x512xbf16>, vector<32x512xf32> -> vector<32x512xf32>
    %22 = arith.addf %16, %21 : vector<32x512xf32>
    %c0_27 = arith.constant 0 : index
    %c3 = arith.constant 3 : index
    %c0_28 = arith.constant 0 : index
    %23 = vector.load %arg10[%c0_27, %c3, %c0_28] : memref<2x20x80xbf16, #tpu.memory_space<vmem>>, vector<2x16x80xbf16>
    %24 = vector.shape_cast %23 : vector<2x16x80xbf16> to vector<32x80xbf16>
    %c3_29 = arith.constant 3 : index
    %c0_30 = arith.constant 0 : index
    %c0_31 = arith.constant 0 : index
    %25 = vector.load %arg1[%c3_29, %c0_30, %c0_31] : memref<5x80x512xbf16, #tpu.memory_space<vmem>>, vector<1x80x512xbf16>
    %26 = vector.shape_cast %25 : vector<1x80x512xbf16> to vector<80x512xbf16>
    %cst_32 = arith.constant dense<0.000000e+00> : vector<32x512xf32>
    %27 = tpu.matmul %24, %26, %cst_32 {dimension_numbers = #tpu.dot_dimension_numbers<[1], [0], [0], [1], [0, 0, 1, 1], [], []>} : vector<32x80xbf16>, vector<80x512xbf16>, vector<32x512xf32> -> vector<32x512xf32>
    %28 = arith.addf %22, %27 : vector<32x512xf32>
    %c0_33 = arith.constant 0 : index
    %c4 = arith.constant 4 : index
    %c0_34 = arith.constant 0 : index
    %29 = vector.load %arg10[%c0_33, %c4, %c0_34] : memref<2x20x80xbf16, #tpu.memory_space<vmem>>, vector<2x16x80xbf16>
    %30 = vector.shape_cast %29 : vector<2x16x80xbf16> to vector<32x80xbf16>
    %c4_35 = arith.constant 4 : index
    %c0_36 = arith.constant 0 : index
    %c0_37 = arith.constant 0 : index
    %31 = vector.load %arg1[%c4_35, %c0_36, %c0_37] : memref<5x80x512xbf16, #tpu.memory_space<vmem>>, vector<1x80x512xbf16>
    %32 = vector.shape_cast %31 : vector<1x80x512xbf16> to vector<80x512xbf16>
    %cst_38 = arith.constant dense<0.000000e+00> : vector<32x512xf32>
    %33 = tpu.matmul %30, %32, %cst_38 {dimension_numbers = #tpu.dot_dimension_numbers<[1], [0], [0], [1], [0, 0, 1, 1], [], []>} : vector<32x80xbf16>, vector<80x512xbf16>, vector<32x512xf32> -> vector<32x512xf32>
    %34 = arith.addf %28, %33 : vector<32x512xf32>
    %cst_39 = arith.constant dense<0.000000e+00> : vector<512xf32>
    %35 = vector.multi_reduction <add>, %34, %cst_39 [0] : vector<32x512xf32> to vector<512xf32>
    %36 = vector.shape_cast %35 : vector<512xf32> to vector<1x512xf32>
    %c32_i32 = arith.constant 32 : i32
    %37 = tpu.dynamic_rotate %36 by %c32_i32 dim 1 : vector<1x512xf32>, i32 -> vector<1x512xf32>
    %38 = arith.addf %36, %37 : vector<1x512xf32>
    %c64_i32 = arith.constant 64 : i32
    %39 = tpu.dynamic_rotate %38 by %c64_i32 dim 1 : vector<1x512xf32>, i32 -> vector<1x512xf32>
    %40 = arith.addf %38, %39 : vector<1x512xf32>
    %c128_i32 = arith.constant 128 : i32
    %41 = tpu.dynamic_rotate %40 by %c128_i32 dim 1 : vector<1x512xf32>, i32 -> vector<1x512xf32>
    %42 = arith.addf %40, %41 : vector<1x512xf32>
    %c256_i32 = arith.constant 256 : i32
    %43 = tpu.dynamic_rotate %42 by %c256_i32 dim 1 : vector<1x512xf32>, i32 -> vector<1x512xf32>
    %44 = arith.addf %42, %43 : vector<1x512xf32>
    %cst_40 = arith.constant 0.001953125 : f32
    %45 = vector.broadcast %cst_40 : f32 to vector<1x512xf32>
    %46 = arith.mulf %44, %45 : vector<1x512xf32>
    %47 = vector.broadcast %46 : vector<1x512xf32> to vector<32x512xf32>
    %48 = arith.subf %34, %47 : vector<32x512xf32>
    %49 = arith.mulf %48, %48 : vector<32x512xf32>
    %cst_41 = arith.constant dense<0.000000e+00> : vector<512xf32>
    %50 = vector.multi_reduction <add>, %49, %cst_41 [0] : vector<32x512xf32> to vector<512xf32>
    %51 = vector.shape_cast %50 : vector<512xf32> to vector<1x512xf32>
    %c32_i32_42 = arith.constant 32 : i32
    %52 = tpu.dynamic_rotate %51 by %c32_i32_42 dim 1 : vector<1x512xf32>, i32 -> vector<1x512xf32>
    %53 = arith.addf %51, %52 : vector<1x512xf32>
    %c64_i32_43 = arith.constant 64 : i32
    %54 = tpu.dynamic_rotate %53 by %c64_i32_43 dim 1 : vector<1x512xf32>, i32 -> vector<1x512xf32>
    %55 = arith.addf %53, %54 : vector<1x512xf32>
    %c128_i32_44 = arith.constant 128 : i32
    %56 = tpu.dynamic_rotate %55 by %c128_i32_44 dim 1 : vector<1x512xf32>, i32 -> vector<1x512xf32>
    %57 = arith.addf %55, %56 : vector<1x512xf32>
    %c256_i32_45 = arith.constant 256 : i32
    %58 = tpu.dynamic_rotate %57 by %c256_i32_45 dim 1 : vector<1x512xf32>, i32 -> vector<1x512xf32>
    %59 = arith.addf %57, %58 : vector<1x512xf32>
    %cst_46 = arith.constant 0.001953125 : f32
    %60 = vector.broadcast %cst_46 : f32 to vector<1x512xf32>
    %61 = arith.mulf %59, %60 : vector<1x512xf32>
    %c0_47 = arith.constant 0 : index
    %c0_48 = arith.constant 0 : index
    %62 = vector.load %arg2[%c0_47, %c0_48] : memref<1x512xf32, #tpu.memory_space<vmem>>, vector<1x512xf32>
    %cst_49 = arith.constant 9.99999974E-6 : f32
    %63 = vector.broadcast %cst_49 : f32 to vector<1x512xf32>
    %64 = arith.addf %61, %63 : vector<1x512xf32>
    %65 = math.rsqrt %64 : vector<1x512xf32>
    %66 = arith.mulf %62, %65 : vector<1x512xf32>
    %67 = vector.broadcast %66 : vector<1x512xf32> to vector<32x512xf32>
    %68 = arith.mulf %48, %67 : vector<32x512xf32>
    %c0_50 = arith.constant 0 : index
    %c0_51 = arith.constant 0 : index
    %69 = vector.load %arg3[%c0_50, %c0_51] : memref<1x512xf32, #tpu.memory_space<vmem>>, vector<1x512xf32>
    %70 = vector.broadcast %69 : vector<1x512xf32> to vector<32x512xf32>
    %71 = arith.addf %68, %70 : vector<32x512xf32>
    %cst_52 = arith.constant 0.000000e+00 : f32
    %72 = vector.broadcast %cst_52 : f32 to vector<32x512xf32>
    %73 = arith.maximumf %71, %72 : vector<32x512xf32>
    %74 = vector.shape_cast %73 : vector<32x512xf32> to vector<16x2x512xf32>
    %75 = vector.extract_strided_slice %74 {offsets = [0, 0, 0], sizes = [16, 1, 512], strides = [1, 1, 1]} : vector<16x2x512xf32> to vector<16x1x512xf32>
    %76 = vector.shape_cast %75 : vector<16x1x512xf32> to vector<16x512xf32>
    %77 = vector.extract_strided_slice %74 {offsets = [0, 1, 0], sizes = [16, 1, 512], strides = [1, 1, 1]} : vector<16x2x512xf32> to vector<16x1x512xf32>
    %78 = vector.shape_cast %77 : vector<16x1x512xf32> to vector<16x512xf32>
    %79 = arith.maximumf %76, %78 : vector<16x512xf32>
    %80 = vector.shape_cast %79 : vector<16x512xf32> to vector<16x8x64xf32>
    %81 = vector.extract_strided_slice %80 {offsets = [0, 0, 0], sizes = [16, 8, 32], strides = [1, 1, 1]} : vector<16x8x64xf32> to vector<16x8x32xf32>
    %82 = vector.extract_strided_slice %80 {offsets = [0, 0, 32], sizes = [16, 8, 32], strides = [1, 1, 1]} : vector<16x8x64xf32> to vector<16x8x32xf32>
    %83 = arith.maximumf %81, %82 : vector<16x8x32xf32>
    %84 = vector.shape_cast %83 : vector<16x8x32xf32> to vector<2x8x256xf32>
    %85 = arith.truncf %84 : vector<2x8x256xf32> to vector<2x8x256xbf16>
    %cst_53 = arith.constant 0.000000e+00 : bf16
    %86 = vector.broadcast %cst_53 : bf16 to vector<2x12x384xbf16>
    %c0_54 = arith.constant 0 : index
    %c0_55 = arith.constant 0 : index
    %c0_56 = arith.constant 0 : index
    %87 = vector.load %arg11[%c0_54, %c0_55, %c0_56] : memref<2x12x384xbf16, #tpu.memory_space<vmem>>, vector<2x12x384xbf16>
    tpu.vector_store %arg11[%c0_54, %c0_55, %c0_56], %86 {strides = array<i32>} : memref<2x12x384xbf16, #tpu.memory_space<vmem>>, vector<2x12x384xbf16>,
    %c0_57 = arith.constant 0 : index
    %c2_58 = arith.constant 2 : index
    %c64 = arith.constant 64 : index
    %88 = vector.load %arg11[%c0_57, %c2_58, %c64] : memref<2x12x384xbf16, #tpu.memory_space<vmem>>, vector<2x8x256xbf16>
    tpu.vector_store %arg11[%c0_57, %c2_58, %c64], %85 {strides = array<i32>} : memref<2x12x384xbf16, #tpu.memory_space<vmem>>, vector<2x8x256xbf16>,
    %cst_59 = arith.constant 0.000000e+00 : f32
    %89 = vector.broadcast %cst_59 : f32 to vector<16x512xf32>
    %c0_60 = arith.constant 0 : index
    %c0_61 = arith.constant 0 : index
    %c0_62 = arith.constant 0 : index
    %90 = vector.load %arg11[%c0_60, %c0_61, %c0_62] : memref<2x12x384xbf16, #tpu.memory_space<vmem>>, vector<2x8x384xbf16>
    %91 = vector.shape_cast %90 : vector<2x8x384xbf16> to vector<16x384xbf16>
    %c0_63 = arith.constant 0 : index
    %c0_64 = arith.constant 0 : index
    %c0_65 = arith.constant 0 : index
    %92 = vector.load %arg4[%c0_63, %c0_64, %c0_65] : memref<5x384x512xbf16, #tpu.memory_space<vmem>>, vector<1x384x512xbf16>
    %93 = vector.shape_cast %92 : vector<1x384x512xbf16> to vector<384x512xbf16>
    %cst_66 = arith.constant dense<0.000000e+00> : vector<16x512xf32>
    %94 = tpu.matmul %91, %93, %cst_66 {dimension_numbers = #tpu.dot_dimension_numbers<[1], [0], [0], [1], [0, 0, 1, 1], [], []>} : vector<16x384xbf16>, vector<384x512xbf16>, vector<16x512xf32> -> vector<16x512xf32>
    %95 = arith.addf %89, %94 : vector<16x512xf32>
    %c0_67 = arith.constant 0 : index
    %c1_68 = arith.constant 1 : index
    %c0_69 = arith.constant 0 : index
    %96 = vector.load %arg11[%c0_67, %c1_68, %c0_69] : memref<2x12x384xbf16, #tpu.memory_space<vmem>>, vector<2x8x384xbf16>
    %97 = vector.shape_cast %96 : vector<2x8x384xbf16> to vector<16x384xbf16>
    %c1_70 = arith.constant 1 : index
    %c0_71 = arith.constant 0 : index
    %c0_72 = arith.constant 0 : index
    %98 = vector.load %arg4[%c1_70, %c0_71, %c0_72] : memref<5x384x512xbf16, #tpu.memory_space<vmem>>, vector<1x384x512xbf16>
    %99 = vector.shape_cast %98 : vector<1x384x512xbf16> to vector<384x512xbf16>
    %cst_73 = arith.constant dense<0.000000e+00> : vector<16x512xf32>
    %100 = tpu.matmul %97, %99, %cst_73 {dimension_numbers = #tpu.dot_dimension_numbers<[1], [0], [0], [1], [0, 0, 1, 1], [], []>} : vector<16x384xbf16>, vector<384x512xbf16>, vector<16x512xf32> -> vector<16x512xf32>
    %101 = arith.addf %95, %100 : vector<16x512xf32>
    %c0_74 = arith.constant 0 : index
    %c2_75 = arith.constant 2 : index
    %c0_76 = arith.constant 0 : index
    %102 = vector.load %arg11[%c0_74, %c2_75, %c0_76] : memref<2x12x384xbf16, #tpu.memory_space<vmem>>, vector<2x8x384xbf16>
    %103 = vector.shape_cast %102 : vector<2x8x384xbf16> to vector<16x384xbf16>
    %c2_77 = arith.constant 2 : index
    %c0_78 = arith.constant 0 : index
    %c0_79 = arith.constant 0 : index
    %104 = vector.load %arg4[%c2_77, %c0_78, %c0_79] : memref<5x384x512xbf16, #tpu.memory_space<vmem>>, vector<1x384x512xbf16>
    %105 = vector.shape_cast %104 : vector<1x384x512xbf16> to vector<384x512xbf16>
    %cst_80 = arith.constant dense<0.000000e+00> : vector<16x512xf32>
    %106 = tpu.matmul %103, %105, %cst_80 {dimension_numbers = #tpu.dot_dimension_numbers<[1], [0], [0], [1], [0, 0, 1, 1], [], []>} : vector<16x384xbf16>, vector<384x512xbf16>, vector<16x512xf32> -> vector<16x512xf32>
    %107 = arith.addf %101, %106 : vector<16x512xf32>
    %c0_81 = arith.constant 0 : index
    %c3_82 = arith.constant 3 : index
    %c0_83 = arith.constant 0 : index
    %108 = vector.load %arg11[%c0_81, %c3_82, %c0_83] : memref<2x12x384xbf16, #tpu.memory_space<vmem>>, vector<2x8x384xbf16>
    %109 = vector.shape_cast %108 : vector<2x8x384xbf16> to vector<16x384xbf16>
    %c3_84 = arith.constant 3 : index
    %c0_85 = arith.constant 0 : index
    %c0_86 = arith.constant 0 : index
    %110 = vector.load %arg4[%c3_84, %c0_85, %c0_86] : memref<5x384x512xbf16, #tpu.memory_space<vmem>>, vector<1x384x512xbf16>
    %111 = vector.shape_cast %110 : vector<1x384x512xbf16> to vector<384x512xbf16>
    %cst_87 = arith.constant dense<0.000000e+00> : vector<16x512xf32>
    %112 = tpu.matmul %109, %111, %cst_87 {dimension_numbers = #tpu.dot_dimension_numbers<[1], [0], [0], [1], [0, 0, 1, 1], [], []>} : vector<16x384xbf16>, vector<384x512xbf16>, vector<16x512xf32> -> vector<16x512xf32>
    %113 = arith.addf %107, %112 : vector<16x512xf32>
    %c0_88 = arith.constant 0 : index
    %c4_89 = arith.constant 4 : index
    %c0_90 = arith.constant 0 : index
    %114 = vector.load %arg11[%c0_88, %c4_89, %c0_90] : memref<2x12x384xbf16, #tpu.memory_space<vmem>>, vector<2x8x384xbf16>
    %115 = vector.shape_cast %114 : vector<2x8x384xbf16> to vector<16x384xbf16>
    %c4_91 = arith.constant 4 : index
    %c0_92 = arith.constant 0 : index
    %c0_93 = arith.constant 0 : index
    %116 = vector.load %arg4[%c4_91, %c0_92, %c0_93] : memref<5x384x512xbf16, #tpu.memory_space<vmem>>, vector<1x384x512xbf16>
    %117 = vector.shape_cast %116 : vector<1x384x512xbf16> to vector<384x512xbf16>
    %cst_94 = arith.constant dense<0.000000e+00> : vector<16x512xf32>
    %118 = tpu.matmul %115, %117, %cst_94 {dimension_numbers = #tpu.dot_dimension_numbers<[1], [0], [0], [1], [0, 0, 1, 1], [], []>} : vector<16x384xbf16>, vector<384x512xbf16>, vector<16x512xf32> -> vector<16x512xf32>
    %119 = arith.addf %113, %118 : vector<16x512xf32>
    %cst_95 = arith.constant dense<0.000000e+00> : vector<512xf32>
    %120 = vector.multi_reduction <add>, %119, %cst_95 [0] : vector<16x512xf32> to vector<512xf32>
    %121 = vector.shape_cast %120 : vector<512xf32> to vector<1x512xf32>
    %c64_i32_96 = arith.constant 64 : i32
    %122 = tpu.dynamic_rotate %121 by %c64_i32_96 dim 1 : vector<1x512xf32>, i32 -> vector<1x512xf32>
    %123 = arith.addf %121, %122 : vector<1x512xf32>
    %c128_i32_97 = arith.constant 128 : i32
    %124 = tpu.dynamic_rotate %123 by %c128_i32_97 dim 1 : vector<1x512xf32>, i32 -> vector<1x512xf32>
    %125 = arith.addf %123, %124 : vector<1x512xf32>
    %c256_i32_98 = arith.constant 256 : i32
    %126 = tpu.dynamic_rotate %125 by %c256_i32_98 dim 1 : vector<1x512xf32>, i32 -> vector<1x512xf32>
    %127 = arith.addf %125, %126 : vector<1x512xf32>
    %cst_99 = arith.constant 7.812500e-03 : f32
    %128 = vector.broadcast %cst_99 : f32 to vector<1x512xf32>
    %129 = arith.mulf %127, %128 : vector<1x512xf32>
    %130 = vector.broadcast %129 : vector<1x512xf32> to vector<16x512xf32>
    %131 = arith.subf %119, %130 : vector<16x512xf32>
    %132 = arith.mulf %131, %131 : vector<16x512xf32>
    %cst_100 = arith.constant dense<0.000000e+00> : vector<512xf32>
    %133 = vector.multi_reduction <add>, %132, %cst_100 [0] : vector<16x512xf32> to vector<512xf32>
    %134 = vector.shape_cast %133 : vector<512xf32> to vector<1x512xf32>
    %c64_i32_101 = arith.constant 64 : i32
    %135 = tpu.dynamic_rotate %134 by %c64_i32_101 dim 1 : vector<1x512xf32>, i32 -> vector<1x512xf32>
    %136 = arith.addf %134, %135 : vector<1x512xf32>
    %c128_i32_102 = arith.constant 128 : i32
    %137 = tpu.dynamic_rotate %136 by %c128_i32_102 dim 1 : vector<1x512xf32>, i32 -> vector<1x512xf32>
    %138 = arith.addf %136, %137 : vector<1x512xf32>
    %c256_i32_103 = arith.constant 256 : i32
    %139 = tpu.dynamic_rotate %138 by %c256_i32_103 dim 1 : vector<1x512xf32>, i32 -> vector<1x512xf32>
    %140 = arith.addf %138, %139 : vector<1x512xf32>
    %cst_104 = arith.constant 7.812500e-03 : f32
    %141 = vector.broadcast %cst_104 : f32 to vector<1x512xf32>
    %142 = arith.mulf %140, %141 : vector<1x512xf32>
    %c0_105 = arith.constant 0 : index
    %c0_106 = arith.constant 0 : index
    %143 = vector.load %arg5[%c0_105, %c0_106] : memref<1x512xf32, #tpu.memory_space<vmem>>, vector<1x512xf32>
    %cst_107 = arith.constant 9.99999974E-6 : f32
    %144 = vector.broadcast %cst_107 : f32 to vector<1x512xf32>
    %145 = arith.addf %142, %144 : vector<1x512xf32>
    %146 = math.rsqrt %145 : vector<1x512xf32>
    %147 = arith.mulf %143, %146 : vector<1x512xf32>
    %148 = vector.broadcast %147 : vector<1x512xf32> to vector<16x512xf32>
    %149 = arith.mulf %131, %148 : vector<16x512xf32>
    %c0_108 = arith.constant 0 : index
    %c0_109 = arith.constant 0 : index
    %150 = vector.load %arg6[%c0_108, %c0_109] : memref<1x512xf32, #tpu.memory_space<vmem>>, vector<1x512xf32>
    %151 = vector.broadcast %150 : vector<1x512xf32> to vector<16x512xf32>
    %152 = arith.addf %149, %151 : vector<16x512xf32>
    %cst_110 = arith.constant 0.000000e+00 : f32
    %153 = vector.broadcast %cst_110 : f32 to vector<16x512xf32>
    %154 = arith.maximumf %152, %153 : vector<16x512xf32>
    %155 = vector.shape_cast %154 : vector<16x512xf32> to vector<8x2x512xf32>
    %156 = vector.extract_strided_slice %155 {offsets = [0, 0, 0], sizes = [8, 1, 512], strides = [1, 1, 1]} : vector<8x2x512xf32> to vector<8x1x512xf32>
    %157 = vector.shape_cast %156 : vector<8x1x512xf32> to vector<8x512xf32>
    %158 = vector.extract_strided_slice %155 {offsets = [0, 1, 0], sizes = [8, 1, 512], strides = [1, 1, 1]} : vector<8x2x512xf32> to vector<8x1x512xf32>
    %159 = vector.shape_cast %158 : vector<8x1x512xf32> to vector<8x512xf32>
    %160 = arith.maximumf %157, %159 : vector<8x512xf32>
    %161 = vector.shape_cast %160 : vector<8x512xf32> to vector<8x4x128xf32>
    %162 = vector.extract_strided_slice %161 {offsets = [0, 0, 0], sizes = [8, 4, 64], strides = [1, 1, 1]} : vector<8x4x128xf32> to vector<8x4x64xf32>
    %163 = vector.extract_strided_slice %161 {offsets = [0, 0, 64], sizes = [8, 4, 64], strides = [1, 1, 1]} : vector<8x4x128xf32> to vector<8x4x64xf32>
    %164 = arith.maximumf %162, %163 : vector<8x4x64xf32>
    %165 = vector.shape_cast %164 : vector<8x4x64xf32> to vector<2x4x256xf32>
    %166 = arith.truncf %165 : vector<2x4x256xf32> to vector<2x4x256xbf16>
    %167 = vector.shape_cast %166 : vector<2x4x256xbf16> to vector<2x1024xbf16>
    %c0_111 = arith.constant 0 : index
    %c0_112 = arith.constant 0 : index
    %168 = vector.load %arg7[%c0_111, %c0_112] : memref<1024x32xbf16, #tpu.memory_space<vmem>>, vector<1024x32xbf16>
    %cst_113 = arith.constant dense<0.000000e+00> : vector<2x32xf32>
    %169 = tpu.matmul %167, %168, %cst_113 {dimension_numbers = #tpu.dot_dimension_numbers<[1], [0], [0], [1], [0, 0, 1, 1], [], []>} : vector<2x1024xbf16>, vector<1024x32xbf16>, vector<2x32xf32> -> vector<2x32xf32>
    %c0_114 = arith.constant 0 : index
    %c0_115 = arith.constant 0 : index
    %170 = vector.load %arg8[%c0_114, %c0_115] : memref<1x32xf32, #tpu.memory_space<vmem>>, vector<1x32xf32>
    %171 = vector.broadcast %170 : vector<1x32xf32> to vector<2x32xf32>
    %172 = arith.addf %169, %171 : vector<2x32xf32>
    %173 = math.tanh %172 : vector<2x32xf32>
    %c0_116 = arith.constant 0 : index
    %c0_117 = arith.constant 0 : index
    %174 = vector.load %arg9[%c0_116, %c0_117] : memref<2x32xf32, #tpu.memory_space<vmem>>, vector<2x32xf32>
    tpu.vector_store %arg9[%c0_116, %c0_117], %173 {strides = array<i32>} : memref<2x32xf32, #tpu.memory_space<vmem>>, vector<2x32xf32>,
    return
  }
}

</mosaic_0001>

<bundles_post_ra>
// kernel: a_call__.1
= control target key start
LH: loop header
LB: loop body
LE: loop exit
PB: predicated region body
PF: predicated region fallthrough
CT: control target
= control target key end

     0   :  { %14 = vsyncpa [#allocation5], 0  ;;  %s15480_s0 = inlined_call_operand.vmem [shape: bf16[2,16,64], index: 0, kind: input, shape index: {}]   ;;  %s15481_s1 = inlined_call_operand.hbm [shape: bf16[5,80,512], index: 1, kind: input, shape index: {}]   ;;  %s15482_s2 = inlined_call_operand.vmem [shape: f32[1,512], index: 2, kind: input, shape index: {}, may-alias: {2,5}]   ;;  %s15483_s3 = inlined_call_operand.vmem [shape: f32[1,512], index: 3, kind: input, shape index: {}, may-alias: {3,6}]   ;;  %s15484_s4 = inlined_call_operand.hbm [shape: bf16[5,384,512], index: 4, kind: input, shape index: {}]   ;;  %s15485_s5 = inlined_call_operand.vmem [shape: f32[1,512], index: 5, kind: input, shape index: {}, may-alias: {2,5}]   ;;  %s15486_s6 = inlined_call_operand.vmem [shape: f32[1,512], index: 6, kind: input, shape index: {}, may-alias: {3,6}]   ;;  %s15487_s7 = inlined_call_operand.hbm [shape: bf16[1024,32], index: 7, kind: input, shape index: {}]   ;;  %s15488_s8 = inlined_call_operand.hbm [shape: f32[1,32], index: 8, kind: input, shape index: {}]   ;;  %s15489_s9 = inlined_call_operand.hbm [shape: f32[2,32], index: 9, kind: output, shape index: {}]  }
   0x1   :  { %15 = vsyncpa [#allocation8], 0 }
   0x2   :  { %16 = vsyncpa [#allocation11], 0 }
   0x3   :  { %17 = vsyncpa [#allocation6], 0  ;;  %s41_s11 = sshll.u32 %s15484_s4, 4  ;;  %s12627_s12 = smov [#allocation7]   ;;  %s42_s11 = int_to_ptr.hbm [resolvable:$true] %s41_s11 }
   0x4   :  { %s43_s13 = sshll.u32 %s12627_s12, 4  ;;  %s24_s16 = sshll.u32 %s15481_s1, 4  ;;  %s44_s13 = int_to_ptr.vmem [resolvable:$true] %s43_s13  ;;  %s25_s16 = int_to_ptr.hbm [resolvable:$true] %s24_s16 }
   0x5   :  { %s12628_s17 = smov 256   ;;  %s12629_s18 = smov 16  }
   0x6   :  { %49 = dma.hbm_to_vmem [thread:$0]  %s42_s11, 61440, %s44_s13, [#allocation8], %s12628_s17, %s12628_s17, %s12629_s18  }
   0x7   :  { %s12630_s19 = smov [#allocation4]   ;;  %s58_s23 = sshll.u32 %s15487_s7, 4  ;;  %s59_s23 = int_to_ptr.hbm [resolvable:$true] %s58_s23 }
   0x8   :  { %s26_s20 = sshll.u32 %s12630_s19, 4  ;;  %s12631_s4 = smov [#allocation9]   ;;  %s27_s20 = int_to_ptr.vmem [resolvable:$true] %s26_s20 }
   0x9   :  { %32 = dma.hbm_to_vmem [thread:$0]  %s25_s16, 12800, %s27_s20, [#allocation5], %s12628_s17, %s12628_s17, %s12629_s18  }
   0xa   :  { %s60_s24 = sshll.u32 %s12631_s4, 4  ;;  %s72_s1 = sshll.u32 %s15488_s8, 4  ;;  %s61_s24 = int_to_ptr.vmem [resolvable:$true] %s60_s24  ;;  %s73_s1 = int_to_ptr.hbm [resolvable:$true] %s72_s1 }
   0xb   :  { %s12632_s27 = smov 64   ;;  %s12633_s28 = smov 4  }
   0xc   :  { %66 = dma.hbm_to_vmem [thread:$0]  %s59_s23, 8192, %s61_s24, [#allocation8], %s12632_s27, %s12632_s27, %s12633_s28  }
   0xd   :  { %s12634_s29 = smov [#allocation10]  }
   0xe   :  { %s74_s30 = sshll.u32 %s12634_s29, 4  ;;  %s75_s30 = int_to_ptr.vmem [resolvable:$true] %s74_s30 }
   0xf   :  { %77 = dma.hbm_to_vmem [thread:$0]  %s73_s1, 16, %s75_s30, [#allocation11]  }
  0x10   :  { %12619 = dma.done.wait [#allocation5], 12800  }
  0x11   :  { %12620 = vsyncadd [#allocation5], 4294954496 }
  0x12   :  { %12621 = dma.done.wait [#allocation8], 69632  }
  0x13   :  { %12622 = vsyncadd [#allocation8], 4294897664 }
  0x14   :  { %12623 = dma.done.wait [#allocation11], 16  }
  0x15   :  { %12624 = vsyncadd [#allocation11], 4294967280  ;;  %vm99_vm0 = vcmask 650240   ;;  %v12635_v0 = vmov 0   ;;  %vm111_vm1 = vcmask 1040384   ;;  %vm112_vm2 = vcmask 1044484  }
  0x16   :  { %100 = vst.msk [vmem:[#allocation2] sm:$0xf] %vm99_vm0, %v12635_v0  ;;  %v95_v1 = vld [vmem:[%s15480_s0] sm:$0xf]  ;;  %v96_v2 = vld [vmem:[%s15480_s0 + $0x4] sm:$0xf]  ;;  %vm113_vm3 = vmor %vm111_vm1, %vm112_vm2 }
  0x17   :  { %101 = vst.msk [vmem:[#allocation2 + $0x4] sm:$0xf] %vm99_vm0, %v12635_v0  ;;  %v97_v3 = vld [vmem:[%s15480_s0 + $0x8] sm:$0xf]  ;;  %v114_v4 = vrot.slane %v95_v1, 7  ;;  %v116_v5 = vrot.slane %v96_v2, 7 }
  0x18   :  { %104 = vst.msk [vmem:[#allocation2 + $0xc] sm:$0xf] %vm99_vm0, %v12635_v0  ;;  %v119_v6 = vrot.slane %v97_v3, 7  ;;  %v98_v7 = vld [vmem:[%s15480_s0 + $0xc] sm:$0xf]  ;;  %s12636_s16 = smov 8  }
  0x19   :  { %105 = vst.msk [vmem:[#allocation2 + $0x10] sm:$0xf] %vm99_vm0, %v12635_v0  ;;  %v121_v8 = vrot.slane %v98_v7, 7  ;;  %124 = vrot.lane.b32.xlu0 %v114_v4, %s12636_s16  ;;  %v118_v9 = vrot.slane %v116_v5, 4  ;;  %v115_v11 = vrot.slane %v114_v4, 4  ;;  %vm102_vm4 = vcmask 648192  }
  0x1a   :  { %3620 = vst [vmem:[#allocation3] sm:$0xff] %v12635_v0  ;;  %v120_v10 = vrot.slane %v119_v6, 4  ;;  %vm144_vm5 = vcmask 584768   ;;  %v9179_v15 = vld [vmem:[#allocation4 + $0x120] sm:$0xf]  ;;  %vm146_vm6 = vcmask 581696  }
  0x1b   :  { %3624 = vst [vmem:[#allocation3 + $0x18] sm:$0xff] %v12635_v0  ;;  %128 = vrot.lane.b32.xlu1 %v118_v9, %s12636_s16  ;;  %v117_v13 = vsel %vm113_vm3, %v115_v11, %v116_v5  ;;  %v123_v14 = vrot.slane %v121_v8, 4  ;;  %v11825_v16 = vld [vmem:[#allocation4 + $0x12c] sm:$0xf0]  ;;  %v11823_v17 = vld [vmem:[#allocation4 + $0x124] sm:$0xf] }
  0x1c   :  { %3621 = vst [vmem:[#allocation3 + $0x8] sm:$0xf] %v12635_v0  ;;  %v122_v12 = vsel %vm113_vm3, %v120_v10, %v121_v8  ;;  %v9180_v18 = vor.u32 %v11825_v16, %v9179_v15  ;;  %v9181_v19 = vld [vmem:[#allocation4 + $0x130] sm:$0xf0]  ;;  %v9187_v20 = vld [vmem:[#allocation4 + $0x128] sm:$0xf] }
  0x1d   :  { %3622 = vst [vmem:[#allocation3 + $0xc] sm:$0x33] %v12635_v0  ;;  %132 = vrot.lane.b32.xlu2 %v122_v12, %s12636_s16  ;;  %v11826_v21 = vld [vmem:[#allocation4 + $0x134] sm:$0xf0]  ;;  %v9184_v22 = vor.u32 %v11823_v17, %v9181_v19  ;;  %v11824_v24 = vld [vmem:[#allocation4 + $0x12c] sm:$0xf] }
  0x1e   :  { %3623 = vst [vmem:[#allocation3 + $0x14] sm:$0x3] %v12635_v0  ;;  %v9188_v23 = vor.u32 %v11826_v21, %v9187_v20  ;;  %v9189_v25 = vld [vmem:[#allocation4 + $0x138] sm:$0xf0]  ;;  %v9163_v26 = vld [vmem:[#allocation4 + $0x100] sm:$0xf]  ;;  %365 = vmatpush.bf16.msra.mxu0 %v9180_v18 }
  0x1f   :  { %3625 = vst [vmem:[#allocation3 + $0x20] sm:$0xf] %v12635_v0  ;;  %v9192_v27 = vor.u32 %v11824_v24, %v9189_v25  ;;  %v11821_v29 = vld [vmem:[#allocation4 + $0x10c] sm:$0xf0]  ;;  %v11819_v30 = vld [vmem:[#allocation4 + $0x104] sm:$0xf]  ;;  %384 = vmatpush.bf16.msra.mxu1 %v9184_v22 }
  0x20   :  { %3626 = vst [vmem:[#allocation3 + $0x24] sm:$0x33] %v12635_v0  ;;  %v9165_v31 = vld [vmem:[#allocation4 + $0x110] sm:$0xf0]  ;;  %403 = vmatpush.bf16.msra.mxu2 %v9188_v23  ;;  %v9164_v32 = vor.u32 %v11821_v29, %v9163_v26  ;;  %v9171_v34 = vld [vmem:[#allocation4 + $0x108] sm:$0xf] }
  0x21   :  { %3627 = vst [vmem:[#allocation3 + $0x2c] sm:$0x3] %v12635_v0  ;;  %126 = vrot.lane.b32.xlu0 %v117_v13, %s12636_s16  ;;  %v9168_v33 = vor.u32 %v11819_v30, %v9165_v31  ;;  %v11822_v35 = vld [vmem:[#allocation4 + $0x114] sm:$0xf0]  ;;  %422 = vmatpush.bf16.msra.mxu3 %v9192_v27  ;;  %v11820_v37 = vld [vmem:[#allocation4 + $0x10c] sm:$0xf] }
  0x22   :  { %103 = vst.msk [vmem:[#allocation2 + $0x8] sm:$0x3] %vm102_vm4, %v12635_v0  ;;  %v9172_v36 = vor.u32 %v11822_v35, %v9171_v34  ;;  %v9173_v38 = vld [vmem:[#allocation4 + $0x118] sm:$0xf0]  ;;  %v9147_v39 = vld [vmem:[#allocation4 + $0xe0] sm:$0xf]  ;;  %366 = vmatpush.bf16.msra.mxu0 %v9164_v32 }
  0x23   :  { %130 = vrot.lane.b32.xlu1 %v119_v6, %s12636_s16  ;;  %106 = vst.msk [vmem:[#allocation2 + $0x14] sm:$0x3] %vm102_vm4, %v12635_v0  ;;  %v9176_v40 = vor.u32 %v11820_v37, %v9173_v38  ;;  %v11817_v41 = vld [vmem:[#allocation4 + $0xec] sm:$0xf0]  ;;  %v11815_v42 = vld [vmem:[#allocation4 + $0xe4] sm:$0xf]  ;;  %385 = vmatpush.bf16.msra.mxu1 %v9168_v33 }
  0x24   :  { %v9149_v43 = vld [vmem:[#allocation4 + $0xf0] sm:$0xf0]  ;;  %v9148_v44 = vor.u32 %v11817_v41, %v9147_v39  ;;  %v9155_v45 = vld [vmem:[#allocation4 + $0xe8] sm:$0xf]  ;;  %v11818_v46 = vld [vmem:[#allocation4 + $0xf4] sm:$0xf0]  ;;  %404 = vmatpush.bf16.msra.mxu2 %v9172_v36 }
  0x25   :  { %134 = vrot.lane.b32.xlu2 %v123_v14, %s12636_s16  ;;  %v11816_v47 = vld [vmem:[#allocation4 + $0xec] sm:$0xf]  ;;  %v9152_v48 = vor.u32 %v11815_v42, %v9149_v43  ;;  %v9156_v49 = vor.u32 %v11818_v46, %v9155_v45  ;;  %v9157_v50 = vld [vmem:[#allocation4 + $0xf8] sm:$0xf0]  ;;  %v9131_v51 = vld [vmem:[#allocation4 + $0xc0] sm:$0xf]  ;;  %423 = vmatpush.bf16.msra.mxu3 %v9176_v40 }
  0x26   :  { %v11813_v52 = vld [vmem:[#allocation4 + $0xcc] sm:$0xf0]  ;;  %v9160_v53 = vor.u32 %v11816_v47, %v9157_v50  ;;  %v11811_v54 = vld [vmem:[#allocation4 + $0xc4] sm:$0xf]  ;;  %v9133_v55 = vld [vmem:[#allocation4 + $0xd0] sm:$0xf0]  ;;  %367 = vmatpush.bf16.msra.mxu0 %v9148_v44 }
  0x27   :  { %v9139_v56 = vld [vmem:[#allocation4 + $0xc8] sm:$0xf]  ;;  %v11814_v57 = vld [vmem:[#allocation4 + $0xd4] sm:$0xf0]  ;;  %v11812_v58 = vld [vmem:[#allocation4 + $0xcc] sm:$0xf]  ;;  %v9132_v61 = vor.u32 %v11813_v52, %v9131_v51  ;;  %386 = vmatpush.bf16.msra.mxu1 %v9152_v48  ;;  %v9136_v63 = vor.u32 %v11811_v54, %v9133_v55 }
  0x28   :  { %v9141_v59 = vld [vmem:[#allocation4 + $0xd8] sm:$0xf0]  ;;  %v9115_v62 = vld [vmem:[#allocation4 + $0xa0] sm:$0xf]  ;;  %405 = vmatpush.bf16.msra.mxu2 %v9156_v49  ;;  %v9140_v0 = vor.u32 %v11814_v57, %v9139_v56  ;;  %v11809_v1 = vld [vmem:[#allocation4 + $0xac] sm:$0xf0] }
  0x29   :  { %v11807_v2 = vld [vmem:[#allocation4 + $0xa4] sm:$0xf]  ;;  %424 = vmatpush.bf16.msra.mxu3 %v9160_v53  ;;  %v9144_v3 = vor.u32 %v11812_v58, %v9141_v59  ;;  %v9117_v4 = vld [vmem:[#allocation4 + $0xb0] sm:$0xf0]  ;;  %v9123_v5 = vld [vmem:[#allocation4 + $0xa8] sm:$0xf]  ;;  %v9116_v9 = vor.u32 %v11809_v1, %v9115_v62 }
  0x2a   :  { %v11810_v6 = vld [vmem:[#allocation4 + $0xb4] sm:$0xf0]  ;;  %v11808_v7 = vld [vmem:[#allocation4 + $0xac] sm:$0xf]  ;;  %v9125_v8 = vld [vmem:[#allocation4 + $0xb8] sm:$0xf0]  ;;  %368 = vmatpush.bf16.msra.mxu0 %v9132_v61  ;;  %v9120_v10 = vor.u32 %v11807_v2, %v9117_v4 }
  0x2b   :  { %387 = vmatpush.bf16.msra.mxu1 %v9136_v63  ;;  %v9124_v11 = vor.u32 %v11810_v6, %v9123_v5  ;;  %v9128_v12 = vor.u32 %v11808_v7, %v9125_v8  ;;  %vm142_vm7 = vcmask 584769   ;;  %v9275_v13 = vld [vmem:[#allocation4 + $0x80] sm:$0xf]  ;;  %v11805_v14 = vld [vmem:[#allocation4 + $0x8c] sm:$0xf0]  ;;  %vm636_vm8 = vcmask 1042432  }
  0x2c   :  { %406 = vmatpush.bf16.msra.mxu2 %v9140_v0  ;;  %v11803_v15 = vld [vmem:[#allocation4 + $0x84] sm:$0xf]  ;;  %v9276_v17 = vor.u32 %v11805_v14, %v9275_v13  ;;  %v9277_v18 = vld [vmem:[#allocation4 + $0x90] sm:$0xf0]  ;;  %v9283_v19 = vld [vmem:[#allocation4 + $0x88] sm:$0xf] }
  0x2d   :  { %425 = vmatpush.bf16.msra.mxu3 %v9144_v3  ;;  %v11806_v20 = vld [vmem:[#allocation4 + $0x94] sm:$0xf0]  ;;  %v9280_v21 = vor.u32 %v11803_v15, %v9277_v18  ;;  %v11804_v23 = vld [vmem:[#allocation4 + $0x8c] sm:$0xf]  ;;  %v9285_v24 = vld [vmem:[#allocation4 + $0x98] sm:$0xf0] }
  0x2e   :  { %369 = vmatpush.bf16.msra.mxu0 %v9116_v9  ;;  %v9284_v22 = vor.u32 %v11806_v20, %v9283_v19  ;;  %v9288_v26 = vor.u32 %v11804_v23, %v9285_v24  ;;  %vm637_vm9 = vcmask 1046532   ;;  %v15547_v34 = vmov 0  ;;  %v9259_v50 = vld [vmem:[#allocation4 + $0x60] sm:$0xf]  ;;  %v11801_v51 = vld [vmem:[#allocation4 + $0x6c] sm:$0xf0] }
  0x2f   :  { %388 = vmatpush.bf16.msra.mxu1 %v9120_v10  ;;  %vm12733_vm10 = vmor %vm636_vm8, %vm637_vm9  ;;  %vm177_vm11 = vsmask.f32 3328  ;;  %vm178_vm12 = vsmask.f32 7440  ;;  %v9260_v52 = vor.u32 %v11801_v51, %v9259_v50  ;;  %v11799_v53 = vld [vmem:[#allocation4 + $0x64] sm:$0xf] }
  0x30   :  { %407 = vmatpush.bf16.msra.mxu2 %v9124_v11  ;;  %v15548_v34 = vsel %vm12733_vm10, 4294967295, %v15547_v34  ;;  %v9261_v54 = vld [vmem:[#allocation4 + $0x70] sm:$0xf0]  ;;  %v9267_v55 = vld [vmem:[#allocation4 + $0x68] sm:$0xf]  ;;  %vm355_vm13 = vcmask 654336   ;;  %vm12764_vm14 = vmor %vm177_vm11, %vm178_vm12 }
  0x31   :  { %426 = vmatpush.bf16.msra.mxu3 %v9128_v12  ;;  %15549 = vst [vmem:[#allocation17_spill] sm:$0xff] %v15548_v34  ;;  %v9264_v57 = vor.u32 %v11799_v53, %v9261_v54  ;;  %v11802_v58 = vld [vmem:[#allocation4 + $0x74] sm:$0xf0]  ;;  %v11800_v59 = vld [vmem:[#allocation4 + $0x6c] sm:$0xf]  ;;  %vm1160_vm4 = vcmask 1041408  }
  0x32   :  { %557 = vmatpush.bf16.msrb.mxu0 %v9276_v17  ;;  %v9268_v62 = vor.u32 %v11802_v58, %v9267_v55  ;;  %v9269_v63 = vld [vmem:[#allocation4 + $0x78] sm:$0xf0]  ;;  %v9243_v0 = vld [vmem:[#allocation4 + $0x40] sm:$0xf]  ;;  %v11797_v5 = vld [vmem:[#allocation4 + $0x4c] sm:$0xf0] }
  0x33   :  { %576 = vmatpush.bf16.msrb.mxu1 %v9280_v21  ;;  %v9272_v4 = vor.u32 %v11800_v59, %v9269_v63  ;;  %v11795_v6 = vld [vmem:[#allocation4 + $0x44] sm:$0xf]  ;;  %v9244_v8 = vor.u32 %v11797_v5, %v9243_v0  ;;  %v9245_v9 = vld [vmem:[#allocation4 + $0x50] sm:$0xf0]  ;;  %v9251_v10 = vld [vmem:[#allocation4 + $0x48] sm:$0xf] }
  0x34   :  { %595 = vmatpush.bf16.msrb.mxu2 %v9284_v22  ;;  %v11798_v15 = vld [vmem:[#allocation4 + $0x54] sm:$0xf0]  ;;  %v9248_v19 = vor.u32 %v11795_v6, %v9245_v9  ;;  %v11796_v21 = vld [vmem:[#allocation4 + $0x4c] sm:$0xf]  ;;  %v9253_v22 = vld [vmem:[#allocation4 + $0x58] sm:$0xf0] }
  0x35   :  { %614 = vmatpush.bf16.msrb.mxu3 %v9288_v26  ;;  %v9252_v20 = vor.u32 %v11798_v15, %v9251_v10  ;;  %v9256_v26 = vor.u32 %v11796_v21, %v9253_v22  ;;  %v11792_v51 = vld [vmem:[#allocation4 + $0x2c] sm:$0xf]  ;;  %v9211_v53 = vld [vmem:[#allocation4] sm:$0xf]  ;;  %v11787_v58 = vld [vmem:[#allocation4 + $0x4] sm:$0xf] }
  0x36   :  { %558 = vmatpush.bf16.msrb.mxu0 %v9260_v52  ;;  %v9237_v52 = vld [vmem:[#allocation4 + $0x38] sm:$0xf0]  ;;  %v9213_v59 = vld [vmem:[#allocation4 + $0x10] sm:$0xf0]  ;;  %v11788_v5 = vld [vmem:[#allocation4 + $0xc] sm:$0xf] }
  0x37   :  { %577 = vmatpush.bf16.msrb.mxu1 %v9264_v57  ;;  %v11789_v57 = vld [vmem:[#allocation4 + $0xc] sm:$0xf0]  ;;  %v9221_v6 = vld [vmem:[#allocation4 + $0x18] sm:$0xf0]  ;;  %v9216_v10 = vor.u32 %v11787_v58, %v9213_v59  ;;  %v11840_v58 = vld [vmem:[#allocation4 + $0x1ac] sm:$0xf] }
  0x38   :  { %596 = vmatpush.bf16.msrb.mxu2 %v9268_v62  ;;  %v11845_v21 = vld [vmem:[#allocation4 + $0x1cc] sm:$0xf0]  ;;  %v9359_v59 = vld [vmem:[#allocation4 + $0x1b8] sm:$0xf0]  ;;  %vm880_vm15 = vsmask.f32 2304 }
  0x39   :  { %615 = vmatpush.bf16.msrb.mxu3 %v9272_v4  ;;  %v11790_v4 = vld [vmem:[#allocation4 + $0x14] sm:$0xf0]  ;;  %vm881_vm0 = vsmask.f32 6416  ;;  %s12637_s0 = smov 32   ;;  %s9101_s25 = sshll.u32 %s15489_s9, 4  ;;  %s9102_s25 = int_to_ptr.hbm [resolvable:$true] %s9101_s25 }
  0x3a   :  { %559 = vmatpush.bf16.msrb.mxu0 %v9244_v8  ;;  %vm12848_vm3 = vmor %vm880_vm15, %vm881_vm0 }
  0x3b   :  { %578 = vmatpush.bf16.msrb.mxu1 %v9248_v19 }
  0x3c   :  { %597 = vmatpush.bf16.msrb.mxu2 %v9252_v20 }
  0x3d   :  { %616 = vmatpush.bf16.msrb.mxu3 %v9256_v26  ;;  %v11846_v26 = vld [vmem:[#allocation4 + $0x1d4] sm:$0xf0] }
  0x77   :  { %v133_v28 = vpop.permute.xlu2 %132 }
  0x78   :  { %149 = vst.msk [vmem:[#allocation2 + $0x10] sm:$0xf] %vm144_vm5, %v133_v28 }
  0x7f   :  { %v135_v60 = vpop.permute.xlu2 %134  ;;  %v12722_v27 = vld [vmem:[#allocation2 + $0x10] sm:$0xf] }
  0x80   :  { %150 = vst.msk [vmem:[#allocation2 + $0x14] sm:$0x1] %vm146_vm6, %v135_v60  ;;  %v648_v29 = vrot.slane %v12722_v27, 5  ;;  %v214_v30 = vshll.u32 %v12722_v27, 16  ;;  %v218_v31 = vshrl.u32 %v12722_v27, 16 }
  0x82   :  { %v650_v32 = vrot.slane %v648_v29, 4  ;;  %v915_v36 = vrot.slane %v218_v31, 5  ;;  %v916_v37 = vrot.slane %v214_v30, 6  ;;  %v12747_v45 = vrot.slane %v214_v30, 5  ;;  %v9227_v30 = vld [vmem:[#allocation4 + $0x20] sm:$0xf] }
  0x83   :  { %v12749_v46 = vrot.slane %v218_v31, 4  ;;  %v11793_v31 = vld [vmem:[#allocation4 + $0x2c] sm:$0xf0] }
  0x84   :  { %v12742_v43 = vor.u32 %v916_v37, %v915_v36  ;;  %v9228_v36 = vor.u32 %v11793_v31, %v9227_v30  ;;  %v11791_v37 = vld [vmem:[#allocation4 + $0x24] sm:$0xf] }
  0x85   :  { %v221_v55 = vor.u32 %v12749_v46, %v12747_v45 }
  0x86   :  { %560 = vmatpush.bf16.msrb.mxu0 %v9228_v36 }
  0x87   :  { %v12724_v28 = vld [vmem:[#allocation2 + $0x14] sm:$0x1] }
  0x88   :  { %v651_v33 = vrot.slane %v12724_v28, 5  ;;  %v224_v0 = vshll.u32 %v12724_v28, 16 }
  0x8a   :  { %v12739_v35 = vsel %vm12733_vm10, %v650_v32, %v651_v33 }
  0x8b   :  { %v125_v16 = vpop.permute.xlu0 %124  ;;  %v677_v20 = vunpack.c.l.b16 %v12739_v35 }
  0x8c   :  { %143 = vst.msk [vmem:[#allocation2] sm:$0xe] %vm142_vm7, %v125_v16  ;;  %v15550_v16 = vmov 0 }
  0x8d   :  { %v129_v25 = vpop.permute.xlu1 %128  ;;  %v15551_v16 = vsel %vm12764_vm14, 4294967295, %v15550_v16 }
  0x8e   :  { %147 = vst.msk [vmem:[#allocation2 + $0x8] sm:$0x1] %vm146_vm6, %v129_v25 }
  0x8f   :  { %15552 = vst [vmem:[#allocation18_spill] sm:$0xff] %v15551_v16 }
  0x93   :  { %v127_v38 = vpop.permute.xlu0 %126  ;;  %v151_v39 = vld [vmem:[#allocation2] sm:$0xf] }
  0x94   :  { %145 = vst.msk [vmem:[#allocation2 + $0x4] sm:$0xf] %vm144_vm5, %v127_v38  ;;  %v181_v40 = vshrl.u32 %v151_v39, 16  ;;  %v184_v41 = vshll.u32 %v151_v39, 16  ;;  %v12751_v47 = vld [vmem:[#allocation2] sm:$0xe] }
  0x95   :  { %v131_v42 = vpop.permute.xlu1 %130  ;;  %v12745_v44 = vld [vmem:[#allocation2 + $0x8] sm:$0x1]  ;;  %v9297_v60 = vrot.slane %v12751_v47, 9  ;;  %v9229_v38 = vld [vmem:[#allocation4 + $0x30] sm:$0xf0]  ;;  %vm1161_vm5 = vcmask 1045508  }
  0x96   :  { %148 = vst.msk [vmem:[#allocation2 + $0xc] sm:$0xe] %vm142_vm7, %v131_v42  ;;  %v183_v48 = vrot.slane %v181_v40, 4  ;;  %v186_v49 = vrot.slane %v184_v41, 5  ;;  %v200_v56 = vshll.u32 %v12745_v44, 16  ;;  %v644_v13 = vrot.slane %v12745_v44, 5  ;;  %vm12883_vm6 = vmor %vm1160_vm4, %vm1161_vm5 }
  0x97   :  { %v9232_v41 = vor.u32 %v11791_v37, %v9229_v38  ;;  %v9235_v42 = vld [vmem:[#allocation4 + $0x28] sm:$0xf]  ;;  %v9365_v44 = vld [vmem:[#allocation4 + $0x1c0] sm:$0xf]  ;;  %v11844_v37 = vld [vmem:[#allocation4 + $0x1cc] sm:$0xf] }
  0x98   :  { %v187_v1 = vor.u32 %v186_v49, %v183_v48  ;;  %v202_v17 = vrot.slane %v200_v56, 5  ;;  %v11794_v48 = vld [vmem:[#allocation4 + $0x34] sm:$0xf0]  ;;  %v9240_v56 = vor.u32 %v11792_v51, %v9237_v52  ;;  %v9375_v38 = vld [vmem:[#allocation4 + $0x1d8] sm:$0xf0] }
  0x99   :  { %v9236_v50 = vor.u32 %v11794_v48, %v9235_v42  ;;  %579 = vmatpush.bf16.msrb.mxu1 %v9232_v41  ;;  %v11841_v51 = vld [vmem:[#allocation4 + $0x1ac] sm:$0xf0]  ;;  %v11839_v52 = vld [vmem:[#allocation4 + $0x1a4] sm:$0xf] }
  0x9a   :  { %v188_v23 = vrot.slane %v187_v1, 4  ;;  %v9212_v1 = vor.u32 %v11789_v57, %v9211_v53  ;;  %617 = vmatpush.bf16.msrb.mxu3 %v9240_v56 }
  0x9b   :  { %v12755_v61 = vld [vmem:[#allocation2 + $0x4] sm:$0xf]  ;;  %598 = vmatpush.bf16.msrb.mxu2 %v9236_v50  ;;  %v9349_v50 = vld [vmem:[#allocation4 + $0x1a0] sm:$0xf] }
  0x9c   :  { %v190_v2 = vshll.u32 %v12755_v61, 16  ;;  %v194_v3 = vshrl.u32 %v12755_v61, 16  ;;  %v641_v49 = vrot.slane %v12755_v61, 5  ;;  %561 = vmatpush.bf16.msrb.mxu0 %v9212_v1  ;;  %v9350_v53 = vor.u32 %v11841_v51, %v9349_v50  ;;  %v11835_v1 = vld [vmem:[#allocation4 + $0x184] sm:$0xf] }
  0x9d   :  { %v153_v7 = vld [vmem:[#allocation2 + $0xc] sm:$0xf]  ;;  %580 = vmatpush.bf16.msrb.mxu1 %v9216_v10  ;;  %v11833_v10 = vld [vmem:[#allocation4 + $0x16c] sm:$0xf0]  ;;  %v9461_v50 = vld [vmem:[#allocation4 + $0x268] sm:$0xf] }
  0x9e   :  { %v192_v11 = vrot.slane %v190_v2, 5  ;;  %v196_v12 = vrot.slane %v194_v3, 4  ;;  %v205_v14 = vshrl.u32 %v153_v7, 16  ;;  %v208_v18 = vshll.u32 %v153_v7, 16  ;;  %v11866_v51 = vld [vmem:[#allocation4 + $0x274] sm:$0xf0] }
  0x9f   :  { %v893_v25 = vrot.slane %v190_v2, 6  ;;  %v9219_v2 = vld [vmem:[#allocation4 + $0x8] sm:$0xf]  ;;  %v642_v46 = vsel %vm12733_vm10, %v9297_v60, %v641_v49  ;;  %v643_v7 = vrot.slane %v641_v49, 4  ;;  %v892_v8 = vrot.slane %v194_v3, 5 }
  0xa0   :  { %v197_v24 = vor.u32 %v196_v12, %v192_v11  ;;  %v12768_v32 = vrot.slane %v205_v14, 4  ;;  %v12770_v33 = vrot.slane %v208_v18, 5  ;;  %v193_v39 = vsel %vm12764_vm14, %v188_v23, %v192_v11  ;;  %v12788_v12 = vld [vmem:[#allocation2 + $0xc] sm:$0xe] }
  0xa1   :  { %v249_v62 = vunpack.c.l.b16 %v193_v39  ;;  %v9220_v11 = vor.u32 %v11790_v4, %v9219_v2  ;;  %v9224_v14 = vor.u32 %v11788_v5, %v9221_v6  ;;  %v645_v15 = vsel %vm12733_vm10, %v643_v7, %v644_v13  ;;  %v11843_v13 = vld [vmem:[#allocation4 + $0x1c4] sm:$0xf]  ;;  %v9335_v2 = vld [vmem:[#allocation4 + $0x190] sm:$0xf0]  ;;  %v9341_v6 = vld [vmem:[#allocation4 + $0x188] sm:$0xf] }
  0xa2   :  { %v198_v40 = vrot.slane %v197_v24, 4  ;;  %v211_v28 = vor.u32 %v12770_v33, %v12768_v32  ;;  %v9298_v60 = vrot.slane %v12788_v12, 9  ;;  %v222_v3 = vrot.slane %v221_v55, 4  ;;  %v9367_v24 = vld [vmem:[#allocation4 + $0x1d0] sm:$0xf0] }
  0xa3   :  { %v674_v18 = vunpack.c.l.b16 %v642_v46  ;;  %v675_v19 = vunpack.c.l.b16 %v645_v15  ;;  %599 = vmatpush.bf16.msrb.mxu2 %v9220_v11  ;;  %v9366_v23 = vor.u32 %v11845_v21, %v9365_v44  ;;  %v226_v32 = vrot.slane %v224_v0, 5  ;;  %618 = vmatpush.bf16.msrb.mxu3 %v9224_v14  ;;  %v11842_v55 = vld [vmem:[#allocation4 + $0x1b4] sm:$0xf0]  ;;  %v11837_v0 = vld [vmem:[#allocation4 + $0x18c] sm:$0xf0] }
  0xa4   :  { %v203_v54 = vsel %vm12764_vm14, %v198_v40, %v202_v17  ;;  %v12795_v17 = vor.u32 %v893_v25, %v892_v8  ;;  %v649_v22 = vsel %vm12733_vm10, %v9298_v60, %v648_v29  ;;  %v9373_v25 = vld [vmem:[#allocation4 + $0x1c8] sm:$0xf]  ;;  %v212_v31 = vrot.slane %v211_v28, 4  ;;  %v11838_v46 = vld [vmem:[#allocation4 + $0x194] sm:$0xf0] }
  0xa5   :  { %v250_v63 = vunpack.c.l.b16 %v203_v54  ;;  %v12806_v30 = vpack.c.b16 %v675_v19, %v674_v18  ;;  %v676_v35 = vunpack.c.l.b16 %v649_v22  ;;  %v9370_v33 = vor.u32 %v11843_v13, %v9367_v24  ;;  %v9351_v54 = vld [vmem:[#allocation4 + $0x1b0] sm:$0xf0]  ;;  %v11836_v7 = vld [vmem:[#allocation4 + $0x18c] sm:$0xf]  ;;  %v9317_v28 = vld [vmem:[#allocation4 + $0x160] sm:$0xf] }
  0xa6   :  { %v9374_v36 = vor.u32 %v11846_v26, %v9373_v25  ;;  %v9378_v39 = vor.u32 %v11844_v37, %v9375_v38  ;;  %v217_v29 = vsel %vm12764_vm14, %v212_v31, %v12747_v45  ;;  %v227_v41 = vsel %vm12764_vm14, %v222_v3, %v226_v32  ;;  %v9357_v45 = vld [vmem:[#allocation4 + $0x1a8] sm:$0xf]  ;;  %v11831_v14 = vld [vmem:[#allocation4 + $0x164] sm:$0xf]  ;;  %v9319_v15 = vld [vmem:[#allocation4 + $0x170] sm:$0xf0] }
  0xa7   :  { %v253_v9 = vpack.c.b16 %v250_v63, %v249_v62  ;;  %v12808_v40 = vpack.c.b16 %v677_v20, %v676_v35  ;;  %v251_v42 = vunpack.c.l.b16 %v217_v29  ;;  %v252_v48 = vunpack.c.l.b16 %v227_v41  ;;  %v9333_v62 = vld [vmem:[#allocation4 + $0x180] sm:$0xf]  ;;  %v9325_v60 = vld [vmem:[#allocation4 + $0x168] sm:$0xf]  ;;  %v11834_v18 = vld [vmem:[#allocation4 + $0x174] sm:$0xf0] }
  0xa8   :  { %v9354_v56 = vor.u32 %v11839_v52, %v9351_v54  ;;  %v9358_v57 = vor.u32 %v11842_v55, %v9357_v45  ;;  %v9362_v63 = vor.u32 %v11840_v58, %v9359_v59  ;;  %v9334_v4 = vor.u32 %v11837_v0, %v9333_v62  ;;  %v11832_v19 = vld [vmem:[#allocation4 + $0x16c] sm:$0xf]  ;;  %v9327_v20 = vld [vmem:[#allocation4 + $0x178] sm:$0xf0]  ;;  %v9301_v22 = vld [vmem:[#allocation4 + $0x140] sm:$0xf] }
  0xa9   :  { %9193 = vmatmul.msk.bf16.vlgmr.msra.gmra.mxu0 %vm355_vm13, %v253_v9  ;;  %9195 = vmatmul.msk.bf16.vlgmr.msra.gmra.mxu1 %vm355_vm13, %v253_v9  ;;  %v254_v49 = vpack.c.b16 %v252_v48, %v251_v42  ;;  %v9338_v5 = vor.u32 %v11835_v1, %v9335_v2  ;;  %v9342_v8 = vor.u32 %v11838_v46, %v9341_v6  ;;  %v11827_v24 = vld [vmem:[#allocation4 + $0x144] sm:$0xf]  ;;  %v9303_v25 = vld [vmem:[#allocation4 + $0x150] sm:$0xf0]  ;;  %v9309_v26 = vld [vmem:[#allocation4 + $0x148] sm:$0xf] }
  0xaa   :  { %9197 = vmatmul.msk.bf16.vlgmr.msra.gmra.mxu2 %vm355_vm13, %v253_v9  ;;  %9199 = vmatmul.msk.bf16.vlgmr.msra.gmra.mxu3 %vm355_vm13, %v253_v9  ;;  %v9343_v9 = vld [vmem:[#allocation4 + $0x198] sm:$0xf0]  ;;  %v9318_v3 = vor.u32 %v11833_v10, %v9317_v28  ;;  %v9322_v44 = vor.u32 %v11831_v14, %v9319_v15  ;;  %v9326_v21 = vor.u32 %v11834_v18, %v9325_v60  ;;  %v11830_v35 = vld [vmem:[#allocation4 + $0x154] sm:$0xf0]  ;;  %v11828_v31 = vld [vmem:[#allocation4 + $0x14c] sm:$0xf] }
  0xab   :  { %789 = vmatpush.bf16.msra.mxu0 %v9366_v23  ;;  %808 = vmatpush.bf16.msra.mxu1 %v9370_v33  ;;  %v9346_v11 = vor.u32 %v11836_v7, %v9343_v9  ;;  %v9330_v13 = vor.u32 %v11832_v19, %v9327_v20  ;;  %v11829_v23 = vld [vmem:[#allocation4 + $0x14c] sm:$0xf0]  ;;  %v9311_v32 = vld [vmem:[#allocation4 + $0x158] sm:$0xf0]  ;;  %v9306_v37 = vor.u32 %v11827_v24, %v9303_v25  ;;  %v9453_v29 = vld [vmem:[#allocation4 + $0x260] sm:$0xf] }
  0xac   :  { %827 = vmatpush.bf16.msra.mxu2 %v9374_v36  ;;  %846 = vmatpush.bf16.msra.mxu3 %v9378_v39  ;;  %v11785_v33 = vld [vmem:[#allocation2] sm:$0xff]  ;;  %v9302_v36 = vor.u32 %v11829_v23, %v9301_v22  ;;  %v9310_v38 = vor.u32 %v11830_v35, %v9309_v26  ;;  %v9314_v39 = vor.u32 %v11828_v31, %v9311_v32  ;;  %v11865_v41 = vld [vmem:[#allocation4 + $0x26c] sm:$0xf0]  ;;  %v11863_v42 = vld [vmem:[#allocation4 + $0x264] sm:$0xf] }
  0xad   :  { %v9454_v48 = vor.u32 %v11865_v41, %v9453_v29  ;;  %v11864_v54 = vld [vmem:[#allocation4 + $0x26c] sm:$0xf]  ;;  %v9463_v45 = vld [vmem:[#allocation4 + $0x278] sm:$0xf0]  ;;  %v11861_v58 = vld [vmem:[#allocation4 + $0x24c] sm:$0xf0] }
  0xae   :  { %v9466_v55 = vor.u32 %v11864_v54, %v9463_v45  ;;  %v11859_v59 = vld [vmem:[#allocation4 + $0x244] sm:$0xf]  ;;  %v9445_v0 = vld [vmem:[#allocation4 + $0x248] sm:$0xf]  ;;  %v11862_v1 = vld [vmem:[#allocation4 + $0x254] sm:$0xf0] }
  0xaf   :  { %790 = vmatpush.bf16.msra.mxu0 %v9350_v53  ;;  %809 = vmatpush.bf16.msra.mxu1 %v9354_v56  ;;  %v9462_v53 = vor.u32 %v11866_v51, %v9461_v50  ;;  %v11786_v56 = vld [vmem:[#allocation2 + $0xc] sm:$0xff]  ;;  %v9447_v6 = vld [vmem:[#allocation4 + $0x258] sm:$0xf0]  ;;  %v9421_v46 = vld [vmem:[#allocation4 + $0x220] sm:$0xf] }
  0xb0   :  { %828 = vmatpush.bf16.msra.mxu2 %v9358_v57  ;;  %847 = vmatpush.bf16.msra.mxu3 %v9362_v63  ;;  %v9437_v57 = vld [vmem:[#allocation4 + $0x240] sm:$0xf]  ;;  %v9439_v63 = vld [vmem:[#allocation4 + $0x250] sm:$0xf0]  ;;  %v11855_v9 = vld [vmem:[#allocation4 + $0x224] sm:$0xf] }
  0xb1   :  { %v9438_v62 = vor.u32 %v11861_v58, %v9437_v57  ;;  %v9442_v2 = vor.u32 %v11859_v59, %v9439_v63  ;;  %v9423_v28 = vld [vmem:[#allocation4 + $0x230] sm:$0xf0]  ;;  %v9429_v14 = vld [vmem:[#allocation4 + $0x228] sm:$0xf]  ;;  %v11858_v15 = vld [vmem:[#allocation4 + $0x234] sm:$0xf0] }
  0xb2   :  { %v11856_v60 = vld [vmem:[#allocation4 + $0x22c] sm:$0xf]  ;;  %v9431_v18 = vld [vmem:[#allocation4 + $0x238] sm:$0xf0]  ;;  %v9405_v19 = vld [vmem:[#allocation4 + $0x200] sm:$0xf] }
  0xb3   :  { %791 = vmatpush.bf16.msra.mxu0 %v9334_v4  ;;  %810 = vmatpush.bf16.msra.mxu1 %v9338_v5  ;;  %v9446_v4 = vor.u32 %v11862_v1, %v9445_v0  ;;  %v11860_v5 = vld [vmem:[#allocation4 + $0x24c] sm:$0xf]  ;;  %v11853_v20 = vld [vmem:[#allocation4 + $0x20c] sm:$0xf0]  ;;  %v9413_v22 = vld [vmem:[#allocation4 + $0x208] sm:$0xf] }
  0xb4   :  { %829 = vmatpush.bf16.msra.mxu2 %v9342_v8  ;;  %848 = vmatpush.bf16.msra.mxu3 %v9346_v11  ;;  %v9450_v7 = vor.u32 %v11860_v5, %v9447_v6  ;;  %v11857_v8 = vld [vmem:[#allocation4 + $0x22c] sm:$0xf0]  ;;  %v9426_v11 = vor.u32 %v11855_v9, %v9423_v28  ;;  %v9406_v23 = vor.u32 %v11853_v20, %v9405_v19  ;;  %v11854_v24 = vld [vmem:[#allocation4 + $0x214] sm:$0xf0]  ;;  %v11852_v25 = vld [vmem:[#allocation4 + $0x20c] sm:$0xf] }
  0xb5   :  { %v9422_v10 = vor.u32 %v11857_v8, %v9421_v46  ;;  %v9415_v26 = vld [vmem:[#allocation4 + $0x218] sm:$0xf0]  ;;  %v9414_v31 = vor.u32 %v11854_v24, %v9413_v22  ;;  %v11850_v29 = vld [vmem:[#allocation4 + $0x1f4] sm:$0xf0]  ;;  %v11848_v41 = vld [vmem:[#allocation4 + $0x1ec] sm:$0xf] }
  0xb6   :  { %v9418_v32 = vor.u32 %v11852_v25, %v9415_v26  ;;  %v11883_v54 = vld [vmem:[#allocation4 + $0x304] sm:$0xf]  ;;  %v11886_v57 = vld [vmem:[#allocation4 + $0x314] sm:$0xf0]  ;;  %v9553_v63 = vld [vmem:[#allocation4 + $0x318] sm:$0xf0] }
  0xb7   :  { %792 = vmatpush.bf16.msra.mxu0 %v9318_v3  ;;  %811 = vmatpush.bf16.msra.mxu1 %v9322_v44  ;;  %v9430_v3 = vor.u32 %v11858_v15, %v9429_v14  ;;  %v9434_v44 = vor.u32 %v11856_v60, %v9431_v18  ;;  %v884_v0 = vshrl.u32 %v12751_v47, 16  ;;  %v887_v1 = vshll.u32 %v12751_v47, 16  ;;  %v12841_v8 = vld [vmem:[#allocation2 + $0x14] sm:$0x3]  ;;  %v11881_v18 = vld [vmem:[#allocation4 + $0x2ec] sm:$0xf0] }
  0xb8   :  { %830 = vmatpush.bf16.msra.mxu2 %v9326_v21  ;;  %849 = vmatpush.bf16.msra.mxu3 %v9330_v13  ;;  %v11851_v21 = vld [vmem:[#allocation4 + $0x204] sm:$0xf]  ;;  %v9407_v13 = vld [vmem:[#allocation4 + $0x210] sm:$0xf0]  ;;  %v921_v28 = vshrl.u32 %v12841_v8, 16  ;;  %v896_v14 = vrot.slane %v12795_v17, 4 }
  0xb9   :  { %9194 = vmatmul.msk.bf16.gmra.mxu0 %vm355_vm13, %v254_v49  ;;  %9196 = vmatmul.msk.bf16.gmra.mxu1 %vm355_vm13, %v254_v49  ;;  %v9410_v35 = vor.u32 %v11851_v21, %v9407_v13  ;;  %v889_v5 = vrot.slane %v887_v1, 6  ;;  %v907_v15 = vshrl.u32 %v12788_v12, 16  ;;  %v910_v60 = vshll.u32 %v12788_v12, 16  ;;  %v11879_v19 = vld [vmem:[#allocation4 + $0x2e4] sm:$0xf] }
  0xba   :  { %9198 = vmatmul.msk.bf16.gmra.mxu2 %vm355_vm13, %v254_v49  ;;  %9200 = vmatmul.msk.bf16.gmra.mxu3 %vm355_vm13, %v254_v49  ;;  %v9455_v49 = vld [vmem:[#allocation4 + $0x270] sm:$0xf0]  ;;  %v9535_v21 = vld [vmem:[#allocation4 + $0x2e8] sm:$0xf]  ;;  %v11882_v13 = vld [vmem:[#allocation4 + $0x2f4] sm:$0xf0] }
  0xbb   :  { %793 = vmatpush.bf16.msra.mxu0 %v9302_v36  ;;  %812 = vmatpush.bf16.msra.mxu1 %v9306_v37  ;;  %v9458_v52 = vor.u32 %v11863_v42, %v9455_v49  ;;  %v11849_v36 = vld [vmem:[#allocation4 + $0x1ec] sm:$0xf0]  ;;  %v11847_v37 = vld [vmem:[#allocation4 + $0x1e4] sm:$0xf]  ;;  %v9399_v42 = vld [vmem:[#allocation4 + $0x1f8] sm:$0xf0]  ;;  %v9536_v24 = vor.u32 %v11882_v13, %v9535_v21 }
  0xbc   :  { %831 = vmatpush.bf16.msra.mxu2 %v9310_v38  ;;  %850 = vmatpush.bf16.msra.mxu3 %v9314_v39  ;;  %v9391_v38 = vld [vmem:[#allocation4 + $0x1f0] sm:$0xf0]  ;;  %v9397_v39 = vld [vmem:[#allocation4 + $0x1e8] sm:$0xf]  ;;  %v9402_v51 = vor.u32 %v11848_v41, %v9399_v42  ;;  %v11880_v25 = vld [vmem:[#allocation4 + $0x2ec] sm:$0xf] }
  0xbd   :  { %v9394_v49 = vor.u32 %v11847_v37, %v9391_v38  ;;  %v9398_v50 = vor.u32 %v11850_v29, %v9397_v39  ;;  %v9537_v26 = vld [vmem:[#allocation4 + $0x2f8] sm:$0xf0]  ;;  %v9519_v37 = vld [vmem:[#allocation4 + $0x2c8] sm:$0xf]  ;;  %v11878_v38 = vld [vmem:[#allocation4 + $0x2d4] sm:$0xf0] }
  0xbe   :  { %v9540_v12 = vor.u32 %v11880_v25, %v9537_v26  ;;  %v11876_v39 = vld [vmem:[#allocation4 + $0x2cc] sm:$0xf]  ;;  %v9520_v29 = vor.u32 %v11878_v38, %v9519_v37  ;;  %v9521_v41 = vld [vmem:[#allocation4 + $0x2d8] sm:$0xf0]  ;;  %v9495_v42 = vld [vmem:[#allocation4 + $0x2a0] sm:$0xf] }
  0xbf   :  { %v912_v1 = vrot.slane %v910_v60, 6  ;;  %v919_v21 = vrot.slane %v12742_v43, 4 }
  0xc9   :  { %9289 = vmatmul.msk.bf16.vlgmr.msrb.gmra.mxu0 %vm355_vm13, %v11785_v33  ;;  %9291 = vmatmul.msk.bf16.vlgmr.msrb.gmra.mxu1 %vm355_vm13, %v11785_v33 }
  0xca   :  { %9293 = vmatmul.msk.bf16.vlgmr.msrb.gmra.mxu2 %vm355_vm13, %v11785_v33  ;;  %9295 = vmatmul.msk.bf16.vlgmr.msrb.gmra.mxu3 %vm355_vm13, %v11785_v33  ;;  %v9389_v33 = vld [vmem:[#allocation4 + $0x1e0] sm:$0xf] }
  0xcb   :  { %1065 = vmatpush.bf16.msrb.mxu0 %v9454_v48  ;;  %1084 = vmatpush.bf16.msrb.mxu1 %v9458_v52  ;;  %v9390_v48 = vor.u32 %v11849_v36, %v9389_v33  ;;  %v9543_v52 = vld [vmem:[#allocation4 + $0x300] sm:$0xf]  ;;  %v9513_v33 = vld [vmem:[#allocation4 + $0x2d0] sm:$0xf0] }
  0xcc   :  { %1103 = vmatpush.bf16.msrb.mxu2 %v9462_v53  ;;  %1122 = vmatpush.bf16.msrb.mxu3 %v9466_v55  ;;  %v11885_v53 = vld [vmem:[#allocation4 + $0x30c] sm:$0xf0]  ;;  %v9545_v55 = vld [vmem:[#allocation4 + $0x310] sm:$0xf0] }
  0xcd   :  { %v9544_v45 = vor.u32 %v11885_v53, %v9543_v52  ;;  %v9548_v58 = vor.u32 %v11883_v54, %v9545_v55  ;;  %v9497_v52 = vld [vmem:[#allocation4 + $0x2b0] sm:$0xf0]  ;;  %v9503_v53 = vld [vmem:[#allocation4 + $0x2a8] sm:$0xf]  ;;  %v11872_v55 = vld [vmem:[#allocation4 + $0x2ac] sm:$0xf] }
  0xcf   :  { %1066 = vmatpush.bf16.msrb.mxu0 %v9438_v62  ;;  %1085 = vmatpush.bf16.msrb.mxu1 %v9442_v2  ;;  %v11884_v62 = vld [vmem:[#allocation4 + $0x30c] sm:$0xf]  ;;  %v12837_v2 = vld [vmem:[#allocation2 + $0x8] sm:$0x3] }
  0xd0   :  { %1104 = vmatpush.bf16.msrb.mxu2 %v9446_v4  ;;  %1123 = vmatpush.bf16.msrb.mxu3 %v9450_v7  ;;  %v886_v4 = vrot.slane %v884_v0, 5  ;;  %v898_v6 = vshrl.u32 %v12837_v2, 16  ;;  %v901_v46 = vshll.u32 %v12837_v2, 16  ;;  %v909_v0 = vrot.slane %v907_v15, 5 }
  0xd2   :  { %v890_v7 = vor.u32 %v889_v5, %v886_v4  ;;  %v900_v9 = vrot.slane %v898_v6, 5  ;;  %v903_v47 = vrot.slane %v901_v46, 6  ;;  %v923_v5 = vrot.slane %v921_v28, 5  ;;  %v9479_v6 = vld [vmem:[#allocation4 + $0x280] sm:$0xf] }
  0xd3   :  { %1067 = vmatpush.bf16.msrb.mxu0 %v9422_v10  ;;  %1086 = vmatpush.bf16.msrb.mxu1 %v9426_v11  ;;  %v15553_v10 = vmov 0  ;;  %v11869_v46 = vld [vmem:[#allocation4 + $0x28c] sm:$0xf0] }
  0xd4   :  { %1105 = vmatpush.bf16.msrb.mxu2 %v9430_v3  ;;  %1124 = vmatpush.bf16.msrb.mxu3 %v9434_v44  ;;  %v15554_v10 = vsel %vm12848_vm3, 4294967295, %v15553_v10  ;;  %v891_v11 = vrot.slane %v890_v7, 4  ;;  %v9527_v3 = vld [vmem:[#allocation4 + $0x2e0] sm:$0xf]  ;;  %v9529_v44 = vld [vmem:[#allocation4 + $0x2f0] sm:$0xf0]  ;;  %v904_v22 = vor.u32 %v903_v47, %v900_v9  ;;  %v9480_v9 = vor.u32 %v11869_v46, %v9479_v6 }
  0xd5   :  { %15555 = vst [vmem:[#allocation19_spill] sm:$0xff] %v15554_v10  ;;  %v9528_v20 = vor.u32 %v11881_v18, %v9527_v3  ;;  %v11867_v7 = vld [vmem:[#allocation4 + $0x284] sm:$0xf]  ;;  %v9481_v47 = vld [vmem:[#allocation4 + $0x290] sm:$0xf0]  ;;  %v913_v3 = vor.u32 %v912_v1, %v909_v0 }
  0xd6   :  { %v9484_v15 = vor.u32 %v11867_v7, %v9481_v47 }
  0xd7   :  { %1068 = vmatpush.bf16.msrb.mxu0 %v9406_v23  ;;  %1087 = vmatpush.bf16.msrb.mxu1 %v9410_v35  ;;  %v9532_v23 = vor.u32 %v11879_v19, %v9529_v44  ;;  %v9511_v35 = vld [vmem:[#allocation4 + $0x2c0] sm:$0xf]  ;;  %v11868_v19 = vld [vmem:[#allocation4 + $0x28c] sm:$0xf]  ;;  %v914_v44 = vrot.slane %v913_v3, 4 }
  0xd8   :  { %1106 = vmatpush.bf16.msrb.mxu2 %v9414_v31  ;;  %1125 = vmatpush.bf16.msrb.mxu3 %v9418_v32  ;;  %v11877_v31 = vld [vmem:[#allocation4 + $0x2cc] sm:$0xf0]  ;;  %v11875_v32 = vld [vmem:[#allocation4 + $0x2c4] sm:$0xf] }
  0xd9   :  { %9290 = vmatmul.msk.bf16.gmra.mxu0 %vm355_vm13, %v11786_v56  ;;  %9292 = vmatmul.msk.bf16.gmra.mxu1 %vm355_vm13, %v11786_v56  ;;  %v9516_v36 = vor.u32 %v11875_v32, %v9513_v33  ;;  %v15556_v32 = vmov 0 }
  0xda   :  { %9294 = vmatmul.msk.bf16.gmra.mxu2 %vm355_vm13, %v11786_v56  ;;  %9296 = vmatmul.msk.bf16.gmra.mxu3 %vm355_vm13, %v11786_v56  ;;  %v9551_v56 = vld [vmem:[#allocation4 + $0x308] sm:$0xf]  ;;  %v15557_v32 = vsel %vm12883_vm6, 4294967295, %v15556_v32 }
  0xdb   :  { %1069 = vmatpush.bf16.msrb.mxu0 %v9390_v48  ;;  %1088 = vmatpush.bf16.msrb.mxu1 %v9394_v49  ;;  %v9552_v59 = vor.u32 %v11886_v57, %v9551_v56  ;;  %v11873_v48 = vld [vmem:[#allocation4 + $0x2ac] sm:$0xf0]  ;;  %v905_v49 = vsel %vm12848_vm3, %v896_v14, %v904_v22  ;;  %v9505_v56 = vld [vmem:[#allocation4 + $0x2b8] sm:$0xf0]  ;;  %v895_v57 = vsel %vm12848_vm3, %v891_v11, %v12795_v17  ;;  %v9487_v11 = vld [vmem:[#allocation4 + $0x288] sm:$0xf] }
  0xdc   :  { %1107 = vmatpush.bf16.msrb.mxu2 %v9398_v50  ;;  %1126 = vmatpush.bf16.msrb.mxu3 %v9402_v51  ;;  %v9524_v50 = vor.u32 %v11876_v39, %v9521_v41  ;;  %v11871_v51 = vld [vmem:[#allocation4 + $0x2a4] sm:$0xf]  ;;  %v9496_v54 = vor.u32 %v11873_v48, %v9495_v42  ;;  %v950_v4 = vunpack.c.l.b16 %v895_v57  ;;  %v11870_v14 = vld [vmem:[#allocation4 + $0x294] sm:$0xf0]  ;;  %v918_v22 = vsel %vm12848_vm3, %v914_v44, %v12742_v43 }
  0xdd   :  { %v9488_v60 = vor.u32 %v11870_v14, %v9487_v11  ;;  %v1168_v43 = vrot.slane %v12837_v2, 6  ;;  %15558 = vst [vmem:[#allocation20_spill] sm:$0xff] %v15557_v32  ;;  %v1172_v2 = vrot.slane %v12722_v27, 6  ;;  %v1155_v41 = vld [vmem:[#allocation2 + $0xc] sm:$0xc] }
  0xde   :  { %v9476_v42 = vrot.slane %v1155_v41, 10 }
  0xdf   :  { %v1174_v48 = vrot.slane %v1172_v2, 4 }
  0xe0   :  { %v1173_v27 = vsel %vm12883_vm6, %v9476_v42, %v1172_v2 }
  0xe9   :  { %9379 = vmatmul.msk.bf16.vlgmr.msra.gmra.mxu0 %vm355_vm13, %v12806_v30  ;;  %9381 = vmatmul.msk.bf16.vlgmr.msra.gmra.mxu1 %vm355_vm13, %v12806_v30 }
  0xea   :  { %9383 = vmatmul.msk.bf16.vlgmr.msra.gmra.mxu2 %vm355_vm13, %v12806_v30  ;;  %9385 = vmatmul.msk.bf16.vlgmr.msra.gmra.mxu3 %vm355_vm13, %v12806_v30  ;;  %v9556_v30 = vor.u32 %v11884_v62, %v9553_v63  ;;  %v951_v62 = vunpack.c.l.b16 %v905_v49  ;;  %v9508_v63 = vor.u32 %v11872_v55, %v9505_v56  ;;  %v1175_v49 = vrot.slane %v12841_v8, 6 }
  0xeb   :  { %1313 = vmatpush.bf16.msra.mxu0 %v9544_v45  ;;  %1332 = vmatpush.bf16.msra.mxu1 %v9548_v58  ;;  %v11874_v45 = vld [vmem:[#allocation4 + $0x2b4] sm:$0xf0]  ;;  %v9500_v58 = vor.u32 %v11871_v51, %v9497_v52 }
  0xec   :  { %1351 = vmatpush.bf16.msra.mxu2 %v9552_v59  ;;  %1370 = vmatpush.bf16.msra.mxu3 %v9556_v30  ;;  %v9504_v59 = vor.u32 %v11874_v45, %v9503_v53  ;;  %v924_v30 = vshll.u32 %v12841_v8, 16  ;;  %v954_v17 = vpack.c.b16 %v951_v62, %v950_v4  ;;  %v1200_v45 = vunpack.c.l.b16 %v1173_v27 }
  0xee   :  { %v926_v18 = vrot.slane %v924_v30, 6 }
  0xef   :  { %1314 = vmatpush.bf16.msra.mxu0 %v9528_v20  ;;  %1333 = vmatpush.bf16.msra.mxu1 %v9532_v23  ;;  %v9489_v20 = vld [vmem:[#allocation4 + $0x298] sm:$0xf0] }
  0xf0   :  { %1352 = vmatpush.bf16.msra.mxu2 %v9536_v24  ;;  %1371 = vmatpush.bf16.msra.mxu3 %v9540_v12  ;;  %v9492_v28 = vor.u32 %v11868_v19, %v9489_v20  ;;  %v927_v13 = vor.u32 %v926_v18, %v923_v5  ;;  %v952_v24 = vunpack.c.l.b16 %v918_v22 }
  0xf2   :  { %v928_v23 = vsel %vm12848_vm3, %v919_v21, %v927_v13 }
  0xf3   :  { %1334 = vmatpush.bf16.msra.mxu1 %v9516_v36  ;;  %v953_v25 = vunpack.c.l.b16 %v928_v23 }
  0xf4   :  { %1353 = vmatpush.bf16.msra.mxu2 %v9520_v29  ;;  %1372 = vmatpush.bf16.msra.mxu3 %v9524_v50 }
  0xf5   :  { %v955_v26 = vpack.c.b16 %v953_v25, %v952_v24 }
  0xf7   :  { %1335 = vmatpush.bf16.msra.mxu1 %v9500_v58 }
  0xf8   :  { %1354 = vmatpush.bf16.msra.mxu2 %v9504_v59  ;;  %1373 = vmatpush.bf16.msra.mxu3 %v9508_v63 }
  0xf9   :  { %9380 = vmatmul.msk.bf16.gmra.mxu0 %vm355_vm13, %v12808_v40  ;;  %9382 = vmatmul.msk.bf16.gmra.mxu1 %vm355_vm13, %v12808_v40 }
  0xfa   :  { %9384 = vmatmul.msk.bf16.gmra.mxu2 %vm355_vm13, %v12808_v40  ;;  %9386 = vmatmul.msk.bf16.gmra.mxu3 %vm355_vm13, %v12808_v40  ;;  %v9512_v40 = vor.u32 %v11877_v31, %v9511_v35  ;;  %v1165_v35 = vrot.slane %v12755_v61, 6  ;;  %v1154_v31 = vld [vmem:[#allocation2] sm:$0xc] }
  0xfb   :  { %1336 = vmatpush.bf16.msra.mxu1 %v9484_v15  ;;  %v9475_v61 = vrot.slane %v1154_v31, 10 }
  0xfc   :  { %1315 = vmatpush.bf16.msra.mxu0 %v9512_v40  ;;  %1355 = vmatpush.bf16.msra.mxu2 %v9488_v60  ;;  %v1167_v12 = vrot.slane %v1165_v35, 4 }
  0xfd   :  { %1374 = vmatpush.bf16.msra.mxu3 %v9492_v28  ;;  %v1166_v40 = vsel %vm12883_vm6, %v9475_v61, %v1165_v35 }
  0xfe   :  { %v1169_v33 = vsel %vm12883_vm6, %v1167_v12, %v1168_v43  ;;  %v1198_v37 = vunpack.c.l.b16 %v1166_v40 }
  0xff   :  { %v1199_v36 = vunpack.c.l.b16 %v1169_v33 }
 0x100   :  { %1316 = vmatpush.bf16.msra.mxu0 %v9496_v54  ;;  %v1176_v54 = vsel %vm12883_vm6, %v1174_v48, %v1175_v49 }
 0x101   :  { %v1202_v29 = vpack.c.b16 %v1199_v36, %v1198_v37  ;;  %v1201_v55 = vunpack.c.l.b16 %v1176_v54 }
 0x103   :  { %v1203_v59 = vpack.c.b16 %v1201_v55, %v1200_v45 }
 0x104   :  { %1317 = vmatpush.bf16.msra.mxu0 %v9480_v9 }
 0x109   :  { %9467 = vmatmul.msk.bf16.vlgmr.msrb.gmra.mxu0 %vm355_vm13, %v954_v17  ;;  %9469 = vmatmul.msk.bf16.vlgmr.msrb.gmra.mxu1 %vm355_vm13, %v954_v17 }
 0x10a   :  { %9471 = vmatmul.msk.bf16.vlgmr.msrb.gmra.mxu2 %vm355_vm13, %v954_v17  ;;  %9473 = vmatmul.msk.bf16.vlgmr.msrb.gmra.mxu3 %vm355_vm13, %v954_v17 }
 0x119   :  { %9468 = vmatmul.msk.bf16.gmra.mxu0 %vm355_vm13, %v955_v26  ;;  %9470 = vmatmul.msk.bf16.gmra.mxu1 %vm355_vm13, %v955_v26 }
 0x11a   :  { %9472 = vmatmul.msk.bf16.gmra.mxu2 %vm355_vm13, %v955_v26  ;;  %9474 = vmatmul.msk.bf16.gmra.mxu3 %vm355_vm13, %v955_v26 }
 0x126   :  { %v371_v38 = vpop.f32.mrf.mxu0  ;;  %v390_v39 = vpop.f32.mrf.mxu1 }
 0x129   :  { %9557 = vmatmul.msk.bf16.vlgmr.msra.gmra.mxu0 %vm355_vm13, %v1202_v29  ;;  %9559 = vmatmul.msk.bf16.vlgmr.msra.gmra.mxu1 %vm355_vm13, %v1202_v29 }
 0x12a   :  { %9561 = vmatmul.msk.bf16.vlgmr.msra.gmra.mxu2 %vm355_vm13, %v1202_v29  ;;  %9563 = vmatmul.msk.bf16.vlgmr.msra.gmra.mxu3 %vm355_vm13, %v1202_v29 }
 0x12d   :  { %v409_v50 = vpop.f32.mrf.mxu2  ;;  %v428_v51 = vpop.f32.mrf.mxu3 }
 0x12e   :  { %v12897_v52 = vpop.f32.mrf.mxu0  ;;  %v12899_v53 = vpop.f32.mrf.mxu1 }
 0x135   :  { %v12905_v56 = vpop.f32.mrf.mxu2  ;;  %v12907_v57 = vpop.f32.mrf.mxu3 }
 0x136   :  { %v376_v58 = vpop.f32.mrf.mxu0  ;;  %v395_v8 = vpop.f32.mrf.mxu1 }
 0x139   :  { %9558 = vmatmul.msk.bf16.gmra.mxu0 %vm355_vm13, %v1203_v59  ;;  %9560 = vmatmul.msk.bf16.gmra.mxu1 %vm355_vm13, %v1203_v59 }
 0x13a   :  { %9562 = vmatmul.msk.bf16.gmra.mxu2 %vm355_vm13, %v1203_v59  ;;  %9564 = vmatmul.msk.bf16.gmra.mxu3 %vm355_vm13, %v1203_v59 }
 0x13d   :  { %v414_v62 = vpop.f32.mrf.mxu2  ;;  %v433_v63 = vpop.f32.mrf.mxu3 }
 0x13e   :  { %v12913_v0 = vpop.f32.mrf.mxu0  ;;  %v12915_v1 = vpop.f32.mrf.mxu1 }
 0x145   :  { %v12917_v30 = vpop.f32.mrf.mxu2  ;;  %v12919_v4 = vpop.f32.mrf.mxu3 }
 0x146   :  { %v563_v5 = vpop.f32.mrf.mxu0  ;;  %v582_v6 = vpop.f32.mrf.mxu1 }
 0x147   :  { %v564_v46 = vadd.f32 %v563_v5, %v371_v38  ;;  %v583_v7 = vadd.f32 %v582_v6, %v390_v39 }
 0x14d   :  { %v601_v17 = vpop.f32.mrf.mxu2  ;;  %v620_v9 = vpop.f32.mrf.mxu3 }
 0x14e   :  { %v602_v47 = vadd.f32 %v601_v17, %v409_v50  ;;  %v621_v11 = vadd.f32 %v620_v9, %v428_v51  ;;  %v565_v14 = vpop.f32.mrf.mxu0  ;;  %v584_v3 = vpop.f32.mrf.mxu1 }
 0x155   :  { %v12921_v18 = vpop.f32.mrf.mxu2  ;;  %v12923_v15 = vpop.f32.mrf.mxu3 }
 0x156   :  { %v568_v60 = vpop.f32.mrf.mxu0  ;;  %v587_v19 = vpop.f32.mrf.mxu1 }
 0x157   :  { %v569_v20 = vadd.f32 %v568_v60, %v376_v58  ;;  %v588_v28 = vadd.f32 %v587_v19, %v395_v8 }
 0x15d   :  { %v606_v44 = vpop.f32.mrf.mxu2  ;;  %v625_v21 = vpop.f32.mrf.mxu3 }
 0x15e   :  { %v607_v13 = vadd.f32 %v606_v44, %v414_v62  ;;  %v626_v22 = vadd.f32 %v625_v21, %v433_v63  ;;  %v570_v23 = vpop.f32.mrf.mxu0  ;;  %v589_v24 = vpop.f32.mrf.mxu1 }
 0x165   :  { %v12925_v25 = vpop.f32.mrf.mxu2  ;;  %v12927_v26 = vpop.f32.mrf.mxu3 }
 0x166   :  { %v795_v35 = vpop.f32.mrf.mxu0  ;;  %v814_v12 = vpop.f32.mrf.mxu1 }
 0x167   :  { %v862_v43 = vadd.f32 %v795_v35, %v564_v46  ;;  %v863_v31 = vadd.f32 %v814_v12, %v583_v7 }
 0x16d   :  { %v833_v61 = vpop.f32.mrf.mxu2  ;;  %v852_v33 = vpop.f32.mrf.mxu3 }
 0x16e   :  { %v12929_v40 = vadd.f32 %v833_v61, %v602_v47  ;;  %v12931_v36 = vadd.f32 %v852_v33, %v621_v11  ;;  %v797_v37 = vpop.f32.mrf.mxu0  ;;  %v816_v38 = vpop.f32.mrf.mxu1  ;;  %v566_v61 = vadd.f32 %v565_v14, %v12897_v52  ;;  %v585_v33 = vadd.f32 %v584_v3, %v12899_v53 }
 0x16f   :  { %v604_v53 = vadd.f32 %v12921_v18, %v12905_v56  ;;  %v623_v14 = vadd.f32 %v12923_v15, %v12907_v57 }
 0x170   :  { %15559 = vst [vmem:[#allocation21_spill] sm:$0xff] %v12931_v36 }
 0x175   :  { %v12933_v39 = vpop.f32.mrf.mxu2  ;;  %v12935_v29 = vpop.f32.mrf.mxu3 }
 0x176   :  { %v800_v2 = vpop.f32.mrf.mxu0  ;;  %v819_v41 = vpop.f32.mrf.mxu1  ;;  %v868_v56 = vadd.f32 %v12933_v39, %v604_v53  ;;  %v869_v57 = vadd.f32 %v12935_v29, %v623_v14 }
 0x177   :  { %v870_v42 = vadd.f32 %v800_v2, %v569_v20  ;;  %v871_v48 = vadd.f32 %v819_v41, %v588_v28  ;;  %v866_v2 = vadd.f32 %v797_v37, %v566_v61  ;;  %v867_v41 = vadd.f32 %v816_v38, %v585_v33 }
 0x17d   :  { %v838_v49 = vpop.f32.mrf.mxu2  ;;  %v857_v50 = vpop.f32.mrf.mxu3 }
 0x17e   :  { %v12937_v51 = vadd.f32 %v838_v49, %v607_v13  ;;  %v12939_v27 = vadd.f32 %v857_v50, %v626_v22  ;;  %v802_v54 = vpop.f32.mrf.mxu0  ;;  %v821_v45 = vpop.f32.mrf.mxu1 }
 0x180   :  { %15560 = vst [vmem:[#allocation22_spill] sm:$0xff] %v12937_v51 }
 0x181   :  { %15561 = vst [vmem:[#allocation23_spill] sm:$0xff] %v12939_v27 }
 0x185   :  { %v12941_v55 = vpop.f32.mrf.mxu2  ;;  %v12943_v58 = vpop.f32.mrf.mxu3 }
 0x186   :  { %15562 = vst [vmem:[#allocation24_spill] sm:$0xff] %v12941_v55  ;;  %v1071_v8 = vpop.f32.mrf.mxu0  ;;  %v1090_v59 = vpop.f32.mrf.mxu1 }
 0x187   :  { %15563 = vst [vmem:[#allocation25_spill] sm:$0xff] %v12943_v58  ;;  %v1138_v58 = vadd.f32 %v1071_v8, %v862_v43  ;;  %v1139_v55 = vadd.f32 %v1090_v59, %v863_v31 }
 0x18d   :  { %v1109_v62 = vpop.f32.mrf.mxu2  ;;  %v1128_v63 = vpop.f32.mrf.mxu3  ;;  %v15569_v59 = vld [vmem:[#allocation24_spill] sm:$0xff] }
 0x18e   :  { %v1073_v5 = vpop.f32.mrf.mxu0  ;;  %v1092_v6 = vpop.f32.mrf.mxu1  ;;  %v1140_v31 = vadd.f32 %v1109_v62, %v12929_v40 }
 0x18f   :  { %v1142_v34 = vadd.f32 %v1073_v5, %v866_v2  ;;  %v1143_v16 = vadd.f32 %v1092_v6, %v867_v41 }
 0x195   :  { %v1111_v46 = vpop.f32.mrf.mxu2  ;;  %v1130_v7 = vpop.f32.mrf.mxu3 }
 0x196   :  { %v1076_v17 = vpop.f32.mrf.mxu0  ;;  %v1095_v9 = vpop.f32.mrf.mxu1 }
 0x197   :  { %v1146_v27 = vadd.f32 %v1076_v17, %v870_v42  ;;  %v1147_v51 = vadd.f32 %v1095_v9, %v871_v48  ;;  %v1144_v42 = vadd.f32 %v1111_v46, %v868_v56 }
 0x19d   :  { %v1114_v47 = vpop.f32.mrf.mxu2  ;;  %v1133_v11 = vpop.f32.mrf.mxu3 }
 0x19e   :  { %v1078_v60 = vpop.f32.mrf.mxu0  ;;  %v1097_v19 = vpop.f32.mrf.mxu1 }
 0x1a5   :  { %v12945_v20 = vpop.f32.mrf.mxu2  ;;  %v12947_v28 = vpop.f32.mrf.mxu3 }
 0x1a6   :  { %15564 = vst [vmem:[#allocation26_spill] sm:$0xff] %v12945_v20  ;;  %v1319_v44 = vpop.f32.mrf.mxu0  ;;  %v1338_v21 = vpop.f32.mrf.mxu1  ;;  %v590_v20 = vadd.f32 %v589_v24, %v12915_v1 }
 0x1a7   :  { %15565 = vst [vmem:[#allocation27_spill] sm:$0xff] %v12947_v28  ;;  %v571_v28 = vadd.f32 %v570_v23, %v12913_v0  ;;  %v12961_v38 = vadd.f32 %v1319_v44, %v1138_v58  ;;  %v12963_v0 = vadd.f32 %v1338_v21, %v1139_v55  ;;  %v15568_v55 = vld [vmem:[#allocation23_spill] sm:$0xff] }
 0x1a8   :  { %v875_v37 = vadd.f32 %v821_v45, %v590_v20  ;;  %v1149_v58 = vadd.f32 %v1133_v11, %v15568_v55 }
 0x1a9   :  { %v874_v3 = vadd.f32 %v802_v54, %v571_v28  ;;  %v15567_v54 = vld [vmem:[#allocation22_spill] sm:$0xff] }
 0x1aa   :  { %v1151_v15 = vadd.f32 %v1097_v19, %v875_v37  ;;  %v1148_v45 = vadd.f32 %v1114_v47, %v15567_v54 }
 0x1ab   :  { %v1150_v18 = vadd.f32 %v1078_v60, %v874_v3 }
 0x1ad   :  { %v1357_v13 = vpop.f32.mrf.mxu2  ;;  %v1376_v22 = vpop.f32.mrf.mxu3  ;;  %v15571_v19 = vld [vmem:[#allocation26_spill] sm:$0xff] }
 0x1ae   :  { %v1321_v35 = vpop.f32.mrf.mxu0  ;;  %v1340_v12 = vpop.f32.mrf.mxu1  ;;  %v15572_v28 = vld [vmem:[#allocation27_spill] sm:$0xff] }
 0x1af   :  { %v12953_v36 = vadd.f32 %v1321_v35, %v1142_v34  ;;  %v12955_v52 = vadd.f32 %v1340_v12, %v1143_v16  ;;  %v609_v34 = vadd.f32 %v12925_v25, %v12917_v30  ;;  %v628_v16 = vadd.f32 %v12927_v26, %v12919_v4  ;;  %v15566_v30 = vld [vmem:[#allocation21_spill] sm:$0xff] }
 0x1b0   :  { %v1141_v25 = vadd.f32 %v1128_v63, %v15566_v30  ;;  %v1145_v4 = vadd.f32 %v1130_v7, %v869_v57  ;;  %v15570_v63 = vld [vmem:[#allocation25_spill] sm:$0xff]  ;;  %v12997_v7 = vadd.f32 %v1357_v13, %v1140_v31 }
 0x1b1   :  { %v1402_v24 = vadd.f32 %v12953_v36, %v12961_v38  ;;  %v876_v62 = vadd.f32 %v15569_v59, %v609_v34  ;;  %v877_v5 = vadd.f32 %v15570_v63, %v628_v16 }
 0x1b2   :  { %v12999_v17 = vadd.f32 %v1376_v22, %v1141_v25 }
 0x1b3   :  { %v1152_v20 = vadd.f32 %v15571_v19, %v876_v62  ;;  %v1153_v44 = vadd.f32 %v15572_v28, %v877_v5 }
 0x1b5   :  { %v1359_v49 = vpop.f32.mrf.mxu2  ;;  %v1378_v50 = vpop.f32.mrf.mxu3 }
 0x1b6   :  { %v1324_v32 = vpop.f32.mrf.mxu0  ;;  %v1343_v10 = vpop.f32.mrf.mxu1  ;;  %v12989_v8 = vadd.f32 %v1359_v49, %v1144_v42  ;;  %v12991_v40 = vadd.f32 %v1378_v50, %v1145_v4 }
 0x1b7   :  { %v12965_v1 = vadd.f32 %v1324_v32, %v1146_v27  ;;  %v12967_v23 = vadd.f32 %v1343_v10, %v1147_v51  ;;  %v1411_v32 = vadd.f32 %v12955_v52, %v12963_v0 }
 0x1b8   :  { %v1420_v21 = vadd.f32 %v12989_v8, %v12997_v7  ;;  %v1429_v35 = vadd.f32 %v12991_v40, %v12999_v17 }
 0x1b9   :  { %v1403_v29 = vadd.f32 %v1402_v24, %v12965_v1  ;;  %v1412_v48 = vadd.f32 %v1411_v32, %v12967_v23 }
 0x1bd   :  { %v1362_v10 = vpop.f32.mrf.mxu2  ;;  %v1381_v43 = vpop.f32.mrf.mxu3 }
 0x1be   :  { %v1326_v26 = vpop.f32.mrf.mxu0  ;;  %v1345_v39 = vpop.f32.mrf.mxu1  ;;  %v13001_v9 = vadd.f32 %v1362_v10, %v1148_v45  ;;  %v13003_v47 = vadd.f32 %v1381_v43, %v1149_v58 }
 0x1bf   :  { %v12983_v51 = vadd.f32 %v1326_v26, %v1150_v18  ;;  %v12985_v27 = vadd.f32 %v1345_v39, %v1151_v15 }
 0x1c0   :  { %v1421_v33 = vadd.f32 %v1420_v21, %v13001_v9  ;;  %v1430_v2 = vadd.f32 %v1429_v35, %v13003_v47 }
 0x1c1   :  { %v1404_v6 = vadd.f32 %v1403_v29, %v12983_v51  ;;  %v1413_v46 = vadd.f32 %v1412_v48, %v12985_v27  ;;  %v1446_v29 = vlaneseq }
 0x1c3   :  { %v1405_v11 = vrot.slane %v1404_v6, 4  ;;  %v1414_v60 = vrot.slane %v1413_v46, 4  ;;  %v13023_v48 = vand.u32 127, %v1446_v29 }
 0x1c5   :  { %v1406_v13 = vadd.f32 %v1405_v11, %v1404_v6  ;;  %v1415_v12 = vadd.f32 %v1414_v60, %v1413_v46  ;;  %v1364_v22 = vpop.f32.mrf.mxu2  ;;  %v1383_v61 = vpop.f32.mrf.mxu3  ;;  %15573 = vst [vmem:[#allocation21_spill] sm:$0xff] %v13023_v48  ;;  %vm1448_vm7 = vcmp.lt.s32.totalorder %v13023_v48, 32  ;;  %vm1465_vm8 = vcmp.lt.s32.totalorder %v13023_v48, 64 }
 0x1c6   :  { %v13013_v41 = vadd.f32 %v1364_v22, %v1152_v20  ;;  %v13015_v49 = vadd.f32 %v1383_v61, %v1153_v44 }
 0x1c7   :  { %v1407_v50 = vrot.slane %v1406_v13, 2  ;;  %v1416_v53 = vrot.slane %v1415_v12, 2 }
 0x1c8   :  { %v1422_v14 = vadd.f32 %v1421_v33, %v13013_v41  ;;  %v1431_v3 = vadd.f32 %v1430_v2, %v13015_v49 }
 0x1c9   :  { %v1417_v37 = vadd.f32 %v1416_v53, %v1415_v12  ;;  %v1408_v34 = vadd.f32 %v1407_v50, %v1406_v13 }
 0x1ca   :  { %v1423_v16 = vrot.slane %v1422_v14, 4  ;;  %v1432_v56 = vrot.slane %v1431_v3, 4 }
 0x1cb   :  { %v1418_v57 = vrot.slane %v1417_v37, 1  ;;  %v1409_v18 = vrot.slane %v1408_v34, 1 }
 0x1cc   :  { %v1424_v15 = vadd.f32 %v1423_v16, %v1422_v14  ;;  %v1433_v24 = vadd.f32 %v1432_v56, %v1431_v3 }
 0x1cd   :  { %v1419_v32 = vadd.f32 %v1418_v57, %v1417_v37  ;;  %v1410_v10 = vadd.f32 %v1409_v18, %v1408_v34 }
 0x1ce   :  { %v1425_v43 = vrot.slane %v1424_v15, 2  ;;  %v1434_v31 = vrot.slane %v1433_v24, 2 }
 0x1cf   :  { %1440 = vrot.lane.b32.xlu1 %v1419_v32, %s12637_s0  ;;  %1438 = vrot.lane.b32.xlu0 %v1410_v10, %s12637_s0 }
 0x1d0   :  { %v1426_v30 = vadd.f32 %v1425_v43, %v1424_v15  ;;  %v1435_v25 = vadd.f32 %v1434_v31, %v1433_v24 }
 0x1d2   :  { %v1427_v42 = vrot.slane %v1426_v30, 1  ;;  %v1436_v4 = vrot.slane %v1435_v25, 1 }
 0x1d4   :  { %v1428_v26 = vadd.f32 %v1427_v42, %v1426_v30  ;;  %v1437_v39 = vadd.f32 %v1436_v4, %v1435_v25 }
 0x1d6   :  { %1442 = vrot.lane.b32.xlu2 %v1428_v26, %s12637_s0 }
 0x1d7   :  { %1444 = vrot.lane.b32.xlu0 %v1437_v39, %s12637_s0 }
 0x230   :  { %v1443_v54 = vpop.permute.xlu2 %1442 }
 0x241   :  { %v1441_v45 = vpop.permute.xlu1 %1440  ;;  %v1439_v55 = vpop.permute.xlu0 %1438 }
 0x242   :  { %v1450_v58 = vsel %vm1448_vm7, %v1441_v45, %v1443_v54  ;;  %v1451_v59 = vsel %vm1448_vm7, %v1439_v55, %v1441_v45 }
 0x243   :  { %v1455_v62 = vadd.f32 %v1450_v58, %v1428_v26  ;;  %v1454_v63 = vadd.f32 %v1451_v59, %v1419_v32 }
 0x245   :  { %1461 = vrot.lane.b32.xlu0 %v1455_v62, %s12632_s27  ;;  %1459 = vrot.lane.b32.xlu2 %v1454_v63, %s12632_s27 }
 0x249   :  { %v1445_v5 = vpop.permute.xlu0 %1444 }
 0x24a   :  { %v1452_v6 = vsel %vm1448_vm7, %v1445_v5, %v1439_v55  ;;  %v1449_v11 = vsel %vm1448_vm7, %v1443_v54, %v1445_v5 }
 0x24b   :  { %v1453_v46 = vadd.f32 %v1452_v6, %v1410_v10  ;;  %v1456_v60 = vadd.f32 %v1449_v11, %v1437_v39 }
 0x24d   :  { %1457 = vrot.lane.b32.xlu1 %v1453_v46, %s12632_s27 }
 0x255   :  { %1463 = vrot.lane.b32.xlu1 %v1456_v60, %s12632_s27 }
 0x29f   :  { %v1460_v20 = vpop.permute.xlu2 %1459 }
 0x2b7   :  { %v1462_v28 = vpop.permute.xlu0 %1461 }
 0x2b8   :  { %v1467_v21 = vsel %vm1465_vm8, %v1460_v20, %v1462_v28 }
 0x2b9   :  { %v1472_v61 = vadd.f32 %v1467_v21, %v1455_v62 }
 0x2bf   :  { %v1458_v19 = vpop.permute.xlu1 %1457 }
 0x2c0   :  { %v1468_v44 = vsel %vm1465_vm8, %v1458_v19, %v1460_v20 }
 0x2c1   :  { %v1471_v35 = vadd.f32 %v1468_v44, %v1454_v63 }
 0x2c3   :  { %v1476_v50 = vadd.f32 %v1472_v61, %v1471_v35 }
 0x2c7   :  { %v1464_v13 = vpop.permute.xlu1 %1463 }
 0x2c8   :  { %v1466_v12 = vsel %vm1465_vm8, %v1462_v28, %v1464_v13  ;;  %v1469_v22 = vsel %vm1465_vm8, %v1464_v13, %v1458_v19 }
 0x2c9   :  { %v1470_v33 = vadd.f32 %v1469_v22, %v1453_v46  ;;  %v1473_v2 = vadd.f32 %v1466_v12, %v1456_v60 }
 0x2cb   :  { %v1474_v53 = vadd.f32 %v1473_v2, %v1470_v33  ;;  %v1475_v14 = vadd.f32 %v1471_v35, %v1470_v33  ;;  %v1477_v3 = vadd.f32 %v1473_v2, %v1472_v61 }
 0x2cd   :  { %v1478_v37 = vadd.f32 %v1476_v50, %v1474_v53  ;;  %v1479_v34 = vadd.f32 %v1477_v3, %v1475_v14 }
 0x2cf   :  { %v1480_v16 = vmul.f32 0.001953125, %v1478_v37  ;;  %v1481_v56 = vmul.f32 0.001953125, %v1479_v34 }
 0x2d1   :  { %v1482_v57 = vperm.slane %v1480_v16, 0  ;;  %v1483_v18 = vperm.slane %v1481_v56, 0 }
 0x2d3   :  { %v13048_v15 = vsub.f32 %v12963_v0, %v1483_v18  ;;  %v13051_v24 = vsub.f32 %v12955_v52, %v1483_v18  ;;  %v13054_v32 = vsub.f32 %v12967_v23, %v1483_v18  ;;  %v13057_v10 = vsub.f32 %v12985_v27, %v1483_v18 }
 0x2d4   :  { %v13060_v43 = vsub.f32 %v12997_v7, %v1482_v57  ;;  %v13063_v31 = vsub.f32 %v12989_v8, %v1482_v57  ;;  %v13066_v30 = vsub.f32 %v13001_v9, %v1482_v57  ;;  %v13075_v27 = vsub.f32 %v13013_v41, %v1482_v57 }
 0x2d5   :  { %v1501_v0 = vmul.f32 %v13048_v15, %v13048_v15  ;;  %v1505_v52 = vmul.f32 %v13051_v24, %v13051_v24  ;;  %v1509_v23 = vmul.f32 %v13054_v32, %v13054_v32  ;;  %v1513_v7 = vmul.f32 %v13057_v10, %v13057_v10 }
 0x2d6   :  { %v1502_v8 = vmul.f32 %v13060_v43, %v13060_v43  ;;  %v1506_v9 = vmul.f32 %v13063_v31, %v13063_v31  ;;  %v1510_v25 = vmul.f32 %v13066_v30, %v13066_v30  ;;  %v13086_v4 = vsub.f32 %v12961_v38, %v1482_v57 }
 0x2d7   :  { %v1525_v42 = vadd.f32 %v1505_v52, %v1501_v0  ;;  %v13089_v26 = vsub.f32 %v12953_v36, %v1482_v57  ;;  %v13092_v41 = vsub.f32 %v12965_v1, %v1482_v57  ;;  %v13095_v29 = vsub.f32 %v12983_v51, %v1482_v57 }
 0x2d8   :  { %v1534_v39 = vadd.f32 %v1506_v9, %v1502_v8  ;;  %v13098_v54 = vsub.f32 %v12999_v17, %v1483_v18  ;;  %v13101_v45 = vsub.f32 %v12991_v40, %v1483_v18  ;;  %v1514_v38 = vmul.f32 %v13075_v27, %v13075_v27 }
 0x2d9   :  { %v1526_v55 = vadd.f32 %v1525_v42, %v1509_v23  ;;  %v1500_v36 = vmul.f32 %v13086_v4, %v13086_v4  ;;  %v1504_v1 = vmul.f32 %v13089_v26, %v13089_v26  ;;  %v1508_v51 = vmul.f32 %v13092_v41, %v13092_v41 }
 0x2da   :  { %v1535_v58 = vadd.f32 %v1534_v39, %v1510_v25  ;;  %v13112_v17 = vsub.f32 %v13003_v47, %v1483_v18  ;;  %v13115_v40 = vsub.f32 %v13015_v49, %v1483_v18  ;;  %v1503_v63 = vmul.f32 %v13098_v54, %v13098_v54 }
 0x2db   :  { %v1527_v59 = vadd.f32 %v1526_v55, %v1513_v7  ;;  %v1516_v62 = vadd.f32 %v1504_v1, %v1500_v36  ;;  %v1507_v5 = vmul.f32 %v13101_v45, %v13101_v45  ;;  %v1512_v46 = vmul.f32 %v13095_v29, %v13095_v29 }
 0x2dc   :  { %v1536_v6 = vadd.f32 %v1535_v58, %v1514_v38  ;;  %v1511_v47 = vmul.f32 %v13112_v17, %v13112_v17  ;;  %v1515_v44 = vmul.f32 %v13115_v40, %v13115_v40 }
 0x2dd   :  { %v1528_v11 = vrot.slane %v1527_v59, 4  ;;  %v1517_v60 = vadd.f32 %v1516_v62, %v1508_v51  ;;  %v1543_v19 = vadd.f32 %v1507_v5, %v1503_v63 }
 0x2de   :  { %v1537_v49 = vrot.slane %v1536_v6, 4 }
 0x2df   :  { %v1529_v20 = vadd.f32 %v1528_v11, %v1527_v59  ;;  %v1518_v28 = vadd.f32 %v1517_v60, %v1512_v46  ;;  %v1544_v21 = vadd.f32 %v1543_v19, %v1511_v47 }
 0x2e0   :  { %v1538_v35 = vadd.f32 %v1537_v49, %v1536_v6 }
 0x2e1   :  { %v1530_v13 = vrot.slane %v1529_v20, 2  ;;  %v1519_v12 = vrot.slane %v1518_v28, 4  ;;  %v1545_v22 = vadd.f32 %v1544_v21, %v1515_v44 }
 0x2e2   :  { %v1539_v61 = vrot.slane %v1538_v35, 2 }
 0x2e3   :  { %v1531_v33 = vadd.f32 %v1530_v13, %v1529_v20  ;;  %v1520_v2 = vadd.f32 %v1519_v12, %v1518_v28  ;;  %v1546_v50 = vrot.slane %v1545_v22, 4 }
 0x2e4   :  { %v1540_v53 = vadd.f32 %v1539_v61, %v1538_v35 }
 0x2e5   :  { %v1532_v14 = vrot.slane %v1531_v33, 1  ;;  %v1521_v3 = vrot.slane %v1520_v2, 2  ;;  %v1547_v37 = vadd.f32 %v1546_v50, %v1545_v22 }
 0x2e6   :  { %v1541_v34 = vrot.slane %v1540_v53, 1 }
 0x2e7   :  { %v1533_v16 = vadd.f32 %v1532_v14, %v1531_v33  ;;  %v1522_v56 = vadd.f32 %v1521_v3, %v1520_v2  ;;  %v1548_v57 = vrot.slane %v1547_v37, 2 }
 0x2e8   :  { %v1542_v18 = vadd.f32 %v1541_v34, %v1540_v53 }
 0x2e9   :  { %1554 = vrot.lane.b32.xlu0 %v1533_v16, %s12637_s0  ;;  %v1523_v0 = vrot.slane %v1522_v56, 1  ;;  %v1549_v23 = vadd.f32 %v1548_v57, %v1547_v37 }
 0x2ea   :  { %1556 = vrot.lane.b32.xlu1 %v1542_v18, %s12637_s0 }
 0x2eb   :  { %v1524_v52 = vadd.f32 %v1523_v0, %v1522_v56  ;;  %v1550_v7 = vrot.slane %v1549_v23, 1 }
 0x2ed   :  { %1552 = vrot.lane.b32.xlu2 %v1524_v52, %s12637_s0  ;;  %v1551_v8 = vadd.f32 %v1550_v7, %v1549_v23 }
 0x2f5   :  { %1558 = vrot.lane.b32.xlu2 %v1551_v8, %s12637_s0 }
 0x347   :  { %v1553_v9 = vpop.permute.xlu2 %1552 }
 0x34f   :  { %v1559_v25 = vpop.permute.xlu2 %1558 }
 0x350   :  { %v1563_v42 = vsel %vm1448_vm7, %v1559_v25, %v1553_v9 }
 0x351   :  { %v1564_v39 = vadd.f32 %v1563_v42, %v1524_v52 }
 0x353   :  { %1568 = vrot.lane.b32.xlu0 %v1564_v39, %s12632_s27 }
 0x35b   :  { %v1555_v55 = vpop.permute.xlu0 %1554 }
 0x35c   :  { %v1562_v38 = vsel %vm1448_vm7, %v1553_v9, %v1555_v55  ;;  %v1557_v36 = vpop.permute.xlu1 %1556 }
 0x35d   :  { %v1560_v1 = vsel %vm1448_vm7, %v1557_v36, %v1559_v25  ;;  %v1561_v58 = vsel %vm1448_vm7, %v1555_v55, %v1557_v36  ;;  %v1565_v51 = vadd.f32 %v1562_v38, %v1533_v16  ;;  %vm1622_vm7 = vcmask 1042434   ;;  %v1592_v55 = vld [vmem:[%s15482_s2] sm:$0xf]  ;;  %s12639_s2 = smov 96  }
 0x35e   :  { %v1566_v59 = vadd.f32 %v1561_v58, %v1542_v18  ;;  %v1567_v62 = vadd.f32 %v1560_v1, %v1551_v8  ;;  %v1653_v1 = vld [vmem:[%s15483_s3] sm:$0xf] }
 0x35f   :  { %1570 = vrot.lane.b32.xlu1 %v1565_v51, %s12632_s27 }
 0x360   :  { %1572 = vrot.lane.b32.xlu2 %v1566_v59, %s12632_s27  ;;  %1574 = vrot.lane.b32.xlu0 %v1567_v62, %s12632_s27 }
 0x3ba   :  { %v1573_v5 = vpop.permute.xlu2 %1572 }
 0x3c5   :  { %v1569_v63 = vpop.permute.xlu0 %1568 }
 0x3d1   :  { %v1571_v6 = vpop.permute.xlu1 %1570 }
 0x3d2   :  { %v1577_v46 = vsel %vm1465_vm8, %v1571_v6, %v1573_v5  ;;  %v1578_v11 = vsel %vm1465_vm8, %v1569_v63, %v1571_v6  ;;  %v1575_v60 = vpop.permute.xlu0 %1574 }
 0x3d3   :  { %v1581_v47 = vadd.f32 %v1578_v11, %v1565_v51  ;;  %v1582_v19 = vadd.f32 %v1577_v46, %v1566_v59  ;;  %v1576_v49 = vsel %vm1465_vm8, %v1573_v5, %v1575_v60  ;;  %v1579_v20 = vsel %vm1465_vm8, %v1575_v60, %v1569_v63 }
 0x3d4   :  { %v1580_v28 = vadd.f32 %v1579_v20, %v1564_v39  ;;  %v1583_v44 = vadd.f32 %v1576_v49, %v1567_v62  ;;  %v13160_v59 = vperm.slane %v1653_v1, 0  ;;  %v13162_v62 = vperm.slane %v1653_v1, 1 }
 0x3d5   :  { %v1586_v21 = vadd.f32 %v1582_v19, %v1581_v47  ;;  %v13164_v63 = vperm.slane %v1653_v1, 2  ;;  %v13166_v5 = vperm.slane %v1653_v1, 3 }
 0x3d6   :  { %v1584_v35 = vadd.f32 %v1583_v44, %v1580_v28  ;;  %v1585_v13 = vadd.f32 %v1581_v47, %v1580_v28  ;;  %v1587_v12 = vadd.f32 %v1583_v44, %v1582_v19 }
 0x3d8   :  { %v1588_v22 = vadd.f32 %v1586_v21, %v1584_v35  ;;  %v1589_v61 = vadd.f32 %v1587_v12, %v1585_v13 }
 0x3da   :  { %v1590_v33 = vmul.f32 0.001953125, %v1588_v22  ;;  %v1591_v2 = vmul.f32 0.001953125, %v1589_v61 }
 0x3dc   :  { %v1593_v50 = vadd.f32 1e-05, %v1590_v33  ;;  %v1594_v53 = vadd.f32 1e-05, %v1591_v2 }
 0x3de   :  { %12489 = vrsqrt.f32 %v1593_v50  ;;  %vm1601_vm12 = vweird.f32 %v1593_v50  ;;  %vm1611_vm15 = vweird.f32 %v1594_v53 }
 0x3df   :  { %12491 = vrsqrt.f32 %v1594_v53 }
 0x3e4   :  { %v12490_v14 = vpop.eup %12489 }
 0x3e5   :  { %v12492_v3 = vpop.eup %12491  ;;  %v1596_v37 = vmul.f32 %v12490_v14, %v1593_v50  ;;  %vm1602_vm9 = vweird.f32 %v12490_v14 }
 0x3e6   :  { %v1606_v34 = vmul.f32 %v12492_v3, %v1594_v53  ;;  %vm1612_vm11 = vweird.f32 %v12492_v3  ;;  %vm1603_vm13 = vmor %vm1601_vm12, %vm1602_vm9  ;;  %vm15502_vm9 = vcmask 1043456   ;;  %vm15546_vm12 = vcmask 1045504  }
 0x3e7   :  { %v1597_v16 = vmul.f32 %v12490_v14, %v1596_v37  ;;  %vm1613_vm0 = vmor %vm1611_vm15, %vm1612_vm11  ;;  %vm15499_vm11 = vcmask 1043458   ;;  %vm15545_vm15 = vcmask 1041409  }
 0x3e8   :  { %v1607_v56 = vmul.f32 %v12492_v3, %v1606_v34 }
 0x3e9   :  { %v1598_v57 = vmul.f32 0.5, %v1597_v16 }
 0x3ea   :  { %v1608_v18 = vmul.f32 0.5, %v1607_v56 }
 0x3eb   :  { %v1599_v0 = vsub.f32 1.5, %v1598_v57 }
 0x3ec   :  { %v1609_v52 = vsub.f32 1.5, %v1608_v18 }
 0x3ed   :  { %v1600_v23 = vmul.f32 %v12490_v14, %v1599_v0 }
 0x3ee   :  { %v1610_v7 = vmul.f32 %v12492_v3, %v1609_v52 }
 0x3ef   :  { %v1604_v8 = vsel %vm1603_vm13, %v12490_v14, %v1600_v23  ;;  %vm15498_vm13 = vcmask 1045506  }
 0x3f0   :  { %v1614_v9 = vsel %vm1613_vm0, %v12492_v3, %v1610_v7  ;;  %v1618_v25 = vrot.slane %v1604_v8, 6  ;;  %vm15544_vm0 = vcmask 1043459  }
 0x3f1   :  { %v1617_v42 = vrot.slane %v1614_v9, 7  ;;  %v1619_v39 = vrot.slane %v1614_v9, 5 }
 0x3f3   :  { %v1621_v38 = vsel %vm111_vm1, %v1604_v8, %v1617_v42  ;;  %v1623_v36 = vsel %vm1622_vm7, %v1618_v25, %v1619_v39 }
 0x3f4   :  { %v1625_v58 = vsel %vm1160_vm4, %v1621_v38, %v1623_v36 }
 0x3f5   :  { %v1627_v51 = vmul.f32 %v1625_v58, %v1592_v55 }
 0x3f7   :  { %v1629_v6 = vperm.slane %v1627_v51, 0  ;;  %v1630_v46 = vperm.slane %v1627_v51, 1  ;;  %v1631_v11 = vperm.slane %v1627_v51, 2  ;;  %v1632_v60 = vperm.slane %v1627_v51, 3 }
 0x3f9   :  { %v1645_v47 = vmul.f32 %v1629_v6, %v13092_v41  ;;  %v1646_v19 = vmul.f32 %v1630_v46, %v13054_v32  ;;  %v1647_v49 = vmul.f32 %v1631_v11, %v13066_v30  ;;  %v1648_v20 = vmul.f32 %v1632_v60, %v13112_v17 }
 0x3fa   :  { %v1641_v28 = vmul.f32 %v1629_v6, %v13089_v26  ;;  %v1642_v44 = vmul.f32 %v1630_v46, %v13051_v24  ;;  %v1643_v21 = vmul.f32 %v1631_v11, %v13063_v31  ;;  %v1644_v35 = vmul.f32 %v1632_v60, %v13101_v45 }
 0x3fb   :  { %v1671_v13 = vadd.f32 %v13160_v59, %v1645_v47  ;;  %v1672_v12 = vadd.f32 %v13162_v62, %v1646_v19  ;;  %v1673_v41 = vadd.f32 %v13164_v63, %v1647_v49  ;;  %v1674_v32 = vadd.f32 %v13166_v5, %v1648_v20 }
 0x3fc   :  { %v1667_v30 = vadd.f32 %v13160_v59, %v1641_v28  ;;  %v1668_v17 = vadd.f32 %v13162_v62, %v1642_v44  ;;  %v1669_v26 = vadd.f32 %v13164_v63, %v1643_v21  ;;  %v1670_v24 = vadd.f32 %v13166_v5, %v1644_v35 }
 0x3fd   :  { %v13184_v22 = vmax.f32 %v1671_v13, 0.0  ;;  %v1688_v31 = vmax.f32 %v1672_v12, 0.0  ;;  %v1689_v45 = vmax.f32 %v1673_v41, 0.0  ;;  %v1690_v61 = vmax.f32 %v1674_v32, 0.0 }
 0x3fe   :  { %v13186_v33 = vmax.f32 %v1667_v30, 0.0  ;;  %v1684_v2 = vmax.f32 %v1668_v17, 0.0  ;;  %v1685_v50 = vmax.f32 %v1669_v26, 0.0  ;;  %v1686_v53 = vmax.f32 %v1670_v24, 0.0 }
 0x3ff   :  { %v13188_v14 = vrot.slane %v1688_v31, 6  ;;  %v13190_v3 = vrot.slane %v1689_v45, 4  ;;  %v13192_v37 = vrot.slane %v1690_v61, 2  ;;  %v1637_v34 = vmul.f32 %v1629_v6, %v13086_v4 }
 0x400   :  { %v13195_v16 = vrot.slane %v1684_v2, 6  ;;  %v13197_v56 = vrot.slane %v1685_v50, 4  ;;  %v13199_v57 = vrot.slane %v1686_v53, 2  ;;  %v1638_v18 = vmul.f32 %v1630_v46, %v13048_v15 }
 0x401   :  { %v1758_v0 = vsel %vm1160_vm4, %v13184_v22, %v13188_v14  ;;  %v1759_v52 = vsel %vm1161_vm5, %v13190_v3, %v13192_v37  ;;  %v1639_v23 = vmul.f32 %v1631_v11, %v13060_v43  ;;  %v1640_v4 = vmul.f32 %v1632_v60, %v13098_v54 }
 0x402   :  { %v1760_v7 = vsel %vm15502_vm9, %v1758_v0, %v1759_v52  ;;  %v1743_v8 = vsel %vm1160_vm4, %v13186_v33, %v13195_v16  ;;  %v1744_v15 = vsel %vm1161_vm5, %v13197_v56, %v13199_v57  ;;  %v1663_v9 = vadd.f32 %v13160_v59, %v1637_v34 }
 0x403   :  { %v9573_v25 = vrot.slane %v1760_v7, 9  ;;  %v1745_v42 = vsel %vm15502_vm9, %v1743_v8, %v1744_v15  ;;  %v1664_v39 = vadd.f32 %v13162_v62, %v1638_v18  ;;  %v1665_v43 = vadd.f32 %v13164_v63, %v1639_v23 }
 0x404   :  { %v9569_v54 = vrot.slane %v1745_v42, 9  ;;  %v1666_v55 = vadd.f32 %v13166_v5, %v1640_v4  ;;  %v13222_v38 = vmax.f32 %v1663_v9, 0.0  ;;  %v1649_v36 = vmul.f32 %v1629_v6, %v13095_v29 }
 0x405   :  { %v13225_v1 = vmax.f32 %v1760_v7, %v9573_v25  ;;  %v1680_v58 = vmax.f32 %v1664_v39, 0.0  ;;  %v1681_v51 = vmax.f32 %v1665_v43, 0.0  ;;  %v1650_v47 = vmul.f32 %v1630_v46, %v13057_v10 }
 0x406   :  { %v13228_v19 = vmax.f32 %v1745_v42, %v9569_v54  ;;  %v1682_v49 = vmax.f32 %v1666_v55, 0.0  ;;  %v1651_v20 = vmul.f32 %v1631_v11, %v13075_v27  ;;  %v1652_v28 = vmul.f32 %v1632_v60, %v13115_v40 }
 0x407   :  { %1916 = vrot.lane.b32.xlu1 %v13225_v1, %s12632_s27  ;;  %v13234_v44 = vrot.slane %v1680_v58, 6  ;;  %v13236_v21 = vrot.slane %v1681_v51, 4  ;;  %v1675_v29 = vadd.f32 %v13160_v59, %v1649_v36  ;;  %v1676_v6 = vadd.f32 %v13162_v62, %v1650_v47 }
 0x408   :  { %1908 = vrot.lane.b32.xlu2 %v13228_v19, %s12632_s27  ;;  %v13242_v10 = vrot.slane %v1682_v49, 2  ;;  %v1677_v27 = vadd.f32 %v13164_v63, %v1651_v20  ;;  %v1678_v40 = vadd.f32 %v13166_v5, %v1652_v28  ;;  %v1761_v46 = vsel %vm15499_vm11, %v13184_v22, %v13188_v14 }
 0x409   :  { %v1723_v11 = vsel %vm1160_vm4, %v13222_v38, %v13234_v44  ;;  %v1739_v59 = vsel %vm15546_vm12, %v13234_v44, %v13222_v38  ;;  %v1729_v62 = vsel %vm15499_vm11, %v13222_v38, %v13234_v44  ;;  %v13258_v60 = vmax.f32 %v1675_v29, 0.0 }
 0x40a   :  { %v1725_v63 = vsel %vm1161_vm5, %v13236_v21, %v13242_v10  ;;  %v1740_v5 = vsel %vm15499_vm11, %v13236_v21, %v13242_v10  ;;  %v1731_v35 = vsel %vm15546_vm12, %v13242_v10, %v13236_v21  ;;  %v1692_v13 = vmax.f32 %v1676_v6, 0.0 }
 0x40b   :  { %v1727_v12 = vsel %vm15502_vm9, %v1723_v11, %v1725_v63  ;;  %v1741_v41 = vsel %vm15498_vm13, %v1740_v5, %v1739_v59  ;;  %v1733_v32 = vsel %vm15498_vm13, %v1729_v62, %v1731_v35  ;;  %v1693_v30 = vmax.f32 %v1677_v27, 0.0 }
 0x40c   :  { %v9565_v17 = vrot.slane %v1727_v12, 9  ;;  %v1742_v26 = vrot.slane %v1741_v41, 6  ;;  %v1734_v24 = vrot.slane %v1733_v32, 2  ;;  %v1694_v31 = vmax.f32 %v1678_v40, 0.0 }
 0x40d   :  { %v13272_v45 = vrot.slane %v1692_v13, 6  ;;  %v13274_v61 = vrot.slane %v1693_v30, 4  ;;  %v1762_v2 = vsel %vm15546_vm12, %v13192_v37, %v13190_v3  ;;  %v1754_v50 = vsel %vm15546_vm12, %v13195_v16, %v13186_v33 }
 0x40e   :  { %v13282_v53 = vmax.f32 %v1727_v12, %v9565_v17  ;;  %v9568_v34 = vrot.slane %v1742_v26, 9  ;;  %v9566_v18 = vrot.slane %v1734_v24, 9  ;;  %v1722_v0 = vrot.slane %v1694_v31, 2 }
 0x40f   :  { %v1773_v52 = vsel %vm1160_vm4, %v13258_v60, %v13272_v45  ;;  %v1763_v23 = vsel %vm15498_vm13, %v1761_v46, %v1762_v2  ;;  %v1755_v4 = vsel %vm15499_vm11, %v13197_v56, %v13199_v57  ;;  %v1746_v7 = vsel %vm15499_vm11, %v13186_v33, %v13195_v16 }
 0x410   :  { %1900 = vrot.lane.b32.xlu0 %v13282_v53, %s12632_s27  ;;  %v13296_v8 = vmax.f32 %v1742_v26, %v9568_v34  ;;  %v13298_v15 = vmax.f32 %v1734_v24, %v9566_v18  ;;  %v1774_v9 = vsel %vm1161_vm5, %v13274_v61, %v1722_v0  ;;  %v1764_v25 = vrot.slane %v1763_v23, 2 }
 0x411   :  { %v1775_v42 = vsel %vm15502_vm9, %v1773_v52, %v1774_v9  ;;  %v1756_v39 = vsel %vm15498_vm13, %v1755_v4, %v1754_v50  ;;  %v1747_v43 = vsel %vm15546_vm12, %v13199_v57, %v13197_v56  ;;  %v1784_v54 = vsel %vm15546_vm12, %v13272_v45, %v13258_v60 }
 0x412   :  { %1906 = vrot.lane.b32.xlu2 %v13296_v8, %s12632_s27  ;;  %1902 = vrot.lane.b32.xlu1 %v13298_v15, %s12632_s27  ;;  %v9577_v55 = vrot.slane %v1775_v42, 9  ;;  %v9574_v36 = vrot.slane %v1764_v25, 9  ;;  %v1757_v58 = vrot.slane %v1756_v39, 6  ;;  %v1748_v51 = vsel %vm15498_vm13, %v1746_v7, %v1747_v43 }
 0x413   :  { %v1749_v47 = vrot.slane %v1748_v51, 2  ;;  %v1785_v49 = vsel %vm15499_vm11, %v13274_v61, %v1722_v0  ;;  %v1776_v20 = vsel %vm15499_vm11, %v13258_v60, %v13272_v45  ;;  %v1777_v28 = vsel %vm15546_vm12, %v1722_v0, %v13274_v61 }
 0x414   :  { %v9572_v29 = vrot.slane %v1757_v58, 9  ;;  %v1786_v6 = vsel %vm15498_vm13, %v1785_v49, %v1784_v54  ;;  %v13323_v27 = vmax.f32 %v1775_v42, %v9577_v55  ;;  %v1778_v46 = vsel %vm15498_vm13, %v1776_v20, %v1777_v28 }
 0x415   :  { %v1787_v40 = vrot.slane %v1786_v6, 6  ;;  %v1769_v11 = vsel %vm15546_vm12, %v13188_v14, %v13184_v22  ;;  %v13329_v59 = vmax.f32 %v1764_v25, %v9574_v36  ;;  %v1779_v62 = vrot.slane %v1778_v46, 2 }
 0x416   :  { %v1770_v63 = vsel %vm15499_vm11, %v13190_v3, %v13192_v37  ;;  %v1765_v5 = vsel %vm1161_vm5, %v13184_v22, %v13188_v14  ;;  %v13337_v35 = vmax.f32 %v1757_v58, %v9572_v29  ;;  %v9570_v13 = vrot.slane %v1749_v47, 9 }
 0x417   :  { %v1771_v12 = vsel %vm15498_vm13, %v1770_v63, %v1769_v11  ;;  %v1766_v41 = vsel %vm1160_vm4, %v13190_v3, %v13192_v37  ;;  %v9580_v32 = vrot.slane %v1787_v40, 9  ;;  %v1735_v22 = vsel %vm1161_vm5, %v13222_v38, %v13234_v44 }
 0x418   :  { %1924 = vrot.lane.b32.xlu0 %v13323_v27, %s12632_s27  ;;  %v1772_v30 = vrot.slane %v1771_v12, 6  ;;  %v1767_v17 = vsel %vm15502_vm9, %v1766_v41, %v1765_v5  ;;  %v9578_v14 = vrot.slane %v1779_v62, 9  ;;  %v1736_v24 = vsel %vm1160_vm4, %v13236_v21, %v13242_v10 }
 0x419   :  { %v1768_v26 = vrot.slane %v1767_v17, 4  ;;  %v1750_v3 = vsel %vm1161_vm5, %v13186_v33, %v13195_v16  ;;  %v1737_v31 = vsel %vm15502_vm9, %v1736_v24, %v1735_v22  ;;  %v1751_v38 = vsel %vm1160_vm4, %v13197_v56, %v13199_v57 }
 0x41a   :  { %1918 = vrot.lane.b32.xlu2 %v13329_v59, %s12632_s27  ;;  %1914 = vrot.lane.b32.xlu1 %v13337_v35, %s12632_s27  ;;  %v9576_v37 = vrot.slane %v1772_v30, 9  ;;  %v13363_v44 = vmax.f32 %v1749_v47, %v9570_v13  ;;  %v1738_v10 = vrot.slane %v1737_v31, 4  ;;  %v1752_v2 = vsel %vm15502_vm9, %v1751_v38, %v1750_v3 }
 0x41b   :  { %v9575_v21 = vrot.slane %v1768_v26, 9  ;;  %v1753_v16 = vrot.slane %v1752_v2, 4  ;;  %v1780_v50 = vsel %vm1161_vm5, %v13258_v60, %v13272_v45  ;;  %v1781_v34 = vsel %vm1160_vm4, %v13274_v61, %v1722_v0 }
 0x41c   :  { %v13366_v33 = vmax.f32 %v1772_v30, %v9576_v37  ;;  %v13373_v18 = vmax.f32 %v1787_v40, %v9580_v32  ;;  %v13375_v52 = vmax.f32 %v1779_v62, %v9578_v14  ;;  %v9567_v56 = vrot.slane %v1738_v10, 9 }
 0x41d   :  { %v13377_v57 = vmax.f32 %v1768_v26, %v9575_v21  ;;  %v9571_v23 = vrot.slane %v1753_v16, 9  ;;  %v2016_v4 = vrot.slane %v13298_v15, 7  ;;  %v1782_v7 = vsel %vm15502_vm9, %v1781_v34, %v1780_v50 }
 0x41e   :  { %vm15543_vm13 = vcmask 1045509   ;;  %v2034_v60 = vrot.slane %v13363_v44, 7  ;;  %v2055_v45 = vrot.slane %v13366_v33, 7  ;;  %v13385_v61 = vmax.f32 %v1738_v10, %v9567_v56 }
 0x41f   :  { %v2018_v0 = vsel %vm15545_vm15, %v2016_v4, %v13282_v53  ;;  %vm15542_vm11 = vcmask 1047559   ;;  %v2027_v9 = vrot.slane %v13296_v8, 7  ;;  %v2041_v43 = vrot.slane %v13337_v35, 7 }
 0x420   :  { %1910 = vrot.lane.b32.xlu0 %v13363_v44, %s12632_s27  ;;  %v2020_v25 = vsel %vm15544_vm0, %v2016_v4, %v2018_v0  ;;  %v2035_v42 = vsel %vm15545_vm15, %v2034_v60, %v13228_v19  ;;  %v2056_v39 = vsel %vm15545_vm15, %v2055_v45, %v13377_v57  ;;  %v13400_v54 = vmax.f32 %v1753_v16, %v9571_v23 }
 0x421   :  { %v1783_v55 = vrot.slane %v1782_v7, 4  ;;  %v2022_v36 = vsel %vm15543_vm13, %v2016_v4, %v2020_v25  ;;  %v2036_v58 = vsel %vm15544_vm0, %v2034_v60, %v2035_v42  ;;  %v2057_v49 = vsel %vm15544_vm0, %v2055_v45, %v2056_v39 }
 0x422   :  { %1930 = vrot.lane.b32.xlu2 %v13373_v18, %s12632_s27  ;;  %1926 = vrot.lane.b32.xlu1 %v13375_v52, %s12632_s27  ;;  %v13405_v51 = vsel %vm15542_vm11, %v2016_v4, %v2022_v36  ;;  %v2037_v47 = vsel %vm15543_vm13, %v2034_v60, %v2036_v58  ;;  %v2028_v20 = vsel %vm15545_vm15, %v2027_v9, %v13385_v61  ;;  %v1887_v63 = vrot.slane %v13296_v8, 2 }
 0x423   :  { %v13412_v28 = vsel %vm15542_vm11, %v2034_v60, %v2037_v47  ;;  %v2058_v29 = vsel %vm15543_vm13, %v2055_v45, %v2057_v49  ;;  %v2029_v6 = vsel %vm15544_vm0, %v2027_v9, %v2028_v20  ;;  %v2042_v40 = vsel %vm15545_vm15, %v2041_v43, %v13400_v54 }
 0x424   :  { %v13419_v46 = vsel %vm15542_vm11, %v2055_v45, %v2058_v29  ;;  %v2030_v11 = vsel %vm15543_vm13, %v2027_v9, %v2029_v6  ;;  %v2043_v62 = vsel %vm15544_vm0, %v2041_v43, %v2042_v40  ;;  %v9579_v5 = vrot.slane %v1783_v55, 9 }
 0x425   :  { %v13425_v13 = vsel %vm15542_vm11, %v2027_v9, %v2030_v11  ;;  %v2044_v12 = vsel %vm15543_vm13, %v2041_v43, %v2043_v62  ;;  %v2062_v41 = vrot.slane %v13375_v52, 7  ;;  %v1886_v30 = vrot.slane %v13385_v61, 2 }
 0x426   :  { %v13430_v32 = vsel %vm15542_vm11, %v2041_v43, %v2044_v12  ;;  %v2139_v17 = vrot.slane %v1887_v63, 7  ;;  %v2069_v14 = vrot.slane %v13373_v18, 7  ;;  %v13444_v3 = vmax.f32 %v1783_v55, %v9579_v5 }
 0x427   :  { %v2063_v22 = vsel %vm15545_vm15, %v2062_v41, %v13323_v27  ;;  %v1889_v38 = vrot.slane %v13363_v44, 2  ;;  %v1888_v50 = vrot.slane %v13228_v19, 2  ;;  %v1899_v23 = vrot.slane %v13373_v18, 2 }
 0x428   :  { %1922 = vrot.lane.b32.xlu0 %v13366_v33, %s12632_s27  ;;  %v2140_v26 = vsel %vm15545_vm15, %v2139_v17, %v1886_v30  ;;  %v2064_v24 = vsel %vm15544_vm0, %v2062_v41, %v2063_v22  ;;  %v2070_v16 = vsel %vm15545_vm15, %v2069_v14, %v13444_v3  ;;  %v1898_v60 = vrot.slane %v13444_v3, 2 }
 0x429   :  { %v2141_v37 = vsel %vm15544_vm0, %v2139_v17, %v2140_v26  ;;  %v2065_v31 = vsel %vm15543_vm13, %v2062_v41, %v2064_v24  ;;  %v2146_v34 = vrot.slane %v1889_v38, 7  ;;  %v2071_v56 = vsel %vm15544_vm0, %v2069_v14, %v2070_v16 }
 0x42a   :  { %1920 = vrot.lane.b32.xlu2 %v13377_v57, %s12632_s27  ;;  %1904 = vrot.lane.b32.xlu1 %v13385_v61, %s12632_s27  ;;  %v2142_v21 = vsel %vm15543_vm13, %v2139_v17, %v2141_v37  ;;  %v13451_v10 = vsel %vm15542_vm11, %v2062_v41, %v2065_v31  ;;  %v2072_v4 = vsel %vm15543_vm13, %v2069_v14, %v2071_v56  ;;  %v1894_v45 = vrot.slane %v13377_v57, 2 }
 0x42b   :  { %v13454_v2 = vsel %vm15542_vm11, %v2139_v17, %v2142_v21  ;;  %v2147_v7 = vsel %vm15545_vm15, %v2146_v34, %v1888_v50  ;;  %v13466_v0 = vsel %vm15542_vm11, %v2069_v14, %v2072_v4  ;;  %v2181_v25 = vrot.slane %v1899_v23, 7 }
 0x42c   :  { %v2148_v9 = vsel %vm15544_vm0, %v2146_v34, %v2147_v7  ;;  %v1895_v42 = vrot.slane %v13366_v33, 2  ;;  %v1884_v43 = vrot.slane %v13282_v53, 2  ;;  %v1885_v55 = vrot.slane %v13298_v15, 2 }
 0x42d   :  { %v2149_v39 = vsel %vm15543_vm13, %v2146_v34, %v2148_v9  ;;  %v1948_v36 = vrot.slane %v13282_v53, 4  ;;  %v2182_v47 = vsel %vm15545_vm15, %v2181_v25, %v1898_v60  ;;  %v1949_v20 = vrot.slane %v13298_v15, 4 }
 0x42e   :  { %v13477_v58 = vsel %vm15542_vm11, %v2146_v34, %v2149_v39  ;;  %v2167_v49 = vrot.slane %v1895_v42, 7  ;;  %v2183_v29 = vsel %vm15544_vm0, %v2181_v25, %v2182_v47  ;;  %v2132_v6 = vrot.slane %v1885_v55, 7 }
 0x42f   :  { %v1950_v40 = vrot.slane %v13385_v61, 4  ;;  %v1951_v11 = vrot.slane %v13296_v8, 4  ;;  %v2184_v62 = vsel %vm15543_vm13, %v2181_v25, %v2183_v29  ;;  %v2244_v5 = vrot.slane %v1949_v20, 7 }
 0x430   :  { %1912 = vrot.lane.b32.xlu0 %v13400_v54, %s12632_s27  ;;  %v2168_v63 = vsel %vm15545_vm15, %v2167_v49, %v1894_v45  ;;  %v1890_v12 = vrot.slane %v13400_v54, 2  ;;  %v13490_v41 = vsel %vm15542_vm11, %v2181_v25, %v2184_v62  ;;  %v2133_v17 = vsel %vm15545_vm15, %v2132_v6, %v1884_v43 }
 0x431   :  { %v2169_v30 = vsel %vm15544_vm0, %v2167_v49, %v2168_v63  ;;  %v2251_v22 = vrot.slane %v1951_v11, 7  ;;  %v2134_v26 = vsel %vm15544_vm0, %v2132_v6, %v2133_v17  ;;  %v2245_v24 = vsel %vm15545_vm15, %v2244_v5, %v1948_v36 }
 0x432   :  { %1928 = vrot.lane.b32.xlu1 %v13444_v3, %s12632_s27  ;;  %v2170_v14 = vsel %vm15543_vm13, %v2167_v49, %v2169_v30  ;;  %v1891_v37 = vrot.slane %v13337_v35, 2  ;;  %v2135_v38 = vsel %vm15543_vm13, %v2132_v6, %v2134_v26  ;;  %v2246_v21 = vsel %vm15544_vm0, %v2244_v5, %v2245_v24 }
 0x433   :  { %v13499_v31 = vsel %vm15542_vm11, %v2167_v49, %v2170_v14  ;;  %v2252_v16 = vsel %vm15545_vm15, %v2251_v22, %v1950_v40  ;;  %v13505_v50 = vsel %vm15542_vm11, %v2132_v6, %v2135_v38  ;;  %v2247_v34 = vsel %vm15543_vm13, %v2244_v5, %v2246_v21 }
 0x434   :  { %v2253_v56 = vsel %vm15544_vm0, %v2251_v22, %v2252_v16  ;;  %v2153_v23 = vrot.slane %v1891_v37, 7  ;;  %v13510_v4 = vsel %vm15542_vm11, %v2244_v5, %v2247_v34  ;;  %v1955_v60 = vrot.slane %v13337_v35, 4 }
 0x435   :  { %v2254_v7 = vsel %vm15543_vm13, %v2251_v22, %v2253_v56  ;;  %v1954_v42 = vrot.slane %v13400_v54, 4  ;;  %v1897_v43 = vrot.slane %v13375_v52, 2  ;;  %v1961_v36 = vrot.slane %v13375_v52, 4 }
 0x436   :  { %v13515_v45 = vsel %vm15542_vm11, %v2251_v22, %v2254_v7  ;;  %v2154_v9 = vsel %vm15545_vm15, %v2153_v23, %v1890_v12  ;;  %v2265_v39 = vrot.slane %v1955_v60, 7  ;;  %v1896_v20 = vrot.slane %v13323_v27, 2 }
 0x437   :  { %15574 = vst [vmem:[#allocation22_spill] sm:$0xff] %v13515_v45  ;;  %v2155_v25 = vsel %vm15544_vm0, %v2153_v23, %v2154_v9  ;;  %v2174_v29 = vrot.slane %v1897_v43, 7  ;;  %v1960_v40 = vrot.slane %v13323_v27, 4  ;;  %v2286_v11 = vrot.slane %v1961_v36, 7 }
 0x438   :  { %v2156_v55 = vsel %vm15543_vm13, %v2153_v23, %v2155_v25  ;;  %v2266_v49 = vsel %vm15545_vm15, %v2265_v39, %v1954_v42  ;;  %v1963_v62 = vrot.slane %v13373_v18, 4  ;;  %v1962_v26 = vrot.slane %v13444_v3, 4 }
 0x439   :  { %v13524_v47 = vsel %vm15542_vm11, %v2153_v23, %v2156_v55  ;;  %v2267_v6 = vsel %vm15544_vm0, %v2265_v39, %v2266_v49  ;;  %v2175_v5 = vsel %vm15545_vm15, %v2174_v29, %v1896_v20  ;;  %v2287_v17 = vsel %vm15545_vm15, %v2286_v11, %v1960_v40 }
 0x43a   :  { %15575 = vst [vmem:[#allocation23_spill] sm:$0xff] %v13524_v47  ;;  %v2268_v63 = vsel %vm15543_vm13, %v2265_v39, %v2267_v6  ;;  %v2176_v30 = vsel %vm15544_vm0, %v2174_v29, %v2175_v5  ;;  %v2288_v14 = vsel %vm15544_vm0, %v2286_v11, %v2287_v17  ;;  %v2293_v24 = vrot.slane %v1963_v62, 7 }
 0x43b   :  { %v13534_v12 = vsel %vm15542_vm11, %v2265_v39, %v2268_v63  ;;  %v2177_v22 = vsel %vm15543_vm13, %v2174_v29, %v2176_v30  ;;  %v2289_v38 = vsel %vm15543_vm13, %v2286_v11, %v2288_v14  ;;  %v1952_v21 = vrot.slane %v13228_v19, 4 }
 0x43c   :  { %15576 = vst [vmem:[#allocation24_spill] sm:$0xff] %v13534_v12  ;;  %v13542_v37 = vsel %vm15542_vm11, %v2174_v29, %v2177_v22  ;;  %v1953_v16 = vrot.slane %v13363_v44, 4  ;;  %v13548_v34 = vsel %vm15542_vm11, %v2286_v11, %v2289_v38  ;;  %v2294_v56 = vsel %vm15545_vm15, %v2293_v24, %v1962_v26 }
 0x43d   :  { %15577 = vst [vmem:[#allocation25_spill] sm:$0xff] %v13542_v37  ;;  %v1984_v23 = vrot.slane %v13228_v19, 6  ;;  %v1985_v7 = vrot.slane %v13363_v44, 6  ;;  %v2295_v60 = vsel %vm15544_vm0, %v2293_v24, %v2294_v56  ;;  %v1980_v25 = vrot.slane %v13282_v53, 6 }
 0x43e   :  { %v2258_v9 = vrot.slane %v1953_v16, 7  ;;  %v1981_v42 = vrot.slane %v13298_v15, 6  ;;  %v2296_v39 = vsel %vm15543_vm13, %v2293_v24, %v2295_v60  ;;  %v1958_v55 = vrot.slane %v13377_v57, 4 }
 0x43f   :  { %v2370_v43 = vrot.slane %v1985_v7, 7  ;;  %v1959_v36 = vrot.slane %v13366_v33, 4  ;;  %v13560_v49 = vsel %vm15542_vm11, %v2293_v24, %v2296_v39  ;;  %v1987_v20 = vrot.slane %v13337_v35, 6 }
 0x440   :  { %15578 = vst [vmem:[#allocation26_spill] sm:$0xff] %v13560_v49  ;;  %v2259_v19 = vsel %vm15545_vm15, %v2258_v9, %v1952_v21  ;;  %v2356_v44 = vrot.slane %v1981_v42, 7  ;;  %v1986_v6 = vrot.slane %v13400_v54, 6  ;;  %v1983_v16 = vrot.slane %v13296_v8, 6 }
 0x441   :  { %v2260_v29 = vsel %vm15544_vm0, %v2258_v9, %v2259_v19  ;;  %v2371_v53 = vsel %vm15545_vm15, %v2370_v43, %v1984_v23  ;;  %v2279_v15 = vrot.slane %v1959_v36, 7  ;;  %v2377_v63 = vrot.slane %v1987_v20, 7 }
 0x442   :  { %v2261_v40 = vsel %vm15543_vm13, %v2258_v9, %v2260_v29  ;;  %v2372_v11 = vsel %vm15544_vm0, %v2370_v43, %v2371_v53  ;;  %v2357_v62 = vsel %vm15545_vm15, %v2356_v44, %v1980_v25  ;;  %v1982_v60 = vrot.slane %v13385_v61, 6 }
 0x443   :  { %v13571_v5 = vsel %vm15542_vm11, %v2258_v9, %v2261_v40  ;;  %v2373_v30 = vsel %vm15543_vm13, %v2370_v43, %v2372_v11  ;;  %v2358_v35 = vsel %vm15544_vm0, %v2356_v44, %v2357_v62  ;;  %v2280_v17 = vsel %vm15545_vm15, %v2279_v15, %v1958_v55 }
 0x444   :  { %v13577_v22 = vsel %vm15542_vm11, %v2370_v43, %v2373_v30  ;;  %v2359_v54 = vsel %vm15543_vm13, %v2356_v44, %v2358_v35  ;;  %v2281_v14 = vsel %vm15544_vm0, %v2279_v15, %v2280_v17  ;;  %v2378_v26 = vsel %vm15545_vm15, %v2377_v63, %v1986_v6 }
 0x445   :  { %v13583_v24 = vsel %vm15542_vm11, %v2356_v44, %v2359_v54  ;;  %v2282_v38 = vsel %vm15543_vm13, %v2279_v15, %v2281_v14  ;;  %v2379_v21 = vsel %vm15544_vm0, %v2377_v63, %v2378_v26  ;;  %v2363_v9 = vrot.slane %v1983_v16, 7 }
 0x446   :  { %v13589_v56 = vsel %vm15542_vm11, %v2279_v15, %v2282_v38  ;;  %v2380_v23 = vsel %vm15543_vm13, %v2377_v63, %v2379_v21  ;;  %v1995_v25 = vrot.slane %v13373_v18, 6  ;;  %v1991_v42 = vrot.slane %v13366_v33, 6 }
 0x447   :  { %15579 = vst [vmem:[#allocation27_spill] sm:$0xff] %v13589_v56  ;;  %v13593_v7 = vsel %vm15542_vm11, %v2377_v63, %v2380_v23  ;;  %v2364_v39 = vsel %vm15545_vm15, %v2363_v9, %v1982_v60  ;;  %v1994_v43 = vrot.slane %v13444_v3, 6  ;;  %v1993_v55 = vrot.slane %v13375_v52, 6 }
 0x448   :  { %v2405_v8 = vrot.slane %v1995_v25, 7  ;;  %v2365_v36 = vsel %vm15544_vm0, %v2363_v9, %v2364_v39  ;;  %v1990_v19 = vrot.slane %v13377_v57, 6  ;;  %v2391_v44 = vrot.slane %v1991_v42, 7 }
 0x449   :  { %v2366_v20 = vsel %vm15543_vm13, %v2363_v9, %v2365_v36  ;;  %v1992_v18 = vrot.slane %v13323_v27, 6  ;;  %v2398_v29 = vrot.slane %v1993_v55, 7  ;;  %v1893_v23 = vrot.slane %v13329_v59, 2 }
 0x44a   :  { %v2406_v61 = vsel %vm15545_vm15, %v2405_v8, %v1994_v43  ;;  %v13607_v33 = vsel %vm15542_vm11, %v2363_v9, %v2366_v20  ;;  %v2392_v53 = vsel %vm15545_vm15, %v2391_v44, %v1990_v19  ;;  %v2048_v60 = vrot.slane %v13329_v59, 7 }
 0x44b   :  { %v2407_v3 = vsel %vm15544_vm0, %v2405_v8, %v2406_v61  ;;  %v2393_v15 = vsel %vm15544_vm0, %v2391_v44, %v2392_v53  ;;  %v2399_v57 = vsel %vm15545_vm15, %v2398_v29, %v1992_v18  ;;  %v1957_v9 = vrot.slane %v13329_v59, 4 }
 0x44c   :  { %v2408_v52 = vsel %vm15543_vm13, %v2405_v8, %v2407_v3  ;;  %v2394_v40 = vsel %vm15543_vm13, %v2391_v44, %v2393_v15  ;;  %v2400_v27 = vsel %vm15544_vm0, %v2398_v29, %v2399_v57  ;;  %v2160_v42 = vrot.slane %v1893_v23, 7 }
 0x44d   :  { %v13615_v6 = vsel %vm15542_vm11, %v2405_v8, %v2408_v52  ;;  %v13620_v11 = vsel %vm15542_vm11, %v2391_v44, %v2394_v40  ;;  %v2401_v62 = vsel %vm15543_vm13, %v2398_v29, %v2400_v27  ;;  %v1989_v39 = vrot.slane %v13329_v59, 6 }
 0x44e   :  { %15580 = vst [vmem:[#allocation28_spill] sm:$0xff] %v13615_v6  ;;  %v13624_v63 = vsel %vm15542_vm11, %v2398_v29, %v2401_v62  ;;  %v2049_v55 = vsel %vm15545_vm15, %v2048_v60, %v13225_v1  ;;  %v1892_v36 = vrot.slane %v13225_v1, 2  ;;  %v2272_v19 = vrot.slane %v1957_v9, 7 }
 0x44f   :  { %15581 = vst [vmem:[#allocation29_spill] sm:$0xff] %v13620_v11  ;;  %v1956_v3 = vrot.slane %v13225_v1, 4  ;;  %v2384_v59 = vrot.slane %v1989_v39, 7  ;;  %v12638_v27 = vmov 1934713408   ;;  %vm15541_vm9 = vcmask 1047556  }
 0x450   :  { %15582 = vst [vmem:[#allocation30_spill] sm:$0xff] %v13624_v63  ;;  %v2161_v29 = vsel %vm15545_vm15, %v2160_v42, %v1892_v36  ;;  %v2534_v62 = vunpack.c.l.s4 %v12638_v27 }
 0x462   :  { %v13626_v30 = vpop.permute.xlu2 %1908 }
 0x46c   :  { %v13628_v35 = vpop.permute.xlu2 %1906 }
 0x474   :  { %v1919_v17 = vpop.permute.xlu2 %1918 }
 0x475   :  { %v2005_v54 = vrot.slane %v1919_v17, 6  ;;  %v1973_v43 = vrot.slane %v1919_v17, 4  ;;  %v1941_v18 = vrot.slane %v1919_v17, 2  ;;  %v2104_v36 = vrot.slane %v1919_v17, 7 }
 0x476   :  { %v13678_v17 = vunpack.c.0.s8 %v2534_v62 }
 0x477   :  { %v13630_v26 = vrot.slane %v2005_v54, 7  ;;  %v2328_v53 = vrot.slane %v1973_v43, 7  ;;  %v2273_v54 = vsel %vm15545_vm15, %v2272_v19, %v1956_v3  ;;  %v2216_v27 = vrot.slane %v1941_v18, 7 }
 0x479   :  { %v1917_v14 = vpop.permute.xlu1 %1916 }
 0x47a   :  { %v2004_v38 = vrot.slane %v1917_v14, 6  ;;  %v1972_v44 = vrot.slane %v1917_v14, 4  ;;  %v2105_v56 = vsel %vm15545_vm15, %v2104_v36, %v1917_v14 }
 0x47c   :  { %v2441_v21 = vsel %vm15545_vm15, %v13630_v26, %v2004_v38  ;;  %v1988_v38 = vrot.slane %v13225_v1, 6  ;;  %v2329_v23 = vsel %vm15545_vm15, %v2328_v53, %v1972_v44  ;;  %v2162_v44 = vsel %vm15544_vm0, %v2160_v42, %v2161_v29 }
 0x47d   :  { %v13636_v16 = vsel %vm15544_vm0, %v13630_v26, %v2441_v21  ;;  %v1940_v21 = vrot.slane %v1917_v14, 2  ;;  %v2330_v49 = vsel %vm15544_vm0, %v2328_v53, %v2329_v23  ;;  %v2106_v14 = vsel %vm15544_vm0, %v2104_v36, %v2105_v56  ;;  %v13697_v23 = vpop.permute.xlu2 %1930 }
 0x47e   :  { %v2385_v3 = vsel %vm15545_vm15, %v2384_v59, %v1988_v38  ;;  %v2331_v62 = vsel %vm15543_vm13, %v2328_v53, %v2330_v49  ;;  %15584 = vst [vmem:[#allocation32_spill] sm:$0xff] %v13697_v23  ;;  %v2107_v49 = vsel %vm15543_vm13, %v2104_v36, %v2106_v14  ;;  %v1935_v14 = vrot.slane %v13628_v35, 2 }
 0x47f   :  { %v2386_v18 = vsel %vm15544_vm0, %v2384_v59, %v2385_v3 }
 0x480   :  { %v13743_v63 = vrot.slane %v1935_v14, 7 }
 0x482   :  { %v13641_v25 = vpop.permute.xlu0 %1900 }
 0x483   :  { %v1996_v52 = vrot.slane %v13641_v25, 6 }
 0x484   :  { %v13644_v8 = vpop.permute.xlu1 %1902 }
 0x485   :  { %v1997_v20 = vrot.slane %v13644_v8, 6  ;;  %v2076_v61 = vrot.slane %v13644_v8, 7  ;;  %v13761_v14 = vpop.permute.xlu2 %1920 }
 0x487   :  { %v2077_v15 = vsel %vm15545_vm15, %v2076_v61, %v13641_v25  ;;  %v13656_v57 = vrot.slane %v1997_v20, 7 }
 0x488   :  { %v2078_v40 = vsel %vm15544_vm0, %v2076_v61, %v2077_v15  ;;  %v2050_v15 = vsel %vm15544_vm0, %v2048_v60, %v2049_v55 }
 0x489   :  { %v13664_v9 = vsel %vm15545_vm15, %v13656_v57, %v1996_v52  ;;  %v2079_v43 = vsel %vm15543_vm13, %v2076_v61, %v2078_v40  ;;  %v2274_v52 = vsel %vm15544_vm0, %v2272_v19, %v2273_v54  ;;  %v2051_v29 = vsel %vm15543_vm13, %v2048_v60, %v2050_v15 }
 0x48a   :  { %v13666_v39 = vpop.permute.xlu0 %1924  ;;  %v2080_v20 = vsel %vm15542_vm11, %v2076_v61, %v2079_v43  ;;  %v2217_v61 = vsel %vm15545_vm15, %v2216_v27, %v1940_v21  ;;  %v2163_v54 = vsel %vm15543_vm13, %v2160_v42, %v2162_v44  ;;  %v2275_v38 = vsel %vm15543_vm13, %v2272_v19, %v2274_v52 }
 0x48b   :  { %v2530_v48 = vrot.slane %v2080_v20, 4  ;;  %v2218_v21 = vsel %vm15544_vm0, %v2216_v27, %v2217_v61  ;;  %v2052_v56 = vsel %vm15542_vm11, %v2048_v60, %v2051_v29  ;;  %v2164_v20 = vsel %vm15542_vm11, %v2160_v42, %v2163_v54 }
 0x48c   :  { %v13672_v1 = vpop.permute.xlu1 %1914  ;;  %v2276_v52 = vsel %vm15542_vm11, %v2272_v19, %v2275_v38  ;;  %v2000_v29 = vrot.slane %v13626_v30, 6 }
 0x48d   :  { %v2532_v55 = vsel %vm15541_vm9, %v2530_v48, %v13405_v51  ;;  %v2332_v48 = vsel %vm15542_vm11, %v2328_v53, %v2331_v62  ;;  %v2387_v51 = vsel %vm15543_vm13, %v2384_v59, %v2386_v18 }
 0x48e   :  { %v13685_v40 = vperm.slane %v2532_v55, %v13678_v17  ;;  %v2675_v15 = vrot.slane %v2332_v48, 4  ;;  %v2219_v55 = vsel %vm15543_vm13, %v2216_v27, %v2218_v21  ;;  %v13715_v60 = vsel %vm15542_vm11, %v2384_v59, %v2387_v51 }
 0x48f   :  { %15586 = vst [vmem:[#allocation34_spill] sm:$0xff] %v13715_v60  ;;  %v2108_v21 = vsel %vm15542_vm11, %v2104_v36, %v2107_v49  ;;  %v1967_v59 = vrot.slane %v13628_v35, 4  ;;  %v1999_v48 = vrot.slane %v13628_v35, 6  ;;  %v1947_v36 = vrot.slane %v13697_v23, 2 }
 0x490   :  { %15583 = vst [vmem:[#allocation31_spill] sm:$0xff] %v13685_v40  ;;  %2851 = vrot.lane.b32.xlu1 %v13685_v40, %s12639_s2  ;;  %v13712_v18 = vsel %vm15541_vm9, %v2675_v15, %v2276_v52  ;;  %v2220_v15 = vsel %vm15542_vm11, %v2216_v27, %v2219_v55  ;;  %v2008_v52 = vrot.slane %v13666_v39, 6  ;;  %v1965_v49 = vrot.slane %v13644_v8, 4 }
 0x491   :  { %15585 = vst [vmem:[#allocation33_spill] sm:$0xff] %v13712_v18  ;;  %v2659_v40 = vrot.slane %v2108_v21, 4  ;;  %v13751_v6 = vrot.slane %v1967_v59, 7  ;;  %v1932_v21 = vrot.slane %v13641_v25, 2 }
 0x492   :  { %v13699_v43 = vpop.permute.xlu0 %1910  ;;  %v13767_v59 = vrot.slane %v1965_v49, 7 }
 0x493   :  { %v2001_v3 = vrot.slane %v13699_v43, 6  ;;  %v2090_v44 = vrot.slane %v13699_v43, 7 }
 0x494   :  { %v13708_v61 = vpop.permute.xlu1 %1926 }
 0x495   :  { %v2091_v54 = vsel %vm15545_vm15, %v2090_v44, %v13626_v30  ;;  %v13721_v19 = vrot.slane %v2001_v3, 7  ;;  %v2009_v62 = vrot.slane %v13708_v61, 6  ;;  %v1933_v3 = vrot.slane %v13644_v8, 2 }
 0x496   :  { %v2092_v38 = vsel %vm15544_vm0, %v2090_v44, %v2091_v54  ;;  %v2660_v8 = vsel %vm15541_vm9, %v2659_v40, %v2052_v56 }
 0x497   :  { %v13731_v51 = vsel %vm15545_vm15, %v13721_v19, %v2000_v29  ;;  %v13736_v42 = vrot.slane %v2009_v62, 7  ;;  %v2093_v54 = vsel %vm15543_vm13, %v2090_v44, %v2092_v38  ;;  %v2083_v29 = vrot.slane %v13628_v35, 7 }
 0x498   :  { %v2094_v53 = vsel %vm15542_vm11, %v2090_v44, %v2093_v54  ;;  %v2667_v62 = vrot.slane %v2220_v15, 4  ;;  %v13753_v38 = vrot.slane %v1999_v48, 7  ;;  %v13759_v35 = vrot.slane %v13697_v23, 7 }
 0x499   :  { %15587 = vst [vmem:[#allocation35_spill] sm:$0xff] %v13736_v42  ;;  %v13747_v27 = vsel %vm15545_vm15, %v13736_v42, %v2008_v52  ;;  %v2188_v52 = vrot.slane %v1933_v3, 7  ;;  %v2595_v54 = vrot.slane %v2094_v53, 4  ;;  %v13765_v15 = vrot.slane %v1947_v36, 7 }
 0x49a   :  { %15588 = vst [vmem:[#allocation36_spill] sm:$0xff] %v13747_v27  ;;  %v13749_v55 = vpop.permute.xlu0 %1922  ;;  %v2668_v53 = vsel %vm15541_vm9, %v2667_v62, %v2164_v20  ;;  %v1964_v3 = vrot.slane %v13641_v25, 4  ;;  %v2118_v36 = vrot.slane %v13708_v61, 7 }
 0x49b   :  { %v2111_v44 = vrot.slane %v13749_v55, 7  ;;  %v2596_v11 = vsel %vm15541_vm9, %v2595_v54, %v13412_v28  ;;  %v2189_v40 = vsel %vm15545_vm15, %v2188_v52, %v1932_v21  ;;  %v13789_v54 = vperm.slane %v2660_v8, %v13678_v17 }
 0x49c   :  { %v13763_v18 = vpop.permute.xlu1 %1904  ;;  %v13781_v27 = vperm.slane %v2596_v11, %v13678_v17  ;;  %v2301_v20 = vsel %vm15545_vm15, %v13767_v59, %v1964_v3  ;;  %v13798_v62 = vperm.slane %v2668_v53, %v13678_v17  ;;  %v2097_v21 = vrot.slane %v13672_v1, 7 }
 0x49d   :  { %v2112_v48 = vsel %vm15545_vm15, %v2111_v44, %v13761_v14  ;;  %v1934_v42 = vrot.slane %v13763_v18, 2  ;;  %v2084_v56 = vsel %vm15545_vm15, %v2083_v29, %v13763_v18  ;;  %v2190_v53 = vsel %vm15544_vm0, %v2188_v52, %v2189_v40 }
 0x49e   :  { %v2113_v49 = vsel %vm15544_vm0, %v2111_v44, %v2112_v48  ;;  %15589 = vst [vmem:[#allocation37_spill] sm:$0xff] %v13781_v27  ;;  %2883 = vrot.lane.b32.xlu0 %v13781_v27, %s12639_s2  ;;  %v2085_v11 = vsel %vm15544_vm0, %v2083_v29, %v2084_v56  ;;  %v1937_v27 = vrot.slane %v13699_v43, 2  ;;  %v2119_v56 = vsel %vm15545_vm15, %v2118_v36, %v13666_v39 }
 0x49f   :  { %v2196_v28 = vsel %vm15545_vm15, %v13743_v63, %v1934_v42  ;;  %v2086_v42 = vsel %vm15543_vm13, %v2083_v29, %v2085_v11  ;;  %v2114_v25 = vsel %vm15543_vm13, %v2111_v44, %v2113_v49  ;;  %v2302_v60 = vsel %vm15544_vm0, %v13767_v59, %v2301_v20 }
 0x4a0   :  { %v2197_v8 = vsel %vm15544_vm0, %v13743_v63, %v2196_v28  ;;  %v2115_v12 = vsel %vm15542_vm11, %v2111_v44, %v2114_v25  ;;  %v2087_v3 = vsel %vm15542_vm11, %v2083_v29, %v2086_v42  ;;  %v1939_v40 = vrot.slane %v13672_v1, 2 }
 0x4a1   :  { %v2198_v45 = vsel %vm15543_vm13, %v13743_v63, %v2197_v8  ;;  %v2120_v37 = vsel %vm15544_vm0, %v2118_v36, %v2119_v56  ;;  %v2191_v44 = vsel %vm15543_vm13, %v2188_v52, %v2190_v53  ;;  %v1971_v25 = vrot.slane %v13672_v1, 4 }
 0x4a2   :  { %v13804_v48 = vpop.permute.xlu0 %1912  ;;  %v2003_v29 = vrot.slane %v13672_v1, 6  ;;  %v2202_v42 = vrot.slane %v1937_v27, 7  ;;  %v2563_v8 = vrot.slane %v2087_v3, 4  ;;  %v2199_v20 = vsel %vm15542_vm11, %v13743_v63, %v2198_v45 }
 0x4a3   :  { %v2098_v28 = vsel %vm15545_vm15, %v2097_v21, %v13804_v48  ;;  %v2303_v56 = vsel %vm15543_vm13, %v13767_v59, %v2302_v60  ;;  %v2121_v1 = vsel %vm15543_vm13, %v2118_v36, %v2120_v37  ;;  %v1977_v27 = vrot.slane %v13708_v61, 4 }
 0x4a4   :  { %v2099_v49 = vsel %vm15544_vm0, %v2097_v21, %v2098_v28  ;;  %v13826_v47 = vpop.permute.xlu1 %1928  ;;  %v2691_v28 = vrot.slane %v2115_v12, 4  ;;  %v2192_v12 = vsel %vm15542_vm11, %v2188_v52, %v2191_v44  ;;  %v15590_v60 = vrot.slane %v13626_v30, 2 }
 0x4a5   :  { %v2100_v11 = vsel %vm15543_vm13, %v2097_v21, %v2099_v49  ;;  %v2126_v53 = vsel %vm15545_vm15, %v13759_v35, %v13826_v47  ;;  %v1946_v63 = vrot.slane %v13826_v47, 2  ;;  %v2564_v3 = vsel %vm15541_vm9, %v2563_v8, %v13425_v13 }
 0x4a6   :  { %v2101_v23 = vsel %vm15542_vm11, %v2097_v21, %v2100_v11  ;;  %v2692_v49 = vsel %vm15541_vm9, %v2691_v28, %v13419_v46  ;;  %v1943_v21 = vrot.slane %v13749_v55, 2  ;;  %v2203_v46 = vsel %vm15545_vm15, %v2202_v42, %v15590_v60 }
 0x4a7   :  { %v13846_v45 = vperm.slane %v2692_v49, %v13678_v17  ;;  %v2627_v11 = vrot.slane %v2101_v23, 4  ;;  %v2571_v37 = vrot.slane %v2199_v20, 4  ;;  %v1969_v52 = vrot.slane %v13699_v43, 4 }
 0x4a8   :  { %v2127_v44 = vsel %vm15544_vm0, %v13759_v35, %v2126_v53  ;;  %v13860_v28 = vperm.slane %v2564_v3, %v13678_v17  ;;  %v2122_v49 = vsel %vm15542_vm11, %v2118_v36, %v2121_v1  ;;  %v1945_v60 = vrot.slane %v13708_v61, 2 }
 0x4a9   :  { %2931 = vrot.lane.b32.xlu0 %v13846_v45, %s12639_s2  ;;  %v2628_v13 = vsel %vm15541_vm9, %v2627_v11, %v13430_v32  ;;  %v2572_v23 = vsel %vm15541_vm9, %v2571_v37, %v13454_v2  ;;  %v13870_v43 = vsel %vm15542_vm11, %v13767_v59, %v2303_v56  ;;  %v2223_v8 = vrot.slane %v1943_v21, 7 }
 0x4aa   :  { %v2238_v20 = vsel %vm15545_vm15, %v13765_v15, %v1946_v63  ;;  %2867 = vrot.lane.b32.xlu2 %v13860_v28, %s12639_s2  ;;  %v13877_v36 = vperm.slane %v2628_v13, %v13678_v17  ;;  %v2204_v61 = vsel %vm15544_vm0, %v2202_v42, %v2203_v46  ;;  %v2342_v32 = vrot.slane %v1977_v27, 7 }
 0x4ab   :  { %v1966_v53 = vrot.slane %v13763_v18, 4  ;;  %v2128_v2 = vsel %vm15543_vm13, %v13759_v35, %v2127_v44  ;;  %v2723_v59 = vrot.slane %v2122_v49, 4  ;;  %v13883_v56 = vrot.slane %v1939_v40, 7 }
 0x4ac   :  { %v13885_v1 = vrot.slane %v1971_v25, 7  ;;  %v2314_v21 = vrot.slane %v1969_v52, 7  ;;  %2899 = vrot.lane.b32.xlu1 %v13877_v36, %s12639_s2  ;;  %v13890_v63 = vperm.slane %v2572_v23, %v13678_v17  ;;  %v13892_v3 = vrot.slane %v2003_v29, 7 }
 0x4ad   :  { %v2239_v27 = vsel %vm15544_vm0, %v13765_v15, %v2238_v20  ;;  %v2205_v46 = vsel %vm15543_vm13, %v2202_v42, %v2204_v61  ;;  %v2539_v11 = vrot.slane %v2192_v12, 4  ;;  %v13897_v37 = vrot.slane %v1945_v60, 7 }
 0x4ae   :  { %v15591_v40 = vrot.slane %v13761_v14, 2  ;;  %v2129_v52 = vsel %vm15542_vm11, %v13759_v35, %v2128_v2  ;;  %v2547_v44 = vrot.slane %v13870_v43, 4  ;;  %v15592_v29 = vrot.slane %v13666_v39, 4 }
 0x4af   :  { %v1998_v13 = vrot.slane %v13763_v18, 6  ;;  %v2308_v12 = vsel %vm15545_vm15, %v13751_v6, %v1966_v53  ;;  %v2724_v60 = vsel %vm15541_vm9, %v2723_v59, %v13451_v10  ;;  %v15593_v23 = vrot.slane %v13626_v30, 4 }
 0x4b0   :  { %v2224_v25 = vsel %vm15545_vm15, %v2223_v8, %v15591_v40  ;;  %v2343_v49 = vsel %vm15545_vm15, %v2342_v32, %v15592_v29  ;;  %v1938_v35 = vrot.slane %v13804_v48, 2  ;;  %v2206_v61 = vsel %vm15542_vm11, %v2202_v42, %v2205_v46 }
 0x4b1   :  { %v2315_v20 = vsel %vm15545_vm15, %v2314_v21, %v15593_v23  ;;  %2869 = vrot.lane.b32.xlu0 %v13890_v63, %s12639_s2  ;;  %v2240_v18 = vsel %vm15543_vm13, %v13765_v15, %v2239_v27  ;;  %v2002_v2 = vrot.slane %v13804_v48, 6  ;;  %v2755_v53 = vrot.slane %v2129_v52, 4 }
 0x4b2   :  { %v2225_v40 = vsel %vm15544_vm0, %v2223_v8, %v2224_v25  ;;  %v2540_v10 = vsel %vm15541_vm9, %v2539_v11, %v13505_v50  ;;  %v15594_v30 = vrot.slane %v13666_v39, 2  ;;  %v2309_v29 = vsel %vm15544_vm0, %v13751_v6, %v2308_v12  ;;  %2915 = vrot.lane.b32.xlu2 %v13789_v54, %s12639_s2 }
 0x4b3   :  { %v13935_v42 = vperm.slane %v2724_v60, %v13678_v17  ;;  %v2344_v27 = vsel %vm15544_vm0, %v2342_v32, %v2343_v49  ;;  %v2420_v46 = vsel %vm15545_vm15, %v13753_v38, %v1998_v13  ;;  %v1970_v50 = vrot.slane %v13804_v48, 4 }
 0x4b4   :  { %v2231_v59 = vsel %vm15545_vm15, %v13897_v37, %v15594_v30  ;;  %v2603_v39 = vrot.slane %v2206_v61, 4  ;;  %v2241_v11 = vsel %vm15542_vm11, %v13765_v15, %v2240_v18  ;;  %v2210_v25 = vsel %vm15545_vm15, %v13883_v56, %v1938_v35 }
 0x4b5   :  { %2947 = vrot.lane.b32.xlu1 %v13935_v42, %s12639_s2  ;;  %v2226_v52 = vsel %vm15543_vm13, %v2223_v8, %v2225_v40  ;;  %v2345_v12 = vsel %vm15543_vm13, %v2342_v32, %v2344_v27  ;;  %v2316_v49 = vsel %vm15544_vm0, %v2314_v21, %v2315_v20  ;;  %v2434_v13 = vsel %vm15545_vm15, %v13892_v3, %v2002_v2 }
 0x4b6   :  { %v2756_v48 = vsel %vm15541_vm9, %v2755_v53, %v13466_v0  ;;  %v2346_v15 = vsel %vm15542_vm11, %v2342_v32, %v2345_v12  ;;  %v2317_v60 = vsel %vm15543_vm13, %v2314_v21, %v2316_v49  ;;  %v2763_v23 = vrot.slane %v2241_v11, 4 }
 0x4b7   :  { %v2739_v35 = vrot.slane %v2346_v15, 4  ;;  %v2318_v61 = vsel %vm15542_vm11, %v2314_v21, %v2317_v60  ;;  %v2428_v18 = vsel %vm15544_vm0, %v13721_v19, %v13731_v51  ;;  %v2604_v20 = vsel %vm15541_vm9, %v2603_v39, %v13477_v58 }
 0x4b8   :  { %v2227_v2 = vsel %vm15542_vm11, %v2223_v8, %v2226_v52  ;;  %v2611_v40 = vrot.slane %v2318_v61, 4  ;;  %v2429_v0 = vsel %vm15543_vm13, %v13721_v19, %v2428_v18  ;;  %v2211_v32 = vsel %vm15544_vm0, %v13883_v56, %v2210_v25 }
 0x4b9   :  { %2917 = vrot.lane.b32.xlu0 %v13798_v62, %s12639_s2  ;;  %v13970_v21 = vperm.slane %v2756_v48, %v13678_v17  ;;  %v13974_v51 = vsel %vm15541_vm9, %v2739_v35, %v13548_v34  ;;  %v2430_v58 = vsel %vm15542_vm11, %v13721_v19, %v2429_v0  ;;  %v2322_v8 = vsel %vm15545_vm15, %v13885_v1, %v1970_v50 }
 0x4ba   :  { %v2435_v53 = vsel %vm15544_vm0, %v13892_v3, %v2434_v13  ;;  %v13984_v30 = vsel %vm15541_vm9, %v2611_v40, %v13571_v5  ;;  %v2619_v27 = vrot.slane %v2430_v58, 4  ;;  %v13989_v34 = vperm.slane %v2604_v20, %v13678_v17 }
 0x4bb   :  { %2963 = vrot.lane.b32.xlu2 %v13970_v21, %s12639_s2  ;;  %v2764_v19 = vsel %vm15541_vm9, %v2763_v23, %v13490_v41  ;;  %v2699_v39 = vrot.slane %v2227_v2, 4  ;;  %v2414_v50 = vsel %vm15544_vm0, %v13656_v57, %v13664_v9  ;;  %v2421_v11 = vsel %vm15544_vm0, %v13753_v38, %v2420_v46 }
 0x4bc   :  { %v2212_v5 = vsel %vm15543_vm13, %v13883_v56, %v2211_v32  ;;  %v14002_v25 = vsel %vm15541_vm9, %v2619_v27, %v13577_v22  ;;  %v2415_v52 = vsel %vm15543_vm13, %v13656_v57, %v2414_v50  ;;  %v2007_v41 = vrot.slane %v13749_v55, 6 }
 0x4bd   :  { %v2323_v12 = vsel %vm15544_vm0, %v13885_v1, %v2322_v8  ;;  %2885 = vrot.lane.b32.xlu1 %v13989_v34, %s12639_s2  ;;  %v14012_v9 = vperm.slane %v2540_v10, %v13678_v17  ;;  %v2416_v46 = vsel %vm15542_vm11, %v13656_v57, %v2415_v52  ;;  %v14017_v22 = vperm.slane %v2764_v19, %v13678_v17  ;;  %v15595_v8 = vld [vmem:[#allocation32_spill] sm:$0xff] }
 0x4be   :  { %v2310_v49 = vsel %vm15543_vm13, %v13751_v6, %v2309_v29  ;;  %v2555_v13 = vrot.slane %v2416_v46, 4  ;;  %v2436_v48 = vsel %vm15543_vm13, %v13892_v3, %v2435_v53  ;;  %v2700_v15 = vsel %vm15541_vm9, %v2699_v39, %v13499_v31 }
 0x4bf   :  { %v2213_v10 = vsel %vm15542_vm11, %v13883_v56, %v2212_v5  ;;  %v2437_v60 = vsel %vm15542_vm11, %v13892_v3, %v2436_v48  ;;  %v2422_v57 = vsel %vm15543_vm13, %v13753_v38, %v2421_v11  ;;  %v2232_v23 = vsel %vm15544_vm0, %v13897_v37, %v2231_v59  ;;  %v15600_v11 = vld [vmem:[#allocation34_spill] sm:$0xff] }
 0x4c0   :  { %v14035_v29 = vsel %vm15541_vm9, %v2555_v13, %v13583_v24  ;;  %v2651_v35 = vrot.slane %v2437_v60, 4  ;;  %v2423_v31 = vsel %vm15542_vm11, %v13753_v38, %v2422_v57  ;;  %v2447_v61 = vrot.slane %v2007_v41, 7 }
 0x4c1   :  { %v2010_v56 = vrot.slane %v13826_v47, 6  ;;  %2965 = vrot.lane.b32.xlu0 %v14017_v22, %s12639_s2  ;;  %v2311_v3 = vsel %vm15542_vm11, %v13751_v6, %v2310_v49  ;;  %v2587_v18 = vrot.slane %v2423_v31, 4  ;;  %v2635_v20 = vrot.slane %v2213_v10, 4 }
 0x4c2   :  { %v2324_v59 = vsel %vm15543_vm13, %v13885_v1, %v2323_v12  ;;  %v14048_v24 = vsel %vm15541_vm9, %v2651_v35, %v13593_v7  ;;  %v2443_v38 = vsel %vm15543_vm13, %v13630_v26, %v13636_v16  ;;  %v14054_v2 = vperm.slane %v2700_v15, %v13678_v17  ;;  %v15604_v35 = vld [vmem:[#allocation24_spill] sm:$0xff] }
 0x4c3   :  { %2853 = vrot.lane.b32.xlu2 %v14012_v9, %s12639_s2  ;;  %v2233_v6 = vsel %vm15543_vm13, %v13897_v37, %v2232_v23  ;;  %v14062_v40 = vsel %vm15541_vm9, %v2587_v18, %v13607_v33  ;;  %v2444_v7 = vsel %vm15542_vm11, %v13630_v26, %v2443_v38  ;;  %v1978_v0 = vrot.slane %v13826_v47, 4  ;;  %v15599_v26 = vld [vmem:[#allocation23_spill] sm:$0xff] }
 0x4c4   :  { %v2548_v16 = vsel %vm15541_vm9, %v2547_v44, %v13510_v4  ;;  %v2579_v32 = vrot.slane %v2311_v3, 4  ;;  %v2683_v58 = vrot.slane %v2444_v7, 4  ;;  %v15596_v53 = vrot.slane %v15595_v8, 4  ;;  %v15605_v3 = vld [vmem:[#allocation25_spill] sm:$0xff]  ;;  %v15607_v7 = vld [vmem:[#allocation35_spill] sm:$0xff] }
 0x4c5   :  { %v15597_v19 = vrot.slane %v15595_v8, 6  ;;  %v15598_v33 = vrot.slane %v13761_v14, 6  ;;  %2933 = vrot.lane.b32.xlu1 %v14054_v2, %s12639_s2  ;;  %v2325_v47 = vsel %vm15542_vm11, %v13885_v1, %v2324_v59  ;;  %v1975_v4 = vrot.slane %v13749_v55, 4  ;;  %v15602_v55 = vld [vmem:[#allocation22_spill] sm:$0xff] }
 0x4c6   :  { %v2349_v27 = vrot.slane %v15596_v53, 7  ;;  %v2636_v43 = vsel %vm15541_vm9, %v2635_v20, %v15599_v26  ;;  %v2234_v44 = vsel %vm15542_vm11, %v13897_v37, %v2233_v6  ;;  %v14089_v5 = vsel %vm15541_vm9, %v2683_v58, %v15600_v11  ;;  %v15606_v6 = vld [vmem:[#allocation36_spill] sm:$0xff] }
 0x4c7   :  { %v2461_v39 = vrot.slane %v15597_v19, 7  ;;  %v2448_v50 = vsel %vm15545_vm15, %v2447_v61, %v15598_v33  ;;  %v14093_v41 = vperm.slane %v2548_v16, %v13678_v17  ;;  %v2580_v46 = vsel %vm15541_vm9, %v2579_v32, %v15602_v55 }
 0x4c8   :  { %v2449_v12 = vsel %vm15544_vm0, %v2447_v61, %v2448_v50  ;;  %v2350_v1 = vsel %vm15545_vm15, %v2349_v27, %v1978_v0  ;;  %v2643_v49 = vrot.slane %v2325_v47, 4  ;;  %v14102_v37 = vperm.slane %v2636_v43, %v13678_v17  ;;  %v15609_v50 = vld [vmem:[#allocation29_spill] sm:$0xff]  ;;  %v15612_v43 = vld [vmem:[#allocation28_spill] sm:$0xff] }
 0x4c9   :  { %v2462_v52 = vsel %vm15545_vm15, %v2461_v39, %v2010_v56  ;;  %15601 = vst [vmem:[#allocation32_spill] sm:$0xff] %v14093_v41  ;;  %2855 = vrot.lane.b32.xlu0 %v14093_v41, %s12639_s2  ;;  %v2731_v13 = vrot.slane %v2234_v44, 4  ;;  %v2335_v48 = vrot.slane %v1975_v4, 7  ;;  %v2450_v10 = vsel %vm15543_vm13, %v2447_v61, %v2449_v12  ;;  %v15610_v4 = vld [vmem:[#allocation33_spill] sm:$0xff] }
 0x4ca   :  { %v2463_v15 = vsel %vm15544_vm0, %v2461_v39, %v2462_v52  ;;  %v2351_v60 = vsel %vm15544_vm0, %v2349_v27, %v2350_v1  ;;  %v14108_v57 = vperm.slane %v2580_v46, %v13678_v17  ;;  %v1974_v23 = vrot.slane %v13761_v14, 4  ;;  %v15613_v52 = vld [vmem:[#allocation30_spill] sm:$0xff] }
 0x4cb   :  { %2901 = vrot.lane.b32.xlu2 %v14102_v37, %s12639_s2  ;;  %v2644_v31 = vsel %vm15541_vm9, %v2643_v49, %v15604_v35  ;;  %v2464_v56 = vsel %vm15543_vm13, %v2461_v39, %v2463_v15  ;;  %v2732_v18 = vsel %vm15541_vm9, %v2731_v13, %v15605_v3  ;;  %v2352_v59 = vsel %vm15543_vm13, %v2349_v27, %v2351_v60  ;;  %v15615_v46 = vld [vmem:[#allocation26_spill] sm:$0xff] }
 0x4cc   :  { %15603 = vst [vmem:[#allocation23_spill] sm:$0xff] %v14108_v57  ;;  %v2336_v20 = vsel %vm15545_vm15, %v2335_v48, %v1974_v23  ;;  %v2451_v38 = vsel %vm15542_vm11, %v2447_v61, %v2450_v10  ;;  %v2456_v14 = vsel %vm15544_vm0, %v15607_v7, %v15606_v6  ;;  %v14127_v0 = vperm.slane %v2644_v31, %v13678_v17 }
 0x4cd   :  { %2871 = vrot.lane.b32.xlu1 %v14108_v57, %s12639_s2  ;;  %v14130_v16 = vperm.slane %v2732_v18, %v13678_v17  ;;  %v2465_v32 = vsel %vm15542_vm11, %v2461_v39, %v2464_v56  ;;  %v2715_v58 = vrot.slane %v2451_v38, 4  ;;  %v2457_v8 = vsel %vm15543_vm13, %v15607_v7, %v2456_v14  ;;  %v15624_v18 = vld [vmem:[#allocation37_spill] sm:$0xff]  ;;  %v15626_v38 = vld [vmem:[#allocation31_spill] sm:$0xff] }
 0x4ce   :  { %15608 = vst [vmem:[#allocation34_spill] sm:$0xff] %v14127_v0  ;;  %v2353_v61 = vsel %vm15542_vm11, %v2349_v27, %v2352_v59  ;;  %v2337_v53 = vsel %vm15544_vm0, %v2335_v48, %v2336_v20  ;;  %v2779_v19 = vrot.slane %v2465_v32, 4  ;;  %v2458_v33 = vsel %vm15542_vm11, %v15607_v7, %v2457_v8 }
 0x4cf   :  { %v14143_v47 = vsel %vm15541_vm9, %v2715_v58, %v15609_v50  ;;  %v2747_v39 = vrot.slane %v2458_v33, 4  ;;  %v14147_v26 = vperm.slane %v15610_v4, %v13678_v17  ;;  %v2771_v44 = vrot.slane %v2353_v61, 4 }
 0x4d0   :  { %v14153_v27 = vsel %vm15541_vm9, %v2779_v19, %v15612_v43  ;;  %v2338_v11 = vsel %vm15543_vm13, %v2335_v48, %v2337_v53  ;;  %v14164_v1 = vperm.slane %v13974_v51, %v13678_v17  ;;  %v14173_v13 = vperm.slane %v13984_v30, %v13678_v17  ;;  %v15618_v51 = vld [vmem:[#allocation27_spill] sm:$0xff] }
 0x4d1   :  { %2903 = vrot.lane.b32.xlu0 %v14127_v0, %s12639_s2  ;;  %15611 = vst [vmem:[#allocation22_spill] sm:$0xff] %v14147_v26  ;;  %v14158_v12 = vsel %vm15541_vm9, %v2747_v39, %v15613_v52  ;;  %v2339_v55 = vsel %vm15542_vm11, %v2335_v48, %v2338_v11  ;;  %v2772_v49 = vsel %vm15541_vm9, %v2771_v44, %v15615_v46  ;;  %v2569_v35 = vrot.slane %v13860_v28, 4 }
 0x4d2   :  { %15614 = vst [vmem:[#allocation24_spill] sm:$0xff] %v14164_v1  ;;  %v2707_v15 = vrot.slane %v2339_v55, 4  ;;  %v14176_v10 = vperm.slane %v2772_v49, %v13678_v17  ;;  %v14186_v60 = vperm.slane %v14002_v25, %v13678_v17  ;;  %v14195_v23 = vperm.slane %v14035_v29, %v13678_v17 }
 0x4d3   :  { %2949 = vrot.lane.b32.xlu2 %v14130_v16, %s12639_s2  ;;  %15616 = vst [vmem:[#allocation25_spill] sm:$0xff] %v14173_v13  ;;  %v14203_v25 = vsel %vm15541_vm9, 0.0, %v2569_v35  ;;  %v14209_v31 = vperm.slane %v14062_v40, %v13678_v17  ;;  %v14213_v29 = vperm.slane %v14048_v24, %v13678_v17  ;;  %v2665_v56 = vrot.slane %v13789_v54, 4 }
 0x4d4   :  { %15617 = vst [vmem:[#allocation36_spill] sm:$0xff] %v14176_v10  ;;  %v2708_v48 = vsel %vm15541_vm9, %v2707_v15, %v15618_v51  ;;  %v2601_v20 = vrot.slane %v15624_v18, 4  ;;  %v14228_v24 = vperm.slane %v14089_v5, %v13678_v17  ;;  %v2761_v59 = vrot.slane %v13970_v21, 4 }
 0x4d5   :  { %2919 = vrot.lane.b32.xlu1 %v14147_v26, %s12639_s2  ;;  %15619 = vst [vmem:[#allocation35_spill] sm:$0xff] %v14186_v60  ;;  %v14191_v30 = vperm.slane %v2708_v48, %v13678_v17  ;;  %v14221_v3 = vsel %vm15541_vm9, 0.0, %v2665_v56  ;;  %v2537_v6 = vrot.slane %v15626_v38, 4  ;;  %v2697_v14 = vrot.slane %v13846_v45, 4 }
 0x4d6   :  { %15621 = vst [vmem:[#allocation33_spill] sm:$0xff] %v14195_v23  ;;  %v14233_v40 = vsel %vm15541_vm9, 0.0, %v2601_v20  ;;  %v14240_v7 = vsel %vm15541_vm9, 0.0, %v2761_v59  ;;  %v2545_v58 = vrot.slane %v14012_v9, 4  ;;  %v2633_v8 = vrot.slane %v13877_v36, 4 }
 0x4d7   :  { %15620 = vst [vmem:[#allocation29_spill] sm:$0xff] %v14191_v30  ;;  %v14246_v5 = vsel %vm15541_vm9, 0.0, %v2537_v6  ;;  %v14251_v32 = vsel %vm15541_vm9, 0.0, %v2697_v14  ;;  %v2577_v53 = vrot.slane %v13890_v63, 4  ;;  %v2641_v50 = vrot.slane %v14102_v37, 4 }
 0x4d8   :  { %15622 = vst [vmem:[#allocation28_spill] sm:$0xff] %v14209_v31  ;;  %v14258_v61 = vsel %vm15541_vm9, 0.0, %v2545_v58  ;;  %v14264_v19 = vsel %vm15541_vm9, 0.0, %v2633_v8  ;;  %v2729_v4 = vrot.slane %v13935_v42, 4  ;;  %v2673_v44 = vrot.slane %v13798_v62, 4 }
 0x4d9   :  { %2951 = vrot.lane.b32.xlu0 %v14164_v1, %s12639_s2  ;;  %15623 = vst [vmem:[#allocation30_spill] sm:$0xff] %v14213_v29  ;;  %v14269_v33 = vsel %vm15541_vm9, 0.0, %v2577_v53  ;;  %v14278_v43 = vsel %vm15541_vm9, 0.0, %v2641_v50  ;;  %v2737_v55 = vrot.slane %v14130_v16, 4  ;;  %v2609_v49 = vrot.slane %v13989_v34, 4 }
 0x4da   :  { %15625 = vst [vmem:[#allocation26_spill] sm:$0xff] %v14228_v24  ;;  %v14284_v11 = vsel %vm15541_vm9, 0.0, %v2729_v4  ;;  %v14289_v52 = vsel %vm15541_vm9, 0.0, %v2673_v44  ;;  %v2769_v51 = vrot.slane %v14017_v22, 4  ;;  %v2617_v20 = vrot.slane %v14173_v13, 4 }
 0x4db   :  { %2887 = vrot.lane.b32.xlu2 %v14173_v13, %s12639_s2  ;;  %v14298_v15 = vsel %vm15541_vm9, 0.0, %v2737_v55  ;;  %v14306_v35 = vsel %vm15541_vm9, 0.0, %v2609_v49  ;;  %v2705_v6 = vrot.slane %v14054_v2, 4  ;;  %v2553_v8 = vrot.slane %v14093_v41, 4 }
 0x4dc   :  { %v14311_v56 = vsel %vm15541_vm9, 0.0, %v2769_v51  ;;  %v14322_v58 = vsel %vm15541_vm9, 0.0, %v2617_v20  ;;  %v2713_v44 = vrot.slane %v14191_v30, 4  ;;  %v2585_v49 = vrot.slane %v14108_v57, 4 }
 0x4dd   :  { %2967 = vrot.lane.b32.xlu1 %v14176_v10, %s12639_s2  ;;  %v14328_v53 = vsel %vm15541_vm9, 0.0, %v2705_v6  ;;  %v14335_v4 = vsel %vm15541_vm9, 0.0, %v2553_v8  ;;  %v2649_v6 = vrot.slane %v14127_v0, 4  ;;  %v2593_v13 = vrot.slane %v14209_v31, 4 }
 0x4de   :  { %15627 = vst [vmem:[#allocation27_spill] sm:$0xff] %v14335_v4  ;;  %v14346_v20 = vsel %vm15541_vm9, 0.0, %v2713_v44  ;;  %v14352_v8 = vsel %vm15541_vm9, 0.0, %v2585_v49  ;;  %v2745_v57 = vrot.slane %v14164_v1, 4  ;;  %vm3606_vm11 = vcmask 523264  }
 0x4df   :  { %15628 = vst [vmem:[#allocation37_spill] sm:$0xff] %v14346_v20  ;;  %v14359_v41 = vsel %vm15541_vm9, 0.0, %v2649_v6  ;;  %v14370_v49 = vsel %vm15541_vm9, 0.0, %v2593_v13  ;;  %vm3609_vm13 = vcmask 785408   ;;  %vm3663_vm15 = vcmask 519169  }
 0x4e0   :  { %15629 = vst [vmem:[#allocation31_spill] sm:$0xff] %v14359_v41 }
 0x4e1   :  { %2889 = vrot.lane.b32.xlu0 %v14186_v60, %s12639_s2  ;;  %15630 = vst [vmem:[#allocation38_spill] sm:$0xff] %v14370_v49 }
 0x4e3   :  { %2935 = vrot.lane.b32.xlu2 %v14191_v30, %s12639_s2 }
 0x4e5   :  { %2857 = vrot.lane.b32.xlu1 %v14195_v23, %s12639_s2 }
 0x4e9   :  { %2875 = vrot.lane.b32.xlu0 %v14203_v25, %s12639_s2 }
 0x4eb   :  { %2873 = vrot.lane.b32.xlu2 %v14209_v31, %s12639_s2 }
 0x4ed   :  { %2905 = vrot.lane.b32.xlu1 %v14213_v29, %s12639_s2 }
 0x4f1   :  { %2923 = vrot.lane.b32.xlu0 %v14221_v3, %s12639_s2 }
 0x4f3   :  { %2921 = vrot.lane.b32.xlu2 %v14228_v24, %s12639_s2 }
 0x4f5   :  { %2891 = vrot.lane.b32.xlu1 %v14233_v40, %s12639_s2 }
 0x4f9   :  { %2971 = vrot.lane.b32.xlu0 %v14240_v7, %s12639_s2 }
 0x4fb   :  { %2859 = vrot.lane.b32.xlu2 %v14246_v5, %s12639_s2 }
 0x4fd   :  { %2939 = vrot.lane.b32.xlu1 %v14251_v32, %s12639_s2 }
 0x501   :  { %2861 = vrot.lane.b32.xlu0 %v14258_v61, %s12639_s2 }
 0x502   :  { %v14319_v14 = vpop.permute.xlu1 %2851 }
 0x503   :  { %2907 = vrot.lane.b32.xlu2 %v14264_v19, %s12639_s2 }
 0x504   :  { %v14274_v39 = vpop.permute.xlu2 %2867 }
 0x505   :  { %2877 = vrot.lane.b32.xlu1 %v14269_v33, %s12639_s2 }
 0x509   :  { %2909 = vrot.lane.b32.xlu0 %v14278_v43, %s12639_s2 }
 0x50b   :  { %2955 = vrot.lane.b32.xlu2 %v14284_v11, %s12639_s2 }
 0x50c   :  { %v14294_v46 = vpop.permute.xlu2 %2915 }
 0x50d   :  { %2925 = vrot.lane.b32.xlu1 %v14289_v52, %s12639_s2 }
 0x510   :  { %v14303_v48 = vpop.permute.xlu0 %2883 }
 0x511   :  { %2957 = vrot.lane.b32.xlu0 %v14298_v15, %s12639_s2 }
 0x513   :  { %2893 = vrot.lane.b32.xlu2 %v14306_v35, %s12639_s2 }
 0x515   :  { %2973 = vrot.lane.b32.xlu1 %v14311_v56, %s12639_s2  ;;  %v14316_v59 = vpop.permute.xlu2 %2963 }
 0x519   :  { %2895 = vrot.lane.b32.xlu0 %v14322_v58, %s12639_s2 }
 0x51b   :  { %v14330_v50 = vpop.permute.xlu0 %2931  ;;  %2941 = vrot.lane.b32.xlu2 %v14328_v53, %s12639_s2 }
 0x51d   :  { %2863 = vrot.lane.b32.xlu1 %v14335_v4, %s12639_s2  ;;  %v14340_v55 = vpop.permute.xlu2 %2853  ;;  %v2625_v4 = vrot.slane %v14186_v60, 4 }
 0x51e   :  { %v14343_v51 = vpop.permute.xlu1 %2899 }
 0x521   :  { %2943 = vrot.lane.b32.xlu0 %v14346_v20, %s12639_s2  ;;  %v2681_v20 = vrot.slane %v14147_v26, 4  ;;  %v14383_v26 = vsel %vm15541_vm9, 0.0, %v2745_v57  ;;  %v14399_v57 = vperm.slane %v14153_v27, %v13678_v17  ;;  %v14416_v27 = vperm.slane %v14143_v47, %v13678_v17 }
 0x522   :  { %15632 = vst [vmem:[#allocation40_spill] sm:$0xff] %v14383_v26 }
 0x523   :  { %v14354_v30 = vpop.permute.xlu0 %2869  ;;  %2879 = vrot.lane.b32.xlu2 %v14352_v8, %s12639_s2  ;;  %v14376_v6 = vsel %vm15541_vm9, 0.0, %v2681_v20  ;;  %15634 = vst [vmem:[#allocation42_spill] sm:$0xff] %v14399_v57  ;;  %v2785_v60 = vrot.slane %v14399_v57, 4 }
 0x524   :  { %15631 = vst [vmem:[#allocation39_spill] sm:$0xff] %v14376_v6 }
 0x525   :  { %2911 = vrot.lane.b32.xlu1 %v14359_v41, %s12639_s2  ;;  %v14364_v44 = vpop.permute.xlu2 %2901  ;;  %v2689_v41 = vrot.slane %v14228_v24, 4  ;;  %15637 = vst [vmem:[#allocation45_spill] sm:$0xff] %v14416_v27 }
 0x527   :  { %v14367_v0 = vpop.permute.xlu1 %2947  ;;  %v14394_v20 = vsel %vm15541_vm9, 0.0, %v2689_v41  ;;  %v14411_v41 = vsel %vm15541_vm9, 0.0, %v2625_v4  ;;  %v2721_v4 = vrot.slane %v14416_v27, 4 }
 0x528   :  { %15633 = vst [vmem:[#allocation41_spill] sm:$0xff] %v14394_v20 }
 0x529   :  { %2881 = vrot.lane.b32.xlu0 %v14370_v49, %s12639_s2  ;;  %v2777_v49 = vrot.slane %v14176_v10, 4  ;;  %15636 = vst [vmem:[#allocation44_spill] sm:$0xff] %v14411_v41 }
 0x52b   :  { %v14378_v31 = vpop.permute.xlu0 %2917  ;;  %2927 = vrot.lane.b32.xlu2 %v14376_v6, %s12639_s2  ;;  %v14404_v24 = vsel %vm15541_vm9, 0.0, %v2777_v49  ;;  %v2561_v49 = vrot.slane %v14195_v23, 4  ;;  %v14439_v23 = vsel %vm15541_vm9, 0.0, %v2721_v4 }
 0x52c   :  { %15635 = vst [vmem:[#allocation43_spill] sm:$0xff] %v14404_v24 }
 0x52d   :  { %2959 = vrot.lane.b32.xlu1 %v14383_v26, %s12639_s2  ;;  %v14388_v13 = vpop.permute.xlu2 %2949  ;;  %v14432_v47 = vsel %vm15541_vm9, 0.0, %v2561_v49  ;;  %15642 = vst [vmem:[#allocation50_spill] sm:$0xff] %v14439_v23  ;;  %v14452_v49 = vperm.slane %v14158_v12, %v13678_v17 }
 0x52e   :  { %15640 = vst [vmem:[#allocation48_spill] sm:$0xff] %v14432_v47 }
 0x52f   :  { %v14391_v1 = vpop.permute.xlu1 %2885  ;;  %15644 = vst [vmem:[#allocation52_spill] sm:$0xff] %v14452_v49 }
 0x531   :  { %2929 = vrot.lane.b32.xlu0 %v14394_v20, %s12639_s2 }
 0x533   :  { %v14406_v26 = vpop.permute.xlu0 %2965  ;;  %2975 = vrot.lane.b32.xlu2 %v14404_v24, %s12639_s2  ;;  %v14426_v24 = vsel %vm15541_vm9, 0.0, %v2785_v60 }
 0x534   :  { %15639 = vst [vmem:[#allocation47_spill] sm:$0xff] %v14426_v24 }
 0x535   :  { %2897 = vrot.lane.b32.xlu1 %v14411_v41, %s12639_s2  ;;  %v14420_v20 = vpop.permute.xlu2 %2887  ;;  %v2657_v41 = vrot.slane %v14213_v29, 4  ;;  %v2753_v29 = vrot.slane %v14452_v49, 4 }
 0x536   :  { %15638 = vst [vmem:[#allocation46_spill] sm:$0xff] %v14420_v20 }
 0x537   :  { %v14423_v10 = vpop.permute.xlu1 %2933  ;;  %v14469_v12 = vsel %vm15541_vm9, 0.0, %v2753_v29  ;;  %v3043_v29 = vmax.f32 %v15626_v38, %v14319_v14 }
 0x538   :  { %15649 = vst [vmem:[#allocation57_spill] sm:$0xff] %v14469_v12 }
 0x539   :  { %2977 = vrot.lane.b32.xlu0 %v14426_v24, %s12639_s2  ;;  %v14455_v24 = vsel %vm15541_vm9, 0.0, %v2657_v41 }
 0x53a   :  { %15645 = vst [vmem:[#allocation53_spill] sm:$0xff] %v14455_v24 }
 0x53b   :  { %v14434_v6 = vpop.permute.xlu0 %2855  ;;  %2865 = vrot.lane.b32.xlu2 %v14432_v47, %s12639_s2 }
 0x53c   :  { %15641 = vst [vmem:[#allocation49_spill] sm:$0xff] %v14434_v6 }
 0x53d   :  { %2945 = vrot.lane.b32.xlu1 %v14439_v23, %s12639_s2  ;;  %v14443_v60 = vpop.permute.xlu2 %2935 }
 0x53e   :  { %15643 = vst [vmem:[#allocation51_spill] sm:$0xff] %v14443_v60 }
 0x53f   :  { %v14446_v20 = vpop.permute.xlu1 %2871 }
 0x541   :  { %2937 = vrot.lane.b32.xlu0 %v14416_v27, %s12639_s2 }
 0x543   :  { %v14457_v4 = vpop.permute.xlu0 %2903  ;;  %2913 = vrot.lane.b32.xlu2 %v14455_v24, %s12639_s2 }
 0x544   :  { %15646 = vst [vmem:[#allocation54_spill] sm:$0xff] %v14457_v4 }
 0x545   :  { %2953 = vrot.lane.b32.xlu1 %v14452_v49, %s12639_s2  ;;  %v14463_v23 = vpop.permute.xlu2 %2873 }
 0x546   :  { %15647 = vst [vmem:[#allocation55_spill] sm:$0xff] %v14463_v23 }
 0x547   :  { %v14466_v27 = vpop.permute.xlu1 %2919 }
 0x548   :  { %15648 = vst [vmem:[#allocation56_spill] sm:$0xff] %v14466_v27 }
 0x54b   :  { %v14471_v47 = vpop.permute.xlu0 %2951  ;;  %2961 = vrot.lane.b32.xlu2 %v14469_v12, %s12639_s2 }
 0x54c   :  { %15650 = vst [vmem:[#allocation58_spill] sm:$0xff] %v14471_v47 }
 0x54d   :  { %v14475_v41 = vpop.permute.xlu2 %2921 }
 0x54e   :  { %15651 = vst [vmem:[#allocation59_spill] sm:$0xff] %v14475_v41 }
 0x54f   :  { %v14477_v24 = vpop.permute.xlu1 %2967 }
 0x550   :  { %15652 = vst [vmem:[#allocation60_spill] sm:$0xff] %v14477_v24 }
 0x553   :  { %v14479_v60 = vpop.permute.xlu0 %2889  ;;  %2969 = vrot.lane.b32.xlu2 %v14399_v57, %s12639_s2  ;;  %v3051_v57 = vmax.f32 %v13860_v28, %v14274_v39 }
 0x554   :  { %15653 = vst [vmem:[#allocation61_spill] sm:$0xff] %v14479_v60 }
 0x555   :  { %v2860_v49 = vpop.permute.xlu2 %2859 }
 0x556   :  { %v3047_v23 = vmax.f32 %v14246_v5, %v2860_v49 }
 0x557   :  { %v14484_v27 = vpop.permute.xlu1 %2857 }
 0x558   :  { %v3107_v47 = vrot.slane %v3047_v23, 4  ;;  %v3067_v23 = vmax.f32 %v13877_v36, %v14343_v51 }
 0x55a   :  { %v3108_v12 = vsel %vm15541_vm9, %v3107_v47, %v3043_v29 }
 0x55b   :  { %v3112_v41 = vperm.slane %v3108_v12, %v13678_v17  ;;  %v2876_v4 = vpop.permute.xlu0 %2875 }
 0x55c   :  { %v3055_v24 = vmax.f32 %v14203_v25, %v2876_v4 }
 0x55d   :  { %3371 = vst [vmem:[#allocation1] ss:$4 sm:$0xff] %v3112_v41  ;;  %v2908_v60 = vpop.permute.xlu2 %2907 }
 0x55e   :  { %v3115_v6 = vrot.slane %v3055_v24, 4  ;;  %v3071_v5 = vmax.f32 %v14264_v19, %v2908_v60  ;;  %v3075_v19 = vmax.f32 %v13789_v54, %v14294_v46 }
 0x55f   :  { %v14494_v49 = vpop.permute.xlu1 %2905 }
 0x560   :  { %v3116_v38 = vsel %vm15541_vm9, %v3115_v6, %v3051_v57  ;;  %v3131_v14 = vrot.slane %v3071_v5, 4  ;;  %v3091_v6 = vmax.f32 %v13935_v42, %v14367_v0 }
 0x561   :  { %v3120_v47 = vperm.slane %v3116_v38, %v13678_v17 }
 0x562   :  { %v3132_v25 = vsel %vm15541_vm9, %v3131_v14, %v3067_v23 }
 0x563   :  { %3373 = vst [vmem:[#allocation1 + $0x1] ss:$4 sm:$0xff] %v3120_v47  ;;  %v3136_v4 = vperm.slane %v3132_v25, %v13678_v17  ;;  %v2924_v12 = vpop.permute.xlu0 %2923 }
 0x564   :  { %v3079_v28 = vmax.f32 %v14221_v3, %v2924_v12  ;;  %v3059_v3 = vmax.f32 %v15624_v18, %v14303_v48  ;;  %v3099_v18 = vmax.f32 %v13970_v21, %v14316_v59 }
 0x565   :  { %3377 = vst [vmem:[#allocation1 + $0x3] ss:$4 sm:$0xff] %v3136_v4  ;;  %v2956_v24 = vpop.permute.xlu2 %2955  ;;  %v3137_v59 = vrot.slane %v3136_v4, 4 }
 0x566   :  { %v3235_v39 = vrot.slane %v3079_v28, 4  ;;  %v3095_v36 = vmax.f32 %v14284_v11, %v2956_v24  ;;  %v3113_v24 = vrot.slane %v3112_v41, 4 }
 0x567   :  { %v2892_v51 = vpop.permute.xlu1 %2891 }
 0x568   :  { %v3236_v57 = vsel %vm15541_vm9, %v3235_v39, %v3075_v19  ;;  %v3063_v60 = vmax.f32 %v14233_v40, %v2892_v51  ;;  %v3251_v29 = vrot.slane %v3095_v36, 4  ;;  %v3121_v39 = vrot.slane %v3120_v47, 4 }
 0x569   :  { %v14511_v5 = vperm.slane %v3236_v57, %v13678_v17  ;;  %v3138_v47 = vsel %vm15541_vm9, 0.0, %v3137_v59  ;;  %v3076_v59 = vmax.f32 %v13798_v62, %v14378_v31 }
 0x56a   :  { %v3123_v23 = vrot.slane %v3063_v60, 4  ;;  %v3252_v54 = vsel %vm15541_vm9, %v3251_v29, %v3091_v6  ;;  %v3114_v60 = vsel %vm15541_vm9, 0.0, %v3113_v24  ;;  %v3122_v29 = vsel %vm15541_vm9, 0.0, %v3121_v39 }
 0x56b   :  { %3380 = vst [vmem:[#allocation1 + $0x20] ss:$4 sm:$0xff] %v14511_v5  ;;  %v14518_v11 = vperm.slane %v3252_v54, %v13678_v17  ;;  %v2972_v42 = vpop.permute.xlu0 %2971 }
 0x56c   :  { %v3124_v0 = vsel %vm15541_vm9, %v3123_v23, %v3059_v3  ;;  %v3103_v40 = vmax.f32 %v14240_v7, %v2972_v42  ;;  %v3083_v7 = vmax.f32 %v13846_v45, %v14330_v50  ;;  %v3060_v23 = vmax.f32 %v13989_v34, %v14391_v1 }
 0x56d   :  { %v3128_v46 = vperm.slane %v3124_v0, %v13678_v17  ;;  %3384 = vst [vmem:[#allocation1 + $0x22] ss:$4 sm:$0xff] %v14518_v11  ;;  %v2894_v38 = vpop.permute.xlu2 %2893 }
 0x56e   :  { %v3259_v48 = vrot.slane %v3103_v40, 4  ;;  %v3064_v6 = vmax.f32 %v14306_v35, %v2894_v38  ;;  %v3241_v38 = vrot.slane %v14511_v5, 4 }
 0x56f   :  { %3375 = vst [vmem:[#allocation1 + $0x2] ss:$4 sm:$0xff] %v3128_v46  ;;  %v2940_v14 = vpop.permute.xlu1 %2939  ;;  %v3129_v51 = vrot.slane %v3128_v46, 4 }
 0x570   :  { %v3260_v25 = vsel %vm15541_vm9, %v3259_v48, %v3099_v18  ;;  %v3087_v12 = vmax.f32 %v14251_v32, %v2940_v14  ;;  %v3155_v4 = vrot.slane %v3064_v6, 4  ;;  %v3257_v14 = vrot.slane %v14518_v11, 4 }
 0x571   :  { %v3264_v28 = vperm.slane %v3260_v25, %v13678_v17  ;;  %v3130_v41 = vsel %vm15541_vm9, 0.0, %v3129_v51 }
 0x572   :  { %v3243_v19 = vrot.slane %v3087_v12, 4  ;;  %v3156_v0 = vsel %vm15541_vm9, %v3155_v4, %v3060_v23  ;;  %v3258_v11 = vsel %vm15541_vm9, 0.0, %v3257_v14  ;;  %v15655_v14 = vld [vmem:[#allocation23_spill] sm:$0xff] }
 0x573   :  { %3386 = vst [vmem:[#allocation1 + $0x23] ss:$4 sm:$0xff] %v3264_v28  ;;  %v2862_v36 = vpop.permute.xlu0 %2861  ;;  %v14557_v25 = vperm.slane %v3156_v0, %v13678_v17 }
 0x574   :  { %v3244_v21 = vsel %vm15541_vm9, %v3243_v19, %v3083_v7  ;;  %v3048_v3 = vmax.f32 %v14258_v61, %v2862_v36  ;;  %v3052_v61 = vmax.f32 %v13890_v63, %v14354_v30  ;;  %v3265_v7 = vrot.slane %v3264_v28, 4 }
 0x575   :  { %v2942_v57 = vpop.permute.xlu2 %2941  ;;  %v3248_v45 = vperm.slane %v3244_v21, %v13678_v17  ;;  %v3242_v63 = vsel %vm15541_vm9, 0.0, %v3241_v38 }
 0x576   :  { %v14534_v32 = vld.sshfl [vmem:[#allocation1] sm:$0xff pattern:$0x73625140]  ;;  %v3139_v18 = vrot.slane %v3048_v3, 4  ;;  %v3266_v39 = vsel %vm15541_vm9, 0.0, %v3265_v7 }
 0x577   :  { %3398 = vst [vmem:[#allocation1] ss:$4 sm:$0xff] %v3114_v60  ;;  %v2878_v50 = vpop.permute.xlu1 %2877  ;;  %v3249_v34 = vrot.slane %v3248_v45, 4  ;;  %v3092_v60 = vmax.f32 %v14130_v16, %v14388_v13  ;;  %v3100_v16 = vmax.f32 %v14017_v22, %v14406_v26 }
 0x578   :  { %3400 = vst [vmem:[#allocation1 + $0x1] ss:$4 sm:$0xff] %v3122_v29  ;;  %v3056_v35 = vmax.f32 %v14269_v33, %v2878_v50  ;;  %v3044_v33 = vmax.f32 %v14012_v9, %v14340_v55  ;;  %v3088_v9 = vmax.f32 %v14328_v53, %v2942_v57 }
 0x579   :  { %3402 = vst [vmem:[#allocation1 + $0x2] ss:$4 sm:$0xff] %v3130_v41 }
 0x57a   :  { %3404 = vst [vmem:[#allocation1 + $0x3] ss:$4 sm:$0xff] %v3138_v47  ;;  %v3147_v40 = vrot.slane %v3056_v35, 4  ;;  %v3275_v51 = vrot.slane %v3088_v9, 4  ;;  %v15656_v9 = vld [vmem:[#allocation46_spill] sm:$0xff] }
 0x57b   :  { %3382 = vst [vmem:[#allocation1 + $0x21] ss:$4 sm:$0xff] %v3248_v45  ;;  %v2910_v54 = vpop.permute.xlu0 %2909 }
 0x57c   :  { %v3072_v42 = vmax.f32 %v14278_v43, %v2910_v54  ;;  %v3068_v43 = vmax.f32 %v14102_v37, %v14364_v44  ;;  %v3148_v24 = vsel %vm15541_vm9, %v3147_v40, %v3052_v61  ;;  %v3140_v37 = vsel %vm15541_vm9, %v3139_v18, %v3044_v33 }
 0x57d   :  { %v14546_v46 = vpop.permute.xlu2 %2879  ;;  %v3250_v44 = vsel %vm15541_vm9, 0.0, %v3249_v34  ;;  %v3152_v28 = vperm.slane %v3148_v24, %v13678_v17  ;;  %v3144_v36 = vperm.slane %v3140_v37, %v13678_v17  ;;  %v15654_v34 = vld [vmem:[#allocation27_spill] sm:$0xff] }
 0x57e   :  { %v3163_v48 = vrot.slane %v3072_v42, 4  ;;  %v3161_v42 = vrot.slane %v14557_v25, 4  ;;  %v3057_v22 = vmax.f32 %v14352_v8, %v14546_v46 }
 0x57f   :  { %v2926_v1 = vpop.permute.xlu1 %2925  ;;  %v3145_v35 = vrot.slane %v3144_v36, 4  ;;  %v3153_v3 = vrot.slane %v3152_v28, 4 }
 0x580   :  { %v3080_v5 = vmax.f32 %v14289_v52, %v2926_v1  ;;  %v3164_v55 = vsel %vm15541_vm9, %v3163_v48, %v3068_v43  ;;  %v3162_v8 = vsel %vm15541_vm9, 0.0, %v3161_v42  ;;  %v3179_v46 = vrot.slane %v3057_v22, 4 }
 0x581   :  { %v3405_v12 = vld.sshfl [vmem:[#allocation1] sm:$0xff pattern:$0x73625140]  ;;  %v3168_v21 = vperm.slane %v3164_v55, %v13678_v17  ;;  %v3146_v18 = vsel %vm15541_vm9, 0.0, %v3145_v35  ;;  %v3154_v33 = vsel %vm15541_vm9, 0.0, %v3153_v3 }
 0x582   :  { %v14563_v30 = vld.sshfl [vmem:[#allocation1 + $0x20] sm:$0xff pattern:$0x73625140]  ;;  %3433 = vst [vmem:[#allocation1 + $0x2] ss:$4 sm:$0xff] %v14557_v25  ;;  %v3267_v53 = vrot.slane %v3080_v5, 4  ;;  %v3053_v25 = vmax.f32 %v15655_v14, %v14446_v20 }
 0x583   :  { %3407 = vst [vmem:[#allocation1 + $0x20] ss:$4 sm:$0xff] %v3242_v63  ;;  %v2958_v52 = vpop.permute.xlu0 %2957  ;;  %v15657_v63 = vld [vmem:[#allocation25_spill] sm:$0xff]  ;;  %v15658_v55 = vld [vmem:[#allocation31_spill] sm:$0xff] }
 0x584   :  { %3409 = vst [vmem:[#allocation1 + $0x21] ss:$4 sm:$0xff] %v3250_v44  ;;  %v3096_v19 = vmax.f32 %v14298_v15, %v2958_v52  ;;  %v3084_v15 = vmax.f32 %v14054_v2, %v14423_v10  ;;  %v3268_v45 = vsel %vm15541_vm9, %v3267_v53, %v3076_v59  ;;  %v3169_v10 = vrot.slane %v3168_v21, 4  ;;  %v15659_v52 = vld [vmem:[#allocation49_spill] sm:$0xff]  ;;  %v15661_v53 = vld [vmem:[#allocation54_spill] sm:$0xff] }
 0x585   :  { %3411 = vst [vmem:[#allocation1 + $0x22] ss:$4 sm:$0xff] %v3258_v11  ;;  %v14577_v57 = vpop.permute.xlu2 %2927  ;;  %v3272_v47 = vperm.slane %v3268_v45, %v13678_v17  ;;  %v15660_v11 = vld [vmem:[#allocation32_spill] sm:$0xff] }
 0x586   :  { %3413 = vst [vmem:[#allocation1 + $0x23] ss:$4 sm:$0xff] %v3266_v39  ;;  %v3283_v6 = vrot.slane %v3096_v19, 4  ;;  %v3276_v41 = vsel %vm15541_vm9, %v3275_v51, %v3084_v15  ;;  %v3170_v0 = vsel %vm15541_vm9, 0.0, %v3169_v10  ;;  %v15662_v19 = vld [vmem:[#allocation34_spill] sm:$0xff]  ;;  %v15665_v10 = vld [vmem:[#allocation37_spill] sm:$0xff] }
 0x587   :  { %3429 = vst [vmem:[#allocation1] ss:$4 sm:$0xff] %v3144_v36  ;;  %v2974_v29 = vpop.permute.xlu1 %2973  ;;  %v14591_v2 = vperm.slane %v3276_v41, %v13678_v17  ;;  %v3069_v39 = vmax.f32 %v15662_v19, %v15661_v53  ;;  %v3273_v36 = vrot.slane %v3272_v47, 4 }
 0x588   :  { %3431 = vst [vmem:[#allocation1 + $0x1] ss:$4 sm:$0xff] %v3152_v28  ;;  %v3104_v50 = vmax.f32 %v14311_v56, %v2974_v29  ;;  %v3284_v62 = vsel %vm15541_vm9, %v3283_v6, %v3092_v60  ;;  %v3045_v28 = vmax.f32 %v15660_v11, %v15659_v52  ;;  %v15663_v29 = vld [vmem:[#allocation39_spill] sm:$0xff] }
 0x589   :  { %3435 = vst [vmem:[#allocation1 + $0x3] ss:$4 sm:$0xff] %v3168_v21  ;;  %v14594_v13 = vperm.slane %v3284_v62, %v13678_v17  ;;  %v3281_v20 = vrot.slane %v14591_v2, 4  ;;  %v3081_v45 = vmax.f32 %v15663_v29, %v14577_v57 }
 0x58a   :  { %v3291_v31 = vrot.slane %v3104_v50, 4 }
 0x58b   :  { %v2896_v4 = vpop.permute.xlu0 %2895  ;;  %v3289_v15 = vrot.slane %v14594_v13, 4  ;;  %v3282_v35 = vsel %vm15541_vm9, 0.0, %v3281_v20  ;;  %v15675_v20 = vld [vmem:[#allocation48_spill] sm:$0xff] }
 0x58c   :  { %v3292_v23 = vsel %vm15541_vm9, %v3291_v31, %v3100_v16  ;;  %v3065_v61 = vmax.f32 %v14322_v58, %v2896_v4  ;;  %v3061_v58 = vmax.f32 %v15657_v63, %v15656_v9  ;;  %v15664_v31 = vld [vmem:[#allocation43_spill] sm:$0xff]  ;;  %v3274_v16 = vsel %vm15541_vm9, 0.0, %v3273_v36  ;;  %v15674_v9 = vld [vmem:[#allocation24_spill] sm:$0xff] }
 0x58d   :  { %v3414_v56 = vld.sshfl [vmem:[#allocation1 + $0x20] sm:$0xff pattern:$0x73625140]  ;;  %v2976_v38 = vpop.permute.xlu2 %2975  ;;  %v3296_v48 = vperm.slane %v3292_v23, %v13678_v17  ;;  %v3290_v23 = vsel %vm15541_vm9, 0.0, %v3289_v15 }
 0x58e   :  { %3440 = vst [vmem:[#allocation1 + $0x21] ss:$4 sm:$0xff] %v14591_v2  ;;  %v12448_v54 = vpack.i.bf16 %v3414_v56, %v3405_v12  ;;  %v3187_v5 = vrot.slane %v3065_v61, 4  ;;  %v3180_v12 = vsel %vm15541_vm9, %v3179_v46, %v3053_v25  ;;  %v15669_v61 = vld [vmem:[#allocation60_spill] sm:$0xff]  ;;  %v15676_v15 = vld [vmem:[#allocation38_spill] sm:$0xff] }
 0x58f   :  { %3438 = vst [vmem:[#allocation1 + $0x20] ss:$4 sm:$0xff] %v3272_v47  ;;  %v2864_v26 = vpop.permute.xlu1 %2863  ;;  %v3297_v37 = vrot.slane %v3296_v48, 4  ;;  %v14622_v51 = vperm.slane %v3180_v12, %v13678_v17  ;;  %v3105_v47 = vmax.f32 %v15664_v31, %v2976_v38 }
 0x590   :  { %v3436_v40 = vld.sshfl [vmem:[#allocation1] sm:$0xff pattern:$0x73625140]  ;;  %3442 = vst [vmem:[#allocation1 + $0x22] ss:$4 sm:$0xff] %v14594_v13  ;;  %12449 = vrot.lane.b32.xlu0 %v12448_v54, %s12637_s0  ;;  %v3049_v1 = vmax.f32 %v15654_v34, %v2864_v26  ;;  %v3188_v21 = vsel %vm15541_vm9, %v3187_v5, %v3061_v58  ;;  %v3299_v54 = vrot.slane %v3081_v45, 4 }
 0x591   :  { %3466 = vst [vmem:[#allocation1 + $0x3] ss:$4 sm:$0xff] %v3170_v0  ;;  %v3298_v41 = vsel %vm15541_vm9, 0.0, %v3297_v37  ;;  %v3192_v2 = vperm.slane %v3188_v21, %v13678_v17  ;;  %v3323_v26 = vrot.slane %v3105_v47, 4  ;;  %v15666_v0 = vld [vmem:[#allocation40_spill] sm:$0xff]  ;;  %v15671_v34 = vld [vmem:[#allocation51_spill] sm:$0xff] }
 0x592   :  { %3460 = vst [vmem:[#allocation1] ss:$4 sm:$0xff] %v3146_v18  ;;  %v3171_v7 = vrot.slane %v3049_v1, 4  ;;  %v15668_v18 = vld [vmem:[#allocation22_spill] sm:$0xff]  ;;  %v15672_v1 = vld [vmem:[#allocation29_spill] sm:$0xff]  ;;  %v15677_v47 = vld [vmem:[#allocation44_spill] sm:$0xff] }
 0x593   :  { %3462 = vst [vmem:[#allocation1 + $0x1] ss:$4 sm:$0xff] %v3154_v33  ;;  %v2944_v43 = vpop.permute.xlu0 %2943 }
 0x594   :  { %3464 = vst [vmem:[#allocation1 + $0x2] ss:$4 sm:$0xff] %v3162_v8  ;;  %v3172_v50 = vsel %vm15541_vm9, %v3171_v7, %v3045_v28  ;;  %v3089_v13 = vmax.f32 %v15665_v10, %v2944_v43  ;;  %v15670_v8 = vld [vmem:[#allocation36_spill] sm:$0xff]  ;;  %v3085_v43 = vmax.f32 %v15672_v1, %v15671_v34  ;;  %v3193_v28 = vrot.slane %v3192_v2, 4 }
 0x595   :  { %3444 = vst [vmem:[#allocation1 + $0x23] ss:$4 sm:$0xff] %v3296_v48  ;;  %v14625_v6 = vpop.permute.xlu2 %2865  ;;  %v3176_v3 = vperm.slane %v3172_v50, %v13678_v17  ;;  %v3101_v46 = vmax.f32 %v15670_v8, %v15669_v61  ;;  %v15684_v61 = vld [vmem:[#allocation30_spill] sm:$0xff] }
 0x596   :  { %v3307_v33 = vrot.slane %v3089_v13, 4  ;;  %v3050_v21 = vmax.f32 %v15675_v20, %v14625_v6  ;;  %v15679_v13 = vld [vmem:[#allocation53_spill] sm:$0xff]  ;;  %v3070_v8 = vmax.f32 %v15684_v61, %v14494_v49 }
 0x597   :  { %v2912_v24 = vpop.permute.xlu1 %2911  ;;  %v3324_v25 = vsel %vm15541_vm9, %v3323_v26, %v3101_v46  ;;  %v3177_v37 = vrot.slane %v3176_v3, 4 }
 0x598   :  { %v3073_v44 = vmax.f32 %v15658_v55, %v2912_v24  ;;  %v3308_v7 = vsel %vm15541_vm9, %v3307_v33, %v3085_v43  ;;  %v15673_v24 = vld [vmem:[#allocation58_spill] sm:$0xff]  ;;  %v3185_v55 = vrot.slane %v14622_v51, 4  ;;  %v3328_v52 = vperm.slane %v3324_v25, %v13678_v17  ;;  %v15685_v25 = vld [vmem:[#allocation41_spill] sm:$0xff] }
 0x599   :  { %v3093_v63 = vmax.f32 %v15674_v9, %v15673_v24  ;;  %v3312_v53 = vperm.slane %v3308_v7, %v13678_v17  ;;  %v3203_v31 = vrot.slane %v3050_v21, 4  ;;  %v15689_v21 = vld [vmem:[#allocation59_spill] sm:$0xff] }
 0x59a   :  { %v3195_v59 = vrot.slane %v3073_v44, 4  ;;  %v3186_v45 = vsel %vm15541_vm9, 0.0, %v3185_v55  ;;  %v3329_v43 = vrot.slane %v3328_v52, 4 }
 0x59b   :  { %v14627_v60 = vld.sshfl [vmem:[#allocation1] sm:$0xff pattern:$0x73625140]  ;;  %v2882_v57 = vpop.permute.xlu0 %2881  ;;  %v3313_v33 = vrot.slane %v3312_v53, 4 }
 0x59c   :  { %3493 = vst [vmem:[#allocation1 + $0x1] ss:$4 sm:$0xff] %v14622_v51  ;;  %v3445_v62 = vld.sshfl [vmem:[#allocation1 + $0x20] sm:$0xff pattern:$0x73625140]  ;;  %v3196_v4 = vsel %vm15541_vm9, %v3195_v59, %v3069_v39  ;;  %v3178_v59 = vsel %vm15541_vm9, 0.0, %v3177_v37  ;;  %v3058_v29 = vmax.f32 %v15676_v15, %v2882_v57 }
 0x59d   :  { %3475 = vst [vmem:[#allocation1 + $0x23] ss:$4 sm:$0xff] %v3298_v41  ;;  %v12453_v56 = vpack.i.bf16 %v3445_v62, %v3436_v40  ;;  %v3200_v42 = vperm.slane %v3196_v4, %v13678_v17  ;;  %v15667_v40 = vld [vmem:[#allocation56_spill] sm:$0xff]  ;;  %v2914_v12 = vpop.permute.xlu2 %2913  ;;  %v3194_v41 = vsel %vm15541_vm9, 0.0, %v3193_v28  ;;  %v15680_v57 = vld [vmem:[#allocation55_spill] sm:$0xff]  ;;  %v3314_v9 = vsel %vm15541_vm9, 0.0, %v3313_v33 }
 0x59e   :  { %3469 = vst [vmem:[#allocation1 + $0x20] ss:$4 sm:$0xff] %v3274_v16  ;;  %v3077_v48 = vmax.f32 %v15668_v18, %v15667_v40  ;;  %v3211_v6 = vrot.slane %v3058_v29, 4  ;;  %v15682_v40 = vld [vmem:[#allocation61_spill] sm:$0xff]  ;;  %v15683_v18 = vld [vmem:[#allocation35_spill] sm:$0xff] }
 0x59f   :  { %3471 = vst [vmem:[#allocation1 + $0x21] ss:$4 sm:$0xff] %v3282_v35  ;;  %12454 = vrot.lane.b32.xlu2 %v12453_v56, %s12632_s27  ;;  %v2960_v22 = vpop.permute.xlu1 %2959  ;;  %v3201_v36 = vrot.slane %v3200_v42, 4  ;;  %v3074_v56 = vmax.f32 %v15679_v13, %v2914_v12  ;;  %v15681_v35 = vld [vmem:[#allocation28_spill] sm:$0xff]  ;;  %v15686_v37 = vld [vmem:[#allocation47_spill] sm:$0xff] }
 0x5a0   :  { %3473 = vst [vmem:[#allocation1 + $0x22] ss:$4 sm:$0xff] %v3290_v23  ;;  %v3097_v38 = vmax.f32 %v15666_v0, %v2960_v22  ;;  %v3300_v14 = vsel %vm15541_vm9, %v3299_v54, %v3077_v48  ;;  %v3062_v48 = vmax.f32 %v15683_v18, %v15682_v40 }
 0x5a1   :  { %3495 = vst [vmem:[#allocation1 + $0x2] ss:$4 sm:$0xff] %v3192_v2  ;;  %v3304_v58 = vperm.slane %v3300_v14, %v13678_v17  ;;  %v3202_v62 = vsel %vm15541_vm9, 0.0, %v3201_v36  ;;  %v15678_v2 = vld [vmem:[#allocation33_spill] sm:$0xff] }
 0x5a2   :  { %3491 = vst [vmem:[#allocation1] ss:$4 sm:$0xff] %v3176_v3  ;;  %v3315_v5 = vrot.slane %v3097_v38, 4  ;;  %v3046_v10 = vmax.f32 %v15678_v2, %v14484_v27  ;;  %v3054_v3 = vmax.f32 %v15681_v35, %v15680_v57  ;;  %v3227_v38 = vrot.slane %v3074_v56, 4  ;;  %v15693_v2 = vld [vmem:[#allocation52_spill] sm:$0xff] }
 0x5a3   :  { %3497 = vst [vmem:[#allocation1 + $0x3] ss:$4 sm:$0xff] %v3200_v42  ;;  %v2930_v11 = vpop.permute.xlu0 %2929  ;;  %v3305_v0 = vrot.slane %v3304_v58, 4 }
 0x5a4   :  { %v3316_v19 = vsel %vm15541_vm9, %v3315_v5, %v3093_v63  ;;  %v3204_v23 = vsel %vm15541_vm9, %v3203_v31, %v3046_v10  ;;  %v3212_v42 = vsel %vm15541_vm9, %v3211_v6, %v3054_v3  ;;  %v3082_v5 = vmax.f32 %v15685_v25, %v2930_v11  ;;  %v15692_v6 = vld [vmem:[#allocation45_spill] sm:$0xff] }
 0x5a5   :  { %v3320_v50 = vperm.slane %v3316_v19, %v13678_v17  ;;  %v2962_v16 = vpop.permute.xlu2 %2961  ;;  %v3208_v27 = vperm.slane %v3204_v23, %v13678_v17  ;;  %v3216_v34 = vperm.slane %v3212_v42, %v13678_v17  ;;  %v3306_v7 = vsel %vm15541_vm9, 0.0, %v3305_v0 }
 0x5a6   :  { %v3228_v24 = vsel %vm15541_vm9, %v3227_v38, %v3070_v8  ;;  %v3331_v28 = vrot.slane %v3082_v5, 4 }
 0x5a7   :  { %v14659_v44 = vld.sshfl [vmem:[#allocation1 + $0x20] sm:$0xff pattern:$0x73625140]  ;;  %v2898_v39 = vpop.permute.xlu1 %2897  ;;  %v3321_v1 = vrot.slane %v3320_v50, 4  ;;  %v3232_v11 = vperm.slane %v3228_v24, %v13678_v17  ;;  %v3209_v56 = vrot.slane %v3208_v27, 4  ;;  %v3217_v3 = vrot.slane %v3216_v34, 4 }
 0x5a8   :  { %3500 = vst [vmem:[#allocation1 + $0x20] ss:$4 sm:$0xff] %v3304_v58  ;;  %v3066_v4 = vmax.f32 %v15677_v47, %v2898_v39  ;;  %v15688_v39 = vld [vmem:[#allocation42_spill] sm:$0xff]  ;;  %v12468_v61 = vpack.i.bf16 %v14659_v44, %v14627_v60 }
 0x5a9   :  { %3506 = vst [vmem:[#allocation1 + $0x23] ss:$4 sm:$0xff] %v3328_v52  ;;  %v3322_v63 = vsel %vm15541_vm9, 0.0, %v3321_v1  ;;  %v3330_v52 = vsel %vm15541_vm9, 0.0, %v3329_v43  ;;  %v3233_v42 = vrot.slane %v3232_v11, 4  ;;  %v3210_v40 = vsel %vm15541_vm9, 0.0, %v3209_v56 }
 0x5aa   :  { %3502 = vst [vmem:[#allocation1 + $0x21] ss:$4 sm:$0xff] %v3312_v53  ;;  %v14667_v51 = vld.sshfl [vmem:[#allocation1] sm:$0xff pattern:$0x73625140]  ;;  %v3219_v22 = vrot.slane %v3066_v4, 4 }
 0x5ab   :  { %3518 = vst [vmem:[#allocation1] ss:$4 sm:$0xff] %v3178_v59  ;;  %v2978_v54 = vpop.permute.xlu0 %2977  ;;  %v15687_v53 = vld [vmem:[#allocation50_spill] sm:$0xff] }
 0x5ac   :  { %3520 = vst [vmem:[#allocation1 + $0x1] ss:$4 sm:$0xff] %v3186_v45  ;;  %v3220_v12 = vsel %vm15541_vm9, %v3219_v22, %v3062_v48  ;;  %v3106_v55 = vmax.f32 %v15686_v37, %v2978_v54  ;;  %v15690_v59 = vld [vmem:[#allocation26_spill] sm:$0xff]  ;;  %v15691_v45 = vld [vmem:[#allocation57_spill] sm:$0xff]  ;;  %v3218_v48 = vsel %vm15541_vm9, 0.0, %v3217_v3 }
 0x5ad   :  { %3522 = vst [vmem:[#allocation1 + $0x2] ss:$4 sm:$0xff] %v3194_v41  ;;  %v2970_v49 = vpop.permute.xlu2 %2969  ;;  %v3224_v58 = vperm.slane %v3220_v12, %v13678_v17  ;;  %v3078_v15 = vmax.f32 %v15690_v59, %v15689_v21  ;;  %v12076_v21 = vld [vmem:[#allocation7 + $0x5cc] sm:$0xf0]  ;;  %v9679_v59 = vld [vmem:[#allocation7 + $0x3c0] sm:$0xf] }
 0x5ae   :  { %3524 = vst [vmem:[#allocation1 + $0x3] ss:$4 sm:$0xff] %v3202_v62  ;;  %v3102_v36 = vmax.f32 %v15688_v39, %v2970_v49  ;;  %v3355_v41 = vrot.slane %v3106_v55, 4  ;;  %v9951_v49 = vld [vmem:[#allocation7 + $0x5e0] sm:$0xf] }
 0x5af   :  { %3504 = vst [vmem:[#allocation1 + $0x22] ss:$4 sm:$0xff] %v3320_v50  ;;  %v2946_v26 = vpop.permute.xlu1 %2945  ;;  %v3098_v50 = vmax.f32 %v15691_v45, %v2962_v16  ;;  %v3332_v62 = vsel %vm15541_vm9, %v3331_v28, %v3078_v15  ;;  %v3225_v13 = vrot.slane %v3224_v58, 4  ;;  %v12016_v55 = vld [vmem:[#allocation7 + $0x3ec] sm:$0xf0] }
 0x5b0   :  { %v3090_v19 = vmax.f32 %v15687_v53, %v2946_v26  ;;  %v3356_v4 = vsel %vm15541_vm9, %v3355_v41, %v3102_v36  ;;  %v3336_v57 = vperm.slane %v3332_v62, %v13678_v17  ;;  %v12014_v39 = vld [vmem:[#allocation7 + $0x3e4] sm:$0xf]  ;;  %v9697_v36 = vld [vmem:[#allocation7 + $0x3f0] sm:$0xf0]  ;;  %v12012_v15 = vld [vmem:[#allocation7 + $0x3cc] sm:$0xf0] }
 0x5b1   :  { %v3347_v35 = vrot.slane %v3098_v50, 4  ;;  %v3360_v54 = vperm.slane %v3356_v4, %v13678_v17  ;;  %v3226_v0 = vsel %vm15541_vm9, 0.0, %v3225_v13  ;;  %v9680_v50 = vor.u32 %v12012_v15, %v9679_v59  ;;  %v9807_v41 = vld [vmem:[#allocation7 + $0x4c0] sm:$0xf]  ;;  %v12044_v62 = vld [vmem:[#allocation7 + $0x4cc] sm:$0xf0] }
 0x5b2   :  { %v3339_v31 = vrot.slane %v3090_v19, 4  ;;  %v9919_v4 = vld [vmem:[#allocation7 + $0x5a0] sm:$0xf]  ;;  %v12036_v15 = vld [vmem:[#allocation7 + $0x48c] sm:$0xf0] }
 0x5b3   :  { %v2938_v20 = vpop.permute.xlu0 %2937  ;;  %v3361_v1 = vrot.slane %v3360_v54, 4  ;;  %v9775_v59 = vld [vmem:[#allocation7 + $0x480] sm:$0xf] }
 0x5b4   :  { %v3086_v47 = vmax.f32 %v15692_v6, %v2938_v20  ;;  %v9935_v20 = vld [vmem:[#allocation7 + $0x5c0] sm:$0xf]  ;;  %v9808_v6 = vor.u32 %v12044_v62, %v9807_v41  ;;  %v9649_v41 = vld [vmem:[#allocation7 + $0x390] sm:$0xf0] }
 0x5b5   :  { %v3525_v46 = vld.sshfl [vmem:[#allocation1] sm:$0xff pattern:$0x73625140]  ;;  %v3362_v24 = vsel %vm15541_vm9, 0.0, %v3361_v1  ;;  %v9936_v45 = vor.u32 %v12076_v21, %v9935_v20  ;;  %v9887_v62 = vld [vmem:[#allocation7 + $0x560] sm:$0xf] }
 0x5b6   :  { %3549 = vst [vmem:[#allocation1] ss:$4 sm:$0xff] %v3208_v27  ;;  %v14688_v14 = vld.sshfl [vmem:[#allocation1 + $0x20] sm:$0xff pattern:$0x73625140]  ;;  %v3340_v16 = vsel %vm15541_vm9, %v3339_v31, %v3086_v47  ;;  %v3234_v27 = vsel %vm15541_vm9, 0.0, %v3233_v42 }
 0x5b7   :  { %3551 = vst [vmem:[#allocation1 + $0x1] ss:$4 sm:$0xff] %v3216_v34  ;;  %v2954_v29 = vpop.permute.xlu1 %2953  ;;  %v3344_v18 = vperm.slane %v3340_v16, %v13678_v17  ;;  %v12010_v31 = vld [vmem:[#allocation7 + $0x3c4] sm:$0xf]  ;;  %v9681_v47 = vld [vmem:[#allocation7 + $0x3d0] sm:$0xf0] }
 0x5b8   :  { %3527 = vst [vmem:[#allocation1 + $0x20] ss:$4 sm:$0xff] %v3306_v7  ;;  %v3094_v10 = vmax.f32 %v15693_v2, %v2954_v29  ;;  %v9700_v29 = vor.u32 %v12014_v39, %v9697_v36  ;;  %v12072_v2 = vld [vmem:[#allocation7 + $0x5ac] sm:$0xf0]  ;;  %v9684_v13 = vor.u32 %v12010_v31, %v9681_v47  ;;  %v9647_v36 = vld [vmem:[#allocation7 + $0x380] sm:$0xf] }
 0x5b9   :  { %3529 = vst [vmem:[#allocation1 + $0x21] ss:$4 sm:$0xff] %v3314_v9  ;;  %v3345_v34 = vrot.slane %v3344_v18, 4  ;;  %v12068_v39 = vld [vmem:[#allocation7 + $0x58c] sm:$0xf0] }
 0x5ba   :  { %3531 = vst [vmem:[#allocation1 + $0x22] ss:$4 sm:$0xff] %v3322_v63  ;;  %v3348_v22 = vsel %vm15541_vm9, %v3347_v35, %v3094_v10  ;;  %v12080_v63 = vld [vmem:[#allocation7 + $0x5ec] sm:$0xf0]  ;;  %4465 = vmatpush.bf16.msrb.mxu3 %v9700_v29  ;;  %v9631_v47 = vld [vmem:[#allocation7 + $0x360] sm:$0xf] }
 0x5bb   :  { %3533 = vst [vmem:[#allocation1 + $0x23] ss:$4 sm:$0xff] %v3330_v52  ;;  %v3352_v33 = vperm.slane %v3348_v22, %v13678_v17  ;;  %v3346_v7 = vsel %vm15541_vm9, 0.0, %v3345_v34  ;;  %v9952_v37 = vor.u32 %v12080_v63, %v9951_v49  ;;  %v9823_v52 = vld [vmem:[#allocation7 + $0x4e0] sm:$0xf] }
 0x5bc   :  { %3555 = vst [vmem:[#allocation1 + $0x3] ss:$4 sm:$0xff] %v3232_v11  ;;  %v12048_v11 = vld [vmem:[#allocation7 + $0x4ec] sm:$0xf0]  ;;  %v9663_v49 = vld [vmem:[#allocation7 + $0x3a0] sm:$0xf] }
 0x5bd   :  { %3553 = vst [vmem:[#allocation1 + $0x2] ss:$4 sm:$0xff] %v3224_v58  ;;  %v3353_v8 = vrot.slane %v3352_v33, 4  ;;  %v9695_v58 = vld [vmem:[#allocation7 + $0x3e0] sm:$0xf]  ;;  %v9824_v19 = vor.u32 %v12048_v11, %v9823_v52  ;;  %4451 = vmatpush.bf16.msrb.mxu2 %v9952_v37 }
 0x5be   :  { %v9696_v53 = vor.u32 %v12016_v55, %v9695_v58  ;;  %4466 = vmatpush.bf16.msrb.mxu3 %v9684_v13  ;;  %v12008_v63 = vld [vmem:[#allocation7 + $0x3ac] sm:$0xf0]  ;;  %v9791_v58 = vld [vmem:[#allocation7 + $0x4a0] sm:$0xf]  ;;  %v12006_v52 = vld [vmem:[#allocation7 + $0x3a4] sm:$0xf] }
 0x5bf   :  { %v3354_v43 = vsel %vm15541_vm9, 0.0, %v3353_v8  ;;  %4437 = vmatpush.bf16.msrb.mxu1 %v9824_v19  ;;  %v9664_v37 = vor.u32 %v12008_v63, %v9663_v49  ;;  %v12040_v55 = vld [vmem:[#allocation7 + $0x4ac] sm:$0xf0]  ;;  %v9665_v11 = vld [vmem:[#allocation7 + $0x3b0] sm:$0xf0] }
 0x5c0   :  { %4423 = vmatpush.bf16.msrb.mxu0 %v9696_v53  ;;  %v9668_v53 = vor.u32 %v12006_v52, %v9665_v11  ;;  %v9903_v19 = vld [vmem:[#allocation7 + $0x580] sm:$0xf]  ;;  %v12004_v21 = vld [vmem:[#allocation7 + $0x38c] sm:$0xf0]  ;;  %v12046_v52 = vld [vmem:[#allocation7 + $0x4e4] sm:$0xf] }
 0x5c1   :  { %4452 = vmatpush.bf16.msrb.mxu2 %v9936_v45  ;;  %v9904_v20 = vor.u32 %v12068_v39, %v9903_v19  ;;  %v9648_v29 = vor.u32 %v12004_v21, %v9647_v36  ;;  %v9776_v45 = vor.u32 %v12036_v15, %v9775_v59  ;;  %v12032_v13 = vld [vmem:[#allocation7 + $0x46c] sm:$0xf0]  ;;  %v9711_v49 = vld [vmem:[#allocation7 + $0x400] sm:$0xf]  ;;  %v9953_v19 = vld [vmem:[#allocation7 + $0x5f0] sm:$0xf0] }
 0x5c2   :  { %v3534_v23 = vld.sshfl [vmem:[#allocation1 + $0x20] sm:$0xff pattern:$0x73625140]  ;;  %4467 = vmatpush.bf16.msrb.mxu3 %v9668_v53  ;;  %v12078_v53 = vld [vmem:[#allocation7 + $0x5e4] sm:$0xf] }
 0x5c3   :  { %3558 = vst [vmem:[#allocation1 + $0x20] ss:$4 sm:$0xff] %v3336_v57  ;;  %v12458_v26 = vpack.i.bf16 %v3534_v23, %v3525_v46  ;;  %v3337_v46 = vrot.slane %v3336_v57, 4  ;;  %v9920_v57 = vor.u32 %v12072_v2, %v9919_v4  ;;  %4438 = vmatpush.bf16.msrb.mxu1 %v9808_v6  ;;  %v12064_v6 = vld [vmem:[#allocation7 + $0x56c] sm:$0xf0] }
 0x5c4   :  { %v3556_v38 = vld.sshfl [vmem:[#allocation1] sm:$0xff pattern:$0x73625140]  ;;  %3564 = vst [vmem:[#allocation1 + $0x23] ss:$4 sm:$0xff] %v3360_v54  ;;  %4424 = vmatpush.bf16.msrb.mxu0 %v9680_v50  ;;  %v9888_v2 = vor.u32 %v12064_v6, %v9887_v62 }
 0x5c5   :  { %3584 = vst [vmem:[#allocation1 + $0x2] ss:$4 sm:$0xff] %v3226_v0  ;;  %12459 = vrot.lane.b32.xlu1 %v12458_v26, %s12637_s0  ;;  %v3338_v5 = vsel %vm15541_vm9, 0.0, %v3337_v46  ;;  %vm3603_vm9 = vcmask 261120   ;;  %4453 = vmatpush.bf16.msrb.mxu2 %v9920_v57  ;;  %v12002_v50 = vld [vmem:[#allocation7 + $0x384] sm:$0xf] }
 0x5c6   :  { %3580 = vst [vmem:[#allocation1] ss:$4 sm:$0xff] %v3210_v40  ;;  %v9652_v31 = vor.u32 %v12002_v50, %v9649_v41  ;;  %v12000_v4 = vld [vmem:[#allocation7 + $0x36c] sm:$0xf0]  ;;  %v9831_v36 = vld [vmem:[#allocation7 + $0x4e8] sm:$0xf] }
 0x5c7   :  { %3582 = vst [vmem:[#allocation1 + $0x1] ss:$4 sm:$0xff] %v3218_v48  ;;  %v9632_v57 = vor.u32 %v12000_v4, %v9631_v47  ;;  %v12020_v63 = vld [vmem:[#allocation7 + $0x40c] sm:$0xf0]  ;;  %v9687_v50 = vld [vmem:[#allocation7 + $0x3c8] sm:$0xf] }
 0x5c8   :  { %3586 = vst [vmem:[#allocation1 + $0x3] ss:$4 sm:$0xff] %v3234_v27  ;;  %4425 = vmatpush.bf16.msrb.mxu0 %v9664_v37  ;;  %4468 = vmatpush.bf16.msrb.mxu3 %v9652_v31  ;;  %v11986_v37 = vld [vmem:[#allocation7 + $0x304] sm:$0xf]  ;;  %v9712_v21 = vor.u32 %v12020_v63, %v9711_v49  ;;  %v12013_v41 = vld [vmem:[#allocation7 + $0x3d4] sm:$0xf0] }
 0x5c9   :  { %3560 = vst [vmem:[#allocation1 + $0x21] ss:$4 sm:$0xff] %v3344_v18  ;;  %4454 = vmatpush.bf16.msrb.mxu2 %v9904_v20  ;;  %v12049_v20 = vld [vmem:[#allocation7 + $0x4f4] sm:$0xf0]  ;;  %v12042_v62 = vld [vmem:[#allocation7 + $0x4c4] sm:$0xf]  ;;  %v9688_v31 = vor.u32 %v12013_v41, %v9687_v50 }
 0x5ca   :  { %3562 = vst [vmem:[#allocation1 + $0x22] ss:$4 sm:$0xff] %v3352_v33  ;;  %v9809_v6 = vld [vmem:[#allocation7 + $0x4d0] sm:$0xf0]  ;;  %v12074_v47 = vld [vmem:[#allocation7 + $0x5c4] sm:$0xf] }
 0x5cb   :  { %v9937_v4 = vld [vmem:[#allocation7 + $0x5d0] sm:$0xf0] }
 0x5cc   :  { %4426 = vmatpush.bf16.msrb.mxu0 %v9648_v29  ;;  %v9956_v29 = vor.u32 %v12078_v53, %v9953_v19  ;;  %v9889_v63 = vld [vmem:[#allocation7 + $0x570] sm:$0xf0]  ;;  %v12026_v53 = vld [vmem:[#allocation7 + $0x444] sm:$0xf] }
 0x5cd   :  { %12469 = vrot.lane.b32.xlu1 %v12468_v61, %s12639_s2  ;;  %4455 = vmatpush.bf16.msrb.mxu2 %v9888_v2  ;;  %v9812_v2 = vor.u32 %v12042_v62, %v9809_v6  ;;  %v12022_v62 = vld [vmem:[#allocation7 + $0x424] sm:$0xf]  ;;  %v9729_v6 = vld [vmem:[#allocation7 + $0x430] sm:$0xf0] }
 0x5cf   :  { %v3587_v60 = vld.sshfl [vmem:[#allocation1] sm:$0xff pattern:$0x73625140] }
 0x5d0   :  { %4427 = vmatpush.bf16.msrb.mxu0 %v9632_v57  ;;  %v9671_v57 = vld [vmem:[#allocation7 + $0x3a8] sm:$0xf] }
 0x5d1   :  { %v3565_v25 = vld.sshfl [vmem:[#allocation1 + $0x20] sm:$0xff pattern:$0x73625140] }
 0x5d2   :  { %3593 = vst [vmem:[#allocation1 + $0x22] ss:$4 sm:$0xff] %v3354_v43  ;;  %v12463_v12 = vpack.i.bf16 %v3565_v25, %v3556_v38 }
 0x5d3   :  { %3589 = vst [vmem:[#allocation1 + $0x20] ss:$4 sm:$0xff] %v3338_v5 }
 0x5d4   :  { %3591 = vst [vmem:[#allocation1 + $0x21] ss:$4 sm:$0xff] %v3346_v7  ;;  %12464 = vrot.lane.b32.xlu0 %v12463_v12, %s12632_s27 }
 0x5d5   :  { %3595 = vst [vmem:[#allocation1 + $0x23] ss:$4 sm:$0xff] %v3362_v24 }
 0x5dc   :  { %v3596_v44 = vld.sshfl [vmem:[#allocation1 + $0x20] sm:$0xff pattern:$0x73625140] }
 0x5dd   :  { %v12473_v9 = vpack.i.bf16 %v3596_v44, %v3587_v60 }
 0x5df   :  { %12474 = vrot.lane.b32.xlu2 %v12473_v9, %s12639_s2 }
 0x5f9   :  { %v12455_v10 = vpop.permute.xlu2 %12454 }
 0x5fa   :  { %v12457_v42 = vunpack.i.h.bf16 %v12455_v10  ;;  %v12456_v48 = vunpack.i.l.bf16 %v12455_v10  ;;  %v9759_v10 = vld [vmem:[#allocation7 + $0x460] sm:$0xf] }
 0x602   :  { %v12450_v56 = vpop.permute.xlu0 %12449 }
 0x603   :  { %v12452_v35 = vunpack.i.h.bf16 %v12450_v56  ;;  %v12451_v3 = vunpack.i.l.bf16 %v12450_v56  ;;  %v11998_v56 = vld [vmem:[#allocation7 + $0x364] sm:$0xf] }
 0x605   :  { %v3605_v22 = vsel %vm3603_vm9, %v14563_v30, %v12452_v35  ;;  %v3604_v0 = vsel %vm3603_vm9, %v14534_v32, %v12451_v3  ;;  %v9633_v35 = vld [vmem:[#allocation7 + $0x370] sm:$0xf0]  ;;  %v9871_v3 = vld [vmem:[#allocation7 + $0x540] sm:$0xf] }
 0x606   :  { %v3608_v34 = vsel %vm3606_vm11, %v3605_v22, %v12457_v42  ;;  %v3607_v1 = vsel %vm3606_vm11, %v3604_v0, %v12456_v48  ;;  %v9615_v42 = vld [vmem:[#allocation7 + $0x340] sm:$0xf]  ;;  %v11996_v22 = vld [vmem:[#allocation7 + $0x34c] sm:$0xf0] }
 0x607   :  { %v9855_v48 = vld [vmem:[#allocation7 + $0x520] sm:$0xf] }
 0x637   :  { %v12460_v28 = vpop.permute.xlu1 %12459 }
 0x638   :  { %v12462_v54 = vunpack.i.h.bf16 %v12460_v28  ;;  %v12461_v16 = vunpack.i.l.bf16 %v12460_v28  ;;  %v9792_v28 = vor.u32 %v12040_v55, %v9791_v58  ;;  %v9585_v55 = vld [vmem:[#allocation7 + $0x310] sm:$0xf0] }
 0x639   :  { %v12475_v26 = vpop.permute.xlu2 %12474  ;;  %v9588_v59 = vor.u32 %v11986_v37, %v9585_v55  ;;  %v12033_v37 = vld [vmem:[#allocation7 + $0x474] sm:$0xf0]  ;;  %v9623_v55 = vld [vmem:[#allocation7 + $0x348] sm:$0xf] }
 0x63a   :  { %v12477_v61 = vunpack.i.h.bf16 %v12475_v26  ;;  %v12476_v8 = vunpack.i.l.bf16 %v12475_v26  ;;  %v3613_v46 = vsel %vm3603_vm9, %v14688_v14, %v12462_v54  ;;  %v3612_v30 = vsel %vm3603_vm9, %v14667_v51, %v12461_v16  ;;  %4439 = vmatpush.bf16.msrb.mxu1 %v9792_v28  ;;  %v9743_v26 = vld [vmem:[#allocation7 + $0x440] sm:$0xf]  ;;  %v9825_v28 = vld [vmem:[#allocation7 + $0x4f0] sm:$0xf0] }
 0x63b   :  { %v9760_v54 = vor.u32 %v12032_v13, %v9759_v10  ;;  %v9636_v16 = vor.u32 %v11998_v56, %v9633_v35  ;;  %v9828_v15 = vor.u32 %v12046_v52, %v9825_v28  ;;  %vm3665_vm9 = vcmask 1040896   ;;  %v9815_v13 = vld [vmem:[#allocation7 + $0x4c8] sm:$0xf]  ;;  %v12045_v56 = vld [vmem:[#allocation7 + $0x4d4] sm:$0xf0] }
 0x63c   :  { %v9940_v10 = vor.u32 %v12074_v47, %v9937_v4  ;;  %v9816_v35 = vor.u32 %v12045_v56, %v9815_v13  ;;  %vm14747_vm0 = vmor %vm112_vm2, %vm3665_vm9  ;;  %v11997_v52 = vld [vmem:[#allocation7 + $0x354] sm:$0xf0]  ;;  %v12054_v47 = vld [vmem:[#allocation7 + $0x524] sm:$0xf]  ;;  %vm3659_vm2 = vcmask 1043969   ;;  %vm3660_vm9 = vcmask 1047557  }
 0x63d   :  { %4469 = vmatpush.bf16.msrb.mxu3 %v9636_v16  ;;  %v9857_v4 = vld [vmem:[#allocation7 + $0x530] sm:$0xf0]  ;;  %v12025_v13 = vld [vmem:[#allocation7 + $0x434] sm:$0xf0]  ;;  %v9591_v56 = vld [vmem:[#allocation7 + $0x308] sm:$0xf] }
 0x63e   :  { %4440 = vmatpush.bf16.msrb.mxu1 %v9776_v45  ;;  %v9832_v45 = vor.u32 %v12049_v20, %v9831_v36  ;;  %v12058_v36 = vld [vmem:[#allocation7 + $0x544] sm:$0xf]  ;;  %v9873_v20 = vld [vmem:[#allocation7 + $0x550] sm:$0xf0]  ;;  %vm3661_vm12 = vmor %vm3660_vm9, %vm3659_vm2  ;;  %vm15706_vm2 = vcmask 1045506  }
 0x63f   :  { %v12470_v23 = vpop.permute.xlu1 %12469  ;;  %v9876_v41 = vor.u32 %v12058_v36, %v9873_v20 }
 0x640   :  { %v12472_v38 = vunpack.i.h.bf16 %v12470_v23  ;;  %v12471_v40 = vunpack.i.l.bf16 %v12470_v23  ;;  %v12060_v23 = vld [vmem:[#allocation7 + $0x54c] sm:$0xf0] }
 0x641   :  { %v9872_v0 = vor.u32 %v12060_v23, %v9871_v3  ;;  %v12009_v3 = vld [vmem:[#allocation7 + $0x3b4] sm:$0xf0]  ;;  %v12038_v23 = vld [vmem:[#allocation7 + $0x4a4] sm:$0xf] }
 0x642   :  { %v3611_v25 = vsel %vm3609_vm13, %v3608_v34, %v12472_v38  ;;  %v3610_v12 = vsel %vm3609_vm13, %v3607_v1, %v12471_v40  ;;  %v12028_v38 = vld [vmem:[#allocation7 + $0x44c] sm:$0xf0]  ;;  %v11994_v40 = vld [vmem:[#allocation7 + $0x344] sm:$0xf]  ;;  %4441 = vmatpush.bf16.msrb.mxu1 %v9760_v54  ;;  %v9727_v34 = vld [vmem:[#allocation7 + $0x420] sm:$0xf] }
 0x643   :  { %4456 = vmatpush.bf16.msrb.mxu2 %v9872_v0  ;;  %v12024_v1 = vld [vmem:[#allocation7 + $0x42c] sm:$0xf0]  ;;  %v9793_v54 = vld [vmem:[#allocation7 + $0x4b0] sm:$0xf0]  ;;  %v9799_v0 = vld [vmem:[#allocation7 + $0x4a8] sm:$0xf] }
 0x646   :  { %v12465_v18 = vpop.permute.xlu0 %12464 }
 0x647   :  { %v12467_v33 = vunpack.i.h.bf16 %v12465_v18  ;;  %v12466_v27 = vunpack.i.l.bf16 %v12465_v18  ;;  %v9617_v18 = vld [vmem:[#allocation7 + $0x350] sm:$0xf0] }
 0x649   :  { %v3615_v32 = vsel %vm3606_vm11, %v3613_v46, %v12467_v33  ;;  %v3614_v43 = vsel %vm3606_vm11, %v3612_v30, %v12466_v27  ;;  %v12056_v33 = vld [vmem:[#allocation7 + $0x52c] sm:$0xf0]  ;;  %v9616_v27 = vor.u32 %v11996_v22, %v9615_v42  ;;  %v9599_v46 = vld [vmem:[#allocation7 + $0x320] sm:$0xf]  ;;  %v9672_v42 = vor.u32 %v12009_v3, %v9671_v57  ;;  %v12070_v22 = vld [vmem:[#allocation7 + $0x5a4] sm:$0xf] }
 0x64a   :  { %v3617_v5 = vsel %vm3609_vm13, %v3615_v32, %v12477_v61  ;;  %v3616_v7 = vsel %vm3609_vm13, %v3614_v43, %v12476_v8  ;;  %v9744_v61 = vor.u32 %v12028_v38, %v9743_v26  ;;  %v9620_v8 = vor.u32 %v11994_v40, %v9617_v18  ;;  %v11992_v30 = vld [vmem:[#allocation7 + $0x32c] sm:$0xf0]  ;;  %v11990_v43 = vld [vmem:[#allocation7 + $0x324] sm:$0xf]  ;;  %v9921_v26 = vld [vmem:[#allocation7 + $0x5b0] sm:$0xf0] }
 0x64b   :  { %v3619_v24 = vpack.c.bf16 %v3617_v5, %v3611_v25  ;;  %v3618_v60 = vpack.c.bf16 %v3616_v7, %v3610_v12  ;;  %v9856_v32 = vor.u32 %v12056_v33, %v9855_v48  ;;  %v9601_v25 = vld [vmem:[#allocation7 + $0x330] sm:$0xf0]  ;;  %v9839_v5 = vld [vmem:[#allocation7 + $0x500] sm:$0xf]  ;;  %v12052_v12 = vld [vmem:[#allocation7 + $0x50c] sm:$0xf0]  ;;  %4428 = vmatpush.bf16.msrb.mxu0 %v9616_v27  ;;  %v9600_v7 = vor.u32 %v11992_v30, %v9599_v46 }
 0x64c   :  { %4442 = vmatpush.bf16.msrb.mxu1 %v9744_v61  ;;  %4470 = vmatpush.bf16.msrb.mxu3 %v9620_v8  ;;  %v9840_v58 = vor.u32 %v12052_v12, %v9839_v5  ;;  %vm3668_vm13 = vcmask 516096   ;;  %v9796_v18 = vor.u32 %v12038_v23, %v9793_v54  ;;  %v9924_v48 = vor.u32 %v12070_v22, %v9921_v26  ;;  %v12041_v33 = vld [vmem:[#allocation7 + $0x4b4] sm:$0xf0]  ;;  %v9655_v61 = vld [vmem:[#allocation7 + $0x388] sm:$0xf] }
 0x64d   :  { %v3632_v44 = vrot.slane %v3619_v24, 7  ;;  %v3630_v9 = vrot.slane %v3618_v60, 7  ;;  %v9583_v24 = vld [vmem:[#allocation7 + $0x300] sm:$0xf]  ;;  %v9703_v60 = vld [vmem:[#allocation7 + $0x3e8] sm:$0xf]  ;;  %4457 = vmatpush.bf16.msrb.mxu2 %v9856_v32  ;;  %v9800_v27 = vor.u32 %v12041_v33, %v9799_v0  ;;  %v9860_v3 = vor.u32 %v12054_v47, %v9857_v4 }
 0x64e   :  { %v12005_v8 = vld [vmem:[#allocation7 + $0x394] sm:$0xf0]  ;;  %v12034_v46 = vld [vmem:[#allocation7 + $0x484] sm:$0xf]  ;;  %v9777_v32 = vld [vmem:[#allocation7 + $0x490] sm:$0xf0] }
 0x64f   :  { %3638 = vrot.lane.b32.xlu1 %v3632_v44, %s12632_s27  ;;  %3634 = vrot.lane.b32.xlu0 %v3630_v9, %s12632_s27  ;;  %v3631_v51 = vrot.slane %v3630_v9, 4  ;;  %v3633_v14 = vrot.slane %v3632_v44, 4  ;;  %v12017_v44 = vld [vmem:[#allocation7 + $0x3f4] sm:$0xf0]  ;;  %v9728_v9 = vor.u32 %v12024_v1, %v9727_v34  ;;  %v9656_v34 = vor.u32 %v12005_v8, %v9655_v61  ;;  %v12066_v1 = vld [vmem:[#allocation7 + $0x584] sm:$0xf] }
 0x650   :  { %v9704_v11 = vor.u32 %v12017_v44, %v9703_v60  ;;  %4429 = vmatpush.bf16.msrb.mxu0 %v9600_v7  ;;  %v9780_v5 = vor.u32 %v12034_v46, %v9777_v32  ;;  %v12037_v7 = vld [vmem:[#allocation7 + $0x494] sm:$0xf0]  ;;  %v12018_v54 = vld [vmem:[#allocation7 + $0x404] sm:$0xf]  ;;  %v9841_v26 = vld [vmem:[#allocation7 + $0x510] sm:$0xf0] }
 0x651   :  { %3636 = vrot.lane.b32.xlu2 %v3631_v51, %s12632_s27  ;;  %v9604_v51 = vor.u32 %v11990_v43, %v9601_v25  ;;  %4443 = vmatpush.bf16.msrb.mxu1 %v9728_v9  ;;  %v9905_v43 = vld [vmem:[#allocation7 + $0x590] sm:$0xf0]  ;;  %v9783_v25 = vld [vmem:[#allocation7 + $0x488] sm:$0xf]  ;;  %v12001_v60 = vld [vmem:[#allocation7 + $0x374] sm:$0xf0] }
 0x652   :  { %4458 = vmatpush.bf16.msrb.mxu2 %v9840_v58  ;;  %v9908_v12 = vor.u32 %v12066_v1, %v9905_v43  ;;  %v9784_v44 = vor.u32 %v12037_v7, %v9783_v25  ;;  %v12030_v9 = vld [vmem:[#allocation7 + $0x464] sm:$0xf]  ;;  %v9767_v58 = vld [vmem:[#allocation7 + $0x468] sm:$0xf]  ;;  %v11989_v57 = vld [vmem:[#allocation7 + $0x314] sm:$0xf0] }
 0x653   :  { %4471 = vmatpush.bf16.msrb.mxu3 %v9604_v51  ;;  %v9761_v51 = vld [vmem:[#allocation7 + $0x470] sm:$0xf0]  ;;  %v9768_v19 = vor.u32 %v12033_v37, %v9767_v58  ;;  %v12050_v22 = vld [vmem:[#allocation7 + $0x504] sm:$0xf]  ;;  %v9719_v0 = vld [vmem:[#allocation7 + $0x408] sm:$0xf] }
 0x655   :  { %4444 = vmatpush.bf16.msrb.mxu1 %v9712_v21  ;;  %v9624_v21 = vor.u32 %v11997_v52, %v9623_v55 }
 0x656   :  { %4507 = vmatpush.bf16.msra.mxu2 %v9704_v11  ;;  %v9764_v11 = vor.u32 %v12030_v9, %v9761_v51 }
 0x657   :  { %3640 = vrot.lane.b32.xlu0 %v3633_v14, %s12632_s27  ;;  %v11988_v14 = vld [vmem:[#allocation7 + $0x30c] sm:$0xf0]  ;;  %4472 = vmatpush.bf16.msrb.mxu3 %v9588_v59  ;;  %v9751_v59 = vld [vmem:[#allocation7 + $0x448] sm:$0xf] }
 0x658   :  { %v9584_v39 = vor.u32 %v11988_v14, %v9583_v24  ;;  %v9639_v24 = vld [vmem:[#allocation7 + $0x368] sm:$0xf]  ;;  %v12062_v14 = vld [vmem:[#allocation7 + $0x564] sm:$0xf] }
 0x659   :  { %4493 = vmatpush.bf16.msra.mxu1 %v9956_v29  ;;  %v9640_v49 = vor.u32 %v12001_v60, %v9639_v24  ;;  %v9892_v28 = vor.u32 %v12062_v14, %v9889_v63  ;;  %v9607_v29 = vld [vmem:[#allocation7 + $0x328] sm:$0xf] }
 0x65a   :  { %4430 = vmatpush.bf16.msrb.mxu0 %v9584_v39  ;;  %4508 = vmatpush.bf16.msra.mxu2 %v9688_v31  ;;  %v9745_v39 = vld [vmem:[#allocation7 + $0x450] sm:$0xf0] }
 0x65b   :  { %4521 = vmatpush.bf16.msra.mxu3 %v9832_v45  ;;  %v11993_v45 = vld [vmem:[#allocation7 + $0x334] sm:$0xf0]  ;;  %v9748_v50 = vor.u32 %v12026_v53, %v9745_v39 }
 0x65d   :  { %4494 = vmatpush.bf16.msra.mxu1 %v9940_v10  ;;  %v9735_v10 = vld [vmem:[#allocation7 + $0x428] sm:$0xf] }
 0x65e   :  { %4479 = vmatpush.bf16.msra.mxu0 %v9828_v15  ;;  %4509 = vmatpush.bf16.msra.mxu2 %v9672_v42  ;;  %v12029_v15 = vld [vmem:[#allocation7 + $0x454] sm:$0xf0]  ;;  %v9736_v23 = vor.u32 %v12025_v13, %v9735_v10  ;;  %v9592_v42 = vor.u32 %v11989_v57, %v9591_v56  ;;  %v12047_v13 = vld [vmem:[#allocation7 + $0x4ec] sm:$0xf]  ;;  %v9833_v56 = vld [vmem:[#allocation7 + $0x4f8] sm:$0xf0] }
 0x65f   :  { %4522 = vmatpush.bf16.msra.mxu3 %v9816_v35  ;;  %v9752_v31 = vor.u32 %v12029_v15, %v9751_v59  ;;  %v9732_v35 = vor.u32 %v12022_v62, %v9729_v6  ;;  %v12031_v57 = vld [vmem:[#allocation7 + $0x46c] sm:$0xf] }
 0x661   :  { %4495 = vmatpush.bf16.msra.mxu1 %v9924_v48  ;;  %v9844_v48 = vor.u32 %v12050_v22, %v9841_v26 }
 0x662   :  { %4480 = vmatpush.bf16.msra.mxu0 %v9812_v2  ;;  %4510 = vmatpush.bf16.msra.mxu2 %v9656_v34  ;;  %v9608_v2 = vor.u32 %v11993_v45, %v9607_v29 }
 0x663   :  { %4523 = vmatpush.bf16.msra.mxu3 %v9800_v27 }
 0x665   :  { %4496 = vmatpush.bf16.msra.mxu1 %v9908_v12 }
 0x666   :  { %4481 = vmatpush.bf16.msra.mxu0 %v9796_v18  ;;  %4511 = vmatpush.bf16.msra.mxu2 %v9640_v49 }
 0x667   :  { %4524 = vmatpush.bf16.msra.mxu3 %v9784_v44 }
 0x669   :  { %4497 = vmatpush.bf16.msra.mxu1 %v9892_v28 }
 0x66a   :  { %4482 = vmatpush.bf16.msra.mxu0 %v9780_v5  ;;  %4512 = vmatpush.bf16.msra.mxu2 %v9624_v21 }
 0x66b   :  { %4525 = vmatpush.bf16.msra.mxu3 %v9768_v19 }
 0x66d   :  { %4498 = vmatpush.bf16.msra.mxu1 %v9876_v41 }
 0x66e   :  { %4483 = vmatpush.bf16.msra.mxu0 %v9764_v11  ;;  %4513 = vmatpush.bf16.msra.mxu2 %v9608_v2 }
 0x66f   :  { %4526 = vmatpush.bf16.msra.mxu3 %v9752_v31 }
 0x671   :  { %4499 = vmatpush.bf16.msra.mxu1 %v9860_v3 }
 0x672   :  { %4484 = vmatpush.bf16.msra.mxu0 %v9748_v50  ;;  %4514 = vmatpush.bf16.msra.mxu2 %v9592_v42  ;;  %v9959_v42 = vld [vmem:[#allocation7 + $0x5e8] sm:$0xf] }
 0x673   :  { %4527 = vmatpush.bf16.msra.mxu3 %v9736_v23 }
 0x675   :  { %4500 = vmatpush.bf16.msra.mxu1 %v9844_v48  ;;  %v12015_v48 = vld [vmem:[#allocation7 + $0x3ec] sm:$0xf] }
 0x676   :  { %4485 = vmatpush.bf16.msra.mxu0 %v9732_v35 }
 0x6ab   :  { %v3637_v16 = vpop.permute.xlu2 %3636 }
 0x6ac   :  { %v3643_v40 = vrot.slane %v3637_v16, 4 }
 0x6ae   :  { %v3648_v30 = vsel %vm3606_vm11, %v3643_v40, %v3637_v16  ;;  %3669 = vst.msk [vmem:[#allocation3 + $0x14] sm:$0x1] %vm3668_vm13, %v3643_v40  ;;  %v9713_v16 = vld [vmem:[#allocation7 + $0x410] sm:$0xf0]  ;;  %v12021_v40 = vld [vmem:[#allocation7 + $0x414] sm:$0xf0] }
 0x6af   :  { %3667 = vst.msk [vmem:[#allocation3 + $0xc] sm:$0x11] %vm14747_vm0, %v3648_v30  ;;  %v9716_v18 = vor.u32 %v12018_v54, %v9713_v16  ;;  %v9720_v61 = vor.u32 %v12021_v40, %v9719_v0  ;;  %v9836_v0 = vor.u32 %v12047_v13, %v9833_v56  ;;  %v12067_v13 = vld [vmem:[#allocation7 + $0x58c] sm:$0xf]  ;;  %v9913_v56 = vld [vmem:[#allocation7 + $0x598] sm:$0xf0] }
 0x6b1   :  { %4486 = vmatpush.bf16.msra.mxu0 %v9716_v18  ;;  %4528 = vmatpush.bf16.msra.mxu3 %v9720_v61  ;;  %v12081_v18 = vld [vmem:[#allocation7 + $0x5f4] sm:$0xf0] }
 0x6b5   :  { %v14761_v5 = vld [vmem:[#allocation3 + $0x14] sm:$0x1] }
 0x6b6   :  { %v14763_v60 = vld [vmem:[#allocation3 + $0xc] sm:$0x11]  ;;  %v3802_v20 = vshll.u32 %v14761_v5, 16 }
 0x6b7   :  { %v3788_v38 = vshll.u32 %v14763_v60, 16 }
 0x6b8   :  { %v3804_v6 = vrot.slane %v3802_v20, 5  ;;  %v9673_v20 = vld [vmem:[#allocation7 + $0x3b8] sm:$0xf0] }
 0x6b9   :  { %v3790_v47 = vrot.slane %v3788_v38, 5 }
 0x6c1   :  { %v3639_v33 = vpop.permute.xlu1 %3638  ;;  %v3635_v27 = vpop.permute.xlu0 %3634 }
 0x6c2   :  { %v3644_v8 = vrot.slane %v3639_v33, 4  ;;  %v3642_v46 = vrot.slane %v3635_v27, 4 }
 0x6c4   :  { %v3649_v30 = vsel %vm3606_vm11, %v3644_v8, %v3639_v33  ;;  %3671 = vst.msk [vmem:[#allocation3 + $0x20] sm:$0xe] %vm3663_vm15, %v3644_v8  ;;  %v3647_v34 = vsel %vm3606_vm11, %v3642_v46, %v3635_v27  ;;  %v9705_v33 = vld [vmem:[#allocation7 + $0x3f8] sm:$0xf0] }
 0x6c5   :  { %3670 = vst.msk [vmem:[#allocation3 + $0x18] sm:$0xee] %vm3661_vm12, %v3649_v30  ;;  %v12079_v30 = vld [vmem:[#allocation7 + $0x5ec] sm:$0xf] }
 0x6c6   :  { %3662 = vst.msk [vmem:[#allocation3] sm:$0xee] %vm3661_vm12, %v3647_v34  ;;  %v9961_v34 = vld [vmem:[#allocation7 + $0x5f8] sm:$0xf0] }
 0x6c7   :  { %3664 = vst.msk [vmem:[#allocation3 + $0x8] sm:$0xe] %vm3663_vm15, %v3642_v46 }
 0x6c9   :  { %v3641_v32 = vpop.permute.xlu0 %3640 }
 0x6ca   :  { %v3645_v1 = vrot.slane %v3641_v32, 4 }
 0x6cb   :  { %v3677_v43 = vld [vmem:[#allocation3 + $0x20] sm:$0xf] }
 0x6cc   :  { %v3650_v25 = vsel %vm3606_vm11, %v3645_v1, %v3641_v32  ;;  %3673 = vst.msk [vmem:[#allocation3 + $0x2c] sm:$0x1] %vm3668_vm13, %v3645_v1  ;;  %v3821_v12 = vshrl.u32 %v3677_v43, 16  ;;  %v3824_v7 = vshll.u32 %v3677_v43, 16  ;;  %v3676_v24 = vld [vmem:[#allocation3 + $0x18] sm:$0xff]  ;;  %vm15705_vm13 = vcmask 1043456  }
 0x6cd   :  { %3672 = vst.msk [vmem:[#allocation3 + $0x24] sm:$0x11] %vm14747_vm0, %v3650_v25  ;;  %v3674_v44 = vld [vmem:[#allocation3] sm:$0xff]  ;;  %v3807_v9 = vshrl.u32 %v3676_v24, 16  ;;  %v3810_v51 = vshll.u32 %v3676_v24, 16  ;;  %v9708_v24 = vor.u32 %v12015_v48, %v9705_v33  ;;  %vm15707_vm9 = vmmov %vm15705_vm13 }
 0x6ce   :  { %v3675_v14 = vld [vmem:[#allocation3 + $0x8] sm:$0xf]  ;;  %v3823_v49 = vrot.slane %v3821_v12, 4  ;;  %v3826_v63 = vrot.slane %v3824_v7, 5  ;;  %v3779_v58 = vshrl.u32 %v3674_v44, 16  ;;  %v3782_v37 = vshll.u32 %v3674_v44, 16 }
 0x6cf   :  { %v3793_v55 = vshrl.u32 %v3675_v14, 16  ;;  %v3796_v52 = vshll.u32 %v3675_v14, 16  ;;  %v3809_v11 = vrot.slane %v3807_v9, 4  ;;  %v3812_v28 = vrot.slane %v3810_v51, 5  ;;  %v12043_v1 = vld [vmem:[#allocation7 + $0x4cc] sm:$0xf] }
 0x6d0   :  { %v3781_v53 = vrot.slane %v3779_v58, 4  ;;  %v3784_v19 = vrot.slane %v3782_v37, 5  ;;  %v3827_v21 = vor.u32 %v3826_v63, %v3823_v49  ;;  %v9817_v43 = vld [vmem:[#allocation7 + $0x4d8] sm:$0xf0]  ;;  %v9960_v7 = vor.u32 %v12081_v18, %v9959_v42  ;;  %v9943_v44 = vld [vmem:[#allocation7 + $0x5c8] sm:$0xf] }
 0x6d1   :  { %v3795_v39 = vrot.slane %v3793_v55, 4  ;;  %v3798_v36 = vrot.slane %v3796_v52, 5  ;;  %v3813_v45 = vor.u32 %v3812_v28, %v3809_v11  ;;  %v9964_v9 = vor.u32 %v12079_v30, %v9961_v34  ;;  %v12077_v51 = vld [vmem:[#allocation7 + $0x5d4] sm:$0xf0]  ;;  %v12011_v14 = vld [vmem:[#allocation7 + $0x3cc] sm:$0xf] }
 0x6d2   :  { %v3785_v59 = vor.u32 %v3784_v19, %v3781_v53  ;;  %v3828_v2 = vrot.slane %v3827_v21, 4  ;;  %v9689_v49 = vld [vmem:[#allocation7 + $0x3d8] sm:$0xf0]  ;;  %v9820_v63 = vor.u32 %v12043_v1, %v9817_v43  ;;  %v12075_v58 = vld [vmem:[#allocation7 + $0x5cc] sm:$0xf]  ;;  %v9944_v11 = vor.u32 %v12077_v51, %v9943_v44 }
 0x6d3   :  { %v14769_v15 = vld [vmem:[#allocation3 + $0x2c] sm:$0x1]  ;;  %v3799_v29 = vor.u32 %v3798_v36, %v3795_v39  ;;  %v3814_v23 = vrot.slane %v3813_v45, 4  ;;  %v12039_v55 = vld [vmem:[#allocation7 + $0x4ac] sm:$0xf]  ;;  %v9692_v28 = vor.u32 %v12011_v14, %v9689_v49 }
 0x6d4   :  { %v3830_v50 = vshll.u32 %v14769_v15, 16  ;;  %v14772_v41 = vld [vmem:[#allocation3 + $0x24] sm:$0x11]  ;;  %v3786_v62 = vrot.slane %v3785_v59, 4  ;;  %v9945_v37 = vld [vmem:[#allocation7 + $0x5d8] sm:$0xf0] }
 0x6d5   :  { %v3800_v31 = vrot.slane %v3799_v29, 4  ;;  %v3816_v4 = vshll.u32 %v14772_v41, 16  ;;  %v9801_v52 = vld [vmem:[#allocation7 + $0x4b8] sm:$0xf0]  ;;  %v9927_v53 = vld [vmem:[#allocation7 + $0x5a8] sm:$0xf]  ;;  %v9948_v19 = vor.u32 %v12075_v58, %v9945_v37 }
 0x6d6   :  { %v3832_v10 = vrot.slane %v3830_v50, 5  ;;  %v3791_v3 = vsel %vm12764_vm14, %v3786_v62, %v3790_v47  ;;  %v12073_v39 = vld [vmem:[#allocation7 + $0x5b4] sm:$0xf0]  ;;  %v12007_v36 = vld [vmem:[#allocation7 + $0x3ac] sm:$0xf]  ;;  %v9804_v38 = vor.u32 %v12039_v55, %v9801_v52  ;;  %v5281_v37 = vrot.slane %v14769_v15, 5 }
 0x6d7   :  { %v3805_v35 = vsel %vm12764_vm14, %v3800_v31, %v3804_v6  ;;  %v3818_v54 = vrot.slane %v3816_v4, 5  ;;  %v3931_v27 = vunpack.c.l.b16 %v3791_v3  ;;  %v3932_v8 = vunpack.c.h.b16 %v3791_v3  ;;  %v12071_v21 = vld [vmem:[#allocation7 + $0x5ac] sm:$0xf]  ;;  %v9929_v59 = vld [vmem:[#allocation7 + $0x5b8] sm:$0xf0] }
 0x6d8   :  { %v3833_v16 = vsel %vm12764_vm14, %v3828_v2, %v3832_v10  ;;  %v3933_v22 = vunpack.c.l.b16 %v3805_v35  ;;  %v12035_v29 = vld [vmem:[#allocation7 + $0x48c] sm:$0xf]  ;;  %v9785_v45 = vld [vmem:[#allocation7 + $0x498] sm:$0xf0]  ;;  %v9928_v50 = vor.u32 %v12073_v39, %v9927_v53  ;;  %v9676_v62 = vor.u32 %v12007_v36, %v9673_v20  ;;  %v9911_v31 = vld [vmem:[#allocation7 + $0x588] sm:$0xf] }
 0x6d9   :  { %v3936_v26 = vunpack.c.l.b16 %v3833_v16  ;;  %v3819_v40 = vsel %vm12764_vm14, %v3814_v23, %v3818_v54  ;;  %v9932_v6 = vor.u32 %v12071_v21, %v9929_v59  ;;  %v12069_v47 = vld [vmem:[#allocation7 + $0x594] sm:$0xf0]  ;;  %v12003_v4 = vld [vmem:[#allocation7 + $0x38c] sm:$0xf]  ;;  %v9657_v2 = vld [vmem:[#allocation7 + $0x398] sm:$0xf0]  ;;  %v9788_v10 = vor.u32 %v12035_v29, %v9785_v45 }
 0x6da   :  { %v3934_v61 = vunpack.c.l.b16 %v3819_v40  ;;  %v3935_v46 = vunpack.c.h.b16 %v3819_v40  ;;  %v9769_v35 = vld [vmem:[#allocation7 + $0x478] sm:$0xf0]  ;;  %v9912_v3 = vor.u32 %v12069_v47, %v9911_v31  ;;  %v9660_v23 = vor.u32 %v12003_v4, %v9657_v2  ;;  %v9895_v54 = vld [vmem:[#allocation7 + $0x568] sm:$0xf]  ;;  %v12065_v42 = vld [vmem:[#allocation7 + $0x574] sm:$0xf0] }
 0x6db   :  { %v14783_v32 = vpack.c.b16 %v3936_v26, %v3933_v22  ;;  %v9916_v16 = vor.u32 %v12067_v13, %v9913_v56  ;;  %v11999_v22 = vld [vmem:[#allocation7 + $0x36c] sm:$0xf]  ;;  %v9641_v26 = vld [vmem:[#allocation7 + $0x378] sm:$0xf0]  ;;  %v12061_v30 = vld [vmem:[#allocation7 + $0x554] sm:$0xf0] }
 0x6dc   :  { %v14785_v25 = vpack.c.b16 %v3934_v61, %v3931_v27  ;;  %v14787_v12 = vpack.c.b16 %v3935_v46, %v3932_v8  ;;  %v12063_v40 = vld [vmem:[#allocation7 + $0x56c] sm:$0xf]  ;;  %v9897_v18 = vld [vmem:[#allocation7 + $0x578] sm:$0xf0]  ;;  %v5273_v27 = vrot.slane %v14761_v5, 5  ;;  %v9896_v61 = vor.u32 %v12065_v42, %v9895_v54 }
 0x6dd   :  { %4459 = vmatmul.bf16.vlgmr.msrb.gmra.mxu2 %v14783_v32  ;;  %v12027_v48 = vld [vmem:[#allocation7 + $0x44c] sm:$0xf]  ;;  %v9753_v33 = vld [vmem:[#allocation7 + $0x458] sm:$0xf0]  ;;  %v9644_v8 = vor.u32 %v11999_v22, %v9641_v26  ;;  %v9879_v46 = vld [vmem:[#allocation7 + $0x548] sm:$0xf]  ;;  %v9900_v34 = vor.u32 %v12063_v40, %v9897_v18 }
 0x6de   :  { %4563 = vmatpush.bf16.msrb.mxu2 %v9836_v0  ;;  %4431 = vmatmul.bf16.vlgmr.msrb.gmra.mxu0 %v14785_v25  ;;  %v9772_v0 = vor.u32 %v12031_v57, %v9769_v35  ;;  %v11995_v1 = vld [vmem:[#allocation7 + $0x34c] sm:$0xf]  ;;  %v9625_v43 = vld [vmem:[#allocation7 + $0x358] sm:$0xf0]  ;;  %v9863_v51 = vld [vmem:[#allocation7 + $0x528] sm:$0xf]  ;;  %v9880_v55 = vor.u32 %v12061_v30, %v9879_v46 }
 0x6df   :  { %4445 = vmatmul.bf16.vlgmr.msrb.gmra.mxu1 %v14787_v12  ;;  %4473 = vmatmul.bf16.vlgmr.msrb.gmra.mxu3 %v14785_v25  ;;  %v9881_v44 = vld [vmem:[#allocation7 + $0x558] sm:$0xf0]  ;;  %v12057_v14 = vld [vmem:[#allocation7 + $0x534] sm:$0xf0]  ;;  %v11991_v49 = vld [vmem:[#allocation7 + $0x32c] sm:$0xf]  ;;  %v9628_v52 = vor.u32 %v11995_v1, %v9625_v43 }
 0x6e0   :  { %4535 = vmatpush.bf16.msrb.mxu0 %v9960_v7  ;;  %4549 = vmatpush.bf16.msrb.mxu1 %v9708_v24  ;;  %v12059_v7 = vld [vmem:[#allocation7 + $0x54c] sm:$0xf]  ;;  %v9756_v24 = vor.u32 %v12027_v48, %v9753_v33  ;;  %v9737_v5 = vld [vmem:[#allocation7 + $0x438] sm:$0xf0]  ;;  %v14798_v58 = vld [vmem:[#allocation3 + $0x8] sm:$0xe]  ;;  %v9864_v13 = vor.u32 %v12057_v14, %v9863_v51 }
 0x6e1   :  { %4577 = vmatpush.bf16.msrb.mxu3 %v9964_v9  ;;  %v12023_v9 = vld [vmem:[#allocation7 + $0x42c] sm:$0xf]  ;;  %v10362_v53 = vrot.slane %v14798_v58, 9  ;;  %v9865_v39 = vld [vmem:[#allocation7 + $0x538] sm:$0xf0]  ;;  %v5269_v29 = vrot.slane %v14763_v60, 5 }
 0x6e2   :  { %4564 = vmatpush.bf16.msrb.mxu2 %v9820_v63  ;;  %v9609_v63 = vld [vmem:[#allocation7 + $0x338] sm:$0xf0]  ;;  %v12019_v36 = vld [vmem:[#allocation7 + $0x40c] sm:$0xf]  ;;  %v14804_v20 = vld [vmem:[#allocation3] sm:$0xee] }
 0x6e3   :  { %v9721_v21 = vld [vmem:[#allocation7 + $0x418] sm:$0xf0]  ;;  %v9847_v59 = vld [vmem:[#allocation7 + $0x508] sm:$0xf]  ;;  %v12053_v15 = vld [vmem:[#allocation7 + $0x514] sm:$0xf0]  ;;  %v5274_v4 = vsel %vm12733_vm10, %v10362_v53, %v5273_v27  ;;  %v9612_v56 = vor.u32 %v11991_v49, %v9609_v63 }
 0x6e4   :  { %4536 = vmatpush.bf16.msrb.mxu0 %v9944_v11  ;;  %4550 = vmatpush.bf16.msrb.mxu1 %v9692_v28  ;;  %v12055_v11 = vld [vmem:[#allocation7 + $0x52c] sm:$0xf]  ;;  %v14801_v28 = vld [vmem:[#allocation3 + $0x20] sm:$0xe]  ;;  %v9849_v31 = vld [vmem:[#allocation7 + $0x518] sm:$0xf0]  ;;  %v9724_v22 = vor.u32 %v12019_v36, %v9721_v21  ;;  %v5382_v40 = vunpack.c.l.b16 %v5274_v4  ;;  %v9848_v48 = vor.u32 %v12053_v15, %v9847_v59 }
 0x6e5   :  { %4578 = vmatpush.bf16.msrb.mxu3 %v9948_v19  ;;  %v9884_v19 = vor.u32 %v12059_v7, %v9881_v44  ;;  %v11987_v45 = vld [vmem:[#allocation7 + $0x30c] sm:$0xf]  ;;  %v10364_v2 = vrot.slane %v14801_v28, 9  ;;  %v11984_v57 = vld [vmem:[#allocation7 + $0x2ec] sm:$0xf0]  ;;  %v10361_v60 = vrot.slane %v14804_v20, 9 }
 0x6e6   :  { %4565 = vmatpush.bf16.msrb.mxu2 %v9804_v38  ;;  %v9740_v38 = vor.u32 %v12023_v9, %v9737_v5  ;;  %v14811_v35 = vld [vmem:[#allocation3 + $0x18] sm:$0xee]  ;;  %v11920_v54 = vld [vmem:[#allocation7 + $0xec] sm:$0xf0]  ;;  %v11918_v26 = vld [vmem:[#allocation7 + $0xe4] sm:$0xf] }
 0x6e7   :  { %v5282_v42 = vsel %vm12733_vm10, %v10364_v2, %v5281_v37  ;;  %v5270_v27 = vsel %vm12733_vm10, %v10361_v60, %v5269_v29  ;;  %v10331_v7 = vld [vmem:[#allocation7 + $0x2c0] sm:$0xf]  ;;  %v11916_v5 = vld [vmem:[#allocation7 + $0xcc] sm:$0xf0]  ;;  %v6074_v21 = vshll.u32 %v14798_v58, 16  ;;  %v6107_v60 = vshrl.u32 %v14801_v28, 16 }
 0x6e8   :  { %4537 = vmatpush.bf16.msrb.mxu0 %v9928_v50  ;;  %4551 = vmatpush.bf16.msrb.mxu1 %v9676_v62  ;;  %v9593_v50 = vld [vmem:[#allocation7 + $0x318] sm:$0xf0]  ;;  %v12051_v62 = vld [vmem:[#allocation7 + $0x50c] sm:$0xf]  ;;  %v5385_v18 = vunpack.c.l.b16 %v5282_v42  ;;  %v10075_v9 = vld [vmem:[#allocation7 + $0xc0] sm:$0xf]  ;;  %v5380_v14 = vunpack.c.l.b16 %v5270_v27  ;;  %v5381_v63 = vunpack.c.h.b16 %v5270_v27 }
 0x6e9   :  { %4579 = vmatpush.bf16.msrb.mxu3 %v9932_v6  ;;  %v10347_v6 = vld [vmem:[#allocation7 + $0x2e0] sm:$0xf]  ;;  %v9852_v46 = vor.u32 %v12051_v62, %v9849_v31  ;;  %v10076_v15 = vor.u32 %v11916_v5, %v10075_v9  ;;  %v11910_v47 = vld [vmem:[#allocation7 + $0xa4] sm:$0xf]  ;;  %v10061_v4 = vld [vmem:[#allocation7 + $0xb0] sm:$0xf0] }
 0x6ea   :  { %4566 = vmatpush.bf16.msrb.mxu2 %v9788_v10  ;;  %v5277_v10 = vrot.slane %v14772_v41, 5  ;;  %v11952_v41 = vld [vmem:[#allocation7 + $0x1ec] sm:$0xf0]  ;;  %v10348_v33 = vor.u32 %v11984_v57, %v10347_v6  ;;  %v14819_v30 = vpack.c.b16 %v5385_v18, %v5382_v40  ;;  %v10203_v51 = vld [vmem:[#allocation7 + $0x1c0] sm:$0xf]  ;;  %v6076_v57 = vrot.slane %v6074_v21, 6 }
 0x6eb   :  { %v10315_v53 = vld [vmem:[#allocation7 + $0x2a0] sm:$0xf]  ;;  %v11944_v6 = vld [vmem:[#allocation7 + $0x1ac] sm:$0xf0]  ;;  %v10045_v40 = vld [vmem:[#allocation7 + $0x90] sm:$0xf0] }
 0x6ec   :  { %4538 = vmatpush.bf16.msrb.mxu0 %v9912_v3  ;;  %4552 = vmatpush.bf16.msrb.mxu1 %v9660_v23  ;;  %v9868_v3 = vor.u32 %v12055_v11, %v9865_v39  ;;  %v10091_v23 = vld [vmem:[#allocation7 + $0xe0] sm:$0xf]  ;;  %v10077_v11 = vld [vmem:[#allocation7 + $0xd0] sm:$0xf0]  ;;  %v11940_v42 = vld [vmem:[#allocation7 + $0x18c] sm:$0xf0] }
 0x6ed   :  { %4580 = vmatpush.bf16.msrb.mxu3 %v9916_v16  ;;  %4515 = vmatmul.bf16.vlgmr.msra.gmra.mxu2 %v14785_v25  ;;  %v10219_v16 = vld [vmem:[#allocation7 + $0x1e0] sm:$0xf] }
 0x6ee   :  { %4567 = vmatpush.bf16.msrb.mxu2 %v9772_v0  ;;  %4487 = vmatmul.bf16.vlgmr.msra.gmra.mxu0 %v14787_v12  ;;  %v10093_v0 = vld [vmem:[#allocation7 + $0xf0] sm:$0xf0]  ;;  %v10220_v1 = vor.u32 %v11952_v41, %v10219_v16  ;;  %v10059_v29 = vld [vmem:[#allocation7 + $0xa0] sm:$0xf]  ;;  %v14836_v41 = vld [vmem:[#allocation3 + $0x2c] sm:$0x3] }
 0x6ef   :  { %4501 = vmatmul.bf16.vlgmr.msra.gmra.mxu1 %v14783_v32  ;;  %4529 = vmatmul.bf16.vlgmr.msra.gmra.mxu3 %v14787_v12  ;;  %v10096_v43 = vor.u32 %v11918_v26, %v10093_v0  ;;  %v10299_v2 = vld [vmem:[#allocation7 + $0x280] sm:$0xf]  ;;  %v6110_v26 = vshll.u32 %v14801_v28, 16  ;;  %v11906_v0 = vld [vmem:[#allocation7 + $0x84] sm:$0xf]  ;;  %v6119_v5 = vshll.u32 %v14836_v41, 16 }
 0x6f0   :  { %4539 = vmatpush.bf16.msrb.mxu0 %v9896_v61  ;;  %4553 = vmatpush.bf16.msrb.mxu1 %v9644_v8  ;;  %v10363_v61 = vrot.slane %v14811_v35, 9  ;;  %v9596_v8 = vor.u32 %v11987_v45, %v9593_v50  ;;  %v11912_v45 = vld [vmem:[#allocation7 + $0xac] sm:$0xf0]  ;;  %v10187_v50 = vld [vmem:[#allocation7 + $0x1a0] sm:$0xf] }
 0x6f1   :  { %4581 = vmatpush.bf16.msrb.mxu3 %v9900_v34  ;;  %v10092_v34 = vor.u32 %v11920_v54, %v10091_v23  ;;  %v10060_v23 = vor.u32 %v11912_v45, %v10059_v29  ;;  %v11908_v54 = vld [vmem:[#allocation7 + $0x8c] sm:$0xf0]  ;;  %v10171_v16 = vld [vmem:[#allocation7 + $0x180] sm:$0xf] }
 0x6f2   :  { %4568 = vmatpush.bf16.msrb.mxu2 %v9756_v24  ;;  %v11980_v24 = vld [vmem:[#allocation7 + $0x2cc] sm:$0xf0]  ;;  %v5278_v44 = vsel %vm12733_vm10, %v10363_v61, %v5277_v10  ;;  %v14831_v10 = vld [vmem:[#allocation3 + $0x14] sm:$0x3]  ;;  %v6109_v61 = vrot.slane %v6107_v60, 5 }
 0x6f3   :  { %v5383_v49 = vunpack.c.l.b16 %v5278_v44  ;;  %v5384_v37 = vunpack.c.h.b16 %v5278_v44  ;;  %v10332_v59 = vor.u32 %v11980_v24, %v10331_v7  ;;  %v6116_v7 = vshrl.u32 %v14836_v41, 16  ;;  %v10155_v28 = vld [vmem:[#allocation7 + $0x160] sm:$0xf]  ;;  %v11932_v45 = vld [vmem:[#allocation7 + $0x14c] sm:$0xf0] }
 0x6f4   :  { %4540 = vmatpush.bf16.msrb.mxu0 %v9880_v55  ;;  %4554 = vmatpush.bf16.msrb.mxu1 %v9628_v52  ;;  %v11948_v55 = vld [vmem:[#allocation7 + $0x1cc] sm:$0xf0]  ;;  %v11914_v52 = vld [vmem:[#allocation7 + $0xc4] sm:$0xf]  ;;  %v10048_v24 = vor.u32 %v11906_v0, %v10045_v40  ;;  %v10139_v29 = vld [vmem:[#allocation7 + $0x140] sm:$0xf] }
 0x6f5   :  { %4582 = vmatpush.bf16.msrb.mxu3 %v9884_v19  ;;  %v11976_v19 = vld [vmem:[#allocation7 + $0x2ac] sm:$0xf0]  ;;  %v14823_v39 = vpack.c.b16 %v5383_v49, %v5380_v14  ;;  %v14825_v36 = vpack.c.b16 %v5384_v37, %v5381_v63  ;;  %v10204_v62 = vor.u32 %v11948_v55, %v10203_v51  ;;  %v10080_v31 = vor.u32 %v11914_v52, %v10077_v11  ;;  %v11902_v14 = vld [vmem:[#allocation7 + $0x64] sm:$0xf]  ;;  %v10029_v49 = vld [vmem:[#allocation7 + $0x70] sm:$0xf0] }
 0x6f6   :  { %4569 = vmatpush.bf16.msrb.mxu2 %v9740_v38  ;;  %v6071_v38 = vshrl.u32 %v14798_v58, 16  ;;  %v11972_v58 = vld [vmem:[#allocation7 + $0x28c] sm:$0xf0]  ;;  %v10267_v63 = vld [vmem:[#allocation7 + $0x240] sm:$0xf]  ;;  %v6118_v21 = vrot.slane %v6116_v7, 5  ;;  %v10140_v60 = vor.u32 %v11932_v45, %v10139_v29 }
 0x6f7   :  { %v10300_v18 = vor.u32 %v11972_v58, %v10299_v2  ;;  %v11936_v51 = vld [vmem:[#allocation7 + $0x16c] sm:$0xf0]  ;;  %v9997_v0 = vld [vmem:[#allocation7 + $0x30] sm:$0xf0]  ;;  %v11890_v7 = vld [vmem:[#allocation7 + $0x4] sm:$0xf] }
 0x6f8   :  { %4541 = vmatpush.bf16.msrb.mxu0 %v9864_v13  ;;  %4555 = vmatpush.bf16.msrb.mxu1 %v9612_v56  ;;  %v10043_v13 = vld [vmem:[#allocation7 + $0x80] sm:$0xf]  ;;  %v6073_v56 = vrot.slane %v6071_v38, 5  ;;  %v11964_v37 = vld [vmem:[#allocation7 + $0x24c] sm:$0xf0] }
 0x6f9   :  { %4583 = vmatpush.bf16.msrb.mxu3 %v9868_v3  ;;  %v10316_v3 = vor.u32 %v11976_v19, %v10315_v53  ;;  %v10011_v19 = vld [vmem:[#allocation7 + $0x40] sm:$0xf]  ;;  %v11900_v38 = vld [vmem:[#allocation7 + $0x4c] sm:$0xf0]  ;;  %v11953_v45 = vld [vmem:[#allocation7 + $0x1f4] sm:$0xf0] }
 0x6fa   :  { %4570 = vmatpush.bf16.msrb.mxu2 %v9724_v22  ;;  %v10064_v22 = vor.u32 %v11910_v47, %v10061_v4  ;;  %v6077_v27 = vor.u32 %v6076_v57, %v6073_v56  ;;  %v10251_v47 = vld [vmem:[#allocation7 + $0x220] sm:$0xf]  ;;  %v10268_v56 = vor.u32 %v11964_v37, %v10267_v63  ;;  %v10012_v57 = vor.u32 %v11900_v38, %v10011_v19  ;;  %v10221_v63 = vld [vmem:[#allocation7 + $0x1f0] sm:$0xf0]  ;;  %v14859_v37 = vld [vmem:[#allocation7 + $0x2e4] sm:$0xf] }
 0x6fb   :  { %v14861_v19 = vld [vmem:[#allocation3 + $0x24] sm:$0x33] }
 0x6fc   :  { %4542 = vmatpush.bf16.msrb.mxu0 %v9848_v48  ;;  %4556 = vmatpush.bf16.msrb.mxu1 %v9596_v8  ;;  %v10283_v48 = vld [vmem:[#allocation7 + $0x260] sm:$0xf]  ;;  %v10044_v8 = vor.u32 %v11908_v54, %v10043_v13  ;;  %v6078_v55 = vrot.slane %v6077_v27, 4  ;;  %v11956_v27 = vld [vmem:[#allocation7 + $0x20c] sm:$0xf0] }
 0x6fd   :  { %4584 = vmatpush.bf16.msrb.mxu3 %v9852_v46  ;;  %4571 = vmatmul.bf16.vlgmr.msrb.gmra.mxu2 %v14787_v12  ;;  %v10188_v12 = vor.u32 %v11944_v6, %v10187_v50  ;;  %v10172_v46 = vor.u32 %v11940_v42, %v10171_v16  ;;  %v10013_v6 = vld [vmem:[#allocation7 + $0x50] sm:$0xf0]  ;;  %v10123_v16 = vld [vmem:[#allocation7 + $0x120] sm:$0xf]  ;;  %v11928_v42 = vld [vmem:[#allocation7 + $0x12c] sm:$0xf0] }
 0x6fe   :  { %5115 = vmatpush.bf16.msra.mxu2 %v10348_v33  ;;  %v11968_v33 = vld [vmem:[#allocation7 + $0x26c] sm:$0xf0] }
 0x6ff   :  { %4543 = vmatmul.bf16.vlgmr.msrb.gmra.mxu0 %v14783_v32  ;;  %4557 = vmatmul.bf16.vlgmr.msrb.gmra.mxu1 %v14785_v25  ;;  %v6083_v25 = vshll.u32 %v14831_v10, 16  ;;  %v10284_v11 = vor.u32 %v11968_v33, %v10283_v48  ;;  %v14849_v48 = vld [vmem:[#allocation3 + $0xc] sm:$0x33] }
 0x700   :  { %5087 = vmatpush.bf16.msra.mxu0 %v10092_v34  ;;  %5101 = vmatpush.bf16.msra.mxu1 %v10220_v1  ;;  %v10027_v34 = vld [vmem:[#allocation7 + $0x60] sm:$0xf]  ;;  %v11904_v1 = vld [vmem:[#allocation7 + $0x6c] sm:$0xf0]  ;;  %v6062_v38 = vshrl.u32 %v14849_v48, 16 }
 0x701   :  { %5129 = vmatpush.bf16.msra.mxu3 %v10096_v43  ;;  %v6112_v43 = vrot.slane %v6110_v26, 6  ;;  %v6085_v9 = vrot.slane %v6083_v25, 6  ;;  %v10028_v53 = vor.u32 %v11904_v1, %v10027_v34  ;;  %v6056_v25 = vshll.u32 %v14804_v20, 16  ;;  %v11894_v26 = vld [vmem:[#allocation7 + $0x24] sm:$0xf] }
 0x702   :  { %4585 = vmatmul.bf16.vlgmr.msrb.gmra.mxu3 %v14783_v32  ;;  %5116 = vmatpush.bf16.msra.mxu2 %v10332_v59  ;;  %v6080_v32 = vshrl.u32 %v14831_v10, 16  ;;  %v10156_v59 = vor.u32 %v11936_v51, %v10155_v28  ;;  %v10235_v33 = vld [vmem:[#allocation7 + $0x200] sm:$0xf]  ;;  %v14853_v34 = vld [vmem:[#allocation7 + $0x10c] sm:$0xf0] }
 0x703   :  { %v6113_v52 = vor.u32 %v6112_v43, %v6109_v61  ;;  %v9979_v61 = vld [vmem:[#allocation7] sm:$0xf]  ;;  %v11950_v51 = vld [vmem:[#allocation7 + $0x1e4] sm:$0xf] }
 0x704   :  { %5088 = vmatpush.bf16.msra.mxu0 %v10076_v15  ;;  %5102 = vmatpush.bf16.msra.mxu1 %v10204_v62  ;;  %v6082_v44 = vrot.slane %v6080_v32, 5  ;;  %v10032_v15 = vor.u32 %v11902_v14, %v10029_v49  ;;  %v6121_v62 = vrot.slane %v6119_v5, 6  ;;  %v6053_v32 = vshrl.u32 %v14804_v20, 16  ;;  %v9981_v20 = vld [vmem:[#allocation7 + $0x10] sm:$0xf0] }
 0x705   :  { %5130 = vmatpush.bf16.msra.mxu3 %v10080_v31  ;;  %v11898_v31 = vld [vmem:[#allocation7 + $0x44] sm:$0xf]  ;;  %v6114_v58 = vrot.slane %v6113_v52, 4  ;;  %v11921_v5 = vld [vmem:[#allocation7 + $0xf4] sm:$0xf0]  ;;  %v6058_v49 = vrot.slane %v6056_v25, 6 }
 0x706   :  { %5117 = vmatpush.bf16.msra.mxu2 %v10316_v3  ;;  %v6086_v50 = vor.u32 %v6085_v9, %v6082_v44  ;;  %v6122_v13 = vor.u32 %v6121_v62, %v6118_v21  ;;  %v11960_v3 = vld [vmem:[#allocation7 + $0x22c] sm:$0xf0]  ;;  %v10016_v54 = vor.u32 %v11898_v31, %v10013_v6  ;;  %v10124_v44 = vor.u32 %v11928_v42, %v10123_v16  ;;  %v10227_v52 = vld [vmem:[#allocation7 + $0x1e8] sm:$0xf]  ;;  %v11887_v31 = vld [vmem:[#allocation3 + $0x4] sm:$0xf] }
 0x707   :  { %v10252_v1 = vor.u32 %v11960_v3, %v10251_v47  ;;  %v10000_v9 = vor.u32 %v11894_v26, %v9997_v0  ;;  %v6055_v14 = vrot.slane %v6053_v32, 5  ;;  %v6065_v21 = vshll.u32 %v14849_v48, 16  ;;  %v11888_v62 = vld [vmem:[#allocation3 + $0x14] sm:$0xf0]  ;;  %v9969_v6 = vld [vmem:[#allocation3 + $0x18] sm:$0xf0] }
 0x708   :  { %5089 = vmatpush.bf16.msra.mxu0 %v10060_v23  ;;  %5103 = vmatpush.bf16.msra.mxu1 %v10188_v12  ;;  %v6087_v2 = vsel %vm12848_vm3, %v6078_v55, %v6086_v50  ;;  %v9995_v23 = vld [vmem:[#allocation7 + $0x20] sm:$0xf]  ;;  %v11896_v12 = vld [vmem:[#allocation7 + $0x2c] sm:$0xf0]  ;;  %v10349_v55 = vld [vmem:[#allocation7 + $0x2f0] sm:$0xf0]  ;;  %v10228_v32 = vor.u32 %v11953_v45, %v10227_v52 }
 0x709   :  { %5131 = vmatpush.bf16.msra.mxu3 %v10064_v22  ;;  %v6123_v22 = vsel %vm12848_vm3, %v6114_v58, %v6122_v13  ;;  %v6223_v40 = vunpack.c.l.b16 %v6087_v2  ;;  %v9996_v43 = vor.u32 %v11896_v12, %v9995_v23  ;;  %v9967_v50 = vld [vmem:[#allocation3] sm:$0xf]  ;;  %v14867_v47 = vld [vmem:[#allocation7 + $0xc8] sm:$0xf]  ;;  %v6089_v2 = vshrl.u32 %v14811_v35, 16 }
 0x70a   :  { %5118 = vmatpush.bf16.msra.mxu2 %v10300_v18  ;;  %v6226_v18 = vunpack.c.l.b16 %v6123_v22  ;;  %v9984_v58 = vor.u32 %v11890_v7, %v9981_v20  ;;  %v6059_v3 = vor.u32 %v6058_v49, %v6055_v14  ;;  %v10224_v23 = vor.u32 %v11950_v51, %v10221_v63  ;;  %v10333_v16 = vld [vmem:[#allocation7 + $0x2d0] sm:$0xf0]  ;;  %v10211_v25 = vld [vmem:[#allocation7 + $0x1c8] sm:$0xf] }
 0x70b   :  { %v10352_v12 = vor.u32 %v14859_v37, %v10349_v55  ;;  %v6092_v42 = vshll.u32 %v14811_v35, 16  ;;  %v6098_v22 = vshrl.u32 %v14861_v19, 16  ;;  %v6064_v26 = vrot.slane %v6062_v38, 5  ;;  %v10189_v7 = vld [vmem:[#allocation7 + $0x1b0] sm:$0xf0] }
 0x70c   :  { %5090 = vmatpush.bf16.msra.mxu0 %v10044_v8  ;;  %5104 = vmatpush.bf16.msra.mxu1 %v10172_v46  ;;  %v11892_v8 = vld [vmem:[#allocation7 + $0xc] sm:$0xf0]  ;;  %v14851_v46 = vld [vmem:[#allocation7 + $0x100] sm:$0xf]  ;;  %v14857_v28 = vpack.c.b16 %v6226_v18, %v6223_v40  ;;  %v6067_v0 = vrot.slane %v6065_v21, 6  ;;  %v6101_v40 = vshll.u32 %v14861_v19, 16  ;;  %v14879_v35 = vor.u32 %v11887_v31, %v9969_v6 }
 0x70d   :  { %5132 = vmatpush.bf16.msra.mxu3 %v10048_v24  ;;  %v14855_v24 = vld [vmem:[#allocation7 + $0xe8] sm:$0xf]  ;;  %v10108_v29 = vor.u32 %v14853_v34, %v14851_v46  ;;  %v6060_v20 = vrot.slane %v6059_v3, 4  ;;  %v6094_v51 = vrot.slane %v6092_v42, 6  ;;  %v6100_v14 = vrot.slane %v6098_v22, 5 }
 0x70e   :  { %5119 = vmatpush.bf16.msra.mxu2 %v10284_v11  ;;  %v9975_v11 = vld [vmem:[#allocation3 + $0x8] sm:$0xf]  ;;  %v10100_v13 = vor.u32 %v11921_v5, %v14855_v24  ;;  %v10067_v34 = vld [vmem:[#allocation7 + $0xa8] sm:$0xf]  ;;  %v10317_v5 = vld [vmem:[#allocation7 + $0x2b0] sm:$0xf0]  ;;  %v6068_v55 = vor.u32 %v6067_v0, %v6064_v26 }
 0x70f   :  { %v10195_v63 = vld [vmem:[#allocation7 + $0x1a8] sm:$0xf]  ;;  %v11945_v37 = vld [vmem:[#allocation7 + $0x1b4] sm:$0xf0]  ;;  %v6103_v52 = vrot.slane %v6101_v40, 6 }
 0x710   :  { %5091 = vmatpush.bf16.msra.mxu0 %v10028_v53  ;;  %5105 = vmatpush.bf16.msra.mxu1 %v10156_v59  ;;  %v11889_v53 = vld [vmem:[#allocation3 + $0x1c] sm:$0xf0]  ;;  %v10236_v59 = vor.u32 %v11956_v27, %v10235_v33  ;;  %v11949_v33 = vld [vmem:[#allocation7 + $0x1d4] sm:$0xf0]  ;;  %v6091_v27 = vrot.slane %v6089_v2, 5  ;;  %v6069_v45 = vsel %vm12848_vm3, %v6060_v20, %v6068_v55 }
 0x711   :  { %5133 = vmatpush.bf16.msra.mxu3 %v10032_v15  ;;  %v9980_v15 = vor.u32 %v11892_v8, %v9979_v61  ;;  %v14875_v18 = vor.u32 %v11889_v53, %v9975_v11  ;;  %v6890_v61 = vld [vmem:[#allocation3 + $0x8] sm:$0xc]  ;;  %v14877_v8 = vor.u32 %v11888_v62, %v9967_v50  ;;  %v10212_v49 = vor.u32 %v11949_v33, %v10211_v25  ;;  %v10051_v53 = vld [vmem:[#allocation7 + $0x88] sm:$0xf]  ;;  %v11970_v2 = vld [vmem:[#allocation7 + $0x284] sm:$0xf] }
 0x712   :  { %5120 = vmatpush.bf16.msra.mxu2 %v10268_v56  ;;  %v11917_v56 = vld [vmem:[#allocation7 + $0xd4] sm:$0xf0]  ;;  %v11134_v11 = vrot.slane %v6890_v61, 10  ;;  %v6095_v21 = vor.u32 %v6094_v51, %v6091_v27  ;;  %v6104_v50 = vor.u32 %v6103_v52, %v6100_v14  ;;  %v6907_v62 = vrot.slane %v14831_v10, 6  ;;  %v10035_v25 = vld [vmem:[#allocation7 + $0x68] sm:$0xf] }
 0x713   :  { %v10084_v46 = vor.u32 %v11917_v56, %v14867_v47  ;;  %v11909_v38 = vld [vmem:[#allocation7 + $0x94] sm:$0xf0]  ;;  %v10301_v56 = vld [vmem:[#allocation7 + $0x290] sm:$0xf0]  ;;  %v6222_v40 = vunpack.c.h.b16 %v6069_v45  ;;  %v11934_v61 = vld [vmem:[#allocation7 + $0x164] sm:$0xf] }
 0x714   :  { %5092 = vmatpush.bf16.msra.mxu0 %v10012_v57  ;;  %5106 = vmatpush.bf16.msra.mxu1 %v10140_v60  ;;  %v11946_v57 = vld [vmem:[#allocation7 + $0x1c4] sm:$0xf]  ;;  %v10205_v60 = vld [vmem:[#allocation7 + $0x1d0] sm:$0xf0]  ;;  %v11941_v42 = vld [vmem:[#allocation7 + $0x194] sm:$0xf0] }
 0x715   :  { %5134 = vmatpush.bf16.msra.mxu3 %v10016_v54  ;;  %v11978_v54 = vld [vmem:[#allocation7 + $0x2c4] sm:$0xf]  ;;  %v10208_v24 = vor.u32 %v11946_v57, %v10205_v60  ;;  %v6908_v60 = vsel %vm12883_vm6, %v11134_v11, %v6907_v62  ;;  %v11905_v26 = vld [vmem:[#allocation7 + $0x74] sm:$0xf0]  ;;  %v10285_v20 = vld [vmem:[#allocation7 + $0x270] sm:$0xf0] }
 0x716   :  { %5121 = vmatpush.bf16.msra.mxu2 %v10252_v1  ;;  %v11913_v1 = vld [vmem:[#allocation7 + $0xb4] sm:$0xf0]  ;;  %v11930_v11 = vld [vmem:[#allocation7 + $0x144] sm:$0xf] }
 0x717   :  { %v10068_v31 = vor.u32 %v11913_v1, %v10067_v34  ;;  %v7016_v34 = vunpack.c.l.b16 %v6908_v60  ;;  %v11937_v51 = vld [vmem:[#allocation7 + $0x174] sm:$0xf0]  ;;  %v10003_v60 = vld [vmem:[#allocation7 + $0x28] sm:$0xf] }
 0x718   :  { %5093 = vmatpush.bf16.msra.mxu0 %v9996_v43  ;;  %5107 = vmatpush.bf16.msra.mxu1 %v10124_v44  ;;  %v11942_v43 = vld [vmem:[#allocation7 + $0x1a4] sm:$0xf]  ;;  %v10336_v44 = vor.u32 %v11978_v54, %v10333_v16  ;;  %v10052_v54 = vor.u32 %v11909_v38, %v10051_v53  ;;  %v10179_v16 = vld [vmem:[#allocation7 + $0x188] sm:$0xf]  ;;  %v11901_v52 = vld [vmem:[#allocation7 + $0x54] sm:$0xf0] }
 0x719   :  { %5135 = vmatpush.bf16.msra.mxu3 %v10000_v9  ;;  %v11974_v9 = vld [vmem:[#allocation7 + $0x2a4] sm:$0xf]  ;;  %v10192_v6 = vor.u32 %v11942_v43, %v10189_v7  ;;  %v10180_v4 = vor.u32 %v11941_v42, %v10179_v16  ;;  %v11933_v62 = vld [vmem:[#allocation7 + $0x154] sm:$0xf0]  ;;  %v10253_v42 = vld [vmem:[#allocation7 + $0x230] sm:$0xf0] }
 0x71a   :  { %5122 = vmatpush.bf16.msra.mxu2 %v10236_v59  ;;  %v6892_v59 = vld [vmem:[#allocation3 + $0x20] sm:$0xc]  ;;  %v10320_v47 = vor.u32 %v11974_v9, %v10317_v5  ;;  %v11966_v7 = vld [vmem:[#allocation7 + $0x264] sm:$0xf]  ;;  %v6891_v9 = vld [vmem:[#allocation3 + $0x18] sm:$0xcc] }
 0x71b   :  { %v11136_v3 = vrot.slane %v6892_v59, 10  ;;  %v10163_v5 = vld [vmem:[#allocation7 + $0x168] sm:$0xf]  ;;  %v11135_v38 = vrot.slane %v6891_v9, 10  ;;  %v10288_v59 = vor.u32 %v11966_v7, %v10285_v20  ;;  %v10229_v7 = vld [vmem:[#allocation7 + $0x1f8] sm:$0xf0] }
 0x71c   :  { %5094 = vmatpush.bf16.msra.mxu0 %v9980_v15  ;;  %5108 = vmatpush.bf16.msra.mxu1 %v10108_v29  ;;  %v11938_v15 = vld [vmem:[#allocation7 + $0x184] sm:$0xf]  ;;  %v10173_v29 = vld [vmem:[#allocation7 + $0x190] sm:$0xf0]  ;;  %v10355_v20 = vld [vmem:[#allocation7 + $0x2e8] sm:$0xf] }
 0x71d   :  { %5136 = vmatpush.bf16.msra.mxu3 %v9984_v58  ;;  %5123 = vmatmul.bf16.vlgmr.msra.gmra.mxu2 %v14875_v18  ;;  %v6096_v58 = vrot.slane %v6095_v21, 4  ;;  %v10176_v10 = vor.u32 %v11938_v15, %v10173_v29  ;;  %v6911_v21 = vrot.slane %v14861_v19, 6  ;;  %v10164_v15 = vor.u32 %v11937_v51, %v10163_v5  ;;  %v10141_v29 = vld [vmem:[#allocation7 + $0x150] sm:$0xf0]  ;;  %v11985_v9 = vld [vmem:[#allocation7 + $0x2f4] sm:$0xf0] }
 0x71e   :  { %5171 = vmatpush.bf16.msrb.mxu2 %v10100_v13  ;;  %v10196_v13 = vor.u32 %v11945_v37, %v10195_v63  ;;  %v10036_v63 = vor.u32 %v11905_v26, %v10035_v25  ;;  %v10019_v37 = vld [vmem:[#allocation7 + $0x48] sm:$0xf]  ;;  %v10144_v19 = vor.u32 %v11930_v11, %v10141_v29  ;;  %v11919_v5 = vld [vmem:[#allocation7 + $0xec] sm:$0xf] }
 0x71f   :  { %5095 = vmatmul.bf16.vlgmr.msra.gmra.mxu0 %v14877_v8  ;;  %5109 = vmatmul.bf16.vlgmr.msra.gmra.mxu1 %v14879_v35  ;;  %v6105_v22 = vsel %vm12848_vm3, %v6096_v58, %v6104_v50  ;;  %v10147_v50 = vld [vmem:[#allocation7 + $0x148] sm:$0xf] }
 0x720   :  { %5143 = vmatpush.bf16.msrb.mxu0 %v10224_v23  ;;  %5157 = vmatpush.bf16.msrb.mxu1 %v10352_v12  ;;  %v6915_v23 = vrot.slane %v14836_v41, 6  ;;  %v6889_v12 = vld [vmem:[#allocation3] sm:$0xcc]  ;;  %v6224_v0 = vunpack.c.l.b16 %v6105_v22  ;;  %v6225_v33 = vunpack.c.h.b16 %v6105_v22  ;;  %v10304_v41 = vor.u32 %v11970_v2, %v10301_v56  ;;  %v10131_v22 = vld [vmem:[#allocation7 + $0x128] sm:$0xf] }
 0x721   :  { %5185 = vmatpush.bf16.msrb.mxu3 %v10228_v32  ;;  %v6221_v32 = vunpack.c.l.b16 %v6069_v45  ;;  %v11133_v43 = vrot.slane %v6889_v12, 10  ;;  %v11962_v45 = vld [vmem:[#allocation7 + $0x244] sm:$0xf]  ;;  %v9987_v25 = vld [vmem:[#allocation7 + $0x8] sm:$0xf] }
 0x722   :  { %5137 = vmatmul.bf16.vlgmr.msra.gmra.mxu3 %v14877_v8  ;;  %5172 = vmatpush.bf16.msrb.mxu2 %v10084_v46  ;;  %v6916_v27 = vsel %vm12883_vm6, %v11136_v3, %v6915_v23  ;;  %v10157_v46 = vld [vmem:[#allocation7 + $0x170] sm:$0xf0]  ;;  %v11897_v3 = vld [vmem:[#allocation7 + $0x34] sm:$0xf0]  ;;  %v10148_v23 = vor.u32 %v11933_v62, %v10147_v50  ;;  %v11926_v12 = vld [vmem:[#allocation7 + $0x124] sm:$0xf] }
 0x723   :  { %v7019_v1 = vunpack.c.l.b16 %v6916_v27  ;;  %v10160_v55 = vor.u32 %v11934_v61, %v10157_v46  ;;  %v10004_v26 = vor.u32 %v11897_v3, %v10003_v60  ;;  %v10109_v27 = vld [vmem:[#allocation7 + $0x110] sm:$0xf0]  ;;  %v11954_v46 = vld [vmem:[#allocation7 + $0x204] sm:$0xf]  ;;  %v11915_v50 = vld [vmem:[#allocation7 + $0xcc] sm:$0xf] }
 0x724   :  { %5144 = vmatpush.bf16.msrb.mxu0 %v10208_v24  ;;  %5158 = vmatpush.bf16.msrb.mxu1 %v10336_v44  ;;  %v14896_v24 = vpack.c.b16 %v6224_v0, %v6221_v32  ;;  %v14898_v44 = vpack.c.b16 %v6225_v33, %v6222_v40  ;;  %v11929_v32 = vld [vmem:[#allocation7 + $0x134] sm:$0xf0]  ;;  %v11922_v33 = vld [vmem:[#allocation7 + $0x104] sm:$0xf]  ;;  %v10085_v62 = vld [vmem:[#allocation7 + $0xd8] sm:$0xf0] }
 0x725   :  { %5186 = vmatpush.bf16.msrb.mxu3 %v10212_v49  ;;  %v14900_v14 = vpack.c.b16 %v7019_v1, %v7016_v34  ;;  %v6903_v49 = vrot.slane %v14849_v48, 6  ;;  %v10269_v48 = vld [vmem:[#allocation7 + $0x250] sm:$0xf0]  ;;  %v11893_v40 = vld [vmem:[#allocation7 + $0x14] sm:$0xf0]  ;;  %v10132_v61 = vor.u32 %v11929_v32, %v10131_v22 }
 0x726   :  { %5173 = vmatpush.bf16.msrb.mxu2 %v10068_v31  ;;  %v6912_v31 = vsel %vm12883_vm6, %v11135_v38, %v6911_v21  ;;  %v10272_v56 = vor.u32 %v11962_v45, %v10269_v48  ;;  %v10237_v34 = vld [vmem:[#allocation7 + $0x210] sm:$0xf0]  ;;  %v10115_v1 = vld [vmem:[#allocation7 + $0x108] sm:$0xf]  ;;  %v9988_v51 = vor.u32 %v11893_v40, %v9987_v25  ;;  %v10356_v38 = vor.u32 %v11985_v9, %v10355_v20  ;;  %v11947_v21 = vld [vmem:[#allocation7 + $0x1cc] sm:$0xf] }
 0x727   :  { %v6904_v53 = vsel %vm12883_vm6, %v11133_v43, %v6903_v49  ;;  %v7018_v58 = vunpack.c.h.b16 %v6912_v31  ;;  %v11925_v43 = vld [vmem:[#allocation7 + $0x114] sm:$0xf0]  ;;  %v10112_v49 = vor.u32 %v11922_v33, %v10109_v27  ;;  %v10339_v45 = vld [vmem:[#allocation7 + $0x2c8] sm:$0xf]  ;;  %v11939_v32 = vld [vmem:[#allocation7 + $0x18c] sm:$0xf] }
 0x728   :  { %5145 = vmatpush.bf16.msrb.mxu0 %v10192_v6  ;;  %5159 = vmatpush.bf16.msrb.mxu1 %v10320_v47  ;;  %v7014_v6 = vunpack.c.l.b16 %v6904_v53  ;;  %v7017_v47 = vunpack.c.l.b16 %v6912_v31  ;;  %v7015_v2 = vunpack.c.h.b16 %v6904_v53  ;;  %v10116_v11 = vor.u32 %v11925_v43, %v10115_v1  ;;  %v11981_v48 = vld [vmem:[#allocation7 + $0x2d4] sm:$0xf0]  ;;  %v11979_v31 = vld [vmem:[#allocation7 + $0x2cc] sm:$0xf]  ;;  %v10323_v60 = vld [vmem:[#allocation7 + $0x2a8] sm:$0xf] }
 0x729   :  { %5187 = vmatpush.bf16.msrb.mxu3 %v10196_v13  ;;  %v10020_v13 = vor.u32 %v11901_v52, %v10019_v37  ;;  %v11983_v37 = vld [vmem:[#allocation7 + $0x2ec] sm:$0xf]  ;;  %v10240_v52 = vor.u32 %v11954_v46, %v10237_v34  ;;  %v11977_v3 = vld [vmem:[#allocation7 + $0x2b4] sm:$0xf0]  ;;  %v10181_v25 = vld [vmem:[#allocation7 + $0x198] sm:$0xf0] }
 0x72a   :  { %5174 = vmatpush.bf16.msrb.mxu2 %v10052_v54  ;;  %v10125_v54 = vld [vmem:[#allocation7 + $0x130] sm:$0xf0]  ;;  %v14908_v16 = vpack.c.b16 %v7017_v47, %v7014_v6  ;;  %v14910_v57 = vpack.c.b16 %v7018_v58, %v7015_v2  ;;  %v10341_v6 = vld [vmem:[#allocation7 + $0x2d8] sm:$0xf0]  ;;  %v10340_v2 = vor.u32 %v11981_v48, %v10339_v45  ;;  %v11943_v58 = vld [vmem:[#allocation7 + $0x1ac] sm:$0xf]  ;;  %v10324_v22 = vor.u32 %v11977_v3, %v10323_v60 }
 0x72b   :  { %v10128_v0 = vor.u32 %v11926_v12, %v10125_v54  ;;  %v10069_v12 = vld [vmem:[#allocation7 + $0xb8] sm:$0xf0]  ;;  %v11975_v54 = vld [vmem:[#allocation7 + $0x2ac] sm:$0xf]  ;;  %v10307_v40 = vld [vmem:[#allocation7 + $0x288] sm:$0xf]  ;;  %v10184_v34 = vor.u32 %v11939_v32, %v10181_v25 }
 0x72c   :  { %5146 = vmatpush.bf16.msrb.mxu0 %v10176_v10  ;;  %5160 = vmatpush.bf16.msrb.mxu1 %v10304_v41  ;;  %v11958_v10 = vld [vmem:[#allocation7 + $0x224] sm:$0xf]  ;;  %v11973_v33 = vld [vmem:[#allocation7 + $0x294] sm:$0xf0]  ;;  %v11907_v27 = vld [vmem:[#allocation7 + $0x8c] sm:$0xf] }
 0x72d   :  { %5188 = vmatpush.bf16.msrb.mxu3 %v10180_v4  ;;  %v10256_v41 = vor.u32 %v11958_v10, %v10253_v42  ;;  %v11951_v4 = vld [vmem:[#allocation7 + $0x1ec] sm:$0xf]  ;;  %v10325_v10 = vld [vmem:[#allocation7 + $0x2b8] sm:$0xf0]  ;;  %v10308_v1 = vor.u32 %v11973_v33, %v10307_v40  ;;  %v10291_v9 = vld [vmem:[#allocation7 + $0x268] sm:$0xf] }
 0x72e   :  { %5175 = vmatpush.bf16.msrb.mxu2 %v10036_v63  ;;  %v10101_v63 = vld [vmem:[#allocation7 + $0xf8] sm:$0xf0]  ;;  %v10232_v53 = vor.u32 %v11951_v4, %v10229_v7  ;;  %v11935_v43 = vld [vmem:[#allocation7 + $0x16c] sm:$0xf]  ;;  %v11957_v32 = vld [vmem:[#allocation7 + $0x214] sm:$0xf0] }
 0x72f   :  { %v10309_v46 = vld [vmem:[#allocation7 + $0x298] sm:$0xf0]  ;;  %v11963_v48 = vld [vmem:[#allocation7 + $0x24c] sm:$0xf] }
 0x730   :  { %5147 = vmatpush.bf16.msrb.mxu0 %v10160_v55  ;;  %5161 = vmatpush.bf16.msrb.mxu1 %v10288_v59  ;;  %v10357_v55 = vld [vmem:[#allocation7 + $0x2f8] sm:$0xf0]  ;;  %v11959_v3 = vld [vmem:[#allocation7 + $0x22c] sm:$0xf] }
 0x731   :  { %5189 = vmatpush.bf16.msrb.mxu3 %v10164_v15  ;;  %v10213_v59 = vld [vmem:[#allocation7 + $0x1d8] sm:$0xf0]  ;;  %v10104_v15 = vor.u32 %v11919_v5, %v10101_v63  ;;  %v10360_v29 = vor.u32 %v11983_v37, %v10357_v55  ;;  %v11969_v5 = vld [vmem:[#allocation7 + $0x274] sm:$0xf0]  ;;  %v11967_v63 = vld [vmem:[#allocation7 + $0x26c] sm:$0xf] }
 0x732   :  { %5176 = vmatpush.bf16.msrb.mxu2 %v10020_v13  ;;  %v10216_v47 = vor.u32 %v11947_v21, %v10213_v59  ;;  %v10197_v13 = vld [vmem:[#allocation7 + $0x1b8] sm:$0xf0]  ;;  %v10275_v59 = vld [vmem:[#allocation7 + $0x248] sm:$0xf]  ;;  %v11955_v33 = vld [vmem:[#allocation7 + $0x20c] sm:$0xf] }
 0x733   :  { %v10200_v42 = vor.u32 %v11943_v58, %v10197_v13  ;;  %v10165_v4 = vld [vmem:[#allocation7 + $0x178] sm:$0xf0]  ;;  %v10259_v13 = vld [vmem:[#allocation7 + $0x228] sm:$0xf] }
 0x734   :  { %5148 = vmatpush.bf16.msrb.mxu0 %v10144_v19  ;;  %5162 = vmatpush.bf16.msrb.mxu1 %v10272_v56  ;;  %v10088_v19 = vor.u32 %v11915_v50, %v10085_v62  ;;  %v10344_v56 = vor.u32 %v11979_v31, %v10341_v6  ;;  %v10293_v37 = vld [vmem:[#allocation7 + $0x278] sm:$0xf0]  ;;  %v10168_v55 = vor.u32 %v11935_v43, %v10165_v4  ;;  %v11927_v6 = vld [vmem:[#allocation7 + $0x12c] sm:$0xf] }
 0x735   :  { %5190 = vmatpush.bf16.msrb.mxu3 %v10148_v23  ;;  %v11911_v23 = vld [vmem:[#allocation7 + $0xac] sm:$0xf]  ;;  %v10296_v21 = vor.u32 %v11967_v63, %v10293_v37  ;;  %v10021_v45 = vld [vmem:[#allocation7 + $0x58] sm:$0xf0]  ;;  %v10719_v37 = vld [vmem:[#allocation7 + $0x8c0] sm:$0xf] }
 0x736   :  { %5177 = vmatpush.bf16.msrb.mxu2 %v10004_v26  ;;  %v10072_v26 = vor.u32 %v11911_v23, %v10069_v12  ;;  %v10277_v50 = vld [vmem:[#allocation7 + $0x258] sm:$0xf0]  ;;  %v11923_v12 = vld [vmem:[#allocation7 + $0x10c] sm:$0xf] }
 0x737   :  { %v10280_v58 = vor.u32 %v11963_v48, %v10277_v50  ;;  %v10005_v60 = vld [vmem:[#allocation7 + $0x38] sm:$0xf0]  ;;  %v10703_v50 = vld [vmem:[#allocation7 + $0x8a0] sm:$0xf] }
 0x738   :  { %5149 = vmatpush.bf16.msrb.mxu0 %v10128_v0  ;;  %5163 = vmatpush.bf16.msrb.mxu1 %v10256_v41  ;;  %v10328_v0 = vor.u32 %v11975_v54, %v10325_v10  ;;  %v10053_v41 = vld [vmem:[#allocation7 + $0x98] sm:$0xf0] }
 0x739   :  { %5191 = vmatpush.bf16.msrb.mxu3 %v10132_v61  ;;  %v11971_v61 = vld [vmem:[#allocation7 + $0x28c] sm:$0xf]  ;;  %v10056_v7 = vor.u32 %v11907_v27, %v10053_v41  ;;  %v10261_v23 = vld [vmem:[#allocation7 + $0x238] sm:$0xf0]  ;;  %v10735_v41 = vld [vmem:[#allocation7 + $0x8e0] sm:$0xf] }
 0x73a   :  { %5178 = vmatpush.bf16.msrb.mxu2 %v9988_v51  ;;  %v10312_v20 = vor.u32 %v11971_v61, %v10309_v46  ;;  %v11903_v51 = vld [vmem:[#allocation7 + $0x6c] sm:$0xf]  ;;  %v9989_v40 = vld [vmem:[#allocation7 + $0x18] sm:$0xf0]  ;;  %v12176_v61 = vld [vmem:[#allocation7 + $0x8ec] sm:$0xf0] }
 0x73b   :  { %v10245_v27 = vld [vmem:[#allocation7 + $0x218] sm:$0xf0]  ;;  %v10479_v46 = vld [vmem:[#allocation7 + $0x6e0] sm:$0xf] }
 0x73c   :  { %5150 = vmatpush.bf16.msrb.mxu0 %v10112_v49  ;;  %5164 = vmatpush.bf16.msrb.mxu1 %v10240_v52  ;;  %v10037_v49 = vld [vmem:[#allocation7 + $0x78] sm:$0xf0]  ;;  %v10292_v52 = vor.u32 %v11969_v5, %v10291_v9  ;;  %v10481_v9 = vld [vmem:[#allocation7 + $0x6f0] sm:$0xf0] }
 0x73d   :  { %5192 = vmatpush.bf16.msrb.mxu3 %v10116_v11  ;;  %5179 = vmatmul.bf16.vlgmr.msrb.gmra.mxu2 %v14877_v8  ;;  %v11931_v11 = vld [vmem:[#allocation7 + $0x14c] sm:$0xf] }
 0x73e   :  { %5227 = vmatpush.bf16.msra.mxu2 %v10232_v53  ;;  %v10149_v53 = vld [vmem:[#allocation7 + $0x158] sm:$0xf0] }
 0x73f   :  { %5151 = vmatmul.bf16.vlgmr.msrb.gmra.mxu0 %v14879_v35  ;;  %5165 = vmatmul.bf16.vlgmr.msrb.gmra.mxu1 %v14875_v18  ;;  %v10152_v62 = vor.u32 %v11931_v11, %v10149_v53  ;;  %v10463_v53 = vld [vmem:[#allocation7 + $0x6c0] sm:$0xf] }
 0x740   :  { %5199 = vmatpush.bf16.msra.mxu0 %v10356_v38  ;;  %5213 = vmatpush.bf16.msra.mxu1 %v10104_v15  ;;  %v10040_v38 = vor.u32 %v11903_v51, %v10037_v49  ;;  %v11965_v15 = vld [vmem:[#allocation7 + $0x254] sm:$0xf0]  ;;  %v10248_v51 = vor.u32 %v11955_v33, %v10245_v27  ;;  %v10736_v49 = vor.u32 %v12176_v61, %v10735_v41  ;;  %v10671_v27 = vld [vmem:[#allocation7 + $0x860] sm:$0xf]  ;;  %v12160_v41 = vld [vmem:[#allocation7 + $0x86c] sm:$0xf0] }
 0x741   :  { %5241 = vmatpush.bf16.msra.mxu3 %v10360_v29  ;;  %v11899_v29 = vld [vmem:[#allocation7 + $0x4c] sm:$0xf]  ;;  %v10276_v31 = vor.u32 %v11965_v15, %v10275_v59  ;;  %v12140_v59 = vld [vmem:[#allocation7 + $0x7cc] sm:$0xf0]  ;;  %v12106_v15 = vld [vmem:[#allocation7 + $0x6c4] sm:$0xf] }
 0x742   :  { %5193 = vmatmul.bf16.vlgmr.msrb.gmra.mxu3 %v14879_v35  ;;  %5228 = vmatpush.bf16.msra.mxu2 %v10216_v47  ;;  %v10133_v47 = vld [vmem:[#allocation7 + $0x138] sm:$0xf0] }
 0x743   :  { %v10136_v54 = vor.u32 %v11927_v6, %v10133_v47  ;;  %v10447_v47 = vld [vmem:[#allocation7 + $0x6a0] sm:$0xf] }
 0x744   :  { %5200 = vmatpush.bf16.msra.mxu0 %v10340_v2  ;;  %5214 = vmatpush.bf16.msra.mxu1 %v10088_v19  ;;  %v10024_v2 = vor.u32 %v11899_v29, %v10021_v45  ;;  %v11961_v19 = vld [vmem:[#allocation7 + $0x234] sm:$0xf0]  ;;  %v10465_v29 = vld [vmem:[#allocation7 + $0x6d0] sm:$0xf0] }
 0x745   :  { %5242 = vmatpush.bf16.msra.mxu3 %v10344_v56  ;;  %v11895_v56 = vld [vmem:[#allocation7 + $0x2c] sm:$0xf]  ;;  %v10260_v10 = vor.u32 %v11961_v19, %v10259_v13  ;;  %v10468_v6 = vor.u32 %v12106_v15, %v10465_v29  ;;  %v12136_v13 = vld [vmem:[#allocation7 + $0x7ac] sm:$0xf0]  ;;  %v12102_v19 = vld [vmem:[#allocation7 + $0x6a4] sm:$0xf] }
 0x746   :  { %5229 = vmatpush.bf16.msra.mxu2 %v10200_v42  ;;  %v10117_v42 = vld [vmem:[#allocation7 + $0x118] sm:$0xf0]  ;;  %v10008_v25 = vor.u32 %v11895_v56, %v10005_v60  ;;  %v10449_v56 = vld [vmem:[#allocation7 + $0x6b0] sm:$0xf0]  ;;  %v10527_v15 = vld [vmem:[#allocation7 + $0x740] sm:$0xf] }
 0x747   :  { %v10120_v43 = vor.u32 %v11923_v12, %v10117_v42  ;;  %v10687_v12 = vld [vmem:[#allocation7 + $0x880] sm:$0xf]  ;;  %v12124_v29 = vld [vmem:[#allocation7 + $0x74c] sm:$0xf0] }
 0x748   :  { %5201 = vmatpush.bf16.msra.mxu0 %v10324_v22  ;;  %5215 = vmatpush.bf16.msra.mxu1 %v10072_v26  ;;  %v10243_v22 = vld [vmem:[#allocation7 + $0x208] sm:$0xf]  ;;  %v10264_v26 = vor.u32 %v11959_v3, %v10261_v23 }
 0x749   :  { %5243 = vmatpush.bf16.msra.mxu3 %v10328_v0  ;;  %v11891_v0 = vld [vmem:[#allocation7 + $0xc] sm:$0xf]  ;;  %v10244_v4 = vor.u32 %v11957_v32, %v10243_v22  ;;  %v10431_v22 = vld [vmem:[#allocation7 + $0x680] sm:$0xf]  ;;  %v12100_v32 = vld [vmem:[#allocation7 + $0x68c] sm:$0xf0] }
 0x74a   :  { %5230 = vmatpush.bf16.msra.mxu2 %v10184_v34  ;;  %v12112_v34 = vld [vmem:[#allocation7 + $0x6ec] sm:$0xf0]  ;;  %v9992_v5 = vor.u32 %v11891_v0, %v9989_v40  ;;  %v10433_v40 = vld [vmem:[#allocation7 + $0x690] sm:$0xf0]  ;;  %v10432_v33 = vor.u32 %v12100_v32, %v10431_v22  ;;  %v10367_v32 = vld [vmem:[#allocation7 + $0x600] sm:$0xf] }
 0x74b   :  { %v10480_v63 = vor.u32 %v12112_v34, %v10479_v46  ;;  %v12132_v0 = vld [vmem:[#allocation7 + $0x78c] sm:$0xf0] }
 0x74c   :  { %5202 = vmatpush.bf16.msra.mxu0 %v10308_v1  ;;  %5216 = vmatpush.bf16.msra.mxu1 %v10056_v7  ;;  %v10607_v1 = vld [vmem:[#allocation7 + $0x7e0] sm:$0xf]  ;;  %v12144_v7 = vld [vmem:[#allocation7 + $0x7ec] sm:$0xf0] }
 0x74d   :  { %5244 = vmatpush.bf16.msra.mxu3 %v10312_v20  ;;  %v12110_v20 = vld [vmem:[#allocation7 + $0x6e4] sm:$0xf]  ;;  %v12148_v22 = vld [vmem:[#allocation7 + $0x80c] sm:$0xf0] }
 0x74e   :  { %5231 = vmatpush.bf16.msra.mxu2 %v10168_v55  ;;  %v12172_v55 = vld [vmem:[#allocation7 + $0x8cc] sm:$0xf0]  ;;  %v10484_v11 = vor.u32 %v12110_v20, %v10481_v9  ;;  %v12094_v9 = vld [vmem:[#allocation7 + $0x664] sm:$0xf] }
 0x74f   :  { %v10720_v45 = vor.u32 %v12172_v55, %v10719_v37  ;;  %v12128_v20 = vld [vmem:[#allocation7 + $0x76c] sm:$0xf0]  ;;  %v10655_v55 = vld [vmem:[#allocation7 + $0x840] sm:$0xf] }
 0x750   :  { %5203 = vmatpush.bf16.msra.mxu0 %v10292_v52  ;;  %5217 = vmatpush.bf16.msra.mxu1 %v10040_v38  ;;  %v10608_v52 = vor.u32 %v12144_v7, %v10607_v1  ;;  %v12108_v38 = vld [vmem:[#allocation7 + $0x6cc] sm:$0xf0]  ;;  %v10415_v1 = vld [vmem:[#allocation7 + $0x660] sm:$0xf] }
 0x751   :  { %5245 = vmatpush.bf16.msra.mxu3 %v10296_v21  ;;  %v10591_v21 = vld [vmem:[#allocation7 + $0x7c0] sm:$0xf]  ;;  %v10464_v48 = vor.u32 %v12108_v38, %v10463_v53 }
 0x752   :  { %5232 = vmatpush.bf16.msra.mxu2 %v10152_v62  ;;  %v12168_v62 = vld [vmem:[#allocation7 + $0x8ac] sm:$0xf0] }
 0x753   :  { %v10704_v60 = vor.u32 %v12168_v62, %v10703_v50 }
 0x754   :  { %5204 = vmatpush.bf16.msra.mxu0 %v10276_v31  ;;  %5218 = vmatpush.bf16.msra.mxu1 %v10024_v2  ;;  %v10592_v31 = vor.u32 %v12140_v59, %v10591_v21  ;;  %v12104_v2 = vld [vmem:[#allocation7 + $0x6ac] sm:$0xf0]  ;;  %v10399_v21 = vld [vmem:[#allocation7 + $0x640] sm:$0xf] }
 0x755   :  { %5246 = vmatpush.bf16.msra.mxu3 %v10280_v58  ;;  %v10575_v58 = vld [vmem:[#allocation7 + $0x7a0] sm:$0xf]  ;;  %v10448_v3 = vor.u32 %v12104_v2, %v10447_v47  ;;  %v12092_v59 = vld [vmem:[#allocation7 + $0x64c] sm:$0xf0]  ;;  %v10528_v47 = vor.u32 %v12124_v29, %v10527_v15 }
 0x756   :  { %5233 = vmatpush.bf16.msra.mxu2 %v10136_v54  ;;  %v12164_v54 = vld [vmem:[#allocation7 + $0x88c] sm:$0xf0]  ;;  %v10400_v62 = vor.u32 %v12092_v59, %v10399_v21  ;;  %v10471_v21 = vld [vmem:[#allocation7 + $0x6c8] sm:$0xf]  ;;  %v12109_v59 = vld [vmem:[#allocation7 + $0x6d4] sm:$0xf0] }
 0x758   :  { %5205 = vmatpush.bf16.msra.mxu0 %v10260_v10  ;;  %5219 = vmatpush.bf16.msra.mxu1 %v10008_v25  ;;  %v10576_v10 = vor.u32 %v12136_v13, %v10575_v58  ;;  %v10559_v25 = vld [vmem:[#allocation7 + $0x780] sm:$0xf] }
 0x759   :  { %5247 = vmatpush.bf16.msra.mxu3 %v10264_v26  ;;  %v10560_v61 = vor.u32 %v12132_v0, %v10559_v25  ;;  %v10383_v13 = vld [vmem:[#allocation7 + $0x620] sm:$0xf]  ;;  %v12084_v25 = vld [vmem:[#allocation7 + $0x60c] sm:$0xf0] }
 0x75a   :  { %5234 = vmatpush.bf16.msra.mxu2 %v10120_v43  ;;  %v12096_v43 = vld [vmem:[#allocation7 + $0x66c] sm:$0xf0] }
 0x75b   :  { %v4432_v23 = vpop.f32.mrf.mxu0 }
 0x75c   :  { %5206 = vmatpush.bf16.msra.mxu0 %v10244_v4  ;;  %5220 = vmatpush.bf16.msra.mxu1 %v9992_v5  ;;  %v4446_v42 = vpop.f32.mrf.mxu1  ;;  %v10543_v4 = vld [vmem:[#allocation7 + $0x760] sm:$0xf]  ;;  %v10417_v5 = vld [vmem:[#allocation7 + $0x670] sm:$0xf0] }
 0x75d   :  { %5248 = vmatpush.bf16.msra.mxu3 %v10248_v51  ;;  %5235 = vmatmul.bf16.vlgmr.msra.gmra.mxu2 %v14879_v35  ;;  %v10452_v35 = vor.u32 %v12102_v19, %v10449_v56  ;;  %v4447_v26 = vadd.f32 %v4446_v42, %v4432_v23  ;;  %v10420_v53 = vor.u32 %v12094_v9, %v10417_v5  ;;  %v12088_v19 = vld [vmem:[#allocation7 + $0x62c] sm:$0xf0]  ;;  %v10511_v56 = vld [vmem:[#allocation7 + $0x720] sm:$0xf]  ;;  %v10385_v23 = vld [vmem:[#allocation7 + $0x630] sm:$0xf0] }
 0x75e   :  { %5900 = vmatpush.bf16.msrb.mxu2 %v10736_v49  ;;  %v10672_v49 = vor.u32 %v12160_v41, %v10671_v27  ;;  %v10369_v41 = vld [vmem:[#allocation7 + $0x610] sm:$0xf0]  ;;  %v10368_v9 = vor.u32 %v12084_v25, %v10367_v32  ;;  %v10583_v32 = vld [vmem:[#allocation7 + $0x7a8] sm:$0xf]  ;;  %v12137_v25 = vld [vmem:[#allocation7 + $0x7b4] sm:$0xf0] }
 0x75f   :  { %5207 = vmatmul.bf16.vlgmr.msra.gmra.mxu0 %v14875_v18  ;;  %5221 = vmatmul.bf16.vlgmr.msra.gmra.mxu1 %v14877_v8  ;;  %v12098_v8 = vld [vmem:[#allocation7 + $0x684] sm:$0xf]  ;;  %v10737_v5 = vld [vmem:[#allocation7 + $0x8f0] sm:$0xf0] }
 0x760   :  { %5872 = vmatpush.bf16.msrb.mxu0 %v10480_v63  ;;  %5886 = vmatpush.bf16.msrb.mxu1 %v10608_v52  ;;  %v10436_v46 = vor.u32 %v12098_v8, %v10433_v40  ;;  %v4460_v34 = vpop.f32.mrf.mxu2  ;;  %v10416_v63 = vor.u32 %v12096_v43, %v10415_v1  ;;  %v12156_v52 = vld [vmem:[#allocation7 + $0x84c] sm:$0xf0]  ;;  %v10495_v40 = vld [vmem:[#allocation7 + $0x700] sm:$0xf]  ;;  %v12142_v1 = vld [vmem:[#allocation7 + $0x7e4] sm:$0xf] }
 0x761   :  { %5914 = vmatpush.bf16.msrb.mxu3 %v10484_v11  ;;  %v14920_v7 = vadd.f32 %v4460_v34, %v4447_v26  ;;  %v10544_v11 = vor.u32 %v12128_v20, %v10543_v4  ;;  %v10656_v50 = vor.u32 %v12156_v52, %v10655_v55  ;;  %v10609_v43 = vld [vmem:[#allocation7 + $0x7f0] sm:$0xf0]  ;;  %v12174_v4 = vld [vmem:[#allocation7 + $0x8e4] sm:$0xf] }
 0x762   :  { %5249 = vmatmul.bf16.vlgmr.msra.gmra.mxu3 %v14875_v18  ;;  %5901 = vmatpush.bf16.msrb.mxu2 %v10720_v45  ;;  %v10688_v18 = vor.u32 %v12164_v54, %v10687_v12  ;;  %v4474_v51 = vpop.f32.mrf.mxu3  ;;  %v12090_v45 = vld [vmem:[#allocation7 + $0x644] sm:$0xf]  ;;  %v10623_v54 = vld [vmem:[#allocation7 + $0x800] sm:$0xf]  ;;  %v10740_v15 = vor.u32 %v12174_v4, %v10737_v5  ;;  %v10689_v4 = vld [vmem:[#allocation7 + $0x890] sm:$0xf0] }
 0x763   :  { %v14922_v37 = vpop.f32.mrf.mxu0  ;;  %v10624_v20 = vor.u32 %v12148_v22, %v10623_v54  ;;  %v10705_v22 = vld [vmem:[#allocation7 + $0x8b0] sm:$0xf0] }
 0x764   :  { %5873 = vmatpush.bf16.msrb.mxu0 %v10464_v48  ;;  %5887 = vmatpush.bf16.msrb.mxu1 %v10592_v31  ;;  %v14924_v38 = vpop.f32.mrf.mxu1  ;;  %v10401_v48 = vld [vmem:[#allocation7 + $0x650] sm:$0xf0]  ;;  %v10639_v31 = vld [vmem:[#allocation7 + $0x820] sm:$0xf] }
 0x765   :  { %5915 = vmatpush.bf16.msrb.mxu3 %v10468_v6  ;;  %v12152_v6 = vld [vmem:[#allocation7 + $0x82c] sm:$0xf0]  ;;  %v10404_v2 = vor.u32 %v12090_v45, %v10401_v48  ;;  %v12138_v48 = vld [vmem:[#allocation7 + $0x7c4] sm:$0xf] }
 0x766   :  { %5902 = vmatpush.bf16.msrb.mxu2 %v10704_v60  ;;  %v12120_v60 = vld [vmem:[#allocation7 + $0x72c] sm:$0xf0] }
 0x767   :  { %v10512_v26 = vor.u32 %v12120_v60, %v10511_v56  ;;  %v10455_v60 = vld [vmem:[#allocation7 + $0x6a8] sm:$0xf] }
 0x768   :  { %5874 = vmatpush.bf16.msrb.mxu0 %v10448_v3  ;;  %5888 = vmatpush.bf16.msrb.mxu1 %v10576_v10  ;;  %v14926_v58 = vpop.f32.mrf.mxu2  ;;  %v12086_v3 = vld [vmem:[#allocation7 + $0x624] sm:$0xf]  ;;  %v10640_v10 = vor.u32 %v12152_v6, %v10639_v31 }
 0x769   :  { %5916 = vmatpush.bf16.msrb.mxu3 %v10452_v35  ;;  %v10384_v35 = vor.u32 %v12088_v19, %v10383_v13  ;;  %v10388_v0 = vor.u32 %v12086_v3, %v10385_v23  ;;  %v12141_v13 = vld [vmem:[#allocation7 + $0x7d4] sm:$0xf0]  ;;  %v10472_v19 = vor.u32 %v12109_v59, %v10471_v21  ;;  %v12126_v21 = vld [vmem:[#allocation7 + $0x764] sm:$0xf]  ;;  %v10545_v59 = vld [vmem:[#allocation7 + $0x770] sm:$0xf0] }
 0x76a   :  { %5903 = vmatpush.bf16.msrb.mxu2 %v10688_v18  ;;  %v14928_v12 = vpop.f32.mrf.mxu3  ;;  %v12116_v18 = vld [vmem:[#allocation7 + $0x70c] sm:$0xf0]  ;;  %v12105_v3 = vld [vmem:[#allocation7 + $0x6b4] sm:$0xf0] }
 0x76b   :  { %v4488_v42 = vpop.f32.mrf.mxu0 }
 0x76c   :  { %5875 = vmatpush.bf16.msrb.mxu0 %v10432_v33  ;;  %5889 = vmatpush.bf16.msrb.mxu1 %v10560_v61  ;;  %v4489_v8 = vadd.f32 %v4488_v42, %v4474_v51  ;;  %v12082_v33 = vld [vmem:[#allocation7 + $0x604] sm:$0xf]  ;;  %v4502_v27 = vpop.f32.mrf.mxu1  ;;  %v10487_v61 = vld [vmem:[#allocation7 + $0x6e8] sm:$0xf]  ;;  %v10496_v51 = vor.u32 %v12116_v18, %v10495_v40 }
 0x76d   :  { %5917 = vmatpush.bf16.msrb.mxu3 %v10436_v46  ;;  %v12113_v46 = vld [vmem:[#allocation7 + $0x6f4] sm:$0xf0]  ;;  %v10372_v55 = vor.u32 %v12082_v33, %v10369_v41  ;;  %v12166_v42 = vld [vmem:[#allocation7 + $0x8a4] sm:$0xf]  ;;  %v10439_v18 = vld [vmem:[#allocation7 + $0x688] sm:$0xf]  ;;  %v10584_v41 = vor.u32 %v12137_v25, %v10583_v32 }
 0x76e   :  { %5904 = vmatpush.bf16.msrb.mxu2 %v10672_v49  ;;  %v14930_v34 = vadd.f32 %v4502_v27, %v4489_v8  ;;  %v10615_v49 = vld [vmem:[#allocation7 + $0x7e8] sm:$0xf]  ;;  %v10456_v8 = vor.u32 %v12105_v3, %v10455_v60  ;;  %v12101_v33 = vld [vmem:[#allocation7 + $0x694] sm:$0xf0]  ;;  %v10708_v27 = vor.u32 %v12166_v42, %v10705_v22  ;;  %v12122_v60 = vld [vmem:[#allocation7 + $0x744] sm:$0xf] }
 0x76f   :  { %v10529_v3 = vld [vmem:[#allocation7 + $0x750] sm:$0xf0]  ;;  %v10535_v42 = vld [vmem:[#allocation7 + $0x748] sm:$0xf]  ;;  %v12125_v22 = vld [vmem:[#allocation7 + $0x754] sm:$0xf0] }
 0x770   :  { %5876 = vmatpush.bf16.msrb.mxu0 %v10416_v63  ;;  %5890 = vmatpush.bf16.msrb.mxu1 %v10544_v11  ;;  %v12145_v63 = vld [vmem:[#allocation7 + $0x7f4] sm:$0xf0]  ;;  %v4516_v52 = vpop.f32.mrf.mxu2  ;;  %v10488_v11 = vor.u32 %v12113_v46, %v10487_v61  ;;  %v12130_v46 = vld [vmem:[#allocation7 + $0x784] sm:$0xf] }
 0x771   :  { %5918 = vmatpush.bf16.msrb.mxu3 %v10420_v53  ;;  %v10612_v53 = vor.u32 %v12142_v1, %v10609_v43  ;;  %v10616_v29 = vor.u32 %v12145_v63, %v10615_v49  ;;  %v10561_v1 = vld [vmem:[#allocation7 + $0x790] sm:$0xf0]  ;;  %v12162_v43 = vld [vmem:[#allocation7 + $0x884] sm:$0xf]  ;;  %v10440_v49 = vor.u32 %v12101_v33, %v10439_v18  ;;  %v12089_v18 = vld [vmem:[#allocation7 + $0x634] sm:$0xf0] }
 0x772   :  { %5905 = vmatpush.bf16.msrb.mxu2 %v10656_v50  ;;  %v4530_v45 = vpop.f32.mrf.mxu3  ;;  %v10593_v50 = vld [vmem:[#allocation7 + $0x7d0] sm:$0xf0] }
 0x773   :  { %v4531_v31 = vadd.f32 %v4530_v45, %v4516_v52  ;;  %v14932_v6 = vpop.f32.mrf.mxu0  ;;  %v10596_v56 = vor.u32 %v12138_v48, %v10593_v50  ;;  %v12097_v52 = vld [vmem:[#allocation7 + $0x674] sm:$0xf0]  ;;  %v10551_v45 = vld [vmem:[#allocation7 + $0x768] sm:$0xf] }
 0x774   :  { %5877 = vmatpush.bf16.msrb.mxu0 %v10400_v62  ;;  %5891 = vmatpush.bf16.msrb.mxu1 %v10528_v47  ;;  %v12170_v62 = vld [vmem:[#allocation7 + $0x8c4] sm:$0xf]  ;;  %v10721_v47 = vld [vmem:[#allocation7 + $0x8d0] sm:$0xf0]  ;;  %v12129_v48 = vld [vmem:[#allocation7 + $0x774] sm:$0xf0] }
 0x775   :  { %5919 = vmatpush.bf16.msrb.mxu3 %v10404_v2  ;;  %v10599_v2 = vld [vmem:[#allocation7 + $0x7c8] sm:$0xf]  ;;  %v10724_v23 = vor.u32 %v12170_v62, %v10721_v47  ;;  %v10548_v62 = vor.u32 %v12126_v21, %v10545_v59  ;;  %v12146_v21 = vld [vmem:[#allocation7 + $0x804] sm:$0xf]  ;;  %v10625_v59 = vld [vmem:[#allocation7 + $0x810] sm:$0xf0] }
 0x776   :  { %5906 = vmatpush.bf16.msrb.mxu2 %v10640_v10  ;;  %v10600_v54 = vor.u32 %v12141_v13, %v10599_v2  ;;  %v12134_v10 = vld [vmem:[#allocation7 + $0x7a4] sm:$0xf]  ;;  %v10407_v47 = vld [vmem:[#allocation7 + $0x648] sm:$0xf] }
 0x778   :  { %5878 = vmatpush.bf16.msrb.mxu0 %v10384_v35  ;;  %5892 = vmatpush.bf16.msrb.mxu1 %v10512_v26  ;;  %v10577_v35 = vld [vmem:[#allocation7 + $0x7b0] sm:$0xf0]  ;;  %v14938_v26 = vpop.f32.mrf.mxu1 }
 0x779   :  { %5920 = vmatpush.bf16.msrb.mxu3 %v10388_v0  ;;  %v14940_v0 = vpop.f32.mrf.mxu2  ;;  %v10580_v40 = vor.u32 %v12134_v10, %v10577_v35  ;;  %v10657_v35 = vld [vmem:[#allocation7 + $0x850] sm:$0xf0] }
 0x77a   :  { %5907 = vmatpush.bf16.msrb.mxu2 %v10624_v20  ;;  %v14942_v61 = vpop.f32.mrf.mxu3  ;;  %v10567_v20 = vld [vmem:[#allocation7 + $0x788] sm:$0xf] }
 0x77c   :  { %5879 = vmatpush.bf16.msrb.mxu0 %v10368_v9  ;;  %5893 = vmatpush.bf16.msrb.mxu1 %v10496_v51  ;;  %v12133_v9 = vld [vmem:[#allocation7 + $0x794] sm:$0xf0]  ;;  %v4544_v5 = vpop.f32.mrf.mxu0  ;;  %v10564_v51 = vor.u32 %v12130_v46, %v10561_v1  ;;  %v10513_v46 = vld [vmem:[#allocation7 + $0x730] sm:$0xf0]  ;;  %v12150_v1 = vld [vmem:[#allocation7 + $0x824] sm:$0xf] }
 0x77d   :  { %5921 = vmatpush.bf16.msrb.mxu3 %v10372_v55  ;;  %5908 = vmatmul.bf16.vlgmr.msrb.gmra.mxu2 %v14819_v30  ;;  %v14944_v63 = vadd.f32 %v4544_v5, %v4531_v31  ;;  %v10423_v55 = vld [vmem:[#allocation7 + $0x668] sm:$0xf]  ;;  %v12093_v31 = vld [vmem:[#allocation7 + $0x654] sm:$0xf0] }
 0x77e   :  { %5956 = vmatpush.bf16.msra.mxu2 %v10488_v11  ;;  %v10692_v11 = vor.u32 %v12162_v43, %v10689_v4  ;;  %v10424_v50 = vor.u32 %v12097_v52, %v10423_v55  ;;  %v10408_v25 = vor.u32 %v12093_v31, %v10407_v47  ;;  %v10641_v43 = vld [vmem:[#allocation7 + $0x830] sm:$0xf0]  ;;  %v10519_v4 = vld [vmem:[#allocation7 + $0x728] sm:$0xf]  ;;  %v12114_v55 = vld [vmem:[#allocation7 + $0x704] sm:$0xf] }
 0x77f   :  { %5880 = vmatmul.bf16.vlgmr.msrb.gmra.mxu0 %v14823_v39  ;;  %5894 = vmatmul.bf16.vlgmr.msrb.gmra.mxu1 %v14825_v36  ;;  %v10497_v52 = vld [vmem:[#allocation7 + $0x710] sm:$0xf0]  ;;  %v12111_v47 = vld [vmem:[#allocation7 + $0x6ec] sm:$0xf] }
 0x780   :  { %5928 = vmatpush.bf16.msra.mxu0 %v10612_v53  ;;  %5942 = vmatpush.bf16.msra.mxu1 %v10740_v15  ;;  %v10568_v53 = vor.u32 %v12133_v9, %v10567_v20  ;;  %v12158_v15 = vld [vmem:[#allocation7 + $0x864] sm:$0xf]  ;;  %v4558_v2 = vpop.f32.mrf.mxu1  ;;  %v12121_v20 = vld [vmem:[#allocation7 + $0x734] sm:$0xf0]  ;;  %v10375_v9 = vld [vmem:[#allocation7 + $0x608] sm:$0xf] }
 0x781   :  { %5970 = vmatpush.bf16.msra.mxu3 %v10616_v29  ;;  %v10673_v29 = vld [vmem:[#allocation7 + $0x870] sm:$0xf0] }
 0x782   :  { %5922 = vmatmul.bf16.vlgmr.msrb.gmra.mxu3 %v14823_v39  ;;  %5957 = vmatpush.bf16.msra.mxu2 %v10472_v19  ;;  %v10676_v13 = vor.u32 %v12158_v15, %v10673_v29  ;;  %v10552_v19 = vor.u32 %v12129_v48, %v10551_v45  ;;  %v10503_v15 = vld [vmem:[#allocation7 + $0x708] sm:$0xf]  ;;  %v12117_v29 = vld [vmem:[#allocation7 + $0x714] sm:$0xf0]  ;;  %v12143_v45 = vld [vmem:[#allocation7 + $0x7ec] sm:$0xf] }
 0x783   :  { %v10617_v48 = vld [vmem:[#allocation7 + $0x7f8] sm:$0xf0] }
 0x784   :  { %5929 = vmatpush.bf16.msra.mxu0 %v10596_v56  ;;  %5943 = vmatpush.bf16.msra.mxu1 %v10724_v23  ;;  %v4572_v56 = vpop.f32.mrf.mxu2  ;;  %v12154_v23 = vld [vmem:[#allocation7 + $0x844] sm:$0xf] }
 0x785   :  { %5971 = vmatpush.bf16.msra.mxu3 %v10600_v54  ;;  %v4573_v54 = vadd.f32 %v4572_v56, %v4558_v2  ;;  %v4586_v10 = vpop.f32.mrf.mxu3  ;;  %v10660_v33 = vor.u32 %v12154_v23, %v10657_v35  ;;  %v10500_v2 = vor.u32 %v12114_v55, %v10497_v52  ;;  %v10745_v56 = vld [vmem:[#allocation7 + $0x8f8] sm:$0xf0]  ;;  %v10620_v23 = vor.u32 %v12143_v45, %v10617_v48  ;;  %v12103_v55 = vld [vmem:[#allocation7 + $0x6ac] sm:$0xf] }
 0x786   :  { %5958 = vmatpush.bf16.msra.mxu2 %v10456_v8  ;;  %v10532_v8 = vor.u32 %v12122_v60, %v10529_v3  ;;  %v10628_v60 = vor.u32 %v12146_v21, %v10625_v59  ;;  %v10504_v3 = vor.u32 %v12117_v29, %v10503_v15  ;;  %v10601_v35 = vld [vmem:[#allocation7 + $0x7d8] sm:$0xf0]  ;;  %v12131_v15 = vld [vmem:[#allocation7 + $0x78c] sm:$0xf] }
 0x787   :  { %v14946_v32 = vadd.f32 %v4586_v10, %v4573_v54  ;;  %v12139_v10 = vld [vmem:[#allocation7 + $0x7cc] sm:$0xf]  ;;  %v10457_v52 = vld [vmem:[#allocation7 + $0x6b8] sm:$0xf0] }
 0x788   :  { %5930 = vmatpush.bf16.msra.mxu0 %v10580_v40  ;;  %5944 = vmatpush.bf16.msra.mxu1 %v10708_v27  ;;  %v10391_v40 = vld [vmem:[#allocation7 + $0x628] sm:$0xf]  ;;  %v10536_v27 = vor.u32 %v12125_v22, %v10535_v42  ;;  %v10569_v29 = vld [vmem:[#allocation7 + $0x798] sm:$0xf0]  ;;  %v10460_v48 = vor.u32 %v12103_v55, %v10457_v52  ;;  %v12157_v52 = vld [vmem:[#allocation7 + $0x854] sm:$0xf0] }
 0x789   :  { %5972 = vmatpush.bf16.msra.mxu3 %v10584_v41  ;;  %v12118_v41 = vld [vmem:[#allocation7 + $0x724] sm:$0xf]  ;;  %v10392_v5 = vor.u32 %v12089_v18, %v10391_v40  ;;  %v12107_v40 = vld [vmem:[#allocation7 + $0x6cc] sm:$0xf]  ;;  %v10473_v18 = vld [vmem:[#allocation7 + $0x6d8] sm:$0xf0] }
 0x78a   :  { %5959 = vmatpush.bf16.msra.mxu2 %v10440_v49  ;;  %v10516_v49 = vor.u32 %v12118_v41, %v10513_v46  ;;  %v14948_v41 = vpop.f32.mrf.mxu0  ;;  %v10604_v46 = vor.u32 %v12139_v10, %v10601_v35  ;;  %v12127_v10 = vld [vmem:[#allocation7 + $0x76c] sm:$0xf]  ;;  %v10553_v35 = vld [vmem:[#allocation7 + $0x778] sm:$0xf0]  ;;  %v10663_v55 = vld [vmem:[#allocation7 + $0x848] sm:$0xf] }
 0x78c   :  { %5931 = vmatpush.bf16.msra.mxu0 %v10564_v51  ;;  %5945 = vmatpush.bf16.msra.mxu1 %v10692_v11  ;;  %v12085_v51 = vld [vmem:[#allocation7 + $0x614] sm:$0xf0]  ;;  %v10644_v11 = vor.u32 %v12150_v1, %v10641_v43  ;;  %v12135_v43 = vld [vmem:[#allocation7 + $0x7ac] sm:$0xf]  ;;  %v14956_v45 = vpop.f32.mrf.mxu2 }
 0x78d   :  { %5973 = vmatpush.bf16.msra.mxu3 %v10568_v53  ;;  %v10520_v53 = vor.u32 %v12121_v20, %v10519_v4  ;;  %v10376_v31 = vor.u32 %v12085_v51, %v10375_v9  ;;  %v10585_v4 = vld [vmem:[#allocation7 + $0x7b8] sm:$0xf0]  ;;  %v14950_v20 = vpop.f32.mrf.mxu1  ;;  %v10476_v9 = vor.u32 %v12107_v40, %v10473_v18  ;;  %v12169_v51 = vld [vmem:[#allocation7 + $0x8b4] sm:$0xf0]  ;;  %v12095_v18 = vld [vmem:[#allocation7 + $0x66c] sm:$0xf] }
 0x78e   :  { %5960 = vmatpush.bf16.msra.mxu2 %v10424_v50  ;;  %v10743_v50 = vld [vmem:[#allocation7 + $0x8e8] sm:$0xf]  ;;  %v10588_v21 = vor.u32 %v12135_v43, %v10585_v4  ;;  %v12161_v40 = vld [vmem:[#allocation7 + $0x874] sm:$0xf0]  ;;  %v10556_v43 = vor.u32 %v12127_v10, %v10553_v35  ;;  %v12123_v4 = vld [vmem:[#allocation7 + $0x74c] sm:$0xf] }
 0x78f   :  { %v10649_v10 = vld [vmem:[#allocation7 + $0x838] sm:$0xf0]  ;;  %v12115_v35 = vld [vmem:[#allocation7 + $0x70c] sm:$0xf] }
 0x790   :  { %5932 = vmatpush.bf16.msra.mxu0 %v10548_v62  ;;  %5946 = vmatpush.bf16.msra.mxu1 %v10676_v13  ;;  %v12177_v62 = vld [vmem:[#allocation7 + $0x8f4] sm:$0xf0]  ;;  %v10489_v13 = vld [vmem:[#allocation7 + $0x6f8] sm:$0xf0] }
 0x791   :  { %5974 = vmatpush.bf16.msra.mxu3 %v10552_v19  ;;  %v12175_v19 = vld [vmem:[#allocation7 + $0x8ec] sm:$0xf]  ;;  %v10744_v54 = vor.u32 %v12177_v62, %v10743_v50  ;;  %v10492_v42 = vor.u32 %v12111_v47, %v10489_v13  ;;  %v10695_v62 = vld [vmem:[#allocation7 + $0x888] sm:$0xf]  ;;  %v12165_v47 = vld [vmem:[#allocation7 + $0x894] sm:$0xf0] }
 0x792   :  { %5961 = vmatpush.bf16.msra.mxu2 %v10408_v25  ;;  %v10748_v22 = vor.u32 %v12175_v19, %v10745_v56  ;;  %v10727_v25 = vld [vmem:[#allocation7 + $0x8c8] sm:$0xf]  ;;  %v10441_v13 = vld [vmem:[#allocation7 + $0x698] sm:$0xf0]  ;;  %v12163_v19 = vld [vmem:[#allocation7 + $0x88c] sm:$0xf] }
 0x793   :  { %v10697_v56 = vld [vmem:[#allocation7 + $0x898] sm:$0xf0] }
 0x794   :  { %5933 = vmatpush.bf16.msra.mxu0 %v10532_v8  ;;  %5947 = vmatpush.bf16.msra.mxu1 %v10660_v33  ;;  %v12173_v8 = vld [vmem:[#allocation7 + $0x8d4] sm:$0xf0]  ;;  %v12171_v33 = vld [vmem:[#allocation7 + $0x8cc] sm:$0xf] }
 0x795   :  { %5975 = vmatpush.bf16.msra.mxu3 %v10536_v27  ;;  %v10729_v27 = vld [vmem:[#allocation7 + $0x8d8] sm:$0xf0]  ;;  %v10728_v1 = vor.u32 %v12173_v8, %v10727_v25  ;;  %v10700_v25 = vor.u32 %v12163_v19, %v10697_v56  ;;  %v10679_v8 = vld [vmem:[#allocation7 + $0x868] sm:$0xf] }
 0x796   :  { %5962 = vmatpush.bf16.msra.mxu2 %v10392_v5  ;;  %v10732_v5 = vor.u32 %v12171_v33, %v10729_v27  ;;  %v10425_v27 = vld [vmem:[#allocation7 + $0x678] sm:$0xf0]  ;;  %v10647_v56 = vld [vmem:[#allocation7 + $0x828] sm:$0xf] }
 0x798   :  { %5934 = vmatpush.bf16.msra.mxu0 %v10516_v49  ;;  %5948 = vmatpush.bf16.msra.mxu1 %v10644_v11  ;;  %v10711_v49 = vld [vmem:[#allocation7 + $0x8a8] sm:$0xf]  ;;  %v12167_v11 = vld [vmem:[#allocation7 + $0x8ac] sm:$0xf] }
 0x799   :  { %5976 = vmatpush.bf16.msra.mxu3 %v10520_v53  ;;  %v10713_v53 = vld [vmem:[#allocation7 + $0x8b8] sm:$0xf0]  ;;  %v10712_v59 = vor.u32 %v12169_v51, %v10711_v49  ;;  %v10428_v49 = vor.u32 %v12095_v18, %v10425_v27 }
 0x79a   :  { %5963 = vmatpush.bf16.msra.mxu2 %v10376_v31  ;;  %v10716_v50 = vor.u32 %v12167_v11, %v10713_v53  ;;  %v12099_v31 = vld [vmem:[#allocation7 + $0x68c] sm:$0xf]  ;;  %v10377_v27 = vld [vmem:[#allocation7 + $0x618] sm:$0xf0] }
 0x79b   :  { %v12091_v11 = vld [vmem:[#allocation7 + $0x64c] sm:$0xf] }
 0x79c   :  { %5935 = vmatpush.bf16.msra.mxu0 %v10500_v2  ;;  %5949 = vmatpush.bf16.msra.mxu1 %v10628_v60  ;;  %v14958_v2 = vpop.f32.mrf.mxu3  ;;  %v5096_v60 = vpop.f32.mrf.mxu0 }
 0x79d   :  { %5977 = vmatpush.bf16.msra.mxu3 %v10504_v3  ;;  %5964 = vmatmul.bf16.vlgmr.msra.gmra.mxu2 %v14823_v39  ;;  %v5097_v3 = vadd.f32 %v5096_v60, %v14920_v7  ;;  %v10680_v7 = vor.u32 %v12161_v40, %v10679_v8  ;;  %v12153_v60 = vld [vmem:[#allocation7 + $0x834] sm:$0xf0] }
 0x79e   :  { %6012 = vmatpush.bf16.msrb.mxu2 %v10620_v23  ;;  %v10572_v23 = vor.u32 %v12131_v15, %v10569_v29  ;;  %v12155_v15 = vld [vmem:[#allocation7 + $0x84c] sm:$0xf]  ;;  %v10665_v29 = vld [vmem:[#allocation7 + $0x858] sm:$0xf0]  ;;  %v12149_v8 = vld [vmem:[#allocation7 + $0x814] sm:$0xf0] }
 0x79f   :  { %5936 = vmatmul.bf16.vlgmr.msra.gmra.mxu0 %v14825_v36  ;;  %5950 = vmatmul.bf16.vlgmr.msra.gmra.mxu1 %v14819_v30  ;;  %v10668_v19 = vor.u32 %v12155_v15, %v10665_v29 }
 0x7a0   :  { %5984 = vmatpush.bf16.msrb.mxu0 %v10744_v54  ;;  %5998 = vmatpush.bf16.msrb.mxu1 %v10492_v42  ;;  %v10696_v54 = vor.u32 %v12165_v47, %v10695_v62  ;;  %v5110_v42 = vpop.f32.mrf.mxu1  ;;  %v10664_v62 = vor.u32 %v12157_v52, %v10663_v55  ;;  %v12119_v47 = vld [vmem:[#allocation7 + $0x72c] sm:$0xf]  ;;  %v12240_v55 = vld [vmem:[#allocation7 + $0xaec] sm:$0xf0]  ;;  %v12206_v52 = vld [vmem:[#allocation7 + $0x9e4] sm:$0xf] }
 0x7a1   :  { %6026 = vmatpush.bf16.msrb.mxu3 %v10748_v22  ;;  %v10444_v22 = vor.u32 %v12099_v31, %v10441_v13  ;;  %v5111_v33 = vadd.f32 %v5110_v42, %v5097_v3  ;;  %v10521_v31 = vld [vmem:[#allocation7 + $0x738] sm:$0xf0]  ;;  %v12087_v3 = vld [vmem:[#allocation7 + $0x62c] sm:$0xf]  ;;  %v10648_v42 = vor.u32 %v12153_v60, %v10647_v56  ;;  %v10975_v56 = vld [vmem:[#allocation7 + $0xac0] sm:$0xf] }
 0x7a2   :  { %5978 = vmatmul.bf16.vlgmr.msra.gmra.mxu3 %v14825_v36  ;;  %6013 = vmatpush.bf16.msrb.mxu2 %v10604_v46  ;;  %v12159_v46 = vld [vmem:[#allocation7 + $0x86c] sm:$0xf]  ;;  %v12236_v60 = vld [vmem:[#allocation7 + $0xacc] sm:$0xf0] }
 0x7a4   :  { %5985 = vmatpush.bf16.msrb.mxu0 %v10728_v1  ;;  %5999 = vmatpush.bf16.msrb.mxu1 %v10476_v9  ;;  %v10681_v1 = vld [vmem:[#allocation7 + $0x878] sm:$0xf0] }
 0x7a5   :  { %6027 = vmatpush.bf16.msrb.mxu3 %v10732_v5  ;;  %v10537_v9 = vld [vmem:[#allocation7 + $0x758] sm:$0xf0]  ;;  %v5124_v5 = vpop.f32.mrf.mxu2  ;;  %v10684_v51 = vor.u32 %v12159_v46, %v10681_v1  ;;  %v12147_v46 = vld [vmem:[#allocation7 + $0x80c] sm:$0xf] }
 0x7a6   :  { %6014 = vmatpush.bf16.msrb.mxu2 %v10588_v21  ;;  %v14961_v53 = vadd.f32 %v5124_v5, %v5111_v33  ;;  %v5138_v21 = vpop.f32.mrf.mxu3  ;;  %v12083_v33 = vld [vmem:[#allocation7 + $0x60c] sm:$0xf]  ;;  %v10633_v1 = vld [vmem:[#allocation7 + $0x818] sm:$0xf0]  ;;  %v10991_v5 = vld [vmem:[#allocation7 + $0xae0] sm:$0xf] }
 0x7a8   :  { %5986 = vmatpush.bf16.msrb.mxu0 %v10712_v59  ;;  %6000 = vmatpush.bf16.msrb.mxu1 %v10460_v48  ;;  %v10409_v59 = vld [vmem:[#allocation7 + $0x658] sm:$0xf0]  ;;  %v14964_v48 = vadd.f32 %v5138_v21, %v14930_v34  ;;  %v10524_v34 = vor.u32 %v12119_v47, %v10521_v31  ;;  %v10380_v21 = vor.u32 %v12083_v33, %v10377_v27  ;;  %v10959_v33 = vld [vmem:[#allocation7 + $0xaa0] sm:$0xf]  ;;  %v12232_v27 = vld [vmem:[#allocation7 + $0xaac] sm:$0xf0] }
 0x7a9   :  { %6028 = vmatpush.bf16.msrb.mxu3 %v10716_v50  ;;  %v10540_v50 = vor.u32 %v12123_v4, %v10537_v9  ;;  %v10412_v13 = vor.u32 %v12091_v11, %v10409_v59  ;;  %v10863_v4 = vld [vmem:[#allocation7 + $0x9e0] sm:$0xf]  ;;  %v12208_v9 = vld [vmem:[#allocation7 + $0x9ec] sm:$0xf0]  ;;  %v10865_v11 = vld [vmem:[#allocation7 + $0x9f0] sm:$0xf0]  ;;  %v10636_v59 = vor.u32 %v12147_v46, %v10633_v1  ;;  %v10992_v47 = vor.u32 %v12240_v55, %v10991_v5 }
 0x7aa   :  { %6015 = vmatpush.bf16.msrb.mxu2 %v10572_v23  ;;  %v10393_v23 = vld [vmem:[#allocation7 + $0x638] sm:$0xf0]  ;;  %v10864_v29 = vor.u32 %v12208_v9, %v10863_v4  ;;  %v10868_v31 = vor.u32 %v12206_v52, %v10865_v11  ;;  %v12198_v46 = vld [vmem:[#allocation7 + $0x9a4] sm:$0xf]  ;;  %v10833_v1 = vld [vmem:[#allocation7 + $0x9b0] sm:$0xf0] }
 0x7ab   :  { %v10396_v40 = vor.u32 %v12087_v3, %v10393_v23  ;;  %v12202_v3 = vld [vmem:[#allocation7 + $0x9c4] sm:$0xf]  ;;  %v10849_v23 = vld [vmem:[#allocation7 + $0x9d0] sm:$0xf0]  ;;  %v11071_v4 = vld [vmem:[#allocation7 + $0xb80] sm:$0xf] }
 0x7ac   :  { %5987 = vmatpush.bf16.msrb.mxu0 %v10696_v54  ;;  %6001 = vmatpush.bf16.msrb.mxu1 %v10444_v22  ;;  %v12151_v54 = vld [vmem:[#allocation7 + $0x82c] sm:$0xf]  ;;  %v10505_v22 = vld [vmem:[#allocation7 + $0x718] sm:$0xf0]  ;;  %v12260_v9 = vld [vmem:[#allocation7 + $0xb8c] sm:$0xf0] }
 0x7ad   :  { %6029 = vmatpush.bf16.msrb.mxu3 %v10700_v25  ;;  %v10631_v25 = vld [vmem:[#allocation7 + $0x808] sm:$0xf]  ;;  %v10652_v18 = vor.u32 %v12151_v54, %v10649_v10  ;;  %v14966_v54 = vpop.f32.mrf.mxu0  ;;  %v14974_v5 = vpop.f32.mrf.mxu2  ;;  %v12196_v55 = vld [vmem:[#allocation7 + $0x98c] sm:$0xf0]  ;;  %v10943_v52 = vld [vmem:[#allocation7 + $0xa80] sm:$0xf] }
 0x7ae   :  { %6016 = vmatpush.bf16.msrb.mxu2 %v10556_v43  ;;  %v11119_v43 = vld [vmem:[#allocation7 + $0xbe0] sm:$0xf]  ;;  %v14976_v11 = vpop.f32.mrf.mxu3 }
 0x7b0   :  { %5988 = vmatpush.bf16.msrb.mxu0 %v10680_v7  ;;  %6002 = vmatpush.bf16.msrb.mxu1 %v10428_v49  ;;  %v12272_v7 = vld [vmem:[#allocation7 + $0xbec] sm:$0xf0]  ;;  %v10508_v49 = vor.u32 %v12115_v35, %v10505_v22  ;;  %v14968_v22 = vpop.f32.mrf.mxu1 }
 0x7b1   :  { %6030 = vmatpush.bf16.msrb.mxu3 %v10684_v51  ;;  %v10632_v51 = vor.u32 %v12149_v8, %v10631_v25  ;;  %v11120_v15 = vor.u32 %v12272_v7, %v11119_v43  ;;  %v10976_v25 = vor.u32 %v12236_v60, %v10975_v56  ;;  %v10852_v8 = vor.u32 %v12202_v3, %v10849_v23  ;;  %v10799_v56 = vld [vmem:[#allocation7 + $0x960] sm:$0xf]  ;;  %v12192_v60 = vld [vmem:[#allocation7 + $0x96c] sm:$0xf0] }
 0x7b2   :  { %6017 = vmatpush.bf16.msrb.mxu2 %v10540_v50  ;;  %v11103_v50 = vld [vmem:[#allocation7 + $0xbc0] sm:$0xf] }
 0x7b3   :  { %v10927_v3 = vld [vmem:[#allocation7 + $0xa60] sm:$0xf] }
 0x7b4   :  { %5989 = vmatpush.bf16.msrb.mxu0 %v10664_v62  ;;  %6003 = vmatpush.bf16.msrb.mxu1 %v10412_v13  ;;  %v12268_v62 = vld [vmem:[#allocation7 + $0xbcc] sm:$0xf0]  ;;  %v10847_v13 = vld [vmem:[#allocation7 + $0x9c0] sm:$0xf] }
 0x7b5   :  { %6031 = vmatpush.bf16.msrb.mxu3 %v10668_v19  ;;  %v12204_v19 = vld [vmem:[#allocation7 + $0x9cc] sm:$0xf0]  ;;  %v11104_v10 = vor.u32 %v12268_v62, %v11103_v50  ;;  %v11055_v62 = vld [vmem:[#allocation7 + $0xb60] sm:$0xf] }
 0x7b6   :  { %6018 = vmatpush.bf16.msrb.mxu2 %v10524_v34  ;;  %v10848_v35 = vor.u32 %v12204_v19, %v10847_v13  ;;  %v11087_v34 = vld [vmem:[#allocation7 + $0xba0] sm:$0xf] }
 0x7b8   :  { %5990 = vmatpush.bf16.msrb.mxu0 %v10648_v42  ;;  %6004 = vmatpush.bf16.msrb.mxu1 %v10396_v40  ;;  %v12264_v42 = vld [vmem:[#allocation7 + $0xbac] sm:$0xf0]  ;;  %v10831_v40 = vld [vmem:[#allocation7 + $0x9a0] sm:$0xf] }
 0x7b9   :  { %6032 = vmatpush.bf16.msrb.mxu3 %v10652_v18  ;;  %v12200_v18 = vld [vmem:[#allocation7 + $0x9ac] sm:$0xf0]  ;;  %v11088_v43 = vor.u32 %v12264_v42, %v11087_v34  ;;  %v10801_v34 = vld [vmem:[#allocation7 + $0x970] sm:$0xf0]  ;;  %v10800_v42 = vor.u32 %v12192_v60, %v10799_v56  ;;  %v10751_v56 = vld [vmem:[#allocation7 + $0x900] sm:$0xf] }
 0x7ba   :  { %6019 = vmatpush.bf16.msrb.mxu2 %v10508_v49  ;;  %v10832_v7 = vor.u32 %v12200_v18, %v10831_v40  ;;  %v10836_v49 = vor.u32 %v12198_v46, %v10833_v1  ;;  %v12188_v46 = vld [vmem:[#allocation7 + $0x94c] sm:$0xf0]  ;;  %v10911_v1 = vld [vmem:[#allocation7 + $0xa40] sm:$0xf] }
 0x7bb   :  { %v12180_v60 = vld [vmem:[#allocation7 + $0x90c] sm:$0xf0] }
 0x7bc   :  { %5991 = vmatpush.bf16.msrb.mxu0 %v10632_v51  ;;  %6005 = vmatpush.bf16.msrb.mxu1 %v10380_v21  ;;  %v10815_v51 = vld [vmem:[#allocation7 + $0x980] sm:$0xf]  ;;  %v12194_v21 = vld [vmem:[#allocation7 + $0x984] sm:$0xf] }
 0x7bd   :  { %6033 = vmatpush.bf16.msrb.mxu3 %v10636_v59  ;;  %6020 = vmatmul.bf16.vlgmr.msrb.gmra.mxu2 %v14825_v36  ;;  %v10960_v36 = vor.u32 %v12232_v27, %v10959_v33  ;;  %v5152_v59 = vpop.f32.mrf.mxu0  ;;  %v10816_v50 = vor.u32 %v12196_v55, %v10815_v51  ;;  %v10783_v27 = vld [vmem:[#allocation7 + $0x940] sm:$0xf] }
 0x7be   :  { %6741 = vmatpush.bf16.msra.mxu2 %v11120_v15  ;;  %v5153_v15 = vadd.f32 %v5152_v59, %v14964_v48  ;;  %v10784_v55 = vor.u32 %v12188_v46, %v10783_v27  ;;  %v10767_v59 = vld [vmem:[#allocation7 + $0x920] sm:$0xf]  ;;  %v10752_v46 = vor.u32 %v12180_v60, %v10751_v56  ;;  %v12201_v56 = vld [vmem:[#allocation7 + $0x9b4] sm:$0xf0] }
 0x7bf   :  { %5992 = vmatmul.bf16.vlgmr.msrb.gmra.mxu0 %v14819_v30  ;;  %6006 = vmatmul.bf16.vlgmr.msrb.gmra.mxu1 %v14823_v39  ;;  %v12228_v39 = vld [vmem:[#allocation7 + $0xa8c] sm:$0xf0] }
 0x7c0   :  { %6713 = vmatpush.bf16.msra.mxu0 %v10864_v29  ;;  %6727 = vmatpush.bf16.msra.mxu1 %v10992_v47  ;;  %v11072_v29 = vor.u32 %v12260_v9, %v11071_v4  ;;  %v12256_v47 = vld [vmem:[#allocation7 + $0xb6c] sm:$0xf0]  ;;  %v10944_v13 = vor.u32 %v12228_v39, %v10943_v52  ;;  %v5180_v40 = vpop.f32.mrf.mxu2  ;;  %v12186_v9 = vld [vmem:[#allocation7 + $0x944] sm:$0xf]  ;;  %v11023_v52 = vld [vmem:[#allocation7 + $0xb20] sm:$0xf] }
 0x7c1   :  { %6755 = vmatpush.bf16.msra.mxu3 %v10868_v31  ;;  %v5166_v31 = vpop.f32.mrf.mxu1  ;;  %v11056_v48 = vor.u32 %v12256_v47, %v11055_v62  ;;  %v12220_v4 = vld [vmem:[#allocation7 + $0xa4c] sm:$0xf0]  ;;  %v10769_v62 = vld [vmem:[#allocation7 + $0x930] sm:$0xf0]  ;;  %v11007_v47 = vld [vmem:[#allocation7 + $0xb00] sm:$0xf] }
 0x7c2   :  { %6034 = vmatmul.bf16.vlgmr.msrb.gmra.mxu3 %v14819_v30  ;;  %6742 = vmatpush.bf16.msra.mxu2 %v11104_v10  ;;  %v10817_v30 = vld [vmem:[#allocation7 + $0x990] sm:$0xf0]  ;;  %v14979_v23 = vadd.f32 %v5166_v31, %v5153_v15  ;;  %v12224_v10 = vld [vmem:[#allocation7 + $0xa6c] sm:$0xf0] }
 0x7c3   :  { %v10820_v19 = vor.u32 %v12194_v21, %v10817_v30  ;;  %v10928_v18 = vor.u32 %v12224_v10, %v10927_v3  ;;  %v12248_v39 = vld [vmem:[#allocation7 + $0xb2c] sm:$0xf0]  ;;  %v10912_v21 = vor.u32 %v12220_v4, %v10911_v1  ;;  %v11121_v1 = vld [vmem:[#allocation7 + $0xbf0] sm:$0xf0] }
 0x7c4   :  { %6714 = vmatpush.bf16.msra.mxu0 %v10848_v35  ;;  %6728 = vmatpush.bf16.msra.mxu1 %v10976_v25  ;;  %v12190_v35 = vld [vmem:[#allocation7 + $0x964] sm:$0xf]  ;;  %v11039_v25 = vld [vmem:[#allocation7 + $0xb40] sm:$0xf]  ;;  %v12184_v15 = vld [vmem:[#allocation7 + $0x92c] sm:$0xf0]  ;;  %v11024_v31 = vor.u32 %v12248_v39, %v11023_v52 }
 0x7c5   :  { %6756 = vmatpush.bf16.msra.mxu3 %v10852_v8  ;;  %v12252_v8 = vld [vmem:[#allocation7 + $0xb4c] sm:$0xf0]  ;;  %v10804_v33 = vor.u32 %v12190_v35, %v10801_v34  ;;  %v10879_v35 = vld [vmem:[#allocation7 + $0xa00] sm:$0xf]  ;;  %v12205_v52 = vld [vmem:[#allocation7 + $0x9d4] sm:$0xf0] }
 0x7c6   :  { %6743 = vmatpush.bf16.msra.mxu2 %v11088_v43  ;;  %v5181_v43 = vadd.f32 %v5180_v40, %v14944_v63  ;;  %v11040_v51 = vor.u32 %v12252_v8, %v11039_v25  ;;  %v12216_v63 = vld [vmem:[#allocation7 + $0xa2c] sm:$0xf0]  ;;  %v10871_v25 = vld [vmem:[#allocation7 + $0x9e8] sm:$0xf]  ;;  %v12209_v8 = vld [vmem:[#allocation7 + $0x9f4] sm:$0xf0] }
 0x7c7   :  { %v12212_v34 = vld [vmem:[#allocation7 + $0xa0c] sm:$0xf0]  ;;  %v12238_v40 = vld [vmem:[#allocation7 + $0xae4] sm:$0xf] }
 0x7c8   :  { %6715 = vmatpush.bf16.msra.mxu0 %v10832_v7  ;;  %6729 = vmatpush.bf16.msra.mxu1 %v10960_v36  ;;  %v5194_v7 = vpop.f32.mrf.mxu3  ;;  %v10785_v36 = vld [vmem:[#allocation7 + $0x950] sm:$0xf0]  ;;  %v10880_v4 = vor.u32 %v12212_v34, %v10879_v35  ;;  %v12262_v34 = vld [vmem:[#allocation7 + $0xba4] sm:$0xf] }
 0x7c9   :  { %6757 = vmatpush.bf16.msra.mxu3 %v10836_v49  ;;  %v14982_v49 = vadd.f32 %v5194_v7, %v5181_v43  ;;  %v10788_v30 = vor.u32 %v12186_v9, %v10785_v36  ;;  %v10999_v43 = vld [vmem:[#allocation7 + $0xae8] sm:$0xf]  ;;  %v12241_v7 = vld [vmem:[#allocation7 + $0xaf4] sm:$0xf0]  ;;  %v10872_v36 = vor.u32 %v12209_v8, %v10871_v25  ;;  %v10961_v35 = vld [vmem:[#allocation7 + $0xab0] sm:$0xf0] }
 0x7ca   :  { %6744 = vmatpush.bf16.msra.mxu2 %v11072_v29  ;;  %v10895_v29 = vld [vmem:[#allocation7 + $0xa20] sm:$0xf]  ;;  %v12233_v25 = vld [vmem:[#allocation7 + $0xab4] sm:$0xf0] }
 0x7cb   :  { %v10896_v3 = vor.u32 %v12216_v63, %v10895_v29  ;;  %v11105_v29 = vld [vmem:[#allocation7 + $0xbd0] sm:$0xf0]  ;;  %v10983_v63 = vld [vmem:[#allocation7 + $0xac8] sm:$0xf] }
 0x7cc   :  { %6716 = vmatpush.bf16.msra.mxu0 %v10816_v50  ;;  %6730 = vmatpush.bf16.msra.mxu1 %v10944_v13  ;;  %v12182_v50 = vld [vmem:[#allocation7 + $0x924] sm:$0xf]  ;;  %v10768_v13 = vor.u32 %v12184_v15, %v10767_v59  ;;  %v10977_v59 = vld [vmem:[#allocation7 + $0xad0] sm:$0xf0] }
 0x7cd   :  { %6758 = vmatpush.bf16.msra.mxu3 %v10820_v19  ;;  %v12244_v19 = vld [vmem:[#allocation7 + $0xb0c] sm:$0xf0]  ;;  %v10772_v10 = vor.u32 %v12182_v50, %v10769_v62  ;;  %v12266_v15 = vld [vmem:[#allocation7 + $0xbc4] sm:$0xf]  ;;  %v12237_v50 = vld [vmem:[#allocation7 + $0xad4] sm:$0xf0]  ;;  %v14984_v62 = vpop.f32.mrf.mxu0 }
 0x7ce   :  { %6745 = vmatpush.bf16.msra.mxu2 %v11056_v48  ;;  %v12178_v48 = vld [vmem:[#allocation7 + $0x904] sm:$0xf]  ;;  %v11008_v27 = vor.u32 %v12244_v19, %v11007_v47  ;;  %v14986_v47 = vpop.f32.mrf.mxu1  ;;  %v10839_v19 = vld [vmem:[#allocation7 + $0x9a8] sm:$0xf]  ;;  %v11108_v60 = vor.u32 %v12266_v15, %v11105_v29  ;;  %v12193_v29 = vld [vmem:[#allocation7 + $0x974] sm:$0xf0] }
 0x7cf   :  { %v10840_v8 = vor.u32 %v12201_v56, %v10839_v19  ;;  %v10807_v15 = vld [vmem:[#allocation7 + $0x968] sm:$0xf]  ;;  %v10929_v19 = vld [vmem:[#allocation7 + $0xa70] sm:$0xf0]  ;;  %v12254_v56 = vld [vmem:[#allocation7 + $0xb64] sm:$0xf] }
 0x7d0   :  { %6717 = vmatpush.bf16.msra.mxu0 %v10800_v42  ;;  %6731 = vmatpush.bf16.msra.mxu1 %v10928_v18  ;;  %v10753_v42 = vld [vmem:[#allocation7 + $0x910] sm:$0xf0] }
 0x7d1   :  { %6759 = vmatpush.bf16.msra.mxu3 %v10804_v33  ;;  %v10993_v18 = vld [vmem:[#allocation7 + $0xaf0] sm:$0xf0]  ;;  %v12270_v33 = vld [vmem:[#allocation7 + $0xbe4] sm:$0xf]  ;;  %v10756_v9 = vor.u32 %v12178_v48, %v10753_v42  ;;  %v10967_v42 = vld [vmem:[#allocation7 + $0xaa8] sm:$0xf] }
 0x7d2   :  { %6746 = vmatpush.bf16.msra.mxu2 %v11040_v51  ;;  %v10996_v51 = vor.u32 %v12238_v40, %v10993_v18  ;;  %v11124_v39 = vor.u32 %v12270_v33, %v11121_v1  ;;  %v11089_v48 = vld [vmem:[#allocation7 + $0xbb0] sm:$0xf0]  ;;  %v10823_v18 = vld [vmem:[#allocation7 + $0x988] sm:$0xf]  ;;  %v12197_v33 = vld [vmem:[#allocation7 + $0x994] sm:$0xf0]  ;;  %v10968_v1 = vor.u32 %v12233_v25, %v10967_v42 }
 0x7d4   :  { %6718 = vmatpush.bf16.msra.mxu0 %v10784_v55  ;;  %6732 = vmatpush.bf16.msra.mxu1 %v10912_v21  ;;  %v10855_v55 = vld [vmem:[#allocation7 + $0x9c8] sm:$0xf]  ;;  %v11000_v21 = vor.u32 %v12241_v7, %v10999_v43  ;;  %v12226_v43 = vld [vmem:[#allocation7 + $0xa84] sm:$0xf]  ;;  %v10945_v7 = vld [vmem:[#allocation7 + $0xa90] sm:$0xf0] }
 0x7d5   :  { %6760 = vmatpush.bf16.msra.mxu3 %v10788_v30  ;;  %v12234_v30 = vld [vmem:[#allocation7 + $0xac4] sm:$0xf] }
 0x7d6   :  { %6747 = vmatpush.bf16.msra.mxu2 %v11024_v31  ;;  %v10856_v31 = vor.u32 %v12205_v52, %v10855_v55  ;;  %v12229_v55 = vld [vmem:[#allocation7 + $0xa94] sm:$0xf0] }
 0x7d8   :  { %6719 = vmatpush.bf16.msra.mxu0 %v10768_v13  ;;  %6733 = vmatpush.bf16.msra.mxu1 %v10896_v3  ;;  %v10980_v13 = vor.u32 %v12234_v30, %v10977_v59  ;;  %v10984_v3 = vor.u32 %v12237_v50, %v10983_v63  ;;  %v10824_v30 = vor.u32 %v12197_v33, %v10823_v18  ;;  %v12250_v18 = vld [vmem:[#allocation7 + $0xb44] sm:$0xf] }
 0x7d9   :  { %6761 = vmatpush.bf16.msra.mxu3 %v10772_v10  ;;  %v12230_v10 = vld [vmem:[#allocation7 + $0xaa4] sm:$0xf]  ;;  %v10948_v59 = vor.u32 %v12226_v43, %v10945_v7  ;;  %v4575_v33 = vadd.f32 %v14956_v45, %v14950_v20  ;;  %v11041_v43 = vld [vmem:[#allocation7 + $0xb50] sm:$0xf0]  ;;  %v10919_v7 = vld [vmem:[#allocation7 + $0xa48] sm:$0xf] }
 0x7da   :  { %6748 = vmatpush.bf16.msra.mxu2 %v11008_v27  ;;  %v10964_v40 = vor.u32 %v12230_v10, %v10961_v35  ;;  %v14992_v27 = vpop.f32.mrf.mxu2  ;;  %v12225_v10 = vld [vmem:[#allocation7 + $0xa74] sm:$0xf0]  ;;  %v10897_v20 = vld [vmem:[#allocation7 + $0xa30] sm:$0xf0]  ;;  %v12246_v45 = vld [vmem:[#allocation7 + $0xb24] sm:$0xf] }
 0x7dc   :  { %6720 = vmatpush.bf16.msra.mxu0 %v10752_v46  ;;  %6734 = vmatpush.bf16.msra.mxu1 %v10880_v4  ;;  %v11092_v46 = vor.u32 %v12262_v34, %v11089_v48  ;;  %v12258_v4 = vld [vmem:[#allocation7 + $0xb84] sm:$0xf]  ;;  %v5208_v52 = vpop.f32.mrf.mxu0  ;;  %v10791_v34 = vld [vmem:[#allocation7 + $0x948] sm:$0xf]  ;;  %v12189_v48 = vld [vmem:[#allocation7 + $0x954] sm:$0xf0] }
 0x7dd   :  { %6762 = vmatpush.bf16.msra.mxu3 %v10756_v9  ;;  %6749 = vmatmul.bf16.vlgmr.msra.gmra.mxu2 %v14857_v28  ;;  %v14994_v9 = vpop.f32.mrf.mxu3 }
 0x7de   :  { %6797 = vmatpush.bf16.msrb.mxu2 %v10872_v36  ;;  %v11073_v36 = vld [vmem:[#allocation7 + $0xb90] sm:$0xf0] }
 0x7df   :  { %6721 = vmatmul.bf16.vlgmr.msra.gmra.mxu0 %v14896_v24  ;;  %6735 = vmatmul.bf16.vlgmr.msra.gmra.mxu1 %v14898_v44  ;;  %v11076_v50 = vor.u32 %v12258_v4, %v11073_v36  ;;  %v12221_v4 = vld [vmem:[#allocation7 + $0xa54] sm:$0xf0] }
 0x7e0   :  { %6769 = vmatpush.bf16.msrb.mxu0 %v10996_v51  ;;  %6783 = vmatpush.bf16.msrb.mxu1 %v11124_v39  ;;  %v10951_v51 = vld [vmem:[#allocation7 + $0xa88] sm:$0xf]  ;;  %v14997_v39 = vadd.f32 %v5208_v52, %v14982_v49  ;;  %v10808_v49 = vor.u32 %v12193_v29, %v10807_v15  ;;  %v10920_v15 = vor.u32 %v12221_v4, %v10919_v7  ;;  %v12214_v29 = vld [vmem:[#allocation7 + $0xa24] sm:$0xf]  ;;  %v12207_v7 = vld [vmem:[#allocation7 + $0x9ec] sm:$0xf] }
 0x7e1   :  { %6811 = vmatpush.bf16.msrb.mxu3 %v11000_v21  ;;  %v5222_v21 = vpop.f32.mrf.mxu1  ;;  %v10775_v52 = vld [vmem:[#allocation7 + $0x928] sm:$0xf] }
 0x7e2   :  { %6763 = vmatmul.bf16.vlgmr.msra.gmra.mxu3 %v14896_v24  ;;  %6798 = vmatpush.bf16.msrb.mxu2 %v10856_v31  ;;  %v5223_v63 = vadd.f32 %v5222_v21, %v14946_v32  ;;  %v10952_v31 = vor.u32 %v12229_v55, %v10951_v51  ;;  %v5236_v42 = vpop.f32.mrf.mxu2  ;;  %v12218_v32 = vld [vmem:[#allocation7 + $0xa44] sm:$0xf]  ;;  %v10792_v51 = vor.u32 %v12189_v48, %v10791_v34  ;;  %v12185_v21 = vld [vmem:[#allocation7 + $0x934] sm:$0xf0] }
 0x7e4   :  { %6770 = vmatpush.bf16.msrb.mxu0 %v10980_v13  ;;  %6784 = vmatpush.bf16.msrb.mxu1 %v11108_v60  ;;  %v12222_v13 = vld [vmem:[#allocation7 + $0xa64] sm:$0xf]  ;;  %v11057_v60 = vld [vmem:[#allocation7 + $0xb70] sm:$0xf0] }
 0x7e5   :  { %6812 = vmatpush.bf16.msrb.mxu3 %v10984_v3  ;;  %v10935_v3 = vld [vmem:[#allocation7 + $0xa68] sm:$0xf]  ;;  %v10932_v35 = vor.u32 %v12222_v13, %v10929_v19  ;;  %v11060_v25 = vor.u32 %v12254_v56, %v11057_v60  ;;  %v12217_v13 = vld [vmem:[#allocation7 + $0xa34] sm:$0xf0]  ;;  %v10776_v60 = vor.u32 %v12185_v21, %v10775_v52  ;;  %v10873_v52 = vld [vmem:[#allocation7 + $0x9f8] sm:$0xf0] }
 0x7e6   :  { %6799 = vmatpush.bf16.msrb.mxu2 %v10840_v8  ;;  %v10936_v8 = vor.u32 %v12225_v10, %v10935_v3  ;;  %v10759_v19 = vld [vmem:[#allocation7 + $0x908] sm:$0xf]  ;;  %v10900_v3 = vor.u32 %v12214_v29, %v10897_v20  ;;  %v12181_v10 = vld [vmem:[#allocation7 + $0x914] sm:$0xf0]  ;;  %v12271_v21 = vld [vmem:[#allocation7 + $0xbec] sm:$0xf] }
 0x7e8   :  { %6771 = vmatpush.bf16.msrb.mxu0 %v10964_v40  ;;  %6785 = vmatpush.bf16.msrb.mxu1 %v11092_v46  ;;  %v10913_v40 = vld [vmem:[#allocation7 + $0xa50] sm:$0xf0]  ;;  %v5237_v46 = vadd.f32 %v5236_v42, %v5223_v63  ;;  %v4589_v63 = vadd.f32 %v14958_v2, %v4575_v33  ;;  %v10887_v2 = vld [vmem:[#allocation7 + $0xa08] sm:$0xf]  ;;  %v12239_v33 = vld [vmem:[#allocation7 + $0xaec] sm:$0xf] }
 0x7e9   :  { %6813 = vmatpush.bf16.msrb.mxu3 %v10968_v1  ;;  %v5250_v1 = vpop.f32.mrf.mxu3  ;;  %v10916_v55 = vor.u32 %v12218_v32, %v10913_v40 }
 0x7ea   :  { %6800 = vmatpush.bf16.msrb.mxu2 %v10824_v30  ;;  %v15002_v36 = vadd.f32 %v5250_v1, %v5237_v46  ;;  %v5224_v30 = vpop.f32.mrf.mxu1  ;;  %v5238_v34 = vpop.f32.mrf.mxu2  ;;  %v11001_v46 = vld [vmem:[#allocation7 + $0xaf8] sm:$0xf0]  ;;  %v11127_v1 = vld [vmem:[#allocation7 + $0xbe8] sm:$0xf] }
 0x7eb   :  { %v5225_v56 = vadd.f32 %v5224_v30, %v4589_v63  ;;  %v11129_v30 = vld [vmem:[#allocation7 + $0xbf8] sm:$0xf0]  ;;  %v11004_v29 = vor.u32 %v12239_v33, %v11001_v46  ;;  %v12263_v33 = vld [vmem:[#allocation7 + $0xbac] sm:$0xf] }
 0x7ec   :  { %6772 = vmatpush.bf16.msrb.mxu0 %v10948_v59  ;;  %6786 = vmatpush.bf16.msrb.mxu1 %v11076_v50  ;;  %v11044_v59 = vor.u32 %v12250_v18, %v11041_v43  ;;  %v11025_v50 = vld [vmem:[#allocation7 + $0xb30] sm:$0xf0]  ;;  %v12213_v18 = vld [vmem:[#allocation7 + $0xa14] sm:$0xf0]  ;;  %v10985_v63 = vld [vmem:[#allocation7 + $0xad8] sm:$0xf0] }
 0x7ed   :  { %6814 = vmatpush.bf16.msrb.mxu3 %v10952_v31  ;;  %v10903_v31 = vld [vmem:[#allocation7 + $0xa28] sm:$0xf]  ;;  %v11028_v48 = vor.u32 %v12246_v45, %v11025_v50  ;;  %v5239_v32 = vadd.f32 %v5238_v34, %v5225_v56  ;;  %v12273_v43 = vld [vmem:[#allocation7 + $0xbf4] sm:$0xf0]  ;;  %v12235_v45 = vld [vmem:[#allocation7 + $0xacc] sm:$0xf]  ;;  %v10876_v50 = vor.u32 %v12207_v7, %v10873_v52 }
 0x7ee   :  { %6801 = vmatpush.bf16.msrb.mxu2 %v10808_v49  ;;  %v12210_v49 = vld [vmem:[#allocation7 + $0xa04] sm:$0xf]  ;;  %v10904_v42 = vor.u32 %v12217_v13, %v10903_v31  ;;  %v11128_v20 = vor.u32 %v12273_v43, %v11127_v1  ;;  %v11132_v31 = vor.u32 %v12271_v21, %v11129_v30  ;;  %v11111_v13 = vld [vmem:[#allocation7 + $0xbc8] sm:$0xf]  ;;  %v12269_v56 = vld [vmem:[#allocation7 + $0xbd4] sm:$0xf0] }
 0x7ef   :  { %v11112_v34 = vor.u32 %v12269_v56, %v11111_v13  ;;  %v11097_v46 = vld [vmem:[#allocation7 + $0xbb8] sm:$0xf0]  ;;  %v12227_v7 = vld [vmem:[#allocation7 + $0xa8c] sm:$0xf]  ;;  %v11079_v21 = vld [vmem:[#allocation7 + $0xb88] sm:$0xf] }
 0x7f0   :  { %6773 = vmatpush.bf16.msrb.mxu0 %v10932_v35  ;;  %6787 = vmatpush.bf16.msrb.mxu1 %v11060_v25  ;;  %v10881_v35 = vld [vmem:[#allocation7 + $0xa10] sm:$0xf0]  ;;  %v12242_v25 = vld [vmem:[#allocation7 + $0xb04] sm:$0xf]  ;;  %v11100_v52 = vor.u32 %v12263_v33, %v11097_v46  ;;  %v12261_v30 = vld [vmem:[#allocation7 + $0xb94] sm:$0xf0] }
 0x7f1   :  { %6815 = vmatpush.bf16.msrb.mxu3 %v10936_v8  ;;  %v11009_v8 = vld [vmem:[#allocation7 + $0xb10] sm:$0xf0]  ;;  %v5252_v40 = vpop.f32.mrf.mxu3  ;;  %v12223_v13 = vld [vmem:[#allocation7 + $0xa6c] sm:$0xf]  ;;  %v10937_v56 = vld [vmem:[#allocation7 + $0xa78] sm:$0xf0] }
 0x7f2   :  { %6802 = vmatpush.bf16.msrb.mxu2 %v10792_v51  ;;  %v15005_v4 = vadd.f32 %v5252_v40, %v5239_v32  ;;  %v10760_v51 = vor.u32 %v12181_v10, %v10759_v19  ;;  %v10857_v19 = vld [vmem:[#allocation7 + $0x9d8] sm:$0xf0]  ;;  %v12265_v32 = vld [vmem:[#allocation7 + $0xbb4] sm:$0xf0]  ;;  %v12199_v40 = vld [vmem:[#allocation7 + $0x9ac] sm:$0xf] }
 0x7f3   :  { %v11113_v10 = vld [vmem:[#allocation7 + $0xbd8] sm:$0xf0] }
 0x7f4   :  { %6774 = vmatpush.bf16.msrb.mxu0 %v10916_v55  ;;  %6788 = vmatpush.bf16.msrb.mxu1 %v11044_v59  ;;  %v10884_v55 = vor.u32 %v12210_v49, %v10881_v35  ;;  %v11012_v59 = vor.u32 %v12242_v25, %v11009_v8  ;;  %v15007_v49 = vpop.f32.mrf.mxu0  ;;  %v10988_v35 = vor.u32 %v12235_v45, %v10985_v63 }
 0x7f5   :  { %6816 = vmatpush.bf16.msrb.mxu3 %v10920_v15  ;;  %v10888_v15 = vor.u32 %v12213_v18, %v10887_v2  ;;  %v11095_v2 = vld [vmem:[#allocation7 + $0xba8] sm:$0xf]  ;;  %v10841_v18 = vld [vmem:[#allocation7 + $0x9b8] sm:$0xf0] }
 0x7f6   :  { %6803 = vmatpush.bf16.msrb.mxu2 %v10776_v60  ;;  %v12203_v60 = vld [vmem:[#allocation7 + $0x9cc] sm:$0xf]  ;;  %v11096_v43 = vor.u32 %v12265_v32, %v11095_v2 }
 0x7f7   :  { %v10860_v25 = vor.u32 %v12203_v60, %v10857_v19  ;;  %v12219_v32 = vld [vmem:[#allocation7 + $0xa4c] sm:$0xf] }
 0x7f8   :  { %6775 = vmatpush.bf16.msrb.mxu0 %v10900_v3  ;;  %6789 = vmatpush.bf16.msrb.mxu1 %v11028_v48  ;;  %v12267_v3 = vld [vmem:[#allocation7 + $0xbcc] sm:$0xf] }
 0x7f9   :  { %6817 = vmatpush.bf16.msrb.mxu3 %v10904_v42  ;;  %v12231_v48 = vld [vmem:[#allocation7 + $0xaac] sm:$0xf]  ;;  %v10969_v42 = vld [vmem:[#allocation7 + $0xab8] sm:$0xf0]  ;;  %v11116_v8 = vor.u32 %v12267_v3, %v11113_v10  ;;  %v11063_v10 = vld [vmem:[#allocation7 + $0xb68] sm:$0xf] }
 0x7fa   :  { %6804 = vmatpush.bf16.msrb.mxu2 %v10760_v51  ;;  %v10972_v1 = vor.u32 %v12231_v48, %v10969_v42  ;;  %v10953_v51 = vld [vmem:[#allocation7 + $0xa98] sm:$0xf0]  ;;  %v12255_v42 = vld [vmem:[#allocation7 + $0xb6c] sm:$0xf] }
 0x7fb   :  { %v10809_v48 = vld [vmem:[#allocation7 + $0x978] sm:$0xf0] }
 0x7fc   :  { %6776 = vmatpush.bf16.msrb.mxu0 %v10884_v55  ;;  %6790 = vmatpush.bf16.msrb.mxu1 %v11012_v59  ;;  %v10844_v55 = vor.u32 %v12199_v40, %v10841_v18  ;;  %v12195_v59 = vld [vmem:[#allocation7 + $0x98c] sm:$0xf]  ;;  %v5881_v45 = vpop.f32.mrf.mxu0  ;;  %v5895_v63 = vpop.f32.mrf.mxu1  ;;  %v10921_v40 = vld [vmem:[#allocation7 + $0xa58] sm:$0xf0] }
 0x7fd   :  { %6818 = vmatpush.bf16.msrb.mxu3 %v10888_v15  ;;  %6805 = vmatmul.bf16.vlgmr.msrb.gmra.mxu2 %v14896_v24  ;;  %v10825_v15 = vld [vmem:[#allocation7 + $0x998] sm:$0xf0]  ;;  %v5896_v60 = vadd.f32 %v5895_v63, %v5881_v45  ;;  %v12215_v45 = vld [vmem:[#allocation7 + $0xa2c] sm:$0xf] }
 0x7fe   :  { %6853 = vmatpush.bf16.msra.mxu2 %v11004_v29  ;;  %v12259_v29 = vld [vmem:[#allocation7 + $0xb8c] sm:$0xf]  ;;  %v10828_v19 = vor.u32 %v12195_v59, %v10825_v15  ;;  %v10905_v63 = vld [vmem:[#allocation7 + $0xa38] sm:$0xf0] }
 0x7ff   :  { %6777 = vmatmul.bf16.vlgmr.msrb.gmra.mxu0 %v14898_v44  ;;  %6791 = vmatmul.bf16.vlgmr.msrb.gmra.mxu1 %v14857_v28 }
 0x800   :  { %6825 = vmatpush.bf16.msra.mxu0 %v11128_v20  ;;  %6839 = vmatpush.bf16.msra.mxu1 %v10876_v50  ;;  %v11081_v20 = vld [vmem:[#allocation7 + $0xb98] sm:$0xf0]  ;;  %v10956_v50 = vor.u32 %v12227_v7, %v10953_v51  ;;  %v5909_v18 = vpop.f32.mrf.mxu2  ;;  %v12187_v7 = vld [vmem:[#allocation7 + $0x94c] sm:$0xf] }
 0x801   :  { %6867 = vmatpush.bf16.msra.mxu3 %v11132_v31  ;;  %v11080_v31 = vor.u32 %v12261_v30, %v11079_v21  ;;  %v11084_v3 = vor.u32 %v12259_v29, %v11081_v20  ;;  %v5910_v51 = vadd.f32 %v5909_v18, %v5896_v60  ;;  %v11049_v21 = vld [vmem:[#allocation7 + $0xb58] sm:$0xf0]  ;;  %v10924_v29 = vor.u32 %v12219_v32, %v10921_v40  ;;  %v12249_v60 = vld [vmem:[#allocation7 + $0xb34] sm:$0xf0]  ;;  %v12179_v18 = vld [vmem:[#allocation7 + $0x90c] sm:$0xf] }
 0x802   :  { %6819 = vmatmul.bf16.vlgmr.msrb.gmra.mxu3 %v14898_v44  ;;  %6854 = vmatpush.bf16.msra.mxu2 %v10988_v35  ;;  %v12257_v35 = vld [vmem:[#allocation7 + $0xb74] sm:$0xf0] }
 0x803   :  { %v11064_v2 = vor.u32 %v12257_v35, %v11063_v10  ;;  %v15014_v59 = vadd.f32 %v5910_v51, %v14961_v53  ;;  %v12247_v10 = vld [vmem:[#allocation7 + $0xb2c] sm:$0xf]  ;;  %v11033_v35 = vld [vmem:[#allocation7 + $0xb38] sm:$0xf0]  ;;  %v10908_v53 = vor.u32 %v12215_v45, %v10905_v63  ;;  %v12368_v51 = vld [vmem:[#allocation7 + $0xeec] sm:$0xf0] }
 0x804   :  { %6826 = vmatpush.bf16.msra.mxu0 %v11112_v34  ;;  %6840 = vmatpush.bf16.msra.mxu1 %v10860_v25  ;;  %v12191_v34 = vld [vmem:[#allocation7 + $0x96c] sm:$0xf]  ;;  %v11065_v25 = vld [vmem:[#allocation7 + $0xb78] sm:$0xf0]  ;;  %v5883_v30 = vpop.f32.mrf.mxu0  ;;  %v5897_v15 = vpop.f32.mrf.mxu1  ;;  %v11036_v40 = vor.u32 %v12247_v10, %v11033_v35  ;;  %v11253_v45 = vld [vmem:[#allocation7 + $0xcf0] sm:$0xf0] }
 0x805   :  { %6868 = vmatpush.bf16.msra.mxu3 %v11116_v8  ;;  %v10940_v8 = vor.u32 %v12223_v13, %v10937_v56  ;;  %v10812_v33 = vor.u32 %v12191_v34, %v10809_v48  ;;  %v11068_v46 = vor.u32 %v12255_v42, %v11065_v25  ;;  %v11031_v56 = vld [vmem:[#allocation7 + $0xb28] sm:$0xf]  ;;  %v12211_v34 = vld [vmem:[#allocation7 + $0xa0c] sm:$0xf]  ;;  %v10889_v42 = vld [vmem:[#allocation7 + $0xa18] sm:$0xf0] }
 0x806   :  { %6855 = vmatpush.bf16.msra.mxu2 %v10972_v1  ;;  %v11047_v1 = vld [vmem:[#allocation7 + $0xb48] sm:$0xf]  ;;  %v11032_v48 = vor.u32 %v12249_v60, %v11031_v56  ;;  %v11491_v60 = vld [vmem:[#allocation7 + $0xec0] sm:$0xf] }
 0x807   :  { %v11015_v25 = vld [vmem:[#allocation7 + $0xb08] sm:$0xf]  ;;  %v11235_v35 = vld [vmem:[#allocation7 + $0xcc0] sm:$0xf] }
 0x808   :  { %6827 = vmatpush.bf16.msra.mxu0 %v11096_v43  ;;  %6841 = vmatpush.bf16.msra.mxu1 %v10844_v55  ;;  %v12253_v43 = vld [vmem:[#allocation7 + $0xb54] sm:$0xf0]  ;;  %v10793_v55 = vld [vmem:[#allocation7 + $0x958] sm:$0xf0] }
 0x809   :  { %6869 = vmatpush.bf16.msra.mxu3 %v11100_v52  ;;  %v12251_v52 = vld [vmem:[#allocation7 + $0xb4c] sm:$0xf]  ;;  %v11048_v20 = vor.u32 %v12253_v43, %v11047_v1  ;;  %v11017_v43 = vld [vmem:[#allocation7 + $0xb18] sm:$0xf0] }
 0x80a   :  { %6856 = vmatpush.bf16.msra.mxu2 %v10956_v50  ;;  %v5898_v50 = vadd.f32 %v5897_v15, %v5883_v30  ;;  %v11052_v13 = vor.u32 %v12251_v52, %v11049_v21  ;;  %v12304_v52 = vld [vmem:[#allocation7 + $0xcec] sm:$0xf0]  ;;  %v11379_v21 = vld [vmem:[#allocation7 + $0xde0] sm:$0xf]  ;;  %v10892_v30 = vor.u32 %v12211_v34, %v10889_v42  ;;  %v11237_v42 = vld [vmem:[#allocation7 + $0xcd0] sm:$0xf0] }
 0x80b   :  { %v12332_v34 = vld [vmem:[#allocation7 + $0xdcc] sm:$0xf0] }
 0x80c   :  { %6828 = vmatpush.bf16.msra.mxu0 %v11080_v31  ;;  %6842 = vmatpush.bf16.msra.mxu1 %v10828_v19  ;;  %v10796_v31 = vor.u32 %v12187_v7, %v10793_v55  ;;  %v12183_v19 = vld [vmem:[#allocation7 + $0x92c] sm:$0xf]  ;;  %v11507_v7 = vld [vmem:[#allocation7 + $0xee0] sm:$0xf] }
 0x80d   :  { %6870 = vmatpush.bf16.msra.mxu3 %v11084_v3  ;;  %v10777_v3 = vld [vmem:[#allocation7 + $0x938] sm:$0xf0]  ;;  %v11251_v55 = vld [vmem:[#allocation7 + $0xce0] sm:$0xf] }
 0x80e   :  { %6857 = vmatpush.bf16.msra.mxu2 %v10940_v8  ;;  %v12245_v8 = vld [vmem:[#allocation7 + $0xb14] sm:$0xf0]  ;;  %v10780_v32 = vor.u32 %v12183_v19, %v10777_v3  ;;  %v11252_v56 = vor.u32 %v12304_v52, %v11251_v55  ;;  %v12364_v19 = vld [vmem:[#allocation7 + $0xecc] sm:$0xf0]  ;;  %v12294_v55 = vld [vmem:[#allocation7 + $0xca4] sm:$0xf] }
 0x80f   :  { %v11016_v15 = vor.u32 %v12245_v8, %v11015_v25  ;;  %v11492_v25 = vor.u32 %v12364_v19, %v11491_v60  ;;  %v11221_v52 = vld [vmem:[#allocation7 + $0xcb0] sm:$0xf0]  ;;  %v12290_v60 = vld [vmem:[#allocation7 + $0xc84] sm:$0xf] }
 0x810   :  { %6829 = vmatpush.bf16.msra.mxu0 %v11064_v2  ;;  %6843 = vmatpush.bf16.msra.mxu1 %v10812_v33  ;;  %v5911_v2 = vpop.f32.mrf.mxu2  ;;  %v10761_v33 = vld [vmem:[#allocation7 + $0x918] sm:$0xf0]  ;;  %v11205_v19 = vld [vmem:[#allocation7 + $0xc90] sm:$0xf0] }
 0x811   :  { %6871 = vmatpush.bf16.msra.mxu3 %v11068_v46  ;;  %v12243_v46 = vld [vmem:[#allocation7 + $0xb0c] sm:$0xf]  ;;  %v15016_v1 = vadd.f32 %v5911_v2, %v5898_v50  ;;  %v10764_v63 = vor.u32 %v12179_v18, %v10761_v33  ;;  %v11508_v50 = vor.u32 %v12368_v51, %v11507_v7  ;;  %v12300_v2 = vld [vmem:[#allocation7 + $0xccc] sm:$0xf0]  ;;  %v11347_v7 = vld [vmem:[#allocation7 + $0xda0] sm:$0xf] }
 0x812   :  { %6858 = vmatpush.bf16.msra.mxu2 %v10924_v29  ;;  %v12336_v29 = vld [vmem:[#allocation7 + $0xdec] sm:$0xf0]  ;;  %v11236_v8 = vor.u32 %v12300_v2, %v11235_v35  ;;  %v11443_v2 = vld [vmem:[#allocation7 + $0xe60] sm:$0xf] }
 0x813   :  { %v11380_v3 = vor.u32 %v12336_v29, %v11379_v21  ;;  %v12328_v51 = vld [vmem:[#allocation7 + $0xdac] sm:$0xf0] }
 0x814   :  { %6830 = vmatpush.bf16.msra.mxu0 %v11048_v20  ;;  %6844 = vmatpush.bf16.msra.mxu1 %v10796_v31  ;;  %v12302_v20 = vld [vmem:[#allocation7 + $0xce4] sm:$0xf]  ;;  %v11020_v31 = vor.u32 %v12243_v46, %v11017_v43  ;;  %v11219_v46 = vld [vmem:[#allocation7 + $0xca0] sm:$0xf]  ;;  %v12296_v43 = vld [vmem:[#allocation7 + $0xcac] sm:$0xf0] }
 0x815   :  { %6872 = vmatpush.bf16.msra.mxu3 %v11052_v13  ;;  %v5923_v13 = vpop.f32.mrf.mxu3  ;;  %v11256_v10 = vor.u32 %v12302_v20, %v11253_v45  ;;  %v12356_v29 = vld [vmem:[#allocation7 + $0xe8c] sm:$0xf0]  ;;  %v11348_v20 = vor.u32 %v12328_v51, %v11347_v7  ;;  %v11224_v45 = vor.u32 %v12294_v55, %v11221_v52  ;;  %v11427_v7 = vld [vmem:[#allocation7 + $0xe40] sm:$0xf] }
 0x816   :  { %6859 = vmatpush.bf16.msra.mxu2 %v10908_v53  ;;  %v11363_v53 = vld [vmem:[#allocation7 + $0xdc0] sm:$0xf]  ;;  %v12348_v51 = vld [vmem:[#allocation7 + $0xe4c] sm:$0xf0] }
 0x817   :  { %v11364_v18 = vor.u32 %v12332_v34, %v11363_v53  ;;  %v12352_v53 = vld [vmem:[#allocation7 + $0xe6c] sm:$0xf0] }
 0x818   :  { %6831 = vmatpush.bf16.msra.mxu0 %v11032_v48  ;;  %6845 = vmatpush.bf16.msra.mxu1 %v10780_v32  ;;  %v12298_v48 = vld [vmem:[#allocation7 + $0xcc4] sm:$0xf]  ;;  %v11475_v32 = vld [vmem:[#allocation7 + $0xea0] sm:$0xf] }
 0x819   :  { %6873 = vmatpush.bf16.msra.mxu3 %v11036_v40  ;;  %v12360_v40 = vld [vmem:[#allocation7 + $0xeac] sm:$0xf0]  ;;  %v11240_v33 = vor.u32 %v12298_v48, %v11237_v42  ;;  %v11208_v48 = vor.u32 %v12290_v60, %v11205_v19  ;;  %v11187_v42 = vld [vmem:[#allocation7 + $0xc60] sm:$0xf]  ;;  %v11428_v60 = vor.u32 %v12348_v51, %v11427_v7 }
 0x81a   :  { %6860 = vmatpush.bf16.msra.mxu2 %v10892_v30  ;;  %v11476_v21 = vor.u32 %v12360_v40, %v11475_v32  ;;  %v11220_v30 = vor.u32 %v12296_v43, %v11219_v46  ;;  %v12320_v40 = vld [vmem:[#allocation7 + $0xd6c] sm:$0xf0] }
 0x81c   :  { %6832 = vmatpush.bf16.msra.mxu0 %v11016_v15  ;;  %6846 = vmatpush.bf16.msra.mxu1 %v10764_v63  ;;  %v11459_v15 = vld [vmem:[#allocation7 + $0xe80] sm:$0xf]  ;;  %v12292_v63 = vld [vmem:[#allocation7 + $0xc8c] sm:$0xf0] }
 0x81d   :  { %6874 = vmatpush.bf16.msra.mxu3 %v11020_v31  ;;  %6861 = vmatmul.bf16.vlgmr.msra.gmra.mxu2 %v14898_v44  ;;  %v11203_v44 = vld [vmem:[#allocation7 + $0xc80] sm:$0xf] }
 0x81e   :  { %7534 = vmatpush.bf16.msrb.mxu2 %v11508_v50  ;;  %v11331_v31 = vld [vmem:[#allocation7 + $0xd80] sm:$0xf]  ;;  %v5925_v50 = vpop.f32.mrf.mxu3  ;;  %v11204_v35 = vor.u32 %v12292_v63, %v11203_v44  ;;  %v12282_v44 = vld [vmem:[#allocation7 + $0xc44] sm:$0xf]  ;;  %v11173_v63 = vld [vmem:[#allocation7 + $0xc50] sm:$0xf0] }
 0x81f   :  { %6833 = vmatmul.bf16.vlgmr.msra.gmra.mxu0 %v14857_v28  ;;  %6847 = vmatmul.bf16.vlgmr.msra.gmra.mxu1 %v14896_v24  ;;  %v5937_v24 = vpop.f32.mrf.mxu0 }
 0x820   :  { %7506 = vmatpush.bf16.msrb.mxu0 %v11252_v56  ;;  %7520 = vmatpush.bf16.msrb.mxu1 %v11380_v3  ;;  %v12324_v56 = vld [vmem:[#allocation7 + $0xd8c] sm:$0xf0]  ;;  %v5951_v3 = vpop.f32.mrf.mxu1  ;;  %v5965_v55 = vpop.f32.mrf.mxu2 }
 0x821   :  { %7548 = vmatpush.bf16.msrb.mxu3 %v11256_v10  ;;  %v11460_v10 = vor.u32 %v12356_v29, %v11459_v15  ;;  %v11332_v34 = vor.u32 %v12324_v56, %v11331_v31  ;;  %v12284_v15 = vld [vmem:[#allocation7 + $0xc4c] sm:$0xf0]  ;;  %v11299_v29 = vld [vmem:[#allocation7 + $0xd40] sm:$0xf] }
 0x822   :  { %6875 = vmatmul.bf16.vlgmr.msra.gmra.mxu3 %v14857_v28  ;;  %7535 = vmatpush.bf16.msrb.mxu2 %v11492_v25  ;;  %v5938_v28 = vadd.f32 %v5937_v24, %v5923_v13  ;;  %v12288_v25 = vld [vmem:[#allocation7 + $0xc6c] sm:$0xf0]  ;;  %v11444_v13 = vor.u32 %v12352_v53, %v11443_v2  ;;  %v11411_v24 = vld [vmem:[#allocation7 + $0xe20] sm:$0xf] }
 0x823   :  { %v11188_v43 = vor.u32 %v12288_v25, %v11187_v42  ;;  %v11155_v2 = vld [vmem:[#allocation7 + $0xc20] sm:$0xf]  ;;  %v12280_v53 = vld [vmem:[#allocation7 + $0xc2c] sm:$0xf0]  ;;  %v12278_v25 = vld [vmem:[#allocation7 + $0xc24] sm:$0xf] }
 0x824   :  { %7507 = vmatpush.bf16.msrb.mxu0 %v11236_v8  ;;  %7521 = vmatpush.bf16.msrb.mxu1 %v11364_v18  ;;  %v11315_v8 = vld [vmem:[#allocation7 + $0xd60] sm:$0xf]  ;;  %v5952_v32 = vadd.f32 %v5951_v3, %v5938_v28  ;;  %v12286_v18 = vld [vmem:[#allocation7 + $0xc64] sm:$0xf]  ;;  %v12344_v28 = vld [vmem:[#allocation7 + $0xe2c] sm:$0xf0] }
 0x825   :  { %7549 = vmatpush.bf16.msrb.mxu3 %v11240_v33  ;;  %v11189_v33 = vld [vmem:[#allocation7 + $0xc70] sm:$0xf0]  ;;  %v11316_v52 = vor.u32 %v12320_v40, %v11315_v8  ;;  %v12312_v42 = vld [vmem:[#allocation7 + $0xd2c] sm:$0xf0]  ;;  %v11156_v40 = vor.u32 %v12280_v53, %v11155_v2  ;;  %v11243_v53 = vld [vmem:[#allocation7 + $0xcc8] sm:$0xf] }
 0x826   :  { %7536 = vmatpush.bf16.msrb.mxu2 %v11476_v21  ;;  %v15023_v46 = vadd.f32 %v5952_v32, %v14979_v23  ;;  %v11192_v21 = vor.u32 %v12286_v18, %v11189_v33  ;;  %v11157_v8 = vld [vmem:[#allocation7 + $0xc30] sm:$0xf0]  ;;  %v11395_v32 = vld [vmem:[#allocation7 + $0xe00] sm:$0xf]  ;;  %v12340_v18 = vld [vmem:[#allocation7 + $0xe0c] sm:$0xf0] }
 0x827   :  { %v5939_v31 = vpop.f32.mrf.mxu0  ;;  %v11139_v33 = vld [vmem:[#allocation7 + $0xc00] sm:$0xf]  ;;  %v11160_v51 = vor.u32 %v12278_v25, %v11157_v8  ;;  %v12330_v8 = vld [vmem:[#allocation7 + $0xdc4] sm:$0xf] }
 0x828   :  { %7508 = vmatpush.bf16.msrb.mxu0 %v11220_v30  ;;  %7522 = vmatpush.bf16.msrb.mxu1 %v11348_v20  ;;  %v11171_v30 = vld [vmem:[#allocation7 + $0xc40] sm:$0xf]  ;;  %v5979_v20 = vpop.f32.mrf.mxu3  ;;  %v5940_v56 = vadd.f32 %v5939_v31, %v5925_v50  ;;  %v5953_v3 = vpop.f32.mrf.mxu1  ;;  %v11412_v50 = vor.u32 %v12344_v28, %v11411_v24  ;;  %v12366_v31 = vld [vmem:[#allocation7 + $0xee4] sm:$0xf]  ;;  %v11387_v24 = vld [vmem:[#allocation7 + $0xde8] sm:$0xf] }
 0x829   :  { %7550 = vmatpush.bf16.msrb.mxu3 %v11224_v45  ;;  %v12316_v45 = vld [vmem:[#allocation7 + $0xd4c] sm:$0xf0]  ;;  %v15025_v23 = vadd.f32 %v5979_v20, %v5965_v55  ;;  %v11172_v19 = vor.u32 %v12284_v15, %v11171_v30  ;;  %v11267_v55 = vld [vmem:[#allocation7 + $0xd00] sm:$0xf]  ;;  %v11141_v15 = vld [vmem:[#allocation7 + $0xc10] sm:$0xf0] }
 0x82a   :  { %7537 = vmatpush.bf16.msrb.mxu2 %v11460_v10  ;;  %v11300_v10 = vor.u32 %v12316_v45, %v11299_v29  ;;  %v11259_v29 = vld [vmem:[#allocation7 + $0xce8] sm:$0xf]  ;;  %v12305_v20 = vld [vmem:[#allocation7 + $0xcf4] sm:$0xf0] }
 0x82b   :  { %v12337_v28 = vld [vmem:[#allocation7 + $0xdf4] sm:$0xf0] }
 0x82c   :  { %7509 = vmatpush.bf16.msrb.mxu0 %v11204_v35  ;;  %7523 = vmatpush.bf16.msrb.mxu1 %v11332_v34  ;;  %v11176_v35 = vor.u32 %v12282_v44, %v11173_v63  ;;  %v11283_v34 = vld [vmem:[#allocation7 + $0xd20] sm:$0xf]  ;;  %v12334_v44 = vld [vmem:[#allocation7 + $0xde4] sm:$0xf]  ;;  %v11381_v63 = vld [vmem:[#allocation7 + $0xdf0] sm:$0xf0]  ;;  %v11388_v25 = vor.u32 %v12337_v28, %v11387_v24 }
 0x82d   :  { %7551 = vmatpush.bf16.msrb.mxu3 %v11208_v48  ;;  %v15027_v48 = vadd.f32 %v5953_v3, %v5940_v56  ;;  %v11284_v7 = vor.u32 %v12312_v42, %v11283_v34  ;;  %v11396_v56 = vor.u32 %v12340_v18, %v11395_v32  ;;  %v11384_v2 = vor.u32 %v12334_v44, %v11381_v63  ;;  %v12301_v34 = vld [vmem:[#allocation7 + $0xcd4] sm:$0xf0]  ;;  %v11493_v32 = vld [vmem:[#allocation7 + $0xed0] sm:$0xf0] }
 0x82e   :  { %7538 = vmatpush.bf16.msrb.mxu2 %v11444_v13  ;;  %v12276_v13 = vld [vmem:[#allocation7 + $0xc0c] sm:$0xf0]  ;;  %v11244_v18 = vor.u32 %v12301_v34, %v11243_v53  ;;  %v12329_v44 = vld [vmem:[#allocation7 + $0xdb4] sm:$0xf0]  ;;  %v11339_v53 = vld [vmem:[#allocation7 + $0xd88] sm:$0xf] }
 0x82f   :  { %v12325_v34 = vld [vmem:[#allocation7 + $0xd94] sm:$0xf0] }
 0x830   :  { %7510 = vmatpush.bf16.msrb.mxu0 %v11188_v43  ;;  %7524 = vmatpush.bf16.msrb.mxu1 %v11316_v52  ;;  %v5967_v43 = vpop.f32.mrf.mxu2  ;;  %v12308_v52 = vld [vmem:[#allocation7 + $0xd0c] sm:$0xf0]  ;;  %v5981_v30 = vpop.f32.mrf.mxu3 }
 0x831   :  { %7552 = vmatpush.bf16.msrb.mxu3 %v11192_v21  ;;  %v12274_v21 = vld [vmem:[#allocation7 + $0xc04] sm:$0xf]  ;;  %v15029_v45 = vadd.f32 %v5981_v30, %v5967_v43  ;;  %v11268_v3 = vor.u32 %v12308_v52, %v11267_v55  ;;  %v11365_v43 = vld [vmem:[#allocation7 + $0xdd0] sm:$0xf0] }
 0x832   :  { %7539 = vmatpush.bf16.msrb.mxu2 %v11428_v60  ;;  %v11140_v60 = vor.u32 %v12276_v13, %v11139_v33  ;;  %v12362_v30 = vld [vmem:[#allocation7 + $0xec4] sm:$0xf]  ;;  %v11368_v33 = vor.u32 %v12330_v8, %v11365_v43  ;;  %v11227_v13 = vld [vmem:[#allocation7 + $0xca8] sm:$0xf] }
 0x833   :  { %v12326_v52 = vld [vmem:[#allocation7 + $0xda4] sm:$0xf] }
 0x834   :  { %7511 = vmatpush.bf16.msrb.mxu0 %v11172_v19  ;;  %7525 = vmatpush.bf16.msrb.mxu1 %v11300_v10  ;;  %v11509_v19 = vld [vmem:[#allocation7 + $0xef0] sm:$0xf0]  ;;  %v11144_v10 = vor.u32 %v12274_v21, %v11141_v15  ;;  %v12358_v15 = vld [vmem:[#allocation7 + $0xea4] sm:$0xf] }
 0x835   :  { %7553 = vmatpush.bf16.msrb.mxu3 %v11176_v35  ;;  %v11260_v35 = vor.u32 %v12305_v20, %v11259_v29  ;;  %v11512_v42 = vor.u32 %v12366_v31, %v11509_v19  ;;  %v11349_v21 = vld [vmem:[#allocation7 + $0xdb0] sm:$0xf0]  ;;  %v11355_v20 = vld [vmem:[#allocation7 + $0xda8] sm:$0xf]  ;;  %v4533_v19 = vadd.f32 %v14942_v61, %v14940_v0  ;;  %v12289_v61 = vld [vmem:[#allocation7 + $0xc74] sm:$0xf0] }
 0x836   :  { %7540 = vmatpush.bf16.msrb.mxu2 %v11412_v50  ;;  %v11371_v50 = vld [vmem:[#allocation7 + $0xdc8] sm:$0xf]  ;;  %v11477_v29 = vld [vmem:[#allocation7 + $0xeb0] sm:$0xf0]  ;;  %v11352_v31 = vor.u32 %v12326_v52, %v11349_v21  ;;  %v11356_v28 = vor.u32 %v12329_v44, %v11355_v20 }
 0x837   :  { %v11480_v24 = vor.u32 %v12358_v15, %v11477_v29  ;;  %v11195_v0 = vld [vmem:[#allocation7 + $0xc68] sm:$0xf] }
 0x838   :  { %7512 = vmatpush.bf16.msrb.mxu0 %v11156_v40  ;;  %7526 = vmatpush.bf16.msrb.mxu1 %v11284_v7  ;;  %v12333_v40 = vld [vmem:[#allocation7 + $0xdd4] sm:$0xf0]  ;;  %v11196_v52 = vor.u32 %v12289_v61, %v11195_v0  ;;  %v11179_v15 = vld [vmem:[#allocation7 + $0xc48] sm:$0xf]  ;;  %v11285_v0 = vld [vmem:[#allocation7 + $0xd30] sm:$0xf0] }
 0x839   :  { %7554 = vmatpush.bf16.msrb.mxu3 %v11160_v51  ;;  %v12297_v7 = vld [vmem:[#allocation7 + $0xcb4] sm:$0xf0]  ;;  %v11496_v51 = vor.u32 %v12362_v30, %v11493_v32  ;;  %v11372_v55 = vor.u32 %v12333_v40, %v11371_v50  ;;  %v11340_v40 = vor.u32 %v12325_v34, %v11339_v53  ;;  %v12342_v61 = vld [vmem:[#allocation7 + $0xe24] sm:$0xf] }
 0x83a   :  { %7541 = vmatpush.bf16.msrb.mxu2 %v11396_v56  ;;  %v11228_v63 = vor.u32 %v12297_v7, %v11227_v13  ;;  %v11211_v56 = vld [vmem:[#allocation7 + $0xc88] sm:$0xf]  ;;  %v12350_v13 = vld [vmem:[#allocation7 + $0xe64] sm:$0xf]  ;;  %v11445_v7 = vld [vmem:[#allocation7 + $0xe70] sm:$0xf0] }
 0x83b   :  { %v11448_v44 = vor.u32 %v12350_v13, %v11445_v7  ;;  %v12277_v7 = vld [vmem:[#allocation7 + $0xc14] sm:$0xf0] }
 0x83c   :  { %7513 = vmatpush.bf16.msrb.mxu0 %v11140_v60  ;;  %7527 = vmatpush.bf16.msrb.mxu1 %v11268_v3  ;;  %v12293_v60 = vld [vmem:[#allocation7 + $0xc94] sm:$0xf0]  ;;  %v12322_v3 = vld [vmem:[#allocation7 + $0xd84] sm:$0xf] }
 0x83d   :  { %7555 = vmatpush.bf16.msrb.mxu3 %v11144_v10  ;;  %7542 = vmatmul.bf16.vlgmr.msrb.gmra.mxu2 %v14900_v14  ;;  %v11333_v10 = vld [vmem:[#allocation7 + $0xd90] sm:$0xf0]  ;;  %v11212_v43 = vor.u32 %v12293_v60, %v11211_v56  ;;  %v12346_v56 = vld [vmem:[#allocation7 + $0xe44] sm:$0xf] }
 0x83e   :  { %7590 = vmatpush.bf16.msra.mxu2 %v11260_v35  ;;  %v12354_v35 = vld [vmem:[#allocation7 + $0xe84] sm:$0xf]  ;;  %v11336_v30 = vor.u32 %v12322_v3, %v11333_v10  ;;  %v12317_v3 = vld [vmem:[#allocation7 + $0xd54] sm:$0xf0] }
 0x83f   :  { %7514 = vmatmul.bf16.vlgmr.msrb.gmra.mxu0 %v14908_v16  ;;  %7528 = vmatmul.bf16.vlgmr.msrb.gmra.mxu1 %v14910_v57 }
 0x840   :  { %7562 = vmatpush.bf16.msra.mxu0 %v11384_v2  ;;  %7576 = vmatpush.bf16.msra.mxu1 %v11512_v42  ;;  %v11461_v2 = vld [vmem:[#allocation7 + $0xe90] sm:$0xf0]  ;;  %v4547_v42 = vadd.f32 %v14948_v41, %v4533_v19  ;;  %v6021_v20 = vpop.f32.mrf.mxu2 }
 0x841   :  { %7604 = vmatpush.bf16.msra.mxu3 %v11388_v25  ;;  %v5993_v25 = vpop.f32.mrf.mxu0  ;;  %v11464_v50 = vor.u32 %v12354_v35, %v11461_v2 }
 0x842   :  { %7556 = vmatmul.bf16.vlgmr.msrb.gmra.mxu3 %v14908_v16  ;;  %7591 = vmatpush.bf16.msra.mxu2 %v11244_v18  ;;  %v5994_v8 = vadd.f32 %v5993_v25, %v15025_v23  ;;  %v5183_v32 = vadd.f32 %v14992_v27, %v4547_v42  ;;  %v12318_v18 = vld [vmem:[#allocation7 + $0xd64] sm:$0xf]  ;;  %v6007_v23 = vpop.f32.mrf.mxu1  ;;  %v12285_v27 = vld [vmem:[#allocation7 + $0xc54] sm:$0xf0]  ;;  %v11163_v42 = vld [vmem:[#allocation7 + $0xc28] sm:$0xf] }
 0x843   :  { %v6022_v60 = vadd.f32 %v6021_v20, %v6007_v23  ;;  %v11180_v2 = vor.u32 %v12285_v27, %v11179_v15  ;;  %v12281_v25 = vld [vmem:[#allocation7 + $0xc34] sm:$0xf0]  ;;  %v12338_v15 = vld [vmem:[#allocation7 + $0xe04] sm:$0xf]  ;;  %v11397_v27 = vld [vmem:[#allocation7 + $0xe10] sm:$0xf0] }
 0x844   :  { %7563 = vmatpush.bf16.msra.mxu0 %v11368_v33  ;;  %7577 = vmatpush.bf16.msra.mxu1 %v11496_v51  ;;  %v11317_v33 = vld [vmem:[#allocation7 + $0xd70] sm:$0xf0]  ;;  %v15041_v41 = vadd.f32 %v5994_v8, %v14997_v39  ;;  %v11323_v51 = vld [vmem:[#allocation7 + $0xd68] sm:$0xf]  ;;  %v5197_v29 = vadd.f32 %v14994_v9, %v5183_v32 }
 0x845   :  { %7605 = vmatpush.bf16.msra.mxu3 %v11372_v55  ;;  %v12321_v55 = vld [vmem:[#allocation7 + $0xd74] sm:$0xf0]  ;;  %v11320_v21 = vor.u32 %v12318_v18, %v11317_v33  ;;  %v11301_v39 = vld [vmem:[#allocation7 + $0xd50] sm:$0xf0]  ;;  %v6035_v19 = vpop.f32.mrf.mxu3  ;;  %v11147_v33 = vld [vmem:[#allocation7 + $0xc08] sm:$0xf] }
 0x846   :  { %7592 = vmatpush.bf16.msra.mxu2 %v11228_v63  ;;  %v11324_v63 = vor.u32 %v12321_v55, %v11323_v51  ;;  %v5211_v10 = vadd.f32 %v15007_v49, %v5197_v29  ;;  %v6036_v9 = vadd.f32 %v6035_v19, %v6022_v60  ;;  %v12313_v18 = vld [vmem:[#allocation7 + $0xd34] sm:$0xf0]  ;;  %v12306_v51 = vld [vmem:[#allocation7 + $0xd04] sm:$0xf]  ;;  %v11269_v55 = vld [vmem:[#allocation7 + $0xd10] sm:$0xf0] }
 0x847   :  { %v11275_v29 = vld [vmem:[#allocation7 + $0xd08] sm:$0xf]  ;;  %v12369_v60 = vld [vmem:[#allocation7 + $0xef4] sm:$0xf0]  ;;  %v12303_v19 = vld [vmem:[#allocation7 + $0xcec] sm:$0xf] }
 0x848   :  { %7564 = vmatpush.bf16.msra.mxu0 %v11352_v31  ;;  %7578 = vmatpush.bf16.msra.mxu1 %v11480_v24  ;;  %v12314_v31 = vld [vmem:[#allocation7 + $0xd44] sm:$0xf]  ;;  %v11429_v24 = vld [vmem:[#allocation7 + $0xe50] sm:$0xf0]  ;;  %v15047_v32 = vadd.f32 %v6036_v9, %v15002_v36  ;;  %v11400_v9 = vor.u32 %v12338_v15, %v11397_v27  ;;  %v11229_v15 = vld [vmem:[#allocation7 + $0xcb8] sm:$0xf0] }
 0x849   :  { %7606 = vmatpush.bf16.msra.mxu3 %v11356_v28  ;;  %v11307_v28 = vld [vmem:[#allocation7 + $0xd48] sm:$0xf]  ;;  %v5995_v35 = vpop.f32.mrf.mxu0  ;;  %v11304_v34 = vor.u32 %v12314_v31, %v11301_v39  ;;  %v11432_v8 = vor.u32 %v12346_v56, %v11429_v24  ;;  %v12335_v31 = vld [vmem:[#allocation7 + $0xdec] sm:$0xf]  ;;  %v11389_v39 = vld [vmem:[#allocation7 + $0xdf8] sm:$0xf0] }
 0x84a   :  { %7593 = vmatpush.bf16.msra.mxu2 %v11212_v43  ;;  %v5996_v53 = vadd.f32 %v5995_v35, %v15029_v45  ;;  %v11308_v43 = vor.u32 %v12317_v3, %v11307_v28  ;;  %v11164_v45 = vor.u32 %v12281_v25, %v11163_v42  ;;  %v6009_v23 = vpop.f32.mrf.mxu1  ;;  %v11515_v56 = vld [vmem:[#allocation7 + $0xee8] sm:$0xf]  ;;  %v11148_v28 = vor.u32 %v12277_v7, %v11147_v33  ;;  %v12367_v35 = vld [vmem:[#allocation7 + $0xeec] sm:$0xf] }
 0x84b   :  { %v11272_v3 = vor.u32 %v12306_v51, %v11269_v55  ;;  %v11392_v42 = vor.u32 %v12335_v31, %v11389_v39  ;;  %v11516_v25 = vor.u32 %v12369_v60, %v11515_v56  ;;  %v12363_v33 = vld [vmem:[#allocation7 + $0xecc] sm:$0xf]  ;;  %v11357_v51 = vld [vmem:[#allocation7 + $0xdb8] sm:$0xf0]  ;;  %v11467_v60 = vld [vmem:[#allocation7 + $0xe88] sm:$0xf] }
 0x84c   :  { %7565 = vmatpush.bf16.msra.mxu0 %v11336_v30  ;;  %7579 = vmatpush.bf16.msra.mxu1 %v11464_v50  ;;  %v12310_v30 = vld [vmem:[#allocation7 + $0xd24] sm:$0xf]  ;;  %v15049_v49 = vadd.f32 %v5996_v53, %v5211_v10  ;;  %v11413_v50 = vld [vmem:[#allocation7 + $0xe30] sm:$0xf0]  ;;  %v11261_v10 = vld [vmem:[#allocation7 + $0xcf8] sm:$0xf0] }
 0x84d   :  { %7607 = vmatpush.bf16.msra.mxu3 %v11340_v40  ;;  %v11291_v40 = vld [vmem:[#allocation7 + $0xd28] sm:$0xf]  ;;  %v11288_v13 = vor.u32 %v12310_v30, %v11285_v0  ;;  %v11264_v30 = vor.u32 %v12303_v19, %v11261_v10  ;;  %v12327_v7 = vld [vmem:[#allocation7 + $0xdac] sm:$0xf]  ;;  %v11341_v31 = vld [vmem:[#allocation7 + $0xd98] sm:$0xf0] }
 0x84e   :  { %7594 = vmatpush.bf16.msra.mxu2 %v11196_v52  ;;  %v6023_v52 = vpop.f32.mrf.mxu2  ;;  %v11292_v36 = vor.u32 %v12313_v18, %v11291_v40  ;;  %v12299_v40 = vld [vmem:[#allocation7 + $0xccc] sm:$0xf]  ;;  %v11245_v18 = vld [vmem:[#allocation7 + $0xcd8] sm:$0xf0]  ;;  %v12357_v19 = vld [vmem:[#allocation7 + $0xe94] sm:$0xf0] }
 0x84f   :  { %v6024_v20 = vadd.f32 %v6023_v52, %v6009_v23  ;;  %v11248_v55 = vor.u32 %v12299_v40, %v11245_v18  ;;  %v11483_v52 = vld [vmem:[#allocation7 + $0xea8] sm:$0xf]  ;;  %v12359_v27 = vld [vmem:[#allocation7 + $0xeac] sm:$0xf]  ;;  %v11469_v10 = vld [vmem:[#allocation7 + $0xe98] sm:$0xf0] }
 0x850   :  { %7566 = vmatpush.bf16.msra.mxu0 %v11320_v21  ;;  %7580 = vmatpush.bf16.msra.mxu1 %v11448_v44  ;;  %v11416_v21 = vor.u32 %v12342_v61, %v11413_v50  ;;  %v6037_v44 = vpop.f32.mrf.mxu3  ;;  %v11499_v61 = vld [vmem:[#allocation7 + $0xec8] sm:$0xf]  ;;  %v12365_v50 = vld [vmem:[#allocation7 + $0xed4] sm:$0xf0] }
 0x851   :  { %7608 = vmatpush.bf16.msra.mxu3 %v11324_v63  ;;  %v12309_v63 = vld [vmem:[#allocation7 + $0xd14] sm:$0xf0]  ;;  %v6038_v24 = vadd.f32 %v6037_v44, %v6024_v20  ;;  %v11360_v20 = vor.u32 %v12327_v7, %v11357_v51  ;;  %v11435_v7 = vld [vmem:[#allocation7 + $0xe48] sm:$0xf] }
 0x852   :  { %7595 = vmatpush.bf16.msra.mxu2 %v11180_v2  ;;  %v11517_v2 = vld [vmem:[#allocation7 + $0xef8] sm:$0xf0]  ;;  %v11276_v53 = vor.u32 %v12309_v63, %v11275_v29  ;;  %v12323_v63 = vld [vmem:[#allocation7 + $0xd8c] sm:$0xf]  ;;  %v12349_v51 = vld [vmem:[#allocation7 + $0xe54] sm:$0xf0] }
 0x853   :  { %v11520_v0 = vor.u32 %v12367_v35, %v11517_v2  ;;  %v11485_v29 = vld [vmem:[#allocation7 + $0xeb8] sm:$0xf0]  ;;  %v11344_v35 = vor.u32 %v12323_v63, %v11341_v31  ;;  %v11468_v2 = vor.u32 %v12357_v19, %v11467_v60  ;;  %v11419_v63 = vld [vmem:[#allocation7 + $0xe28] sm:$0xf]  ;;  %v12345_v31 = vld [vmem:[#allocation7 + $0xe34] sm:$0xf0] }
 0x854   :  { %7567 = vmatpush.bf16.msra.mxu0 %v11304_v34  ;;  %7581 = vmatpush.bf16.msra.mxu1 %v11432_v8  ;;  %v15052_v34 = vadd.f32 %v6038_v24, %v15005_v4  ;;  %v12331_v8 = vld [vmem:[#allocation7 + $0xdcc] sm:$0xf]  ;;  %v11488_v56 = vor.u32 %v12359_v27, %v11485_v29  ;;  %v11293_v29 = vld [vmem:[#allocation7 + $0xd38] sm:$0xf0] }
 0x855   :  { %7609 = vmatpush.bf16.msra.mxu3 %v11308_v43  ;;  %v11373_v43 = vld [vmem:[#allocation7 + $0xdd8] sm:$0xf0]  ;;  %v12291_v24 = vld [vmem:[#allocation7 + $0xc8c] sm:$0xf] }
 0x856   :  { %7596 = vmatpush.bf16.msra.mxu2 %v11164_v45  ;;  %v11501_v45 = vld [vmem:[#allocation7 + $0xed8] sm:$0xf0]  ;;  %v11376_v4 = vor.u32 %v12331_v8, %v11373_v43  ;;  %v11451_v8 = vld [vmem:[#allocation7 + $0xe68] sm:$0xf]  ;;  %v12353_v43 = vld [vmem:[#allocation7 + $0xe74] sm:$0xf0] }
 0x857   :  { %v11504_v23 = vor.u32 %v12363_v33, %v11501_v45  ;;  %v11452_v18 = vor.u32 %v12353_v43, %v11451_v8  ;;  %v12315_v33 = vld [vmem:[#allocation7 + $0xd4c] sm:$0xf]  ;;  %v11309_v45 = vld [vmem:[#allocation7 + $0xd58] sm:$0xf0] }
 0x858   :  { %7568 = vmatpush.bf16.msra.mxu0 %v11288_v13  ;;  %7582 = vmatpush.bf16.msra.mxu1 %v11416_v21  ;;  %v11500_v13 = vor.u32 %v12365_v50, %v11499_v61  ;;  %v12361_v21 = vld [vmem:[#allocation7 + $0xeb4] sm:$0xf0]  ;;  %v12351_v61 = vld [vmem:[#allocation7 + $0xe6c] sm:$0xf]  ;;  %v11453_v50 = vld [vmem:[#allocation7 + $0xe78] sm:$0xf0] }
 0x859   :  { %7610 = vmatpush.bf16.msra.mxu3 %v11292_v36  ;;  %v12295_v36 = vld [vmem:[#allocation7 + $0xcac] sm:$0xf]  ;;  %v11484_v44 = vor.u32 %v12361_v21, %v11483_v52  ;;  %v11437_v21 = vld [vmem:[#allocation7 + $0xe58] sm:$0xf0] }
 0x85a   :  { %7597 = vmatpush.bf16.msra.mxu2 %v11148_v28  ;;  %v11232_v39 = vor.u32 %v12295_v36, %v11229_v15  ;;  %v11213_v28 = vld [vmem:[#allocation7 + $0xc98] sm:$0xf0]  ;;  %v12347_v52 = vld [vmem:[#allocation7 + $0xe4c] sm:$0xf]  ;;  %v11312_v36 = vor.u32 %v12315_v33, %v11309_v45  ;;  %v11436_v15 = vor.u32 %v12349_v51, %v11435_v7 }
 0x85b   :  { %v12311_v27 = vld [vmem:[#allocation7 + $0xd2c] sm:$0xf]  ;;  %v11421_v19 = vld [vmem:[#allocation7 + $0xe38] sm:$0xf0] }
 0x85c   :  { %7569 = vmatpush.bf16.msra.mxu0 %v11272_v3  ;;  %7583 = vmatpush.bf16.msra.mxu1 %v11400_v9  ;;  %v12355_v3 = vld [vmem:[#allocation7 + $0xe8c] sm:$0xf]  ;;  %v11149_v43 = vld [vmem:[#allocation7 + $0xc18] sm:$0xf0] }
 0x85d   :  { %7611 = vmatpush.bf16.msra.mxu3 %v11276_v53  ;;  %7598 = vmatmul.bf16.vlgmr.msra.gmra.mxu2 %v14908_v16  ;;  %v12319_v9 = vld [vmem:[#allocation7 + $0xd6c] sm:$0xf]  ;;  %v11325_v53 = vld [vmem:[#allocation7 + $0xd78] sm:$0xf0] }
 0x85e   :  { %7646 = vmatpush.bf16.msrb.mxu2 %v11392_v42  ;;  %v11216_v42 = vor.u32 %v12291_v24, %v11213_v28  ;;  %v11328_v40 = vor.u32 %v12319_v9, %v11325_v53  ;;  %v12343_v60 = vld [vmem:[#allocation7 + $0xe2c] sm:$0xf]  ;;  %v15058_v24 = vpop.f32.mrf.mxu0  ;;  %v11296_v28 = vor.u32 %v12311_v27, %v11293_v29 }
 0x85f   :  { %7570 = vmatmul.bf16.vlgmr.msra.gmra.mxu0 %v14910_v57  ;;  %7584 = vmatmul.bf16.vlgmr.msra.gmra.mxu1 %v14900_v14  ;;  %v11424_v53 = vor.u32 %v12343_v60, %v11421_v19  ;;  %v12275_v8 = vld [vmem:[#allocation7 + $0xc0c] sm:$0xf] }
 0x860   :  { %7618 = vmatpush.bf16.msrb.mxu0 %v11516_v25  ;;  %7632 = vmatpush.bf16.msrb.mxu1 %v11264_v30  ;;  %v11472_v25 = vor.u32 %v12355_v3, %v11469_v10  ;;  %v12287_v30 = vld [vmem:[#allocation7 + $0xc6c] sm:$0xf]  ;;  %v11420_v3 = vor.u32 %v12345_v31, %v11419_v63 }
 0x861   :  { %7660 = vmatpush.bf16.msrb.mxu3 %v11520_v0  ;;  %v11197_v0 = vld [vmem:[#allocation7 + $0xc78] sm:$0xf0]  ;;  %v12307_v10 = vld [vmem:[#allocation7 + $0xd0c] sm:$0xf] }
 0x862   :  { %7612 = vmatmul.bf16.vlgmr.msra.gmra.mxu3 %v14910_v57  ;;  %7647 = vmatpush.bf16.msrb.mxu2 %v11376_v4  ;;  %v11200_v4 = vor.u32 %v12287_v30, %v11197_v0  ;;  %v12339_v30 = vld [vmem:[#allocation7 + $0xe0c] sm:$0xf]  ;;  %v11405_v0 = vld [vmem:[#allocation7 + $0xe18] sm:$0xf0] }
 0x863   :  { %v11408_v33 = vor.u32 %v12339_v30, %v11405_v0  ;;  %v4449_v30 = vadd.f32 %v14924_v38, %v14922_v37 }
 0x864   :  { %7619 = vmatpush.bf16.msrb.mxu0 %v11500_v13  ;;  %7633 = vmatpush.bf16.msrb.mxu1 %v11248_v55  ;;  %v11456_v13 = vor.u32 %v12351_v61, %v11453_v50  ;;  %v12283_v55 = vld [vmem:[#allocation7 + $0xc4c] sm:$0xf] }
 0x865   :  { %7661 = vmatpush.bf16.msrb.mxu3 %v11504_v23  ;;  %v11181_v23 = vld [vmem:[#allocation7 + $0xc58] sm:$0xf0]  ;;  %v6764_v45 = vpop.f32.mrf.mxu3 }
 0x866   :  { %7648 = vmatpush.bf16.msrb.mxu2 %v11360_v20  ;;  %v11184_v20 = vor.u32 %v12283_v55, %v11181_v23 }
 0x868   :  { %7620 = vmatpush.bf16.msrb.mxu0 %v11484_v44  ;;  %7634 = vmatpush.bf16.msrb.mxu1 %v11232_v39  ;;  %v11440_v44 = vor.u32 %v12347_v52, %v11437_v21  ;;  %v12279_v39 = vld [vmem:[#allocation7 + $0xc2c] sm:$0xf] }
 0x869   :  { %7662 = vmatpush.bf16.msrb.mxu3 %v11488_v56  ;;  %v11165_v56 = vld [vmem:[#allocation7 + $0xc38] sm:$0xf0] }
 0x86a   :  { %7649 = vmatpush.bf16.msrb.mxu2 %v11344_v35  ;;  %v11277_v35 = vld [vmem:[#allocation7 + $0xd18] sm:$0xf0]  ;;  %v11168_v9 = vor.u32 %v12279_v39, %v11165_v56 }
 0x86b   :  { %v11280_v61 = vor.u32 %v12307_v10, %v11277_v35 }
 0x86c   :  { %7621 = vmatpush.bf16.msrb.mxu0 %v11468_v2  ;;  %7635 = vmatpush.bf16.msrb.mxu1 %v11216_v42  ;;  %v15060_v2 = vpop.f32.mrf.mxu1  ;;  %v11403_v42 = vld [vmem:[#allocation7 + $0xe08] sm:$0xf] }
 0x86d   :  { %7663 = vmatpush.bf16.msrb.mxu3 %v11472_v25  ;;  %v12341_v25 = vld [vmem:[#allocation7 + $0xe14] sm:$0xf0]  ;;  %v15066_v51 = vpop.f32.mrf.mxu3 }
 0x86e   :  { %7650 = vmatpush.bf16.msrb.mxu2 %v11328_v40  ;;  %v11404_v50 = vor.u32 %v12341_v25, %v11403_v42  ;;  %v6750_v40 = vpop.f32.mrf.mxu2 }
 0x870   :  { %7622 = vmatpush.bf16.msrb.mxu0 %v11452_v18  ;;  %7636 = vmatpush.bf16.msrb.mxu1 %v11200_v4  ;;  %v11152_v18 = vor.u32 %v12275_v8, %v11149_v43  ;;  %v6724_v4 = vpop.f32.mrf.mxu0 }
 0x871   :  { %7664 = vmatpush.bf16.msrb.mxu3 %v11456_v13 }
 0x872   :  { %7651 = vmatpush.bf16.msrb.mxu2 %v11312_v36 }
 0x874   :  { %7623 = vmatpush.bf16.msrb.mxu0 %v11436_v15  ;;  %7637 = vmatpush.bf16.msrb.mxu1 %v11184_v20  ;;  %v6738_v13 = vpop.f32.mrf.mxu1 }
 0x875   :  { %7665 = vmatpush.bf16.msrb.mxu3 %v11440_v44 }
 0x876   :  { %7652 = vmatpush.bf16.msrb.mxu2 %v11296_v28  ;;  %v6752_v7 = vpop.f32.mrf.mxu2 }
 0x878   :  { %7624 = vmatpush.bf16.msrb.mxu0 %v11420_v3  ;;  %7638 = vmatpush.bf16.msrb.mxu1 %v11168_v9 }
 0x879   :  { %7666 = vmatpush.bf16.msrb.mxu3 %v11424_v53 }
 0x87a   :  { %7653 = vmatpush.bf16.msrb.mxu2 %v11280_v61  ;;  %v4463_v61 = vadd.f32 %v14926_v58, %v4449_v30 }
 0x87c   :  { %7625 = vmatpush.bf16.msrb.mxu0 %v11404_v50  ;;  %7639 = vmatpush.bf16.msrb.mxu1 %v11152_v18  ;;  %v6778_v55 = vpop.f32.mrf.mxu0  ;;  %v6792_v52 = vpop.f32.mrf.mxu1 }
 0x87d   :  { %7667 = vmatpush.bf16.msrb.mxu3 %v11408_v33  ;;  %7654 = vmatmul.bf16.vlgmr.msrb.gmra.mxu2 %v14910_v57  ;;  %v6779_v23 = vadd.f32 %v6778_v55, %v6764_v45  ;;  %v6737_v33 = vadd.f32 %v15060_v2, %v15058_v24  ;;  %v6739_v45 = vadd.f32 %v6738_v13, %v6724_v4 }
 0x87e   :  { %v4491_v4 = vadd.f32 %v14932_v6, %v14928_v12 }
 0x87f   :  { %7626 = vmatmul.bf16.vlgmr.msrb.gmra.mxu0 %v14900_v14  ;;  %7640 = vmatmul.bf16.vlgmr.msrb.gmra.mxu1 %v14908_v16  ;;  %v6793_v21 = vadd.f32 %v6792_v52, %v6779_v23  ;;  %v6751_v52 = vadd.f32 %v6750_v40, %v6737_v33 }
 0x880   :  { %7668 = vmatmul.bf16.vlgmr.msrb.gmra.mxu3 %v14900_v14  ;;  %v6806_v15 = vpop.f32.mrf.mxu2 }
 0x881   :  { %v15069_v36 = vadd.f32 %v6793_v21, %v15023_v46  ;;  %v6753_v21 = vadd.f32 %v6752_v7, %v6739_v45 }
 0x884   :  { %v6780_v57 = vpop.f32.mrf.mxu0  ;;  %v15071_v20 = vpop.f32.mrf.mxu1 }
 0x885   :  { %v6820_v27 = vpop.f32.mrf.mxu3 }
 0x886   :  { %v6821_v29 = vadd.f32 %v6820_v27, %v6806_v15 }
 0x888   :  { %v6808_v44 = vpop.f32.mrf.mxu2 }
 0x88d   :  { %v6822_v16 = vpop.f32.mrf.mxu3 }
 0x88e   :  { %v6823_v60 = vadd.f32 %v6822_v16, %v6808_v44  ;;  %v4505_v16 = vadd.f32 %v14938_v26, %v4491_v4 }
 0x89c   :  { %v6834_v63 = vpop.f32.mrf.mxu0  ;;  %v6848_v39 = vpop.f32.mrf.mxu1 }
 0x89d   :  { %v6835_v14 = vadd.f32 %v6834_v63, %v6821_v29 }
 0x89f   :  { %v15074_v31 = vadd.f32 %v6835_v14, %v15041_v41  ;;  %v5141_v14 = vadd.f32 %v14976_v11, %v4505_v16 }
 0x8a0   :  { %v6862_v56 = vpop.f32.mrf.mxu2 }
 0x8a1   :  { %v6863_v19 = vadd.f32 %v6862_v56, %v6848_v39 }
 0x8a4   :  { %v6836_v46 = vpop.f32.mrf.mxu0  ;;  %v6850_v53 = vpop.f32.mrf.mxu1 }
 0x8a5   :  { %v6876_v28 = vpop.f32.mrf.mxu3  ;;  %v6837_v10 = vadd.f32 %v6836_v46, %v6823_v60  ;;  %v5155_v60 = vadd.f32 %v14984_v62, %v5141_v14 }
 0x8a6   :  { %v6877_v3 = vadd.f32 %v6876_v28, %v6863_v19  ;;  %v6781_v19 = vadd.f32 %v6780_v57, %v15066_v51 }
 0x8a7   :  { %v15080_v9 = vadd.f32 %v6837_v10, %v15049_v49  ;;  %v5169_v6 = vadd.f32 %v14986_v47, %v5155_v60 }
 0x8a8   :  { %v15077_v35 = vadd.f32 %v6877_v3, %v15047_v32  ;;  %v6864_v42 = vpop.f32.mrf.mxu2  ;;  %v5099_v32 = vadd.f32 %v14966_v54, %v4463_v61  ;;  %v6881_v54 = vadd.f32 %v6751_v52, %v15014_v59  ;;  %v6795_v28 = vadd.f32 %v15071_v20, %v6781_v19 }
 0x8a9   :  { %v6865_v25 = vadd.f32 %v6864_v42, %v6850_v53  ;;  %v6045_v3 = vadd.f32 %v15027_v48, %v5169_v6 }
 0x8aa   :  { %v5113_v49 = vadd.f32 %v14968_v22, %v5099_v32 }
 0x8ab   :  { %v6886_v42 = vadd.f32 %v6795_v28, %v6045_v3 }
 0x8ad   :  { %v6878_v8 = vpop.f32.mrf.mxu3 }
 0x8ae   :  { %v6879_v41 = vadd.f32 %v6878_v8, %v6865_v25 }
 0x8b0   :  { %v15083_v43 = vadd.f32 %v6879_v41, %v15052_v34  ;;  %v5127_v34 = vadd.f32 %v14974_v5, %v5113_v49 }
 0x8b2   :  { %v6044_v38 = vadd.f32 %v15016_v1, %v5127_v34 }
 0x8b4   :  { %v6885_v29 = vadd.f32 %v6753_v21, %v6044_v38 }
 0x8bc   :  { %v7515_v0 = vpop.f32.mrf.mxu0  ;;  %v7529_v50 = vpop.f32.mrf.mxu1 }
 0x8bd   :  { %v7530_v37 = vadd.f32 %v7529_v50, %v7515_v0 }
 0x8c0   :  { %v7543_v18 = vpop.f32.mrf.mxu2 }
 0x8c1   :  { %v7544_v58 = vadd.f32 %v7543_v18, %v7530_v37 }
 0x8c3   :  { %v15095_v44 = vadd.f32 %v7544_v58, %v6881_v54 }
 0x8c4   :  { %v7517_v55 = vpop.f32.mrf.mxu0  ;;  %v7531_v23 = vpop.f32.mrf.mxu1 }
 0x8c5   :  { %v7532_v15 = vadd.f32 %v7531_v23, %v7517_v55  ;;  %v7557_v7 = vpop.f32.mrf.mxu3 }
 0x8c8   :  { %v7545_v27 = vpop.f32.mrf.mxu2 }
 0x8c9   :  { %v7546_v22 = vadd.f32 %v7545_v27, %v7532_v15 }
 0x8cb   :  { %v15097_v24 = vadd.f32 %v7546_v22, %v6885_v29 }
 0x8cd   :  { %v7682_v2 = vadd.f32 %v15097_v24, %v15095_v44  ;;  %v7559_v26 = vpop.f32.mrf.mxu3 }
 0x8cf   :  { %v7683_v5 = vrot.slane %v7682_v2, 4 }
 0x8d1   :  { %v7684_v40 = vadd.f32 %v7683_v5, %v7682_v2 }
 0x8d3   :  { %v7685_v1 = vrot.slane %v7684_v40, 2 }
 0x8d5   :  { %v7686_v13 = vadd.f32 %v7685_v1, %v7684_v40 }
 0x8d7   :  { %v7687_v59 = vrot.slane %v7686_v13, 1 }
 0x8d9   :  { %v15105_v56 = vadd.f32 %v7687_v59, %v7686_v13 }
 0x8db   :  { %7710 = vrot.lane.b32.xlu1 %v15105_v56, %s12632_s27 }
 0x8dc   :  { %v7571_v63 = vpop.f32.mrf.mxu0  ;;  %v7585_v39 = vpop.f32.mrf.mxu1 }
 0x8dd   :  { %v7572_v12 = vadd.f32 %v7571_v63, %v7557_v7 }
 0x8df   :  { %v7586_v11 = vadd.f32 %v7585_v39, %v7572_v12 }
 0x8e0   :  { %v7599_v47 = vpop.f32.mrf.mxu2 }
 0x8e1   :  { %v15115_v62 = vadd.f32 %v7586_v11, %v15069_v36 }
 0x8e4   :  { %v7573_v46 = vpop.f32.mrf.mxu0  ;;  %v7587_v53 = vpop.f32.mrf.mxu1 }
 0x8e5   :  { %v7574_v10 = vadd.f32 %v7573_v46, %v7559_v26  ;;  %v7613_v20 = vpop.f32.mrf.mxu3 }
 0x8e6   :  { %v7614_v49 = vadd.f32 %v7613_v20, %v7599_v47 }
 0x8e7   :  { %v7588_v25 = vadd.f32 %v7587_v53, %v7574_v10 }
 0x8e8   :  { %v7601_v61 = vpop.f32.mrf.mxu2 }
 0x8e9   :  { %v15117_v51 = vadd.f32 %v7588_v25, %v6886_v42 }
 0x8eb   :  { %v7689_v57 = vadd.f32 %v15117_v51, %v15115_v62 }
 0x8ed   :  { %v7690_v8 = vrot.slane %v7689_v57, 4  ;;  %v7615_v32 = vpop.f32.mrf.mxu3 }
 0x8ee   :  { %v7616_v45 = vadd.f32 %v7615_v32, %v7601_v61 }
 0x8ef   :  { %v7691_v41 = vadd.f32 %v7690_v8, %v7689_v57 }
 0x8f1   :  { %v7692_v30 = vrot.slane %v7691_v41, 2 }
 0x8f3   :  { %v7693_v0 = vadd.f32 %v7692_v30, %v7691_v41 }
 0x8f5   :  { %v7694_v48 = vrot.slane %v7693_v0, 1 }
 0x8f7   :  { %v7695_v50 = vadd.f32 %v7694_v48, %v7693_v0 }
 0x8f9   :  { %7712 = vrot.lane.b32.xlu2 %v7695_v50, %s12632_s27 }
 0x8fc   :  { %v7627_v18 = vpop.f32.mrf.mxu0  ;;  %v7641_v36 = vpop.f32.mrf.mxu1 }
 0x8fd   :  { %v7628_v55 = vadd.f32 %v7627_v18, %v7614_v49 }
 0x8ff   :  { %v7676_v21 = vadd.f32 %v7628_v55, %v15074_v31 }
 0x900   :  { %v7655_v33 = vpop.f32.mrf.mxu2 }
 0x901   :  { %v7656_v37 = vadd.f32 %v7655_v33, %v7641_v36 }
 0x903   :  { %v7669_v23 = vpop.f32.mrf.mxu3 }
 0x904   :  { %v7629_v34 = vpop.f32.mrf.mxu0  ;;  %v7643_v15 = vpop.f32.mrf.mxu1  ;;  %v7670_v54 = vadd.f32 %v7669_v23, %v7656_v37 }
 0x905   :  { %v7630_v52 = vadd.f32 %v7629_v34, %v7616_v45 }
 0x906   :  { %v7677_v4 = vadd.f32 %v7670_v54, %v15077_v35 }
 0x907   :  { %v7680_v38 = vadd.f32 %v7630_v52, %v15080_v9 }
 0x908   :  { %v7657_v27 = vpop.f32.mrf.mxu2 }
 0x909   :  { %v7696_v58 = vadd.f32 %v7680_v38, %v7676_v21  ;;  %v7658_v22 = vadd.f32 %v7657_v27, %v7643_v15 }
 0x90b   :  { %v7697_v29 = vrot.slane %v7696_v58, 4  ;;  %v7671_v2 = vpop.f32.mrf.mxu3 }
 0x90c   :  { %v7672_v5 = vadd.f32 %v7671_v2, %v7658_v22 }
 0x90d   :  { %v7698_v40 = vadd.f32 %v7697_v29, %v7696_v58 }
 0x90e   :  { %v7681_v1 = vadd.f32 %v7672_v5, %v15083_v43 }
 0x90f   :  { %v7699_v13 = vrot.slane %v7698_v40, 2 }
 0x910   :  { %v7703_v7 = vadd.f32 %v7681_v1, %v7677_v4 }
 0x911   :  { %v7700_v16 = vadd.f32 %v7699_v13, %v7698_v40 }
 0x912   :  { %v7704_v31 = vrot.slane %v7703_v7, 4 }
 0x913   :  { %v7701_v59 = vrot.slane %v7700_v16, 1 }
 0x914   :  { %v7705_v9 = vadd.f32 %v7704_v31, %v7703_v7 }
 0x915   :  { %v7702_v63 = vadd.f32 %v7701_v59, %v7700_v16 }
 0x916   :  { %v7706_v14 = vrot.slane %v7705_v9, 2 }
 0x917   :  { %7714 = vrot.lane.b32.xlu0 %v7702_v63, %s12632_s27 }
 0x918   :  { %v7707_v39 = vadd.f32 %v7706_v14, %v7705_v9 }
 0x91a   :  { %v7708_v60 = vrot.slane %v7707_v39, 1 }
 0x91c   :  { %v7709_v19 = vadd.f32 %v7708_v60, %v7707_v39 }
 0x91e   :  { %7716 = vrot.lane.b32.xlu1 %v7709_v19, %s12632_s27 }
 0x94d   :  { %v7711_v12 = vpop.permute.xlu1 %7710 }
 0x953   :  { %v7713_v35 = vpop.permute.xlu2 %7712 }
 0x954   :  { %v7720_v26 = vsel %vm1465_vm8, %v7711_v12, %v7713_v35 }
 0x955   :  { %v7723_v53 = vadd.f32 %v7720_v26, %v7695_v50 }
 0x989   :  { %v7715_v6 = vpop.permute.xlu0 %7714 }
 0x98a   :  { %v7719_v43 = vsel %vm1465_vm8, %v7713_v35, %v7715_v6 }
 0x98b   :  { %v7724_v46 = vadd.f32 %v7719_v43, %v7702_v63 }
 0x98d   :  { %v7728_v57 = vadd.f32 %v7724_v46, %v7723_v53 }
 0x990   :  { %v7717_v3 = vpop.permute.xlu1 %7716 }
 0x991   :  { %v7718_v11 = vsel %vm1465_vm8, %v7715_v6, %v7717_v3  ;;  %v7721_v10 = vsel %vm1465_vm8, %v7717_v3, %v7711_v12 }
 0x992   :  { %v7722_v42 = vadd.f32 %v7721_v10, %v15105_v56  ;;  %v7725_v25 = vadd.f32 %v7718_v11, %v7709_v19 }
 0x994   :  { %v7726_v47 = vadd.f32 %v7725_v25, %v7722_v42  ;;  %v7727_v8 = vadd.f32 %v7723_v53, %v7722_v42  ;;  %v7729_v20 = vadd.f32 %v7725_v25, %v7724_v46 }
 0x996   :  { %v7730_v41 = vadd.f32 %v7728_v57, %v7726_v47  ;;  %v7731_v30 = vadd.f32 %v7729_v20, %v7727_v8 }
 0x998   :  { %v7732_v0 = vmul.f32 0.0078125, %v7730_v41  ;;  %v7733_v48 = vmul.f32 0.0078125, %v7731_v30 }
 0x99a   :  { %v7734_v61 = vperm.slane %v7732_v0, 0  ;;  %v7735_v32 = vperm.slane %v7733_v48, 0 }
 0x99c   :  { %v15138_v18 = vsub.f32 %v15115_v62, %v7735_v32  ;;  %v15141_v36 = vsub.f32 %v15117_v51, %v7735_v32  ;;  %v15143_v50 = vsub.f32 %v7676_v21, %v7734_v61  ;;  %v15145_v56 = vsub.f32 %v7680_v38, %v7734_v61 }
 0x99d   :  { %v15148_v49 = vsub.f32 %v15095_v44, %v7734_v61  ;;  %v15151_v33 = vsub.f32 %v15097_v24, %v7734_v61  ;;  %v15153_v45 = vsub.f32 %v7677_v4, %v7735_v32  ;;  %v15155_v55 = vsub.f32 %v7681_v1, %v7735_v32 }
 0x99e   :  { %v7745_v62 = vmul.f32 %v15138_v18, %v15138_v18  ;;  %v7749_v51 = vmul.f32 %v15141_v36, %v15141_v36  ;;  %v7746_v23 = vmul.f32 %v15143_v50, %v15143_v50  ;;  %v7750_v44 = vmul.f32 %v15145_v56, %v15145_v56 }
 0x99f   :  { %v7744_v24 = vmul.f32 %v15148_v49, %v15148_v49  ;;  %v7748_v34 = vmul.f32 %v15151_v33, %v15151_v33  ;;  %v7747_v52 = vmul.f32 %v15153_v45, %v15153_v45  ;;  %v7751_v21 = vmul.f32 %v15155_v55, %v15155_v55 }
 0x9a0   :  { %v7759_v37 = vadd.f32 %v7749_v51, %v7745_v62  ;;  %v7766_v38 = vadd.f32 %v7750_v44, %v7746_v23 }
 0x9a1   :  { %v7752_v58 = vadd.f32 %v7748_v34, %v7744_v24  ;;  %v7773_v15 = vadd.f32 %v7751_v21, %v7747_v52 }
 0x9a2   :  { %v7760_v27 = vrot.slane %v7759_v37, 4  ;;  %v7767_v54 = vrot.slane %v7766_v38, 4 }
 0x9a3   :  { %v7753_v29 = vrot.slane %v7752_v58, 4  ;;  %v7774_v22 = vrot.slane %v7773_v15, 4 }
 0x9a4   :  { %v7761_v2 = vadd.f32 %v7760_v27, %v7759_v37  ;;  %v7768_v5 = vadd.f32 %v7767_v54, %v7766_v38 }
 0x9a5   :  { %v7754_v40 = vadd.f32 %v7753_v29, %v7752_v58  ;;  %v7775_v4 = vadd.f32 %v7774_v22, %v7773_v15 }
 0x9a6   :  { %v7762_v1 = vrot.slane %v7761_v2, 2  ;;  %v7769_v13 = vrot.slane %v7768_v5, 2 }
 0x9a7   :  { %v7755_v7 = vrot.slane %v7754_v40, 2  ;;  %v7776_v63 = vrot.slane %v7775_v4, 2 }
 0x9a8   :  { %v7763_v16 = vadd.f32 %v7762_v1, %v7761_v2  ;;  %v7770_v31 = vadd.f32 %v7769_v13, %v7768_v5  ;;  %v7804_v1 = vld [vmem:[%s15485_s5] sm:$0xf]  ;;  %s12640_s5 = smov [#allocation12]  }
 0x9a9   :  { %v7756_v59 = vadd.f32 %v7755_v7, %v7754_v40  ;;  %v7777_v6 = vadd.f32 %v7776_v63, %v7775_v4  ;;  %v7854_v13 = vld [vmem:[%s15486_s6] sm:$0xf]  ;;  %s9099_s6 = sshll.u32 %s12640_s5, 4  ;;  %s9100_s6 = int_to_ptr.vmem [resolvable:$true] %s9099_s6 }
 0x9aa   :  { %v7764_v9 = vrot.slane %v7763_v16, 1  ;;  %v7771_v14 = vrot.slane %v7770_v31, 1  ;;  %v7856_v63 = vperm.slane %v7854_v13, 0 }
 0x9ab   :  { %v7757_v39 = vrot.slane %v7756_v59, 1  ;;  %v7778_v35 = vrot.slane %v7777_v6, 1 }
 0x9ac   :  { %v7765_v60 = vadd.f32 %v7764_v9, %v7763_v16  ;;  %v7772_v19 = vadd.f32 %v7771_v14, %v7770_v31  ;;  %v7857_v9 = vperm.slane %v7854_v13, 1  ;;  %v7858_v14 = vperm.slane %v7854_v13, 2 }
 0x9ad   :  { %v7758_v12 = vadd.f32 %v7757_v39, %v7756_v59  ;;  %v7779_v43 = vadd.f32 %v7778_v35, %v7777_v6  ;;  %v7859_v39 = vperm.slane %v7854_v13, 3 }
 0x9ae   :  { %7782 = vrot.lane.b32.xlu0 %v7765_v60, %s12632_s27  ;;  %7784 = vrot.lane.b32.xlu1 %v7772_v19, %s12632_s27 }
 0x9af   :  { %7780 = vrot.lane.b32.xlu2 %v7758_v12, %s12632_s27 }
 0x9b7   :  { %7786 = vrot.lane.b32.xlu2 %v7779_v43, %s12632_s27 }
 0xa09   :  { %v7781_v26 = vpop.permute.xlu2 %7780 }
 0xa11   :  { %v7787_v46 = vpop.permute.xlu2 %7786 }
 0xa12   :  { %v7791_v3 = vsel %vm1465_vm8, %v7787_v46, %v7781_v26 }
 0xa13   :  { %v7792_v57 = vadd.f32 %v7791_v3, %v7758_v12 }
 0xa20   :  { %v7783_v11 = vpop.permute.xlu0 %7782  ;;  %v7785_v10 = vpop.permute.xlu1 %7784 }
 0xa21   :  { %v7790_v53 = vsel %vm1465_vm8, %v7781_v26, %v7783_v11  ;;  %v7788_v42 = vsel %vm1465_vm8, %v7785_v10, %v7787_v46  ;;  %v7789_v25 = vsel %vm1465_vm8, %v7783_v11, %v7785_v10 }
 0xa22   :  { %v7793_v47 = vadd.f32 %v7790_v53, %v7765_v60  ;;  %v7794_v8 = vadd.f32 %v7789_v25, %v7772_v19  ;;  %v7795_v20 = vadd.f32 %v7788_v42, %v7779_v43 }
 0xa24   :  { %v7797_v41 = vadd.f32 %v7793_v47, %v7792_v57  ;;  %v7796_v30 = vadd.f32 %v7795_v20, %v7792_v57  ;;  %v7798_v0 = vadd.f32 %v7794_v8, %v7793_v47  ;;  %v7799_v48 = vadd.f32 %v7795_v20, %v7794_v8 }
 0xa26   :  { %v7800_v61 = vadd.f32 %v7798_v0, %v7796_v30  ;;  %v7801_v32 = vadd.f32 %v7799_v48, %v7797_v41 }
 0xa28   :  { %v7802_v62 = vmul.f32 0.0078125, %v7800_v61  ;;  %v7803_v51 = vmul.f32 0.0078125, %v7801_v32 }
 0xa2a   :  { %v7805_v23 = vadd.f32 1e-05, %v7802_v62  ;;  %v7806_v44 = vadd.f32 1e-05, %v7803_v51 }
 0xa2c   :  { %12493 = vrsqrt.f32 %v7805_v23  ;;  %vm7813_vm3 = vweird.f32 %v7805_v23  ;;  %vm7823_vm8 = vweird.f32 %v7806_v44 }
 0xa2d   :  { %12495 = vrsqrt.f32 %v7806_v44 }
 0xa32   :  { %v12494_v24 = vpop.eup %12493 }
 0xa33   :  { %v12496_v34 = vpop.eup %12495  ;;  %v7808_v28 = vmul.f32 %v12494_v24, %v7805_v23  ;;  %vm7814_vm10 = vweird.f32 %v12494_v24 }
 0xa34   :  { %v7818_v52 = vmul.f32 %v12496_v34, %v7806_v44  ;;  %vm7824_vm14 = vweird.f32 %v12496_v34  ;;  %vm7815_vm6 = vmor %vm7813_vm3, %vm7814_vm10 }
 0xa35   :  { %v7809_v21 = vmul.f32 %v12494_v24, %v7808_v28  ;;  %vm7825_vm12 = vmor %vm7823_vm8, %vm7824_vm14 }
 0xa36   :  { %v7819_v37 = vmul.f32 %v12496_v34, %v7818_v52  ;;  %vm15708_vm10 = vmmov %vm15706_vm2 }
 0xa37   :  { %v7810_v38 = vmul.f32 0.5, %v7809_v21  ;;  %vm15712_vm8 = vmmov %vm15706_vm2 }
 0xa38   :  { %v7820_v58 = vmul.f32 0.5, %v7819_v37 }
 0xa39   :  { %v7811_v15 = vsub.f32 1.5, %v7810_v38 }
 0xa3a   :  { %v7821_v27 = vsub.f32 1.5, %v7820_v58 }
 0xa3b   :  { %v7812_v54 = vmul.f32 %v12494_v24, %v7811_v15 }
 0xa3c   :  { %v7822_v29 = vmul.f32 %v12496_v34, %v7821_v27 }
 0xa3d   :  { %v7816_v22 = vsel %vm7815_vm6, %v12494_v24, %v7812_v54  ;;  %vm15711_vm6 = vmmov %vm15707_vm9 }
 0xa3e   :  { %v7826_v2 = vsel %vm7825_vm12, %v12496_v34, %v7822_v29  ;;  %v7830_v5 = vrot.slane %v7816_v22, 6  ;;  %vm15713_vm12 = vmmov %vm15711_vm6 }
 0xa3f   :  { %v7829_v40 = vrot.slane %v7826_v2, 7  ;;  %v7831_v4 = vrot.slane %v7826_v2, 5 }
 0xa41   :  { %v7832_v7 = vsel %vm111_vm1, %v7816_v22, %v7829_v40  ;;  %v7833_v16 = vsel %vm1622_vm7, %v7830_v5, %v7831_v4  ;;  %vm15701_vm1 = vcmask 1045504   ;;  %vm15702_vm7 = vcmask 1043458  }
 0xa42   :  { %v7834_v31 = vsel %vm1160_vm4, %v7832_v7, %v7833_v16  ;;  %vm15703_vm15 = vmmov %vm15702_vm7 }
 0xa43   :  { %v7836_v59 = vmul.f32 %v7834_v31, %v7804_v1  ;;  %vm15704_vm0 = vmmov %vm15701_vm1 }
 0xa44   :  { %vm15709_vm14 = vmmov %vm15702_vm7 }
 0xa45   :  { %v7838_v60 = vperm.slane %v7836_v59, 0  ;;  %v7839_v19 = vperm.slane %v7836_v59, 1  ;;  %v7840_v12 = vperm.slane %v7836_v59, 2  ;;  %v7841_v6 = vperm.slane %v7836_v59, 3  ;;  %vm15710_vm3 = vmmov %vm15704_vm0 }
 0xa47   :  { %v7846_v35 = vmul.f32 %v7838_v60, %v15148_v49  ;;  %v7847_v43 = vmul.f32 %v7839_v19, %v15138_v18  ;;  %v7848_v26 = vmul.f32 %v7840_v12, %v15143_v50  ;;  %v7849_v46 = vmul.f32 %v7841_v6, %v15153_v45 }
 0xa48   :  { %v7850_v3 = vmul.f32 %v7838_v60, %v15151_v33  ;;  %v7851_v11 = vmul.f32 %v7839_v19, %v15141_v36  ;;  %v7852_v10 = vmul.f32 %v7840_v12, %v15145_v56  ;;  %v7853_v53 = vmul.f32 %v7841_v6, %v15155_v55 }
 0xa49   :  { %v7864_v42 = vadd.f32 %v7856_v63, %v7846_v35  ;;  %v7865_v25 = vadd.f32 %v7857_v9, %v7847_v43  ;;  %v7866_v57 = vadd.f32 %v7858_v14, %v7848_v26  ;;  %v7867_v47 = vadd.f32 %v7859_v39, %v7849_v46 }
 0xa4a   :  { %v7868_v8 = vadd.f32 %v7856_v63, %v7850_v3  ;;  %v7869_v49 = vadd.f32 %v7857_v9, %v7851_v11  ;;  %v7870_v20 = vadd.f32 %v7858_v14, %v7852_v10  ;;  %v7871_v18 = vadd.f32 %v7859_v39, %v7853_v53 }
 0xa4b   :  { %v7873_v41 = vmax.f32 %v7865_v25, 0.0  ;;  %v7874_v50 = vmax.f32 %v7866_v57, 0.0  ;;  %v7875_v30 = vmax.f32 %v7867_v47, 0.0  ;;  %v7872_v48 = vmax.f32 %v7864_v42, 0.0 }
 0xa4c   :  { %v7877_v45 = vmax.f32 %v7869_v49, 0.0  ;;  %v7878_v0 = vmax.f32 %v7870_v20, 0.0  ;;  %v7879_v33 = vmax.f32 %v7871_v18, 0.0  ;;  %v7876_v32 = vmax.f32 %v7868_v8, 0.0 }
 0xa4d   :  { %v7888_v36 = vrot.slane %v7873_v41, 6  ;;  %v7889_v61 = vrot.slane %v7874_v50, 4  ;;  %v7890_v56 = vrot.slane %v7875_v30, 2 }
 0xa4e   :  { %v7891_v55 = vrot.slane %v7877_v45, 6  ;;  %v7892_v62 = vrot.slane %v7878_v0, 4  ;;  %v7893_v51 = vrot.slane %v7879_v33, 2 }
 0xa4f   :  { %v7901_v23 = vsel %vm1161_vm5, %v7872_v48, %v7888_v36  ;;  %v7902_v44 = vsel %vm1160_vm4, %v7889_v61, %v7890_v56  ;;  %v7905_v24 = vsel %vm15701_vm1, %v7888_v36, %v7872_v48  ;;  %v7906_v34 = vsel %vm15702_vm7, %v7889_v61, %v7890_v56 }
 0xa50   :  { %v7909_v28 = vsel %vm1160_vm4, %v7876_v32, %v7891_v55  ;;  %v7910_v52 = vsel %vm1161_vm5, %v7892_v62, %v7893_v51  ;;  %v7912_v21 = vsel %vm15703_vm15, %v7876_v32, %v7891_v55  ;;  %v7913_v37 = vsel %vm15704_vm0, %v7893_v51, %v7892_v62  ;;  %vm15718_vm15 = vmmov %vm15709_vm14 }
 0xa51   :  { %v7911_v38 = vsel %vm15705_vm13, %v7909_v28, %v7910_v52  ;;  %v7914_v58 = vsel %vm15706_vm2, %v7912_v21, %v7913_v37  ;;  %v7903_v15 = vsel %vm15707_vm9, %v7902_v44, %v7901_v23  ;;  %v7907_v27 = vsel %vm15708_vm10, %v7906_v34, %v7905_v24 }
 0xa52   :  { %v7915_v54 = vrot.slane %v7914_v58, 2  ;;  %v11525_v29 = vrot.slane %v7911_v38, 9  ;;  %v7904_v22 = vrot.slane %v7903_v15, 4  ;;  %v7908_v2 = vrot.slane %v7907_v27, 6 }
 0xa53   :  { %v7894_v5 = vsel %vm1160_vm4, %v7872_v48, %v7888_v36  ;;  %v7895_v40 = vsel %vm1161_vm5, %v7889_v61, %v7890_v56  ;;  %v7897_v4 = vsel %vm15709_vm14, %v7872_v48, %v7888_v36  ;;  %v7898_v1 = vsel %vm15710_vm3, %v7890_v56, %v7889_v61 }
 0xa54   :  { %v11526_v13 = vrot.slane %v7915_v54, 9  ;;  %v15218_v7 = vmax.f32 %v7911_v38, %v11525_v29  ;;  %v11523_v16 = vrot.slane %v7904_v22, 9  ;;  %v11524_v31 = vrot.slane %v7908_v2, 9 }
 0xa55   :  { %v7896_v59 = vsel %vm15711_vm6, %v7894_v5, %v7895_v40  ;;  %v7899_v63 = vsel %vm15712_vm8, %v7897_v4, %v7898_v1  ;;  %v7916_v9 = vsel %vm1161_vm5, %v7876_v32, %v7891_v55  ;;  %v7917_v14 = vsel %vm1160_vm4, %v7892_v62, %v7893_v51  ;;  %vm15714_vm4 = vmmov %vm15704_vm0 }
 0xa56   :  { %v15224_v39 = vmax.f32 %v7915_v54, %v11526_v13  ;;  %v15226_v60 = vmax.f32 %v7904_v22, %v11523_v16  ;;  %v15228_v19 = vmax.f32 %v7908_v2, %v11524_v31  ;;  %v7976_v12 = vrot.slane %v15218_v7, 2 }
 0xa57   :  { %v7900_v6 = vrot.slane %v7899_v63, 2  ;;  %v11521_v35 = vrot.slane %v7896_v59, 9  ;;  %v15232_v43 = vsel %vm15713_vm12, %v7917_v14, %v7916_v9  ;;  %v7920_v11 = vsel %vm15714_vm4, %v7891_v55, %v7876_v32 }
 0xa58   :  { %v7977_v26 = vrot.slane %v15224_v39, 2  ;;  %v8012_v46 = vrot.slane %v15224_v39, 7  ;;  %v7975_v3 = vrot.slane %v15228_v19, 2  ;;  %v7974_v10 = vrot.slane %v15226_v60, 2 }
 0xa59   :  { %v8005_v53 = vrot.slane %v15228_v19, 7  ;;  %v11522_v42 = vrot.slane %v7900_v6, 9  ;;  %v7956_v25 = vmax.f32 %v7896_v59, %v11521_v35  ;;  %vm15715_vm5 = vcmask 1041409  }
 0xa5a   :  { %v8013_v57 = vsel %vm15715_vm5, %v8012_v46, %v15218_v7  ;;  %v8040_v47 = vrot.slane %v7977_v26, 7  ;;  %v8033_v8 = vrot.slane %v7975_v3, 7  ;;  %v7919_v49 = vrot.slane %v15232_v43, 4  ;;  %vm15717_vm7 = vmmov %vm15715_vm5 }
 0xa5b   :  { %vm15716_vm1 = vcmask 1043459   ;;  %v8006_v18 = vsel %vm15717_vm7, %v8005_v53, %v15226_v60  ;;  %v7957_v41 = vmax.f32 %v7900_v6, %v11522_v42  ;;  %v7921_v50 = vsel %vm15718_vm15, %v7892_v62, %v7893_v51  ;;  %vm15720_vm13 = vmmov %vm15715_vm5 }
 0xa5c   :  { %v8014_v20 = vsel %vm15716_vm1, %v8012_v46, %v8013_v57  ;;  %vm15719_vm0 = vcmask 1045509   ;;  %v8041_v45 = vsel %vm15720_vm13, %v8040_v47, %v7976_v12  ;;  %vm15721_vm2 = vmmov %vm15716_vm1  ;;  %v7972_v56 = vrot.slane %v7956_v25, 2 }
 0xa5d   :  { %v8015_v30 = vsel %vm15719_vm0, %v8012_v46, %v8014_v20  ;;  %v8007_v0 = vsel %vm15721_vm2, %v8005_v53, %v8006_v18  ;;  %vm15722_vm9 = vmmov %vm15715_vm5  ;;  %vm15726_vm6 = vcmask 1047559   ;;  %v7973_v51 = vrot.slane %v7957_v41, 2 }
 0xa5e   :  { %v8034_v33 = vsel %vm15722_vm9, %v8033_v8, %v7974_v10  ;;  %vm15723_vm10 = vmmov %vm15716_vm1  ;;  %v8016_v32 = vsel %vm15726_vm6, %v8012_v46, %v8015_v30  ;;  %v7998_v34 = vrot.slane %v7957_v41, 7  ;;  %v7981_v37 = vrot.slane %v7957_v41, 4 }
 0xa5f   :  { %v8042_v48 = vsel %vm15723_vm10, %v8040_v47, %v8041_v45  ;;  %vm15724_vm14 = vmmov %vm15719_vm0  ;;  %v8026_v21 = vrot.slane %v7973_v51, 7  ;;  %v7980_v58 = vrot.slane %v7956_v25, 4  ;;  %v7989_v15 = vrot.slane %v7957_v41, 6 }
 0xa60   :  { %v8008_v36 = vsel %vm15724_vm14, %v8005_v53, %v8007_v0  ;;  %vm15725_vm3 = vmmov %vm15716_vm1  ;;  %v7999_v38 = vsel %vm15717_vm7, %v7998_v34, %v7956_v25  ;;  %vm15732_vm15 = vcmask 1045506   ;;  %v7988_v1 = vrot.slane %v7956_v25, 6 }
 0xa61   :  { %v8035_v61 = vsel %vm15725_vm3, %v8033_v8, %v8034_v33  ;;  %vm15727_vm8 = vmmov %vm15719_vm0  ;;  %v7922_v27 = vsel %vm15732_vm15, %v7921_v50, %v7920_v11  ;;  %v8000_v22 = vsel %vm15721_vm2, %v7998_v34, %v7999_v38  ;;  %v8054_v31 = vrot.slane %v7981_v37, 7 }
 0xa62   :  { %v8043_v55 = vsel %vm15727_vm8, %v8040_v47, %v8042_v48  ;;  %vm15728_vm12 = vmmov %vm15719_vm0  ;;  %vm15733_vm0 = vcmask 1047556   ;;  %v8082_v59 = vrot.slane %v7989_v15, 7  ;;  %v7923_v14 = vrot.slane %v7922_v27, 6 }
 0xa63   :  { %v8036_v62 = vsel %vm15728_vm12, %v8033_v8, %v8035_v61  ;;  %vm15729_vm4 = vmmov %vm15726_vm6  ;;  %v11527_v43 = vrot.slane %v7919_v49, 9  ;;  %v7984_v0 = vrot.slane %v15218_v7, 4  ;;  %v7985_v33 = vrot.slane %v15224_v39, 4 }
 0xa64   :  { %v8044_v23 = vsel %vm15729_vm4, %v8040_v47, %v8043_v55  ;;  %vm15730_vm5 = vmmov %vm15729_vm4  ;;  %v11528_v42 = vrot.slane %v7923_v14, 9 }
 0xa65   :  { %v8009_v44 = vsel %vm15730_vm5, %v8005_v53, %v8008_v36  ;;  %vm15731_vm1 = vmmov %vm15729_vm4  ;;  %v8156_v28 = vrot.slane %v8044_v23, 4 }
 0xa66   :  { %v8037_v24 = vsel %vm15731_vm1, %v8033_v8, %v8036_v62  ;;  %vm15734_vm13 = vmmov %vm15733_vm0  ;;  %v7962_v8 = vmax.f32 %v7919_v49, %v11527_v43  ;;  %v7963_v50 = vmax.f32 %v7923_v14, %v11528_v42 }
 0xa67   :  { %v8140_v52 = vrot.slane %v8037_v24, 4  ;;  %v8157_v54 = vsel %vm15733_vm0, %v8156_v28, %v8016_v32  ;;  %vm15735_vm9 = vmmov %vm15717_vm7  ;;  %v7993_v24 = vrot.slane %v15224_v39, 6  ;;  %v7992_v39 = vrot.slane %v15218_v7, 6 }
 0xa68   :  { %v8027_v2 = vsel %vm15735_vm9, %v8026_v21, %v7972_v56  ;;  %v15267_v5 = vperm.slane %v8157_v54, %v13678_v17  ;;  %vm15736_vm10 = vmmov %vm15721_vm2  ;;  %v7978_v45 = vrot.slane %v7962_v8, 2  ;;  %v7979_v49 = vrot.slane %v7963_v50, 2 }
 0xa69   :  { %v8141_v29 = vsel %vm15734_vm13, %v8140_v52, %v8009_v44  ;;  %v8028_v4 = vsel %vm15736_vm10, %v8026_v21, %v8027_v2  ;;  %vm15737_vm14 = vmmov %vm15727_vm8  ;;  %v8019_v36 = vrot.slane %v7963_v50, 7  ;;  %v7987_v61 = vrot.slane %v7963_v50, 4 }
 0xa6a   :  { %v15270_v40 = vperm.slane %v8141_v29, %v13678_v17  ;;  %v8001_v13 = vsel %vm15737_vm14, %v7998_v34, %v8000_v22  ;;  %vm15738_vm3 = vmmov %vm15727_vm8  ;;  %8220 = vrot.lane.b32.xlu0 %v15267_v5, %s12632_s27  ;;  %v8162_v9 = vrot.slane %v15267_v5, 4  ;;  %v7986_v55 = vrot.slane %v7962_v8, 4 }
 0xa6b   :  { %v8029_v16 = vsel %vm15738_vm3, %v8026_v21, %v8028_v4  ;;  %vm15739_vm6 = vmmov %vm15731_vm1  ;;  %v7995_v62 = vrot.slane %v7963_v50, 6  ;;  %v8047_v23 = vrot.slane %v7979_v49, 7  ;;  %v8075_v44 = vrot.slane %v7987_v61, 7 }
 0xa6c   :  { %8212 = vrot.lane.b32.xlu2 %v15270_v40, %s12632_s27  ;;  %v8030_v63 = vsel %vm15739_vm6, %v8026_v21, %v8029_v16  ;;  %vm15740_vm8 = vmmov %vm15717_vm7  ;;  %v8146_v57 = vrot.slane %v15270_v40, 4  ;;  %v8068_v21 = vrot.slane %v7985_v33, 7  ;;  %v7994_v38 = vrot.slane %v7962_v8, 6 }
 0xa6d   :  { %v8124_v12 = vrot.slane %v8030_v63, 4  ;;  %v8055_v6 = vsel %vm15740_vm8, %v8054_v31, %v7980_v58  ;;  %vm15741_vm12 = vmmov %vm15717_vm7  ;;  %v8103_v52 = vrot.slane %v7995_v62, 7  ;;  %v8096_v15 = vrot.slane %v7993_v24, 7 }
 0xa6e   :  { %v8083_v35 = vsel %vm15741_vm12, %v8082_v59, %v7988_v1  ;;  %vm15742_vm4 = vmmov %vm15731_vm1 }
 0xa6f   :  { %v8002_v26 = vsel %vm15742_vm4, %v7998_v34, %v8001_v13  ;;  %vm15743_vm5 = vmmov %vm15721_vm2 }
 0xa70   :  { %v8056_v46 = vsel %vm15743_vm5, %v8054_v31, %v8055_v6  ;;  %vm15744_vm1 = vmmov %vm15721_vm2 }
 0xa71   :  { %v8084_v3 = vsel %vm15744_vm1, %v8082_v59, %v8083_v35  ;;  %vm15745_vm7 = vmmov %vm15733_vm0 }
 0xa72   :  { %v8125_v11 = vsel %vm15745_vm7, %v8124_v12, %v8002_v26  ;;  %vm15746_vm15 = vmmov %vm15738_vm3 }
 0xa73   :  { %v8057_v10 = vsel %vm15746_vm15, %v8054_v31, %v8056_v46  ;;  %vm15747_vm0 = vmmov %vm15738_vm3  ;;  %v15290_v25 = vperm.slane %v8125_v11, %v13678_v17  ;;  %v7983_v11 = vrot.slane %v15228_v19, 4 }
 0xa74   :  { %v8085_v53 = vsel %vm15747_vm0, %v8082_v59, %v8084_v3  ;;  %vm15748_vm13 = vmmov %vm15742_vm4 }
 0xa75   :  { %v8086_v47 = vsel %vm15748_vm13, %v8082_v59, %v8085_v53  ;;  %vm15749_vm2 = vmmov %vm15745_vm7  ;;  %8204 = vrot.lane.b32.xlu1 %v15290_v25, %s12632_s27  ;;  %v8130_v30 = vrot.slane %v15290_v25, 4 }
 0xa76   :  { %v15295_v20 = vsel %vm15749_vm2, 0.0, %v8162_v9  ;;  %vm15750_vm9 = vmmov %vm15742_vm4  ;;  %v8132_v41 = vrot.slane %v8086_v47, 4 }
 0xa77   :  { %v8058_v18 = vsel %vm15750_vm9, %v8054_v31, %v8057_v10  ;;  %vm15751_vm10 = vmmov %vm15749_vm2  ;;  %8224 = vrot.lane.b32.xlu2 %v15295_v20, %s12632_s27 }
 0xa78   :  { %v8133_v48 = vsel %vm15751_vm10, %v8132_v41, %v8058_v18  ;;  %vm15752_vm14 = vmmov %vm15749_vm2  ;;  %v7982_v18 = vrot.slane %v15226_v60, 4  ;;  %v8061_v41 = vrot.slane %v7983_v11, 7 }
 0xa79   :  { %v15307_v56 = vsel %vm15752_vm14, 0.0, %v8130_v30  ;;  %v15310_v32 = vperm.slane %v8133_v48, %v13678_v17  ;;  %vm15753_vm3 = vmmov %vm15740_vm8  ;;  %v7990_v48 = vrot.slane %v15226_v60, 6 }
 0xa7a   :  { %8208 = vrot.lane.b32.xlu0 %v15307_v56, %s12632_s27  ;;  %v8020_v51 = vsel %vm15753_vm3, %v8019_v36, %v7962_v8  ;;  %vm15754_vm6 = vmmov %vm15744_vm1 }
 0xa7b   :  { %v8138_v34 = vrot.slane %v15310_v32, 4  ;;  %v8021_v28 = vsel %vm15754_vm6, %v8019_v36, %v8020_v51  ;;  %vm15755_vm8 = vmmov %vm15753_vm3 }
 0xa7c   :  { %v8048_v37 = vsel %vm15755_vm8, %v8047_v23, %v7978_v45  ;;  %vm15756_vm12 = vmmov %vm15753_vm3 }
 0xa7d   :  { %v8076_v58 = vsel %vm15756_vm12, %v8075_v44, %v7986_v55  ;;  %vm15757_vm4 = vmmov %vm15749_vm2  ;;  %v15333_v13 = vsel %vm15749_vm2, 0.0, %v8138_v34 }
 0xa7e   :  { %v15321_v27 = vsel %vm15757_vm4, 0.0, %v8146_v57  ;;  %vm15758_vm5 = vmmov %vm15744_vm1  ;;  %v8077_v29 = vsel %vm15744_vm1, %v8075_v44, %v8076_v58  ;;  %v7991_v57 = vrot.slane %v15228_v19, 6 }
 0xa7f   :  { %v8049_v54 = vsel %vm15758_vm5, %v8047_v23, %v8048_v37  ;;  %vm15759_vm7 = vmmov %vm15747_vm0  ;;  %8216 = vrot.lane.b32.xlu1 %v15321_v27, %s12632_s27  ;;  %8210 = vrot.lane.b32.xlu2 %v15333_v13, %s12632_s27 }
 0xa80   :  { %v8022_v22 = vsel %vm15759_vm7, %v8019_v36, %v8021_v28  ;;  %vm15760_vm15 = vmmov %vm15747_vm0 }
 0xa81   :  { %v8050_v2 = vsel %vm15760_vm15, %v8047_v23, %v8049_v54  ;;  %vm15761_vm0 = vmmov %vm15753_vm3 }
 0xa82   :  { %v8104_v4 = vsel %vm15761_vm0, %v8103_v52, %v7994_v38  ;;  %vm15762_vm13 = vmmov %vm15761_vm0  ;;  %v8051_v16 = vsel %vm15750_vm9, %v8047_v23, %v8050_v2 }
 0xa83   :  { %v8069_v1 = vsel %vm15762_vm13, %v8068_v21, %v7984_v0  ;;  %vm15763_vm10 = vmmov %vm15744_vm1  ;;  %v8172_v59 = vrot.slane %v8051_v16, 4  ;;  %v8089_v0 = vrot.slane %v7991_v57, 7 }
 0xa84   :  { %v8105_v31 = vsel %vm15763_vm10, %v8103_v52, %v8104_v4  ;;  %vm15764_vm14 = vmmov %vm15744_vm1 }
 0xa85   :  { %v8070_v7 = vsel %vm15764_vm14, %v8068_v21, %v8069_v1  ;;  %vm15765_vm3 = vmmov %vm15759_vm7 }
 0xa86   :  { %v8078_v63 = vsel %vm15765_vm3, %v8075_v44, %v8077_v29  ;;  %vm15766_vm6 = vmmov %vm15765_vm3 }
 0xa87   :  { %v8106_v9 = vsel %vm15766_vm6, %v8103_v52, %v8105_v31  ;;  %vm15767_vm8 = vmmov %vm15761_vm0 }
 0xa88   :  { %v8097_v14 = vsel %vm15767_vm8, %v8096_v15, %v7992_v39  ;;  %vm15768_vm12 = vmmov %vm15750_vm9  ;;  %v8090_v62 = vsel %vm15767_vm8, %v8089_v0, %v7990_v48 }
 0xa89   :  { %v8023_v12 = vsel %vm15768_vm12, %v8019_v36, %v8022_v22  ;;  %vm15769_vm4 = vmmov %vm15750_vm9  ;;  %v8098_v43 = vsel %vm15744_vm1, %v8096_v15, %v8097_v14 }
 0xa8a   :  { %v8107_v6 = vsel %vm15769_vm4, %v8103_v52, %v8106_v9  ;;  %vm15770_vm5 = vmmov %vm15765_vm3 }
 0xa8b   :  { %v8071_v35 = vsel %vm15770_vm5, %v8068_v21, %v8070_v7  ;;  %vm15771_vm7 = vmmov %vm15749_vm2  ;;  %v8180_v46 = vrot.slane %v8107_v6, 4 }
 0xa8c   :  { %v8173_v26 = vsel %vm15771_vm7, %v8172_v59, %v8023_v12  ;;  %vm15772_vm15 = vmmov %vm15765_vm3 }
 0xa8d   :  { %v8099_v3 = vsel %vm15772_vm15, %v8096_v15, %v8098_v43  ;;  %v15351_v10 = vperm.slane %v8173_v26, %v13678_v17  ;;  %vm15773_vm0 = vmmov %vm15769_vm4 }
 0xa8e   :  { %v8079_v53 = vsel %vm15773_vm0, %v8075_v44, %v8078_v63  ;;  %vm15774_vm13 = vmmov %vm15773_vm0 }
 0xa8f   :  { %v8100_v42 = vsel %vm15774_vm13, %v8096_v15, %v8099_v3  ;;  %v8181_v47 = vsel %vm15749_vm2, %v8180_v46, %v8079_v53  ;;  %v8178_v50 = vrot.slane %v15351_v10, 4  ;;  %vm15775_vm9 = vmmov %vm15773_vm0  ;;  %8228 = vrot.lane.b32.xlu1 %v15351_v10, %s12632_s27 }
 0xa90   :  { %v8164_v8 = vrot.slane %v8100_v42, 4  ;;  %v15360_v30 = vperm.slane %v8181_v47, %v13678_v17  ;;  %v8072_v45 = vsel %vm15775_vm9, %v8068_v21, %v8071_v35  ;;  %vm15776_vm10 = vmmov %vm15749_vm2 }
 0xa91   :  { %vm15777_vm14 = vmmov %vm15767_vm8 }
 0xa92   :  { %v8165_v33 = vsel %vm15776_vm10, %v8164_v8, %v8072_v45  ;;  %v8062_v19 = vsel %vm15777_vm14, %v8061_v41, %v7982_v18  ;;  %vm15778_vm3 = vmmov %vm15749_vm2  ;;  %v8186_v36 = vrot.slane %v15360_v30, 4 }
 0xa93   :  { %v8179_v49 = vsel %vm15778_vm3, 0.0, %v8178_v50  ;;  %v15371_v61 = vperm.slane %v8165_v33, %v13678_v17  ;;  %vm15779_vm6 = vmmov %vm15744_vm1 }
 0xa94   :  { %v8063_v55 = vsel %vm15779_vm6, %v8061_v41, %v8062_v19  ;;  %8232 = vrot.lane.b32.xlu0 %v8179_v49, %s12632_s27  ;;  %vm15780_vm12 = vmmov %vm15749_vm2 }
 0xa95   :  { %v15377_v60 = vsel %vm15780_vm12, 0.0, %v8186_v36  ;;  %vm15781_vm4 = vmmov %vm15744_vm1  ;;  %v8170_v23 = vrot.slane %v15371_v61, 4  ;;  %v8064_v44 = vsel %vm15770_vm5, %v8061_v41, %v8063_v55 }
 0xa96   :  { %v8091_v51 = vsel %vm15781_vm4, %v8089_v0, %v8090_v62  ;;  %8234 = vrot.lane.b32.xlu2 %v15377_v60, %s12632_s27  ;;  %vm15782_vm1 = vmmov %vm15770_vm5 }
 0xa97   :  { %v8092_v24 = vsel %vm15782_vm1, %v8089_v0, %v8091_v51  ;;  %vm15783_vm7 = vmmov %vm15773_vm0 }
 0xa98   :  { %v8093_v34 = vsel %vm15783_vm7, %v8089_v0, %v8092_v24  ;;  %vm15784_vm15 = vmmov %vm15773_vm0 }
 0xa99   :  { %v8148_v28 = vrot.slane %v8093_v34, 4  ;;  %v8065_v52 = vsel %vm15784_vm15, %v8061_v41, %v8064_v44  ;;  %vm15785_vm0 = vmmov %vm15749_vm2 }
 0xa9a   :  { %v15388_v21 = vsel %vm15785_vm0, 0.0, %v8170_v23  ;;  %vm15786_vm13 = vmmov %vm15785_vm0 }
 0xa9b   :  { %v8149_v37 = vsel %vm15786_vm13, %v8148_v28, %v8065_v52  ;;  %8226 = vrot.lane.b32.xlu1 %v15388_v21, %s12632_s27  ;;  %vm15787_vm2 = vmmov %vm15785_vm0  ;;  %v12377_v52 = vld [vmem:[#allocation9 + $0x38] sm:$0xff] }
 0xa9c   :  { %v15394_v38 = vperm.slane %v8149_v37, %v13678_v17  ;;  %8206 = vrot.lane.b32.xlu0 %v15310_v32, %s12632_s27  ;;  %vm15788_vm9 = vmmov %vm15785_vm0  ;;  %v12393_v37 = vld [vmem:[#allocation9 + $0xb8] sm:$0xff]  ;;  %8987 = vmatpush.bf16.msra.mxu0 %v12377_v52  ;;  %v12394_v52 = vld [vmem:[#allocation9 + $0xc0] sm:$0xff] }
 0xa9d   :  { %vm15789_vm10 = vmmov %vm15785_vm0  ;;  %9013 = vmatpush.bf16.msra.mxu2 %v12393_v37  ;;  %v12433_v37 = vld [vmem:[#allocation9 + $0x1f8] sm:$0xff] }
 0xa9e   :  { %8222 = vrot.lane.b32.xlu2 %v15371_v61, %s12632_s27  ;;  %v8154_v58 = vrot.slane %v15394_v38, 4  ;;  %vm15790_vm14 = vmmov %vm15785_vm0 }
 0xa9f   :  { %vm15791_vm3 = vmmov %vm15785_vm0 }
 0xaa0   :  { %v15404_v15 = vsel %vm15787_vm2, 0.0, %v8154_v58  ;;  %vm15792_vm6 = vmmov %vm15785_vm0 }
 0xaa1   :  { %vm15793_vm8 = vmmov %vm15785_vm0 }
 0xaa2   :  { %vm15794_vm12 = vmmov %vm15785_vm0 }
 0xaa3   :  { %8214 = vrot.lane.b32.xlu1 %v15394_v38, %s12632_s27  ;;  %vm15795_vm4 = vmmov %vm15785_vm0 }
 0xaa4   :  { %8218 = vrot.lane.b32.xlu0 %v15404_v15, %s12632_s27  ;;  %vm15796_vm5 = vmmov %vm15785_vm0 }
 0xaa5   :  { %vm15797_vm1 = vmmov %vm15785_vm0 }
 0xaa6   :  { %vm15798_vm7 = vmmov %vm15785_vm0 }
 0xaa7   :  { %vm15799_vm15 = vmmov %vm15785_vm0 }
 0xaa8   :  { %vm15800_vm13 = vmmov %vm15785_vm0 }
 0xaa9   :  { %vm15801_vm2 = vmmov %vm15785_vm0 }
 0xaac   :  { %8230 = vrot.lane.b32.xlu0 %v15360_v30, %s12632_s27 }
 0xac6   :  { %v8213_v54 = vpop.permute.xlu2 %8212 }
 0xad1   :  { %v8225_v29 = vpop.permute.xlu2 %8224 }
 0xad2   :  { %v8262_v39 = vmax.f32 %v15295_v20, %v8225_v29 }
 0xad4   :  { %v8300_v2 = vrot.slane %v8262_v39, 4 }
 0xad9   :  { %v8211_v43 = vpop.permute.xlu2 %8210 }
 0xada   :  { %v8255_v41 = vmax.f32 %v15333_v13, %v8211_v43  ;;  %v12374_v43 = vld [vmem:[#allocation9 + $0x20] sm:$0xff] }
 0xadc   :  { %v8221_v22 = vpop.permute.xlu0 %8220  ;;  %v8284_v33 = vrot.slane %v8255_v41, 4  ;;  %v12372_v41 = vld [vmem:[#allocation9 + $0x10] sm:$0xff] }
 0xadd   :  { %v8260_v4 = vmax.f32 %v15267_v5, %v8221_v22  ;;  %v8256_v5 = vmax.f32 %v15270_v40, %v8213_v54  ;;  %v12401_v54 = vld [vmem:[#allocation9 + $0xf8] sm:$0xff]  ;;  %v12376_v22 = vld [vmem:[#allocation9 + $0x30] sm:$0xff] }
 0xade   :  { %9026 = vmatpush.bf16.msra.mxu3 %v12401_v54  ;;  %8988 = vmatpush.bf16.msra.mxu0 %v12376_v22  ;;  %v12416_v54 = vld [vmem:[#allocation9 + $0x170] sm:$0xff]  ;;  %v12407_v22 = vld [vmem:[#allocation9 + $0x128] sm:$0xff] }
 0xadf   :  { %v8301_v1 = vsel %vm15788_vm9, %v8300_v2, %v8260_v4  ;;  %v12384_v2 = vld [vmem:[#allocation9 + $0x70] sm:$0xff]  ;;  %vm15802_vm9 = vmmov %vm15785_vm0 }
 0xae0   :  { %v8305_v16 = vperm.slane %v8301_v1, %v13678_v17  ;;  %v12400_v1 = vld [vmem:[#allocation9 + $0xf0] sm:$0xff] }
 0xae2   :  { %8341 = vst [vmem:[#allocation1 + $0x20] ss:$4 sm:$0xff] %v8305_v16  ;;  %v8306_v48 = vrot.slane %v8305_v16, 4  ;;  %9027 = vmatpush.bf16.msra.mxu3 %v12400_v1  ;;  %v12406_v1 = vld [vmem:[#allocation9 + $0x120] sm:$0xff] }
 0xae4   :  { %v8307_v55 = vsel %vm15795_vm4, 0.0, %v8306_v48 }
 0xae7   :  { %v8205_v31 = vpop.permute.xlu1 %8204 }
 0xae8   :  { %v8252_v63 = vmax.f32 %v15290_v25, %v8205_v31 }
 0xaec   :  { %v8209_v7 = vpop.permute.xlu0 %8208 }
 0xaed   :  { %v8254_v59 = vmax.f32 %v15307_v56, %v8209_v7 }
 0xaef   :  { %v8268_v9 = vrot.slane %v8254_v59, 4  ;;  %v12383_v59 = vld [vmem:[#allocation9 + $0x68] sm:$0xff] }
 0xaf0   :  { %v8235_v57 = vpop.permute.xlu2 %8234 }
 0xaf1   :  { %v8217_v14 = vpop.permute.xlu1 %8216  ;;  %v8269_v12 = vsel %vm15789_vm10, %v8268_v9, %v8252_v63  ;;  %v8267_v16 = vmax.f32 %v15377_v60, %v8235_v57  ;;  %v12389_v57 = vld [vmem:[#allocation9 + $0x98] sm:$0xff]  ;;  %vm15803_vm10 = vmmov %vm15785_vm0 }
 0xaf2   :  { %v8258_v20 = vmax.f32 %v15321_v27, %v8217_v14  ;;  %v8273_v6 = vperm.slane %v8269_v12, %v13678_v17  ;;  %v12391_v14 = vld [vmem:[#allocation9 + $0xa8] sm:$0xff] }
 0xaf3   :  { %v8324_v12 = vrot.slane %v8267_v16, 4  ;;  %v12414_v16 = vld [vmem:[#allocation9 + $0x160] sm:$0xff] }
 0xaf4   :  { %v8276_v35 = vrot.slane %v8258_v20, 4  ;;  %8336 = vst [vmem:[#allocation1] ss:$4 sm:$0xff] %v8273_v6  ;;  %v8274_v11 = vrot.slane %v8273_v6, 4  ;;  %v12399_v6 = vld [vmem:[#allocation9 + $0xe8] sm:$0xff] }
 0xaf5   :  { %9028 = vmatpush.bf16.msra.mxu3 %v12399_v6  ;;  %v12429_v6 = vld [vmem:[#allocation9 + $0x1d8] sm:$0xff] }
 0xaf6   :  { %v8277_v26 = vsel %vm15790_vm14, %v8276_v35, %v8256_v5  ;;  %v8275_v40 = vsel %vm15792_vm6, 0.0, %v8274_v11  ;;  %vm15804_vm14 = vmmov %vm15785_vm0 }
 0xaf7   :  { %v8281_v46 = vperm.slane %v8277_v26, %v13678_v17  ;;  %vm15807_vm6 = vmmov %vm15785_vm0 }
 0xaf8   :  { %v8223_v62 = vpop.permute.xlu2 %8222 }
 0xaf9   :  { %8338 = vst [vmem:[#allocation1 + $0x1] ss:$4 sm:$0xff] %v8281_v46  ;;  %v8282_v27 = vrot.slane %v8281_v46, 4  ;;  %v8261_v58 = vmax.f32 %v15371_v61, %v8223_v62  ;;  %v12379_v62 = vld [vmem:[#allocation9 + $0x48] sm:$0xff] }
 0xafb   :  { %v8283_v45 = vsel %vm15793_vm8, 0.0, %v8282_v27  ;;  %v12381_v27 = vld [vmem:[#allocation9 + $0x58] sm:$0xff]  ;;  %vm15808_vm8 = vmmov %vm15785_vm0 }
 0xb00   :  { %v15426_v18 = vld.sshfl [vmem:[#allocation1] sm:$0xff pattern:$0x73625140] }
 0xb01   :  { %v8229_v56 = vpop.permute.xlu1 %8228  ;;  %8351 = vst [vmem:[#allocation1] ss:$4 sm:$0xff] %v8275_v40  ;;  %v12397_v40 = vld [vmem:[#allocation9 + $0xd8] sm:$0xff] }
 0xb02   :  { %v8264_v53 = vmax.f32 %v15351_v10, %v8229_v56  ;;  %8353 = vst [vmem:[#allocation1 + $0x1] ss:$4 sm:$0xff] %v8283_v45  ;;  %v12382_v56 = vld [vmem:[#allocation9 + $0x60] sm:$0xff]  ;;  %v12388_v45 = vld [vmem:[#allocation9 + $0x90] sm:$0xff] }
 0xb06   :  { %v8233_v25 = vpop.permute.xlu0 %8232 }
 0xb07   :  { %v8266_v3 = vmax.f32 %v8179_v49, %v8233_v25  ;;  %v12390_v25 = vld [vmem:[#allocation9 + $0xa0] sm:$0xff] }
 0xb09   :  { %v8308_v42 = vrot.slane %v8266_v3, 4  ;;  %v8354_v34 = vld.sshfl [vmem:[#allocation1] sm:$0xff pattern:$0x73625140]  ;;  %v12398_v3 = vld [vmem:[#allocation9 + $0xe0] sm:$0xff] }
 0xb0a   :  { %9029 = vmatpush.bf16.msra.mxu3 %v12398_v3 }
 0xb0b   :  { %v8309_v47 = vsel %vm15791_vm3, %v8308_v42, %v8264_v53  ;;  %v12373_v53 = vld [vmem:[#allocation9 + $0x18] sm:$0xff]  ;;  %vm15806_vm3 = vmmov %vm15785_vm0 }
 0xb0c   :  { %v8313_v8 = vperm.slane %v8309_v47, %v13678_v17 }
 0xb0d   :  { %v8227_v50 = vpop.permute.xlu1 %8226 }
 0xb0e   :  { %8343 = vst [vmem:[#allocation1 + $0x21] ss:$4 sm:$0xff] %v8313_v8  ;;  %v8207_v0 = vpop.permute.xlu0 %8206  ;;  %v8314_v19 = vrot.slane %v8313_v8, 4  ;;  %v8263_v49 = vmax.f32 %v15388_v21, %v8227_v50  ;;  %v12385_v21 = vld [vmem:[#allocation9 + $0x78] sm:$0xff]  ;;  %v12380_v50 = vld [vmem:[#allocation9 + $0x50] sm:$0xff]  ;;  %9030 = vmatpush.bf16.msra.mxu3 %v12397_v40 }
 0xb0f   :  { %v8253_v10 = vmax.f32 %v15310_v32, %v8207_v0  ;;  %9000 = vmatpush.bf16.msra.mxu1 %v12385_v21  ;;  %v12425_v21 = vld [vmem:[#allocation9 + $0x1b8] sm:$0xff] }
 0xb10   :  { %v8315_v13 = vsel %vm15796_vm5, 0.0, %v8314_v19  ;;  %v8316_v23 = vrot.slane %v8263_v49, 4 }
 0xb11   :  { %v8285_v36 = vsel %vm15794_vm12, %v8284_v33, %v8253_v10  ;;  %v12396_v33 = vld [vmem:[#allocation9 + $0xd0] sm:$0xff]  ;;  %vm9092_vm12 = vcmask 254976  }
 0xb12   :  { %v8289_v44 = vperm.slane %v8285_v36, %v13678_v17  ;;  %v8317_v4 = vsel %vm15797_vm1, %v8316_v23, %v8261_v58  ;;  %9031 = vmatpush.bf16.msra.mxu3 %v12396_v33  ;;  %v12395_v23 = vld [vmem:[#allocation9 + $0xc8] sm:$0xff]  ;;  %v12408_v58 = vld [vmem:[#allocation9 + $0x130] sm:$0xff] }
 0xb13   :  { %v8321_v7 = vperm.slane %v8317_v4, %v13678_v17  ;;  %9001 = vmatpush.bf16.msra.mxu1 %v12384_v2  ;;  %v12415_v2 = vld [vmem:[#allocation9 + $0x168] sm:$0xff] }
 0xb14   :  { %8370 = vst [vmem:[#allocation1] ss:$4 sm:$0xff] %v8289_v44  ;;  %v8290_v5 = vrot.slane %v8289_v44, 4  ;;  %v12370_v44 = vld [vmem:[#allocation9] sm:$0xff]  ;;  %v12423_v4 = vld [vmem:[#allocation9 + $0x1a8] sm:$0xff] }
 0xb15   :  { %v15435_v51 = vld.sshfl [vmem:[#allocation1 + $0x20] sm:$0xff pattern:$0x73625140]  ;;  %v8215_v24 = vpop.permute.xlu1 %8214  ;;  %v8322_v47 = vrot.slane %v8321_v7, 4 }
 0xb16   :  { %v8219_v32 = vpop.permute.xlu0 %8218  ;;  %8356 = vst [vmem:[#allocation1 + $0x20] ss:$4 sm:$0xff] %v8307_v55  ;;  %v8257_v29 = vmax.f32 %v15394_v38, %v8215_v24  ;;  %v12375_v38 = vld [vmem:[#allocation9 + $0x28] sm:$0xff]  ;;  %v12378_v24 = vld [vmem:[#allocation9 + $0x40] sm:$0xff]  ;;  %9032 = vmatpush.bf16.msra.mxu3 %v12395_v23 }
 0xb17   :  { %v8259_v28 = vmax.f32 %v15404_v15, %v8219_v32  ;;  %8358 = vst [vmem:[#allocation1 + $0x21] ss:$4 sm:$0xff] %v8315_v13  ;;  %v12392_v15 = vld [vmem:[#allocation9 + $0xb0] sm:$0xff]  ;;  %8989 = vmatpush.bf16.msra.mxu0 %v12375_v38  ;;  %9002 = vmatpush.bf16.msra.mxu1 %v12383_v59  ;;  %v8323_v0 = vsel %vm15801_vm2, 0.0, %v8322_v47  ;;  %v12371_v55 = vld [vmem:[#allocation9 + $0x8] sm:$0xff]  ;;  %v12409_v32 = vld [vmem:[#allocation9 + $0x138] sm:$0xff] }
 0xb18   :  { %9014 = vmatpush.bf16.msra.mxu2 %v12392_v15  ;;  %v12387_v13 = vld [vmem:[#allocation9 + $0x88] sm:$0xff]  ;;  %v12405_v38 = vld [vmem:[#allocation9 + $0x118] sm:$0xff] }
 0xb19   :  { %v8292_v39 = vrot.slane %v8259_v28, 4  ;;  %v12386_v28 = vld [vmem:[#allocation9 + $0x80] sm:$0xff]  ;;  %v12431_v15 = vld [vmem:[#allocation9 + $0x1e8] sm:$0xff]  ;;  %v12413_v59 = vld [vmem:[#allocation9 + $0x158] sm:$0xff] }
 0xb1a   :  { %9033 = vmatpush.bf16.msra.mxu3 %v12394_v52  ;;  %v12411_v47 = vld [vmem:[#allocation9 + $0x148] sm:$0xff] }
 0xb1b   :  { %v8293_v31 = vsel %vm15798_vm7, %v8292_v39, %v8257_v29  ;;  %8990 = vmatpush.bf16.msra.mxu0 %v12374_v43  ;;  %9003 = vmatpush.bf16.msra.mxu1 %v12382_v56  ;;  %v12424_v29 = vld [vmem:[#allocation9 + $0x1b0] sm:$0xff] }
 0xb1c   :  { %v8297_v61 = vperm.slane %v8293_v31, %v13678_v17  ;;  %9015 = vmatpush.bf16.msra.mxu2 %v12391_v14  ;;  %v12432_v39 = vld [vmem:[#allocation9 + $0x1f0] sm:$0xff]  ;;  %v12422_v31 = vld [vmem:[#allocation9 + $0x1a0] sm:$0xff] }
 0xb1e   :  { %v8231_v63 = vpop.permute.xlu0 %8230  ;;  %v8359_v9 = vld.sshfl [vmem:[#allocation1 + $0x20] sm:$0xff pattern:$0x73625140]  ;;  %8372 = vst [vmem:[#allocation1 + $0x1] ss:$4 sm:$0xff] %v8297_v61  ;;  %v8298_v26 = vrot.slane %v8297_v61, 4  ;;  %9078 = vmatpush.bf16.msrb.mxu3 %v12433_v37 }
 0xb1f   :  { %v8265_v20 = vmax.f32 %v15360_v30, %v8231_v63  ;;  %v12478_v60 = vpack.i.bf16 %v8359_v9, %v8354_v34  ;;  %8375 = vst [vmem:[#allocation1 + $0x20] ss:$4 sm:$0xff] %v8321_v7  ;;  %v8291_v30 = vsel %vm15785_vm0, 0.0, %v8290_v5  ;;  %8991 = vmatpush.bf16.msra.mxu0 %v12373_v53  ;;  %9004 = vmatpush.bf16.msra.mxu1 %v12381_v27  ;;  %v12417_v34 = vld [vmem:[#allocation9 + $0x178] sm:$0xff]  ;;  %v12430_v61 = vld [vmem:[#allocation9 + $0x1e0] sm:$0xff]  ;;  %v12404_v5 = vld [vmem:[#allocation9 + $0x110] sm:$0xff] }
 0xb20   :  { %v8299_v42 = vsel %vm15800_vm13, 0.0, %v8298_v26  ;;  %9016 = vmatpush.bf16.msra.mxu2 %v12390_v25  ;;  %v12428_v53 = vld [vmem:[#allocation9 + $0x1d0] sm:$0xff] }
 0xb21   :  { %v8325_v35 = vsel %vm15799_vm15, %v8324_v12, %v8265_v20  ;;  %12479 = vrot.lane.b32.xlu1 %v12478_v60, %s12632_s27  ;;  %v12421_v60 = vld [vmem:[#allocation9 + $0x198] sm:$0xff] }
 0xb22   :  { %v8329_v46 = vperm.slane %v8325_v35, %v13678_v17  ;;  %9079 = vmatpush.bf16.msrb.mxu3 %v12432_v39  ;;  %v12412_v35 = vld [vmem:[#allocation9 + $0x150] sm:$0xff] }
 0xb23   :  { %8992 = vmatpush.bf16.msra.mxu0 %v12372_v41  ;;  %9005 = vmatpush.bf16.msra.mxu1 %v12380_v50  ;;  %v12427_v41 = vld [vmem:[#allocation9 + $0x1c8] sm:$0xff]  ;;  %v12402_v50 = vld [vmem:[#allocation9 + $0x100] sm:$0xff] }
 0xb24   :  { %8377 = vst [vmem:[#allocation1 + $0x21] ss:$4 sm:$0xff] %v8329_v46  ;;  %v8330_v8 = vrot.slane %v8329_v46, 4  ;;  %9017 = vmatpush.bf16.msra.mxu2 %v12389_v57  ;;  %v12403_v57 = vld [vmem:[#allocation9 + $0x108] sm:$0xff] }
 0xb25   :  { %v15451_v11 = vld.sshfl [vmem:[#allocation1] sm:$0xff pattern:$0x73625140] }
 0xb26   :  { %8385 = vst [vmem:[#allocation1] ss:$4 sm:$0xff] %v8291_v30  ;;  %v8331_v48 = vsel %vm15802_vm9, 0.0, %v8330_v8  ;;  %9080 = vmatpush.bf16.msrb.mxu3 %v12431_v15  ;;  %v12420_v30 = vld [vmem:[#allocation9 + $0x190] sm:$0xff]  ;;  %v12419_v8 = vld [vmem:[#allocation9 + $0x188] sm:$0xff] }
 0xb27   :  { %8387 = vst [vmem:[#allocation1 + $0x1] ss:$4 sm:$0xff] %v8299_v42  ;;  %8993 = vmatpush.bf16.msra.mxu0 %v12371_v55  ;;  %9006 = vmatpush.bf16.msra.mxu1 %v12379_v62  ;;  %v12426_v55 = vld [vmem:[#allocation9 + $0x1c0] sm:$0xff] }
 0xb28   :  { %9018 = vmatpush.bf16.msra.mxu2 %v12388_v45  ;;  %v12410_v45 = vld [vmem:[#allocation9 + $0x140] sm:$0xff] }
 0xb2a   :  { %9081 = vmatpush.bf16.msrb.mxu3 %v12430_v61 }
 0xb2b   :  { %v15455_v10 = vld.sshfl [vmem:[#allocation1 + $0x20] sm:$0xff pattern:$0x73625140]  ;;  %8994 = vmatpush.bf16.msra.mxu0 %v12370_v44  ;;  %9007 = vmatpush.bf16.msra.mxu1 %v12378_v24 }
 0xb2c   :  { %8390 = vst [vmem:[#allocation1 + $0x20] ss:$4 sm:$0xff] %v8323_v0  ;;  %9019 = vmatpush.bf16.msra.mxu2 %v12387_v13 }
 0xb2d   :  { %8392 = vst [vmem:[#allocation1 + $0x21] ss:$4 sm:$0xff] %v8331_v48 }
 0xb2e   :  { %v8388_v19 = vld.sshfl [vmem:[#allocation1] sm:$0xff pattern:$0x73625140]  ;;  %9082 = vmatpush.bf16.msrb.mxu3 %v12429_v6 }
 0xb2f   :  { %9039 = vmatpush.bf16.msrb.mxu0 %v12409_v32  ;;  %9052 = vmatpush.bf16.msrb.mxu1 %v12417_v34 }
 0xb30   :  { %9020 = vmatpush.bf16.msra.mxu2 %v12386_v28 }
 0xb32   :  { %9083 = vmatpush.bf16.msrb.mxu3 %v12428_v53 }
 0xb33   :  { %9040 = vmatpush.bf16.msrb.mxu0 %v12408_v58  ;;  %9053 = vmatpush.bf16.msrb.mxu1 %v12416_v54 }
 0xb34   :  { %v8393_v49 = vld.sshfl [vmem:[#allocation1 + $0x20] sm:$0xff pattern:$0x73625140]  ;;  %9065 = vmatpush.bf16.msrb.mxu2 %v12425_v21 }
 0xb35   :  { %v12483_v36 = vpack.i.bf16 %v8393_v49, %v8388_v19 }
 0xb36   :  { %9084 = vmatpush.bf16.msrb.mxu3 %v12427_v41 }
 0xb37   :  { %12484 = vrot.lane.b32.xlu2 %v12483_v36, %s12632_s27  ;;  %9041 = vmatpush.bf16.msrb.mxu0 %v12407_v22  ;;  %v12418_v36 = vld [vmem:[#allocation9 + $0x180] sm:$0xff] }
 0xb38   :  { %9066 = vmatpush.bf16.msrb.mxu2 %v12424_v29  ;;  %9054 = vmatpush.bf16.msrb.mxu1 %v12415_v2 }
 0xb3a   :  { %9085 = vmatpush.bf16.msrb.mxu3 %v12426_v55 }
 0xb3b   :  { %9042 = vmatpush.bf16.msrb.mxu0 %v12406_v1 }
 0xb3c   :  { %9067 = vmatpush.bf16.msrb.mxu2 %v12423_v4  ;;  %9055 = vmatpush.bf16.msrb.mxu1 %v12414_v16 }
 0xb3f   :  { %9043 = vmatpush.bf16.msrb.mxu0 %v12405_v38 }
 0xb40   :  { %9068 = vmatpush.bf16.msrb.mxu2 %v12422_v31  ;;  %9056 = vmatpush.bf16.msrb.mxu1 %v12413_v59 }
 0xb43   :  { %9044 = vmatpush.bf16.msrb.mxu0 %v12404_v5 }
 0xb44   :  { %9069 = vmatpush.bf16.msrb.mxu2 %v12421_v60  ;;  %9057 = vmatpush.bf16.msrb.mxu1 %v12412_v35 }
 0xb47   :  { %9045 = vmatpush.bf16.msrb.mxu0 %v12403_v57 }
 0xb48   :  { %9070 = vmatpush.bf16.msrb.mxu2 %v12420_v30  ;;  %9058 = vmatpush.bf16.msrb.mxu1 %v12411_v47 }
 0xb4b   :  { %9046 = vmatpush.bf16.msrb.mxu0 %v12402_v50 }
 0xb4c   :  { %9071 = vmatpush.bf16.msrb.mxu2 %v12419_v8  ;;  %9059 = vmatpush.bf16.msrb.mxu1 %v12410_v45 }
 0xb50   :  { %9072 = vmatpush.bf16.msrb.mxu2 %v12418_v36 }
 0xb91   :  { %v12485_v7 = vpop.permute.xlu2 %12484 }
 0xb92   :  { %v12487_v63 = vunpack.i.h.bf16 %v12485_v7  ;;  %v12486_v9 = vunpack.i.l.bf16 %v12485_v7 }
 0xb93   :  { %v12480_v14 = vpop.permute.xlu1 %12479 }
 0xb94   :  { %v12482_v12 = vunpack.i.h.bf16 %v12480_v14  ;;  %v12481_v20 = vunpack.i.l.bf16 %v12480_v14  ;;  %v8403_v43 = vsel %vm3606_vm11, %v15455_v10, %v12487_v63  ;;  %v8402_v26 = vsel %vm3606_vm11, %v15451_v11, %v12486_v9 }
 0xb96   :  { %v8401_v46 = vsel %vm3606_vm11, %v15435_v51, %v12482_v12  ;;  %v8400_v56 = vsel %vm3606_vm11, %v15426_v18, %v12481_v20  ;;  %vm15805_vm11 = vmmov %vm15785_vm0  ;;  %v12488_v12 = vld [vmem:[#allocation10] ss:$0 sm:$0xff] }
 0xb97   :  { %v8404_v25 = vpack.c.bf16 %v8402_v26, %v8400_v56  ;;  %v8405_v3 = vpack.c.bf16 %v8403_v43, %v8401_v46 }
 0xb99   :  { %v8410_v42 = vrot.slane %v8404_v25, 4  ;;  %v8425_v27 = vrot.slane %v8405_v3, 4  ;;  %v8409_v0 = vperm.slane %v8404_v25, %v13678_v17  ;;  %v8424_v33 = vperm.slane %v8405_v3, %v13678_v17 }
 0xb9b   :  { %v8412_v11 = vsel %vm15803_vm10, 0, %v8410_v42  ;;  %v8426_v40 = vsel %vm15804_vm14, 0, %v8425_v27  ;;  %v8419_v34 = vrot.slane %v8409_v0, 4  ;;  %v8433_v28 = vrot.slane %v8424_v33, 4 }
 0xb9c   :  { %v8416_v51 = vperm.slane %v8412_v11, %v13678_v17  ;;  %v8430_v18 = vperm.slane %v8426_v40, %v13678_v17 }
 0xb9e   :  { %v8417_v10 = vrot.slane %v8416_v51, 4  ;;  %v8431_v48 = vrot.slane %v8430_v18, 4  ;;  %v8420_v29 = vsel %vm15807_vm6, %v8416_v51, %v8419_v34  ;;  %v8434_v39 = vsel %vm15808_vm8, %v8430_v18, %v8433_v28 }
 0xb9f   :  { %v8444_v22 = vshrl.u32 %v8420_v29, 16  ;;  %v8445_v2 = vshrl.u32 %v8434_v39, 16  ;;  %v8443_v4 = vpack.i.b16 %v8434_v39, %v8420_v29 }
 0xba0   :  { %v8418_v19 = vsel %vm15805_vm11, %v8417_v10, %v8409_v0  ;;  %v8432_v49 = vsel %vm15806_vm3, %v8431_v48, %v8424_v33 }
 0xba1   :  { %v8437_v62 = vpack.i.b16 %v8432_v49, %v8418_v19  ;;  %v8438_v13 = vshrl.u32 %v8418_v19, 16  ;;  %v8439_v23 = vshrl.u32 %v8432_v49, 16  ;;  %v8446_v15 = vpack.i.b16 %v8445_v2, %v8444_v22 }
 0xba2   :  { %v8459_v1 = vunpack.c.l.b16 %v8443_v4  ;;  %v8460_v16 = vunpack.c.h.b16 %v8443_v4 }
 0xba3   :  { %v8447_v44 = vunpack.c.l.b16 %v8437_v62  ;;  %v8448_v24 = vunpack.c.h.b16 %v8437_v62  ;;  %v8440_v32 = vpack.i.b16 %v8439_v23, %v8438_v13  ;;  %v8465_v31 = vunpack.c.l.b16 %v8446_v15 }
 0xba4   :  { %v8466_v61 = vunpack.c.h.b16 %v8446_v15  ;;  %v8461_v7 = vpack.c.b16 %v8459_v1, %v8459_v1  ;;  %v8462_v38 = vpack.c.b16 %v8460_v16, %v8460_v16 }
 0xba5   :  { %v8449_v17 = vpack.c.b16 %v8447_v44, %v8447_v44  ;;  %v8450_v52 = vpack.c.b16 %v8448_v24, %v8448_v24  ;;  %v8453_v21 = vunpack.c.l.b16 %v8440_v32  ;;  %v8454_v37 = vunpack.c.h.b16 %v8440_v32 }
 0xba6   :  { %v8467_v59 = vpack.c.b16 %v8465_v31, %v8465_v31  ;;  %v8468_v63 = vpack.c.b16 %v8466_v61, %v8466_v61 }
 0xba7   :  { %8995 = vmatmul.bf16.vlgmr.msra.gmra.mxu0 %v8449_v17  ;;  %9008 = vmatmul.bf16.vlgmr.msra.gmra.mxu1 %v8450_v52  ;;  %v8455_v58 = vpack.c.b16 %v8453_v21, %v8453_v21  ;;  %v8456_v54 = vpack.c.b16 %v8454_v37, %v8454_v37 }
 0xba9   :  { %9021 = vmatmul.bf16.vlgmr.msra.gmra.mxu2 %v8455_v58  ;;  %9034 = vmatmul.bf16.vlgmr.msra.gmra.mxu3 %v8456_v54 }
 0xbb7   :  { %9047 = vmatmul.bf16.vlgmr.msrb.gmra.mxu0 %v8461_v7  ;;  %9060 = vmatmul.bf16.vlgmr.msrb.gmra.mxu1 %v8462_v38 }
 0xbb9   :  { %9073 = vmatmul.bf16.vlgmr.msrb.gmra.mxu2 %v8467_v59  ;;  %9086 = vmatmul.bf16.vlgmr.msrb.gmra.mxu3 %v8468_v63 }
 0xc24   :  { %v8996_v9 = vpop.f32.mrf.mxu0  ;;  %v9009_v14 = vpop.f32.mrf.mxu1 }
 0xc25   :  { %v8997_v20 = vadd.f32 %v12488_v12, %v8996_v9 }
 0xc27   :  { %v9010_v43 = vadd.f32 %v9009_v14, %v8997_v20 }
 0xc2c   :  { %v8998_v60 = vpop.f32.mrf.mxu0  ;;  %v9011_v6 = vpop.f32.mrf.mxu1 }
 0xc2d   :  { %v9022_v5 = vpop.f32.mrf.mxu2  ;;  %v9035_v35 = vpop.f32.mrf.mxu3 }
 0xc2e   :  { %v9023_v26 = vadd.f32 %v9022_v5, %v9010_v43 }
 0xc30   :  { %v9036_v30 = vadd.f32 %v9035_v35, %v9023_v26 }
 0xc34   :  { %v9048_v46 = vpop.f32.mrf.mxu0  ;;  %v9061_v56 = vpop.f32.mrf.mxu1 }
 0xc35   :  { %v9024_v25 = vpop.f32.mrf.mxu2  ;;  %v9037_v3 = vpop.f32.mrf.mxu3  ;;  %v9049_v53 = vadd.f32 %v9048_v46, %v9036_v30 }
 0xc37   :  { %v9062_v42 = vadd.f32 %v9061_v56, %v9049_v53 }
 0xc3c   :  { %v9050_v27 = vpop.f32.mrf.mxu0  ;;  %v9063_v57 = vpop.f32.mrf.mxu1 }
 0xc3d   :  { %v9074_v47 = vpop.f32.mrf.mxu2  ;;  %v9087_v11 = vpop.f32.mrf.mxu3 }
 0xc3e   :  { %v9075_v40 = vadd.f32 %v9074_v47, %v9062_v42 }
 0xc40   :  { %v9088_v51 = vadd.f32 %v9087_v11, %v9075_v40 }
 0xc42   :  { %12497 = vtanh.f32 %v9088_v51 }
 0xc45   :  { %v9076_v18 = vpop.f32.mrf.mxu2  ;;  %v9089_v8 = vpop.f32.mrf.mxu3 }
 0xc48   :  { %v12498_v41 = vpop.eup %12497 }
 0xc49   :  { %9093 = vst.msk [vmem:[#allocation12] sm:$0x3] %vm9092_vm12, %v12498_v41 }
 0xc4a   :  { %9104 = dma.vmem_to_hbm [thread:$0]  %s9100_s6, 32, %s9102_s25, [#allocation6]  }
 0xc4b   :  { %12625 = dma.done.wait [#allocation6], 32  }
 0xc4c   :  { %12626 = vsyncadd [#allocation6], 4294967264 }
 0xc4d   :  { %9109 = vsyncpa [#allocation5], 1 }
 0xc4e   :  { %9110 = vsyncpa [#allocation8], 1 }
 0xc4f   :  { %9111 = vsyncpa [#allocation11], 1 }
 0xc50   :  { %9112 = vsyncpa [#allocation6], 1 }

</bundles_post_ra>
